<compile_context>
chip_gen: v7x
topology: tpu7x:2x2x1
jax: 0.10.0
libtpu: 0.0.40
codegen_flags: <defaults>
</compile_context>

<pallas_src>
import functools

import jax
import jax.numpy as jnp
from jax import lax
from jax.experimental import pallas as pl
from jax.experimental.pallas import tpu as pltpu

# ----------------------------- config (small) --------------------------------
B = 2                      # batch of images
C = 3                      # image channels
IMG = 32                   # image H = W
PATCH = 8                  # patch size  -> 4x4 = 16 patches
VIS_D = 32                 # vision transformer width
VIS_HEADS = 2
VIS_LAYERS = 2
N_PATCHES = (IMG // PATCH) ** 2          # 16
VIS_SEQ = N_PATCHES + 1                  # 17 = CLS + patches
VIS_SEQ_PAD = 24                         # padded to a sublane multiple of 8
N_CLASSES = 4              # number of text class prompts
CTX = 8                    # text context length
VOCAB = 64
TXT_D = 32                 # text transformer width
TXT_HEADS = 2
TXT_LAYERS = 2
EMBED = 16                 # shared CLIP embedding dim (projection output)
LOGIT_SCALE = 1.0 / 0.07   # exp(log(1/0.07)) as in CLIP

OUT_LANES = 128                          # lane-dense output slab width
OUT_ROWS = B + N_CLASSES + B             # img feats | txt feats | logits = 8


# ------------------------- in-kernel building blocks --------------------------
def _layernorm(x, g, b, eps=1e-5):
    mu = jnp.mean(x, axis=-1, keepdims=True)
    var = jnp.mean((x - mu) ** 2, axis=-1, keepdims=True)
    return (x - mu) * lax.rsqrt(var + eps) * g + b


def _attention(x, p, n_heads, mask):
    """Multi-head self-attention, entirely in-VMEM. x: (B, N, D) f32."""
    bx, n, d = x.shape
    dh = d // n_heads
    scale = float(dh) ** -0.5

    # one fused QKV matmul (bf16 MXU, f32 accumulation)
    xb = x.reshape(bx * n, d).astype(jnp.bfloat16)
    qkv = jnp.dot(xb, p["qkv_w"], preferred_element_type=jnp.float32) + p["qkv_b"]
    qkv = qkv.reshape(bx, n, 3 * d)
    q = qkv[:, :, 0:d] * scale
    k = qkv[:, :, d:2 * d]
    v = qkv[:, :, 2 * d:3 * d]

    def fold_heads(t):
        # (bx, n, d) -> (n_heads*bx, n, dh): head index lives on the (major)
        # batch axis so scores/values are a single batched matmul each.
        return jnp.concatenate(
            [t[:, :, h * dh:(h + 1) * dh] for h in range(n_heads)], axis=0)

    qh = fold_heads(q).astype(jnp.bfloat16)
    kh = fold_heads(k).astype(jnp.bfloat16)
    vh = fold_heads(v).astype(jnp.bfloat16)

    s = jnp.einsum("bqd,bkd->bqk", qh, kh, preferred_element_type=jnp.float32)
    s = s + mask[None, :, :]
    s = s - jnp.max(s, axis=-1, keepdims=True)
    e = jnp.exp(s)
    pr = e * pl.reciprocal(jnp.sum(e, axis=-1, keepdims=True), approx=True)
    o = jnp.einsum("bqk,bkd->bqd", pr.astype(jnp.bfloat16), vh,
                   preferred_element_type=jnp.float32)        # (h*bx, n, dh)

    # merge heads back to (bx, n, d) and do ONE fused output projection
    o = jnp.concatenate([o[h * bx:(h + 1) * bx] for h in range(n_heads)],
                        axis=-1)
    out = jnp.dot(o.reshape(bx * n, d).astype(jnp.bfloat16), p["out_w"],
                  preferred_element_type=jnp.float32) + p["out_b"]
    return out.reshape(bx, n, d)


def _mlp(x, p):
    bx, n, d = x.shape
    h = jnp.dot(x.reshape(bx * n, d).astype(jnp.bfloat16), p["fc_w"],
                preferred_element_type=jnp.float32) + p["fc_b"]
    h = h * jax.nn.sigmoid(1.702 * h)            # QuickGELU, f32 (VPU/EUP)
    o = jnp.dot(h.astype(jnp.bfloat16), p["proj_w"],
                preferred_element_type=jnp.float32) + p["proj_b"]
    return o.reshape(bx, n, d)


def _resblock(x, mask, n_heads, p):
    h = _layernorm(x, p["ln1_g"], p["ln1_b"])
    x = x + _attention(h, p, n_heads, mask)
    h = _layernorm(x, p["ln2_g"], p["ln2_b"])
    x = x + _mlp(h, p)
    return x


def _layer_params(l, vecs_ref, qkv_b_ref, fc_b_ref,
                  qkv_w_ref, out_w_ref, fc_w_ref, proj_w_ref):
    """Static (Python-int) per-layer indexing of the resident weight slabs."""
    vecs = vecs_ref[l]                            # (6, D) f32
    return dict(
        ln1_g=vecs[0:1, :], ln1_b=vecs[1:2, :],
        ln2_g=vecs[2:3, :], ln2_b=vecs[3:4, :],
        out_b=vecs[4:5, :], proj_b=vecs[5:6, :],
        qkv_b=qkv_b_ref[l], fc_b=fc_b_ref[l],     # (1, 3D), (1, 4D) f32
        qkv_w=qkv_w_ref[l], out_w=out_w_ref[l],   # bf16 matrices
        fc_w=fc_w_ref[l], proj_w=proj_w_ref[l],
    )


# ----------------------------- the single fused kernel ------------------------
def _clip_fused_kernel(
        # vision
        patches_ref, conv_w_ref, init_add_ref, ln_pre_ref,
        v_vecs_ref, v_qkv_b_ref, v_fc_b_ref,
        v_qkv_w_ref, v_out_w_ref, v_fc_w_ref, v_proj_w_ref,
        ln_post_ref, vis_proj_ref,
        # text
        x0_ref, eot_ref,
        t_vecs_ref, t_qkv_b_ref, t_fc_b_ref,
        t_qkv_w_ref, t_out_w_ref, t_fc_w_ref, t_proj_w_ref,
        ln_final_ref, txt_proj_ref,
        # output
        out_ref,
        *, vis_heads, txt_heads, vis_layers, txt_layers,
        n_valid, logit_scale):
    # ---------------- vision encoder (prologue + unrolled layers) ------------
    npad, d = init_add_ref.shape
    bx = patches_ref.shape[0] // npad
    # patch embedding (strided conv as matmul; CLIP conv1 has no bias) +
    # CLS token + positional embedding + ln_pre
    emb = jnp.dot(patches_ref[...].astype(jnp.bfloat16), conv_w_ref[...],
                  preferred_element_type=jnp.float32)
    x = emb.reshape(bx, npad, d) + init_add_ref[...][None, :, :]
    x = _layernorm(x, ln_pre_ref[0:1, :], ln_pre_ref[1:2, :])

    # key-padding mask, built once (layers are statically unrolled)
    col = lax.broadcasted_iota(jnp.int32, (npad, npad), 1)
    vis_mask = jnp.where(col < n_valid, 0.0, -1e9).astype(jnp.float32)

    for l in range(vis_layers):
        p = _layer_params(l, v_vecs_ref, v_qkv_b_ref, v_fc_b_ref,
                          v_qkv_w_ref, v_out_w_ref, v_fc_w_ref, v_proj_w_ref)
        x = _resblock(x, vis_mask, vis_heads, p)

    cls_tok = _layernorm(x[:, 0, :], ln_post_ref[0:1, :], ln_post_ref[1:2, :])
    img_feat = jnp.dot(cls_tok.astype(jnp.bfloat16), vis_proj_ref[...],
                       preferred_element_type=jnp.float32)      # (B, EMBED)

    # ---------------- text encoder (unrolled layers) --------------------------
    _, ctx, _ = x0_ref.shape
    xt = x0_ref[...]
    row = lax.broadcasted_iota(jnp.int32, (ctx, ctx), 0)
    colt = lax.broadcasted_iota(jnp.int32, (ctx, ctx), 1)
    txt_mask = jnp.where(colt <= row, 0.0, -1e9).astype(jnp.float32)

    for l in range(txt_layers):
        p = _layer_params(l, t_vecs_ref, t_qkv_b_ref, t_fc_b_ref,
                          t_qkv_w_ref, t_out_w_ref, t_fc_w_ref, t_proj_w_ref)
        xt = _resblock(xt, txt_mask, txt_heads, p)

    xf = _layernorm(xt, ln_final_ref[0:1, :], ln_final_ref[1:2, :])
    # EOT pooling via one-hot weighted sum (indices computed in wrapper)
    pooled = jnp.sum(eot_ref[...][:, :, None] * xf, axis=1)      # (NC, D)
    txt_feat = jnp.dot(pooled.astype(jnp.bfloat16), txt_proj_ref[...],
                       preferred_element_type=jnp.float32)       # (NC, EMBED)

    # ---------------- CLIP logits + packed lane-dense output ------------------
    img_n = img_feat * lax.rsqrt(
        jnp.sum(img_feat * img_feat, axis=-1, keepdims=True) + 1e-12)
    txt_n = txt_feat * lax.rsqrt(
        jnp.sum(txt_feat * txt_feat, axis=-1, keepdims=True) + 1e-12)
    logits = jnp.einsum("be,ce->bc", img_n, txt_n,
                        preferred_element_type=jnp.float32) * logit_scale

    nc = txt_feat.shape[0]
    embed = img_feat.shape[-1]
    out_ref[...] = jnp.zeros_like(out_ref)
    out_ref[0:bx, 0:embed] = img_feat
    out_ref[bx:bx + nc, 0:embed] = txt_feat
    out_ref[bx + nc:bx + nc + bx, 0:nc] = logits


# ----------------------------- wrapper ----------------------------------------
def clip_forward(image, tokens, params):
    vp, tp = params["visual"], params["text"]
    vb, tb = vp["blocks"], tp["blocks"]
    bx = image.shape[0]
    n_cls = tokens.shape[0]
    ph = PATCH

    # --- host-side layout glue (not the hot path) ---
    # Patchify NCHW -> (B, P, C*ph*ph) rows (matches Conv2d.weight.view(width,-1)).
    patches = image.reshape(bx, C, IMG // ph, ph, IMG // ph, ph)
    patches = patches.transpose(0, 2, 4, 1, 3, 5).reshape(bx, N_PATCHES,
                                                          C * ph * ph)
    # Row 0 reserved for CLS (zeros -> conv contributes nothing; conv1 has no
    # bias); tail rows zero-padded so the sequence is a sublane multiple of 8.
    patches_pad = jnp.zeros((bx, VIS_SEQ_PAD, C * ph * ph), jnp.float32)
    patches_pad = patches_pad.at[:, 1:VIS_SEQ, :].set(patches)
    patches_pad = patches_pad.reshape(bx * VIS_SEQ_PAD, C * ph * ph)

    init_add = jnp.zeros((VIS_SEQ_PAD, VIS_D), jnp.float32)
    init_add = init_add.at[0].set(vp["class_emb"] + vp["pos_emb"][0])
    init_add = init_add.at[1:VIS_SEQ].set(vp["pos_emb"][1:])

    # TODO(synk): real CLIP BPE tokenizer has no Pallas equivalent; the
    # token-embedding gather stays host-side (data-dependent gather).
    x0 = tp["token_emb"][tokens] + tp["pos_emb"][None]
    eot_onehot = jax.nn.one_hot(jnp.argmax(tokens, axis=-1), CTX,
                                dtype=jnp.float32)

    kernel = functools.partial(
        _clip_fused_kernel,
        vis_heads=VIS_HEADS, txt_heads=TXT_HEADS,
        vis_layers=VIS_LAYERS, txt_layers=TXT_LAYERS,
        n_valid=VIS_SEQ, logit_scale=float(LOGIT_SCALE))

    args = (patches_pad, vp["conv_w"], init_add, vp["ln_pre"],
            vb["vecs"], vb["qkv_b"], vb["fc_b"],
            vb["qkv_w"], vb["out_w"], vb["fc_w"], vb["proj_w"],
            vp["ln_post"], vp["proj"],
            x0, eot_onehot,
            tb["vecs"], tb["qkv_b"], tb["fc_b"],
            tb["qkv_w"], tb["out_w"], tb["fc_w"], tb["proj_w"],
            tp["ln_final"], tp["proj"])

    vmem = pltpu.MemorySpace.VMEM
    slab = pl.pallas_call(
        kernel,
        out_shape=jax.ShapeDtypeStruct((OUT_ROWS, OUT_LANES), jnp.float32),
        in_specs=[pl.BlockSpec(memory_space=vmem)] * len(args),
        out_specs=pl.BlockSpec(memory_space=vmem),
    )(*args)

    image_features = slab[0:bx, 0:EMBED]
    text_features = slab[bx:bx + n_cls, 0:EMBED]
    logits_per_image = slab[bx + n_cls:bx + n_cls + bx, 0:N_CLASSES]
    # logits_per_text would be logits_per_image.T; original module discards it.
    return logits_per_image, image_features, text_features


# ----------------------------- parameter init ---------------------------------
def init_params(key):
    keys = iter(jax.random.split(key, 64))

    def nrm(shape, std=0.02, dtype=jnp.float32):
        return (jax.random.normal(next(keys), shape, jnp.float32) * std
                ).astype(dtype)

    def init_blocks(nl, d):
        # all (1, D)-shaped per-layer vectors packed into one (L, 6, D) slab:
        # rows = [ln1_g, ln1_b, ln2_g, ln2_b, out_b, proj_b]
        vecs = jnp.zeros((nl, 6, d), jnp.float32)
        vecs = vecs.at[:, 0, :].set(1.0)
        vecs = vecs.at[:, 2, :].set(1.0)
        return dict(
            vecs=vecs,
            qkv_b=jnp.zeros((nl, 1, 3 * d), jnp.float32),
            fc_b=jnp.zeros((nl, 1, 4 * d), jnp.float32),
            qkv_w=nrm((nl, d, 3 * d), dtype=jnp.bfloat16),
            out_w=nrm((nl, d, d), dtype=jnp.bfloat16),
            fc_w=nrm((nl, d, 4 * d), dtype=jnp.bfloat16),
            proj_w=nrm((nl, 4 * d, d), dtype=jnp.bfloat16),
        )

    def ln_pack(d):  # (2, D): row 0 = gamma, row 1 = beta
        return jnp.concatenate([jnp.ones((1, d), jnp.float32),
                                jnp.zeros((1, d), jnp.float32)], axis=0)

    visual = dict(
        conv_w=nrm((C * PATCH * PATCH, VIS_D), dtype=jnp.bfloat16),  # conv1 (no bias)
        class_emb=nrm((VIS_D,)),
        pos_emb=nrm((VIS_SEQ, VIS_D)),
        ln_pre=ln_pack(VIS_D),
        blocks=init_blocks(VIS_LAYERS, VIS_D),
        ln_post=ln_pack(VIS_D),
        proj=nrm((VIS_D, EMBED), dtype=jnp.bfloat16),
    )
    text = dict(
        token_emb=nrm((VOCAB, TXT_D)),
        pos_emb=nrm((CTX, TXT_D)),
        blocks=init_blocks(TXT_LAYERS, TXT_D),
        ln_final=ln_pack(TXT_D),
        proj=nrm((TXT_D, EMBED), dtype=jnp.bfloat16),
    )
    return dict(visual=visual, text=text)


# ----------------------------- main -------------------------------------------
if __name__ == "__main__":
    key = jax.random.PRNGKey(0)
    k_img, k_tok, k_par = jax.random.split(key, 3)

    image = jax.random.normal(k_img, (B, C, IMG, IMG), jnp.float32)

    # TODO(synk): real CLIP BPE tokenizer / classes.json / pretrained weights
    # have no Pallas equivalent; replaced with deterministic synthetic tokens
    # and weights.
    tokens = jax.random.randint(k_tok, (N_CLASSES, CTX), 1, VOCAB - 1, jnp.int32)
    tokens = tokens.at[:, -1].set(VOCAB - 1)    # EOT is the max token id

    params = init_params(k_par)

    fwd = jax.jit(clip_forward)
    logits_per_image, image_features, text_features = fwd(image, tokens, params)
    jax.block_until_ready((logits_per_image, image_features, text_features))

    assert logits_per_image.shape == (B, N_CLASSES)
    assert image_features.shape == (B, EMBED)
    assert text_features.shape == (N_CLASSES, EMBED)
    assert bool(jnp.all(jnp.isfinite(logits_per_image)))
    print("KERNEL_OK")
</pallas_src>

<mosaic_0001>
module attributes {stable_mosaic.version = 11 : i64} {
  func.func @_clip_fused_kernel(%arg0: memref<48x192xf32, #tpu.memory_space<vmem>>, %arg1: memref<192x32xbf16, #tpu.memory_space<vmem>>, %arg2: memref<24x32xf32, #tpu.memory_space<vmem>>, %arg3: memref<2x32xf32, #tpu.memory_space<vmem>>, %arg4: memref<2x6x32xf32, #tpu.memory_space<vmem>>, %arg5: memref<2x1x96xf32, #tpu.memory_space<vmem>>, %arg6: memref<2x1x128xf32, #tpu.memory_space<vmem>>, %arg7: memref<2x32x96xbf16, #tpu.memory_space<vmem>>, %arg8: memref<2x32x32xbf16, #tpu.memory_space<vmem>>, %arg9: memref<2x32x128xbf16, #tpu.memory_space<vmem>>, %arg10: memref<2x128x32xbf16, #tpu.memory_space<vmem>>, %arg11: memref<2x32xf32, #tpu.memory_space<vmem>>, %arg12: memref<32x16xbf16, #tpu.memory_space<vmem>>, %arg13: memref<4x8x32xf32, #tpu.memory_space<vmem>>, %arg14: memref<4x8xf32, #tpu.memory_space<vmem>>, %arg15: memref<2x6x32xf32, #tpu.memory_space<vmem>>, %arg16: memref<2x1x96xf32, #tpu.memory_space<vmem>>, %arg17: memref<2x1x128xf32, #tpu.memory_space<vmem>>, %arg18: memref<2x32x96xbf16, #tpu.memory_space<vmem>>, %arg19: memref<2x32x32xbf16, #tpu.memory_space<vmem>>, %arg20: memref<2x32x128xbf16, #tpu.memory_space<vmem>>, %arg21: memref<2x128x32xbf16, #tpu.memory_space<vmem>>, %arg22: memref<2x32xf32, #tpu.memory_space<vmem>>, %arg23: memref<32x16xbf16, #tpu.memory_space<vmem>>, %arg24: memref<8x128xf32, #tpu.memory_space<vmem>>) attributes {dimension_semantics = [], scalar_prefetch = 0 : i64, scratch_operands = 0 : i64, tpu.core_type = #tpu.core_type<tc>} {
    %c0 = arith.constant 0 : index
    %c0_0 = arith.constant 0 : index
    %0 = vector.load %arg0[%c0, %c0_0] : memref<48x192xf32, #tpu.memory_space<vmem>>, vector<48x192xf32>
    %1 = arith.truncf %0 : vector<48x192xf32> to vector<48x192xbf16>
    %c0_1 = arith.constant 0 : index
    %c0_2 = arith.constant 0 : index
    %2 = vector.load %arg1[%c0_1, %c0_2] : memref<192x32xbf16, #tpu.memory_space<vmem>>, vector<192x32xbf16>
    %cst = arith.constant dense<0.000000e+00> : vector<48x32xf32>
    %3 = tpu.matmul %1, %2, %cst {dimension_numbers = #tpu.dot_dimension_numbers<[1], [0], [0], [1], [0, 0, 1, 1], [], []>} : vector<48x192xbf16>, vector<192x32xbf16>, vector<48x32xf32> -> vector<48x32xf32>
    %4 = vector.shape_cast %3 : vector<48x32xf32> to vector<2x24x32xf32>
    %c0_3 = arith.constant 0 : index
    %c0_4 = arith.constant 0 : index
    %5 = vector.load %arg2[%c0_3, %c0_4] : memref<24x32xf32, #tpu.memory_space<vmem>>, vector<24x32xf32>
    %6 = vector.shape_cast %5 : vector<24x32xf32> to vector<1x24x32xf32>
    %7 = vector.broadcast %6 : vector<1x24x32xf32> to vector<2x24x32xf32>
    %8 = arith.addf %4, %7 : vector<2x24x32xf32>
    %c0_5 = arith.constant 0 : index
    %c0_6 = arith.constant 0 : index
    %9 = vector.load %arg3[%c0_5, %c0_6] : memref<2x32xf32, #tpu.memory_space<vmem>>, vector<1x32xf32>
    %c1 = arith.constant 1 : index
    %c0_7 = arith.constant 0 : index
    %10 = vector.load %arg3[%c1, %c0_7] : memref<2x32xf32, #tpu.memory_space<vmem>>, vector<1x32xf32>
    %cst_8 = arith.constant dense<0.000000e+00> : vector<2x24xf32>
    %11 = vector.multi_reduction <add>, %8, %cst_8 [2] : vector<2x24x32xf32> to vector<2x24xf32>
    %12 = vector.shape_cast %11 : vector<2x24xf32> to vector<2x24x1xf32>
    %cst_9 = arith.constant 3.200000e+01 : f32
    %13 = vector.broadcast %cst_9 : f32 to vector<2x24x1xf32>
    %14 = arith.divf %12, %13 : vector<2x24x1xf32>
    %15 = vector.broadcast %14 : vector<2x24x1xf32> to vector<2x24x32xf32>
    %16 = arith.subf %8, %15 : vector<2x24x32xf32>
    %17 = arith.mulf %16, %16 : vector<2x24x32xf32>
    %cst_10 = arith.constant dense<0.000000e+00> : vector<2x24xf32>
    %18 = vector.multi_reduction <add>, %17, %cst_10 [2] : vector<2x24x32xf32> to vector<2x24xf32>
    %19 = vector.shape_cast %18 : vector<2x24xf32> to vector<2x24x1xf32>
    %cst_11 = arith.constant 3.200000e+01 : f32
    %20 = vector.broadcast %cst_11 : f32 to vector<2x24x1xf32>
    %21 = arith.divf %19, %20 : vector<2x24x1xf32>
    %22 = vector.broadcast %14 : vector<2x24x1xf32> to vector<2x24x32xf32>
    %23 = arith.subf %8, %22 : vector<2x24x32xf32>
    %cst_12 = arith.constant 9.99999974E-6 : f32
    %24 = vector.broadcast %cst_12 : f32 to vector<2x24x1xf32>
    %25 = arith.addf %21, %24 : vector<2x24x1xf32>
    %26 = math.rsqrt %25 : vector<2x24x1xf32>
    %27 = vector.broadcast %26 : vector<2x24x1xf32> to vector<2x24x32xf32>
    %28 = arith.mulf %23, %27 : vector<2x24x32xf32>
    %29 = vector.shape_cast %9 : vector<1x32xf32> to vector<1x1x32xf32>
    %30 = vector.broadcast %29 : vector<1x1x32xf32> to vector<2x24x32xf32>
    %31 = arith.mulf %28, %30 : vector<2x24x32xf32>
    %32 = vector.shape_cast %10 : vector<1x32xf32> to vector<1x1x32xf32>
    %33 = vector.broadcast %32 : vector<1x1x32xf32> to vector<2x24x32xf32>
    %34 = arith.addf %31, %33 : vector<2x24x32xf32>
    %35 = tpu.iota {dimensions = array<i32: 1>} : vector<24x24xi32>
    %c17_i32 = arith.constant 17 : i32
    %36 = vector.broadcast %c17_i32 : i32 to vector<24x24xi32>
    %37 = arith.cmpi slt, %35, %36 : vector<24x24xi32>
    %cst_13 = arith.constant 0.000000e+00 : f32
    %cst_14 = arith.constant -1.000000e+09 : f32
    %38 = vector.broadcast %cst_13 : f32 to vector<24x24xf32>
    %39 = vector.broadcast %cst_14 : f32 to vector<24x24xf32>
    %40 = arith.select %37, %38, %39 : vector<24x24xi1>, vector<24x24xf32>
    %c0_15 = arith.constant 0 : index
    %c0_16 = arith.constant 0 : index
    %c0_17 = arith.constant 0 : index
    %41 = vector.load %arg4[%c0_15, %c0_16, %c0_17] : memref<2x6x32xf32, #tpu.memory_space<vmem>>, vector<1x6x32xf32>
    %42 = vector.shape_cast %41 : vector<1x6x32xf32> to vector<6x32xf32>
    %43 = vector.extract_strided_slice %42 {offsets = [0, 0], sizes = [1, 32], strides = [1, 1]} : vector<6x32xf32> to vector<1x32xf32>
    %44 = vector.extract_strided_slice %42 {offsets = [1, 0], sizes = [1, 32], strides = [1, 1]} : vector<6x32xf32> to vector<1x32xf32>
    %45 = vector.extract_strided_slice %42 {offsets = [2, 0], sizes = [1, 32], strides = [1, 1]} : vector<6x32xf32> to vector<1x32xf32>
    %46 = vector.extract_strided_slice %42 {offsets = [3, 0], sizes = [1, 32], strides = [1, 1]} : vector<6x32xf32> to vector<1x32xf32>
    %47 = vector.extract_strided_slice %42 {offsets = [4, 0], sizes = [1, 32], strides = [1, 1]} : vector<6x32xf32> to vector<1x32xf32>
    %48 = vector.extract_strided_slice %42 {offsets = [5, 0], sizes = [1, 32], strides = [1, 1]} : vector<6x32xf32> to vector<1x32xf32>
    %c0_18 = arith.constant 0 : index
    %c0_19 = arith.constant 0 : index
    %c0_20 = arith.constant 0 : index
    %49 = vector.load %arg5[%c0_18, %c0_19, %c0_20] : memref<2x1x96xf32, #tpu.memory_space<vmem>>, vector<1x1x96xf32>
    %50 = vector.shape_cast %49 : vector<1x1x96xf32> to vector<1x96xf32>
    %c0_21 = arith.constant 0 : index
    %c0_22 = arith.constant 0 : index
    %c0_23 = arith.constant 0 : index
    %51 = vector.load %arg6[%c0_21, %c0_22, %c0_23] : memref<2x1x128xf32, #tpu.memory_space<vmem>>, vector<1x1x128xf32>
    %52 = vector.shape_cast %51 : vector<1x1x128xf32> to vector<1x128xf32>
    %c0_24 = arith.constant 0 : index
    %c0_25 = arith.constant 0 : index
    %c0_26 = arith.constant 0 : index
    %53 = vector.load %arg7[%c0_24, %c0_25, %c0_26] : memref<2x32x96xbf16, #tpu.memory_space<vmem>>, vector<1x32x96xbf16>
    %54 = vector.shape_cast %53 : vector<1x32x96xbf16> to vector<32x96xbf16>
    %c0_27 = arith.constant 0 : index
    %c0_28 = arith.constant 0 : index
    %c0_29 = arith.constant 0 : index
    %55 = vector.load %arg8[%c0_27, %c0_28, %c0_29] : memref<2x32x32xbf16, #tpu.memory_space<vmem>>, vector<1x32x32xbf16>
    %56 = vector.shape_cast %55 : vector<1x32x32xbf16> to vector<32x32xbf16>
    %c0_30 = arith.constant 0 : index
    %c0_31 = arith.constant 0 : index
    %c0_32 = arith.constant 0 : index
    %57 = vector.load %arg9[%c0_30, %c0_31, %c0_32] : memref<2x32x128xbf16, #tpu.memory_space<vmem>>, vector<1x32x128xbf16>
    %58 = vector.shape_cast %57 : vector<1x32x128xbf16> to vector<32x128xbf16>
    %c0_33 = arith.constant 0 : index
    %c0_34 = arith.constant 0 : index
    %c0_35 = arith.constant 0 : index
    %59 = vector.load %arg10[%c0_33, %c0_34, %c0_35] : memref<2x128x32xbf16, #tpu.memory_space<vmem>>, vector<1x128x32xbf16>
    %60 = vector.shape_cast %59 : vector<1x128x32xbf16> to vector<128x32xbf16>
    %cst_36 = arith.constant dense<0.000000e+00> : vector<2x24xf32>
    %61 = vector.multi_reduction <add>, %34, %cst_36 [2] : vector<2x24x32xf32> to vector<2x24xf32>
    %62 = vector.shape_cast %61 : vector<2x24xf32> to vector<2x24x1xf32>
    %cst_37 = arith.constant 3.200000e+01 : f32
    %63 = vector.broadcast %cst_37 : f32 to vector<2x24x1xf32>
    %64 = arith.divf %62, %63 : vector<2x24x1xf32>
    %65 = vector.broadcast %64 : vector<2x24x1xf32> to vector<2x24x32xf32>
    %66 = arith.subf %34, %65 : vector<2x24x32xf32>
    %67 = arith.mulf %66, %66 : vector<2x24x32xf32>
    %cst_38 = arith.constant dense<0.000000e+00> : vector<2x24xf32>
    %68 = vector.multi_reduction <add>, %67, %cst_38 [2] : vector<2x24x32xf32> to vector<2x24xf32>
    %69 = vector.shape_cast %68 : vector<2x24xf32> to vector<2x24x1xf32>
    %cst_39 = arith.constant 3.200000e+01 : f32
    %70 = vector.broadcast %cst_39 : f32 to vector<2x24x1xf32>
    %71 = arith.divf %69, %70 : vector<2x24x1xf32>
    %72 = vector.broadcast %64 : vector<2x24x1xf32> to vector<2x24x32xf32>
    %73 = arith.subf %34, %72 : vector<2x24x32xf32>
    %cst_40 = arith.constant 9.99999974E-6 : f32
    %74 = vector.broadcast %cst_40 : f32 to vector<2x24x1xf32>
    %75 = arith.addf %71, %74 : vector<2x24x1xf32>
    %76 = math.rsqrt %75 : vector<2x24x1xf32>
    %77 = vector.broadcast %76 : vector<2x24x1xf32> to vector<2x24x32xf32>
    %78 = arith.mulf %73, %77 : vector<2x24x32xf32>
    %79 = vector.shape_cast %43 : vector<1x32xf32> to vector<1x1x32xf32>
    %80 = vector.broadcast %79 : vector<1x1x32xf32> to vector<2x24x32xf32>
    %81 = arith.mulf %78, %80 : vector<2x24x32xf32>
    %82 = vector.shape_cast %44 : vector<1x32xf32> to vector<1x1x32xf32>
    %83 = vector.broadcast %82 : vector<1x1x32xf32> to vector<2x24x32xf32>
    %84 = arith.addf %81, %83 : vector<2x24x32xf32>
    %85 = vector.shape_cast %84 : vector<2x24x32xf32> to vector<48x32xf32>
    %86 = arith.truncf %85 : vector<48x32xf32> to vector<48x32xbf16>
    %cst_41 = arith.constant dense<0.000000e+00> : vector<48x96xf32>
    %87 = tpu.matmul %86, %54, %cst_41 {dimension_numbers = #tpu.dot_dimension_numbers<[1], [0], [0], [1], [0, 0, 1, 1], [], []>} : vector<48x32xbf16>, vector<32x96xbf16>, vector<48x96xf32> -> vector<48x96xf32>
    %88 = vector.broadcast %50 : vector<1x96xf32> to vector<48x96xf32>
    %89 = arith.addf %87, %88 : vector<48x96xf32>
    %90 = vector.shape_cast %89 : vector<48x96xf32> to vector<2x24x96xf32>
    %91 = vector.extract_strided_slice %90 {offsets = [0, 0, 0], sizes = [2, 24, 32], strides = [1, 1, 1]} : vector<2x24x96xf32> to vector<2x24x32xf32>
    %cst_42 = arith.constant 2.500000e-01 : f32
    %92 = vector.broadcast %cst_42 : f32 to vector<2x24x32xf32>
    %93 = arith.mulf %91, %92 : vector<2x24x32xf32>
    %94 = vector.extract_strided_slice %90 {offsets = [0, 0, 32], sizes = [2, 24, 32], strides = [1, 1, 1]} : vector<2x24x96xf32> to vector<2x24x32xf32>
    %95 = vector.extract_strided_slice %90 {offsets = [0, 0, 64], sizes = [2, 24, 32], strides = [1, 1, 1]} : vector<2x24x96xf32> to vector<2x24x32xf32>
    %96 = vector.extract_strided_slice %93 {offsets = [0, 0, 0], sizes = [2, 24, 16], strides = [1, 1, 1]} : vector<2x24x32xf32> to vector<2x24x16xf32>
    %97 = vector.extract_strided_slice %93 {offsets = [0, 0, 16], sizes = [2, 24, 16], strides = [1, 1, 1]} : vector<2x24x32xf32> to vector<2x24x16xf32>
    %98 = tpu.concatenate %96, %97 in 0 : vector<2x24x16xf32>, vector<2x24x16xf32> -> vector<4x24x16xf32>
    %99 = arith.truncf %98 : vector<4x24x16xf32> to vector<4x24x16xbf16>
    %100 = vector.extract_strided_slice %94 {offsets = [0, 0, 0], sizes = [2, 24, 16], strides = [1, 1, 1]} : vector<2x24x32xf32> to vector<2x24x16xf32>
    %101 = vector.extract_strided_slice %94 {offsets = [0, 0, 16], sizes = [2, 24, 16], strides = [1, 1, 1]} : vector<2x24x32xf32> to vector<2x24x16xf32>
    %102 = tpu.concatenate %100, %101 in 0 : vector<2x24x16xf32>, vector<2x24x16xf32> -> vector<4x24x16xf32>
    %103 = arith.truncf %102 : vector<4x24x16xf32> to vector<4x24x16xbf16>
    %104 = vector.extract_strided_slice %95 {offsets = [0, 0, 0], sizes = [2, 24, 16], strides = [1, 1, 1]} : vector<2x24x32xf32> to vector<2x24x16xf32>
    %105 = vector.extract_strided_slice %95 {offsets = [0, 0, 16], sizes = [2, 24, 16], strides = [1, 1, 1]} : vector<2x24x32xf32> to vector<2x24x16xf32>
    %106 = tpu.concatenate %104, %105 in 0 : vector<2x24x16xf32>, vector<2x24x16xf32> -> vector<4x24x16xf32>
    %107 = arith.truncf %106 : vector<4x24x16xf32> to vector<4x24x16xbf16>
    "tpu.trace_start"() <{level = 10 : i32, message = "bqd,bkd->bqk"}> : () -> ()
    %cst_43 = arith.constant dense<0.000000e+00> : vector<4x24x24xf32>
    %108 = tpu.matmul %99, %103, %cst_43 {dimension_numbers = #tpu.dot_dimension_numbers<[2], [2], [1], [1], [0, 0, 0, 1, 1, 1], [0], [0]>} : vector<4x24x16xbf16>, vector<4x24x16xbf16>, vector<4x24x24xf32> -> vector<4x24x24xf32>
    "tpu.trace_stop"() : () -> ()
    %109 = vector.shape_cast %40 : vector<24x24xf32> to vector<1x24x24xf32>
    %110 = vector.broadcast %109 : vector<1x24x24xf32> to vector<4x24x24xf32>
    %111 = arith.addf %108, %110 : vector<4x24x24xf32>
    %cst_44 = arith.constant dense<0xFF800000> : vector<4x24xf32>
    %112 = vector.multi_reduction <maximumf>, %111, %cst_44 [2] : vector<4x24x24xf32> to vector<4x24xf32>
    %113 = vector.shape_cast %112 : vector<4x24xf32> to vector<4x24x1xf32>
    %114 = vector.broadcast %113 : vector<4x24x1xf32> to vector<4x24x24xf32>
    %115 = arith.subf %111, %114 : vector<4x24x24xf32>
    %116 = math.exp %115 : vector<4x24x24xf32>
    %cst_45 = arith.constant dense<0.000000e+00> : vector<4x24xf32>
    %117 = vector.multi_reduction <add>, %116, %cst_45 [2] : vector<4x24x24xf32> to vector<4x24xf32>
    %118 = vector.shape_cast %117 : vector<4x24xf32> to vector<4x24x1xf32>
    %119 = tpu.reciprocal %118 {approx = true} : vector<4x24x1xf32> -> vector<4x24x1xf32>
    %120 = vector.broadcast %119 : vector<4x24x1xf32> to vector<4x24x24xf32>
    %121 = arith.mulf %116, %120 : vector<4x24x24xf32>
    %122 = arith.truncf %121 : vector<4x24x24xf32> to vector<4x24x24xbf16>
    "tpu.trace_start"() <{level = 10 : i32, message = "bqk,bkd->bqd"}> : () -> ()
    %cst_46 = arith.constant dense<0.000000e+00> : vector<4x24x16xf32>
    %123 = tpu.matmul %122, %107, %cst_46 {dimension_numbers = #tpu.dot_dimension_numbers<[2], [1], [1], [2], [0, 0, 0, 1, 1, 2], [0], [0]>} : vector<4x24x24xbf16>, vector<4x24x16xbf16>, vector<4x24x16xf32> -> vector<4x24x16xf32>
    "tpu.trace_stop"() : () -> ()
    %124 = vector.extract_strided_slice %123 {offsets = [0, 0, 0], sizes = [2, 24, 16], strides = [1, 1, 1]} : vector<4x24x16xf32> to vector<2x24x16xf32>
    %125 = vector.extract_strided_slice %123 {offsets = [2, 0, 0], sizes = [2, 24, 16], strides = [1, 1, 1]} : vector<4x24x16xf32> to vector<2x24x16xf32>
    %126 = tpu.concatenate %124, %125 in 2 : vector<2x24x16xf32>, vector<2x24x16xf32> -> vector<2x24x32xf32>
    %127 = vector.shape_cast %126 : vector<2x24x32xf32> to vector<48x32xf32>
    %128 = arith.truncf %127 : vector<48x32xf32> to vector<48x32xbf16>
    %cst_47 = arith.constant dense<0.000000e+00> : vector<48x32xf32>
    %129 = tpu.matmul %128, %56, %cst_47 {dimension_numbers = #tpu.dot_dimension_numbers<[1], [0], [0], [1], [0, 0, 1, 1], [], []>} : vector<48x32xbf16>, vector<32x32xbf16>, vector<48x32xf32> -> vector<48x32xf32>
    %130 = vector.broadcast %47 : vector<1x32xf32> to vector<48x32xf32>
    %131 = arith.addf %129, %130 : vector<48x32xf32>
    %132 = vector.shape_cast %131 : vector<48x32xf32> to vector<2x24x32xf32>
    %133 = arith.addf %34, %132 : vector<2x24x32xf32>
    %cst_48 = arith.constant dense<0.000000e+00> : vector<2x24xf32>
    %134 = vector.multi_reduction <add>, %133, %cst_48 [2] : vector<2x24x32xf32> to vector<2x24xf32>
    %135 = vector.shape_cast %134 : vector<2x24xf32> to vector<2x24x1xf32>
    %cst_49 = arith.constant 3.200000e+01 : f32
    %136 = vector.broadcast %cst_49 : f32 to vector<2x24x1xf32>
    %137 = arith.divf %135, %136 : vector<2x24x1xf32>
    %138 = vector.broadcast %137 : vector<2x24x1xf32> to vector<2x24x32xf32>
    %139 = arith.subf %133, %138 : vector<2x24x32xf32>
    %140 = arith.mulf %139, %139 : vector<2x24x32xf32>
    %cst_50 = arith.constant dense<0.000000e+00> : vector<2x24xf32>
    %141 = vector.multi_reduction <add>, %140, %cst_50 [2] : vector<2x24x32xf32> to vector<2x24xf32>
    %142 = vector.shape_cast %141 : vector<2x24xf32> to vector<2x24x1xf32>
    %cst_51 = arith.constant 3.200000e+01 : f32
    %143 = vector.broadcast %cst_51 : f32 to vector<2x24x1xf32>
    %144 = arith.divf %142, %143 : vector<2x24x1xf32>
    %145 = vector.broadcast %137 : vector<2x24x1xf32> to vector<2x24x32xf32>
    %146 = arith.subf %133, %145 : vector<2x24x32xf32>
    %cst_52 = arith.constant 9.99999974E-6 : f32
    %147 = vector.broadcast %cst_52 : f32 to vector<2x24x1xf32>
    %148 = arith.addf %144, %147 : vector<2x24x1xf32>
    %149 = math.rsqrt %148 : vector<2x24x1xf32>
    %150 = vector.broadcast %149 : vector<2x24x1xf32> to vector<2x24x32xf32>
    %151 = arith.mulf %146, %150 : vector<2x24x32xf32>
    %152 = vector.shape_cast %45 : vector<1x32xf32> to vector<1x1x32xf32>
    %153 = vector.broadcast %152 : vector<1x1x32xf32> to vector<2x24x32xf32>
    %154 = arith.mulf %151, %153 : vector<2x24x32xf32>
    %155 = vector.shape_cast %46 : vector<1x32xf32> to vector<1x1x32xf32>
    %156 = vector.broadcast %155 : vector<1x1x32xf32> to vector<2x24x32xf32>
    %157 = arith.addf %154, %156 : vector<2x24x32xf32>
    %158 = vector.shape_cast %157 : vector<2x24x32xf32> to vector<48x32xf32>
    %159 = arith.truncf %158 : vector<48x32xf32> to vector<48x32xbf16>
    %cst_53 = arith.constant dense<0.000000e+00> : vector<48x128xf32>
    %160 = tpu.matmul %159, %58, %cst_53 {dimension_numbers = #tpu.dot_dimension_numbers<[1], [0], [0], [1], [0, 0, 1, 1], [], []>} : vector<48x32xbf16>, vector<32x128xbf16>, vector<48x128xf32> -> vector<48x128xf32>
    %161 = vector.broadcast %52 : vector<1x128xf32> to vector<48x128xf32>
    %162 = arith.addf %160, %161 : vector<48x128xf32>
    %cst_54 = arith.constant 1.702000e+00 : f32
    %163 = vector.broadcast %cst_54 : f32 to vector<48x128xf32>
    %164 = arith.mulf %163, %162 : vector<48x128xf32>
    %165 = arith.negf %164 : vector<48x128xf32>
    %166 = math.exp %165 : vector<48x128xf32>
    %cst_55 = arith.constant 1.000000e+00 : f32
    %167 = vector.broadcast %cst_55 : f32 to vector<48x128xf32>
    %168 = arith.addf %167, %166 : vector<48x128xf32>
    %169 = arith.divf %167, %168 : vector<48x128xf32>
    %170 = arith.mulf %162, %169 : vector<48x128xf32>
    %171 = arith.truncf %170 : vector<48x128xf32> to vector<48x128xbf16>
    %cst_56 = arith.constant dense<0.000000e+00> : vector<48x32xf32>
    %172 = tpu.matmul %171, %60, %cst_56 {dimension_numbers = #tpu.dot_dimension_numbers<[1], [0], [0], [1], [0, 0, 1, 1], [], []>} : vector<48x128xbf16>, vector<128x32xbf16>, vector<48x32xf32> -> vector<48x32xf32>
    %173 = vector.broadcast %48 : vector<1x32xf32> to vector<48x32xf32>
    %174 = arith.addf %172, %173 : vector<48x32xf32>
    %175 = vector.shape_cast %174 : vector<48x32xf32> to vector<2x24x32xf32>
    %176 = arith.addf %133, %175 : vector<2x24x32xf32>
    %c1_57 = arith.constant 1 : index
    %c0_58 = arith.constant 0 : index
    %c0_59 = arith.constant 0 : index
    %177 = vector.load %arg4[%c1_57, %c0_58, %c0_59] : memref<2x6x32xf32, #tpu.memory_space<vmem>>, vector<1x6x32xf32>
    %178 = vector.shape_cast %177 : vector<1x6x32xf32> to vector<6x32xf32>
    %179 = vector.extract_strided_slice %178 {offsets = [0, 0], sizes = [1, 32], strides = [1, 1]} : vector<6x32xf32> to vector<1x32xf32>
    %180 = vector.extract_strided_slice %178 {offsets = [1, 0], sizes = [1, 32], strides = [1, 1]} : vector<6x32xf32> to vector<1x32xf32>
    %181 = vector.extract_strided_slice %178 {offsets = [2, 0], sizes = [1, 32], strides = [1, 1]} : vector<6x32xf32> to vector<1x32xf32>
    %182 = vector.extract_strided_slice %178 {offsets = [3, 0], sizes = [1, 32], strides = [1, 1]} : vector<6x32xf32> to vector<1x32xf32>
    %183 = vector.extract_strided_slice %178 {offsets = [4, 0], sizes = [1, 32], strides = [1, 1]} : vector<6x32xf32> to vector<1x32xf32>
    %184 = vector.extract_strided_slice %178 {offsets = [5, 0], sizes = [1, 32], strides = [1, 1]} : vector<6x32xf32> to vector<1x32xf32>
    %c1_60 = arith.constant 1 : index
    %c0_61 = arith.constant 0 : index
    %c0_62 = arith.constant 0 : index
    %185 = vector.load %arg5[%c1_60, %c0_61, %c0_62] : memref<2x1x96xf32, #tpu.memory_space<vmem>>, vector<1x1x96xf32>
    %186 = vector.shape_cast %185 : vector<1x1x96xf32> to vector<1x96xf32>
    %c1_63 = arith.constant 1 : index
    %c0_64 = arith.constant 0 : index
    %c0_65 = arith.constant 0 : index
    %187 = vector.load %arg6[%c1_63, %c0_64, %c0_65] : memref<2x1x128xf32, #tpu.memory_space<vmem>>, vector<1x1x128xf32>
    %188 = vector.shape_cast %187 : vector<1x1x128xf32> to vector<1x128xf32>
    %c1_66 = arith.constant 1 : index
    %c0_67 = arith.constant 0 : index
    %c0_68 = arith.constant 0 : index
    %189 = vector.load %arg7[%c1_66, %c0_67, %c0_68] : memref<2x32x96xbf16, #tpu.memory_space<vmem>>, vector<1x32x96xbf16>
    %190 = vector.shape_cast %189 : vector<1x32x96xbf16> to vector<32x96xbf16>
    %c1_69 = arith.constant 1 : index
    %c0_70 = arith.constant 0 : index
    %c0_71 = arith.constant 0 : index
    %191 = vector.load %arg8[%c1_69, %c0_70, %c0_71] : memref<2x32x32xbf16, #tpu.memory_space<vmem>>, vector<1x32x32xbf16>
    %192 = vector.shape_cast %191 : vector<1x32x32xbf16> to vector<32x32xbf16>
    %c1_72 = arith.constant 1 : index
    %c0_73 = arith.constant 0 : index
    %c0_74 = arith.constant 0 : index
    %193 = vector.load %arg9[%c1_72, %c0_73, %c0_74] : memref<2x32x128xbf16, #tpu.memory_space<vmem>>, vector<1x32x128xbf16>
    %194 = vector.shape_cast %193 : vector<1x32x128xbf16> to vector<32x128xbf16>
    %c1_75 = arith.constant 1 : index
    %c0_76 = arith.constant 0 : index
    %c0_77 = arith.constant 0 : index
    %195 = vector.load %arg10[%c1_75, %c0_76, %c0_77] : memref<2x128x32xbf16, #tpu.memory_space<vmem>>, vector<1x128x32xbf16>
    %196 = vector.shape_cast %195 : vector<1x128x32xbf16> to vector<128x32xbf16>
    %cst_78 = arith.constant dense<0.000000e+00> : vector<2x24xf32>
    %197 = vector.multi_reduction <add>, %176, %cst_78 [2] : vector<2x24x32xf32> to vector<2x24xf32>
    %198 = vector.shape_cast %197 : vector<2x24xf32> to vector<2x24x1xf32>
    %cst_79 = arith.constant 3.200000e+01 : f32
    %199 = vector.broadcast %cst_79 : f32 to vector<2x24x1xf32>
    %200 = arith.divf %198, %199 : vector<2x24x1xf32>
    %201 = vector.broadcast %200 : vector<2x24x1xf32> to vector<2x24x32xf32>
    %202 = arith.subf %176, %201 : vector<2x24x32xf32>
    %203 = arith.mulf %202, %202 : vector<2x24x32xf32>
    %cst_80 = arith.constant dense<0.000000e+00> : vector<2x24xf32>
    %204 = vector.multi_reduction <add>, %203, %cst_80 [2] : vector<2x24x32xf32> to vector<2x24xf32>
    %205 = vector.shape_cast %204 : vector<2x24xf32> to vector<2x24x1xf32>
    %cst_81 = arith.constant 3.200000e+01 : f32
    %206 = vector.broadcast %cst_81 : f32 to vector<2x24x1xf32>
    %207 = arith.divf %205, %206 : vector<2x24x1xf32>
    %208 = vector.broadcast %200 : vector<2x24x1xf32> to vector<2x24x32xf32>
    %209 = arith.subf %176, %208 : vector<2x24x32xf32>
    %cst_82 = arith.constant 9.99999974E-6 : f32
    %210 = vector.broadcast %cst_82 : f32 to vector<2x24x1xf32>
    %211 = arith.addf %207, %210 : vector<2x24x1xf32>
    %212 = math.rsqrt %211 : vector<2x24x1xf32>
    %213 = vector.broadcast %212 : vector<2x24x1xf32> to vector<2x24x32xf32>
    %214 = arith.mulf %209, %213 : vector<2x24x32xf32>
    %215 = vector.shape_cast %179 : vector<1x32xf32> to vector<1x1x32xf32>
    %216 = vector.broadcast %215 : vector<1x1x32xf32> to vector<2x24x32xf32>
    %217 = arith.mulf %214, %216 : vector<2x24x32xf32>
    %218 = vector.shape_cast %180 : vector<1x32xf32> to vector<1x1x32xf32>
    %219 = vector.broadcast %218 : vector<1x1x32xf32> to vector<2x24x32xf32>
    %220 = arith.addf %217, %219 : vector<2x24x32xf32>
    %221 = vector.shape_cast %220 : vector<2x24x32xf32> to vector<48x32xf32>
    %222 = arith.truncf %221 : vector<48x32xf32> to vector<48x32xbf16>
    %cst_83 = arith.constant dense<0.000000e+00> : vector<48x96xf32>
    %223 = tpu.matmul %222, %190, %cst_83 {dimension_numbers = #tpu.dot_dimension_numbers<[1], [0], [0], [1], [0, 0, 1, 1], [], []>} : vector<48x32xbf16>, vector<32x96xbf16>, vector<48x96xf32> -> vector<48x96xf32>
    %224 = vector.broadcast %186 : vector<1x96xf32> to vector<48x96xf32>
    %225 = arith.addf %223, %224 : vector<48x96xf32>
    %226 = vector.shape_cast %225 : vector<48x96xf32> to vector<2x24x96xf32>
    %227 = vector.extract_strided_slice %226 {offsets = [0, 0, 0], sizes = [2, 24, 32], strides = [1, 1, 1]} : vector<2x24x96xf32> to vector<2x24x32xf32>
    %cst_84 = arith.constant 2.500000e-01 : f32
    %228 = vector.broadcast %cst_84 : f32 to vector<2x24x32xf32>
    %229 = arith.mulf %227, %228 : vector<2x24x32xf32>
    %230 = vector.extract_strided_slice %226 {offsets = [0, 0, 32], sizes = [2, 24, 32], strides = [1, 1, 1]} : vector<2x24x96xf32> to vector<2x24x32xf32>
    %231 = vector.extract_strided_slice %226 {offsets = [0, 0, 64], sizes = [2, 24, 32], strides = [1, 1, 1]} : vector<2x24x96xf32> to vector<2x24x32xf32>
    %232 = vector.extract_strided_slice %229 {offsets = [0, 0, 0], sizes = [2, 24, 16], strides = [1, 1, 1]} : vector<2x24x32xf32> to vector<2x24x16xf32>
    %233 = vector.extract_strided_slice %229 {offsets = [0, 0, 16], sizes = [2, 24, 16], strides = [1, 1, 1]} : vector<2x24x32xf32> to vector<2x24x16xf32>
    %234 = tpu.concatenate %232, %233 in 0 : vector<2x24x16xf32>, vector<2x24x16xf32> -> vector<4x24x16xf32>
    %235 = arith.truncf %234 : vector<4x24x16xf32> to vector<4x24x16xbf16>
    %236 = vector.extract_strided_slice %230 {offsets = [0, 0, 0], sizes = [2, 24, 16], strides = [1, 1, 1]} : vector<2x24x32xf32> to vector<2x24x16xf32>
    %237 = vector.extract_strided_slice %230 {offsets = [0, 0, 16], sizes = [2, 24, 16], strides = [1, 1, 1]} : vector<2x24x32xf32> to vector<2x24x16xf32>
    %238 = tpu.concatenate %236, %237 in 0 : vector<2x24x16xf32>, vector<2x24x16xf32> -> vector<4x24x16xf32>
    %239 = arith.truncf %238 : vector<4x24x16xf32> to vector<4x24x16xbf16>
    %240 = vector.extract_strided_slice %231 {offsets = [0, 0, 0], sizes = [2, 24, 16], strides = [1, 1, 1]} : vector<2x24x32xf32> to vector<2x24x16xf32>
    %241 = vector.extract_strided_slice %231 {offsets = [0, 0, 16], sizes = [2, 24, 16], strides = [1, 1, 1]} : vector<2x24x32xf32> to vector<2x24x16xf32>
    %242 = tpu.concatenate %240, %241 in 0 : vector<2x24x16xf32>, vector<2x24x16xf32> -> vector<4x24x16xf32>
    %243 = arith.truncf %242 : vector<4x24x16xf32> to vector<4x24x16xbf16>
    "tpu.trace_start"() <{level = 10 : i32, message = "bqd,bkd->bqk"}> : () -> ()
    %cst_85 = arith.constant dense<0.000000e+00> : vector<4x24x24xf32>
    %244 = tpu.matmul %235, %239, %cst_85 {dimension_numbers = #tpu.dot_dimension_numbers<[2], [2], [1], [1], [0, 0, 0, 1, 1, 1], [0], [0]>} : vector<4x24x16xbf16>, vector<4x24x16xbf16>, vector<4x24x24xf32> -> vector<4x24x24xf32>
    "tpu.trace_stop"() : () -> ()
    %245 = vector.shape_cast %40 : vector<24x24xf32> to vector<1x24x24xf32>
    %246 = vector.broadcast %245 : vector<1x24x24xf32> to vector<4x24x24xf32>
    %247 = arith.addf %244, %246 : vector<4x24x24xf32>
    %cst_86 = arith.constant dense<0xFF800000> : vector<4x24xf32>
    %248 = vector.multi_reduction <maximumf>, %247, %cst_86 [2] : vector<4x24x24xf32> to vector<4x24xf32>
    %249 = vector.shape_cast %248 : vector<4x24xf32> to vector<4x24x1xf32>
    %250 = vector.broadcast %249 : vector<4x24x1xf32> to vector<4x24x24xf32>
    %251 = arith.subf %247, %250 : vector<4x24x24xf32>
    %252 = math.exp %251 : vector<4x24x24xf32>
    %cst_87 = arith.constant dense<0.000000e+00> : vector<4x24xf32>
    %253 = vector.multi_reduction <add>, %252, %cst_87 [2] : vector<4x24x24xf32> to vector<4x24xf32>
    %254 = vector.shape_cast %253 : vector<4x24xf32> to vector<4x24x1xf32>
    %255 = tpu.reciprocal %254 {approx = true} : vector<4x24x1xf32> -> vector<4x24x1xf32>
    %256 = vector.broadcast %255 : vector<4x24x1xf32> to vector<4x24x24xf32>
    %257 = arith.mulf %252, %256 : vector<4x24x24xf32>
    %258 = arith.truncf %257 : vector<4x24x24xf32> to vector<4x24x24xbf16>
    "tpu.trace_start"() <{level = 10 : i32, message = "bqk,bkd->bqd"}> : () -> ()
    %cst_88 = arith.constant dense<0.000000e+00> : vector<4x24x16xf32>
    %259 = tpu.matmul %258, %243, %cst_88 {dimension_numbers = #tpu.dot_dimension_numbers<[2], [1], [1], [2], [0, 0, 0, 1, 1, 2], [0], [0]>} : vector<4x24x24xbf16>, vector<4x24x16xbf16>, vector<4x24x16xf32> -> vector<4x24x16xf32>
    "tpu.trace_stop"() : () -> ()
    %260 = vector.extract_strided_slice %259 {offsets = [0, 0, 0], sizes = [2, 24, 16], strides = [1, 1, 1]} : vector<4x24x16xf32> to vector<2x24x16xf32>
    %261 = vector.extract_strided_slice %259 {offsets = [2, 0, 0], sizes = [2, 24, 16], strides = [1, 1, 1]} : vector<4x24x16xf32> to vector<2x24x16xf32>
    %262 = tpu.concatenate %260, %261 in 2 : vector<2x24x16xf32>, vector<2x24x16xf32> -> vector<2x24x32xf32>
    %263 = vector.shape_cast %262 : vector<2x24x32xf32> to vector<48x32xf32>
    %264 = arith.truncf %263 : vector<48x32xf32> to vector<48x32xbf16>
    %cst_89 = arith.constant dense<0.000000e+00> : vector<48x32xf32>
    %265 = tpu.matmul %264, %192, %cst_89 {dimension_numbers = #tpu.dot_dimension_numbers<[1], [0], [0], [1], [0, 0, 1, 1], [], []>} : vector<48x32xbf16>, vector<32x32xbf16>, vector<48x32xf32> -> vector<48x32xf32>
    %266 = vector.broadcast %183 : vector<1x32xf32> to vector<48x32xf32>
    %267 = arith.addf %265, %266 : vector<48x32xf32>
    %268 = vector.shape_cast %267 : vector<48x32xf32> to vector<2x24x32xf32>
    %269 = arith.addf %176, %268 : vector<2x24x32xf32>
    %cst_90 = arith.constant dense<0.000000e+00> : vector<2x24xf32>
    %270 = vector.multi_reduction <add>, %269, %cst_90 [2] : vector<2x24x32xf32> to vector<2x24xf32>
    %271 = vector.shape_cast %270 : vector<2x24xf32> to vector<2x24x1xf32>
    %cst_91 = arith.constant 3.200000e+01 : f32
    %272 = vector.broadcast %cst_91 : f32 to vector<2x24x1xf32>
    %273 = arith.divf %271, %272 : vector<2x24x1xf32>
    %274 = vector.broadcast %273 : vector<2x24x1xf32> to vector<2x24x32xf32>
    %275 = arith.subf %269, %274 : vector<2x24x32xf32>
    %276 = arith.mulf %275, %275 : vector<2x24x32xf32>
    %cst_92 = arith.constant dense<0.000000e+00> : vector<2x24xf32>
    %277 = vector.multi_reduction <add>, %276, %cst_92 [2] : vector<2x24x32xf32> to vector<2x24xf32>
    %278 = vector.shape_cast %277 : vector<2x24xf32> to vector<2x24x1xf32>
    %cst_93 = arith.constant 3.200000e+01 : f32
    %279 = vector.broadcast %cst_93 : f32 to vector<2x24x1xf32>
    %280 = arith.divf %278, %279 : vector<2x24x1xf32>
    %281 = vector.broadcast %273 : vector<2x24x1xf32> to vector<2x24x32xf32>
    %282 = arith.subf %269, %281 : vector<2x24x32xf32>
    %cst_94 = arith.constant 9.99999974E-6 : f32
    %283 = vector.broadcast %cst_94 : f32 to vector<2x24x1xf32>
    %284 = arith.addf %280, %283 : vector<2x24x1xf32>
    %285 = math.rsqrt %284 : vector<2x24x1xf32>
    %286 = vector.broadcast %285 : vector<2x24x1xf32> to vector<2x24x32xf32>
    %287 = arith.mulf %282, %286 : vector<2x24x32xf32>
    %288 = vector.shape_cast %181 : vector<1x32xf32> to vector<1x1x32xf32>
    %289 = vector.broadcast %288 : vector<1x1x32xf32> to vector<2x24x32xf32>
    %290 = arith.mulf %287, %289 : vector<2x24x32xf32>
    %291 = vector.shape_cast %182 : vector<1x32xf32> to vector<1x1x32xf32>
    %292 = vector.broadcast %291 : vector<1x1x32xf32> to vector<2x24x32xf32>
    %293 = arith.addf %290, %292 : vector<2x24x32xf32>
    %294 = vector.shape_cast %293 : vector<2x24x32xf32> to vector<48x32xf32>
    %295 = arith.truncf %294 : vector<48x32xf32> to vector<48x32xbf16>
    %cst_95 = arith.constant dense<0.000000e+00> : vector<48x128xf32>
    %296 = tpu.matmul %295, %194, %cst_95 {dimension_numbers = #tpu.dot_dimension_numbers<[1], [0], [0], [1], [0, 0, 1, 1], [], []>} : vector<48x32xbf16>, vector<32x128xbf16>, vector<48x128xf32> -> vector<48x128xf32>
    %297 = vector.broadcast %188 : vector<1x128xf32> to vector<48x128xf32>
    %298 = arith.addf %296, %297 : vector<48x128xf32>
    %cst_96 = arith.constant 1.702000e+00 : f32
    %299 = vector.broadcast %cst_96 : f32 to vector<48x128xf32>
    %300 = arith.mulf %299, %298 : vector<48x128xf32>
    %301 = arith.negf %300 : vector<48x128xf32>
    %302 = math.exp %301 : vector<48x128xf32>
    %cst_97 = arith.constant 1.000000e+00 : f32
    %303 = vector.broadcast %cst_97 : f32 to vector<48x128xf32>
    %304 = arith.addf %303, %302 : vector<48x128xf32>
    %305 = arith.divf %303, %304 : vector<48x128xf32>
    %306 = arith.mulf %298, %305 : vector<48x128xf32>
    %307 = arith.truncf %306 : vector<48x128xf32> to vector<48x128xbf16>
    %cst_98 = arith.constant dense<0.000000e+00> : vector<48x32xf32>
    %308 = tpu.matmul %307, %196, %cst_98 {dimension_numbers = #tpu.dot_dimension_numbers<[1], [0], [0], [1], [0, 0, 1, 1], [], []>} : vector<48x128xbf16>, vector<128x32xbf16>, vector<48x32xf32> -> vector<48x32xf32>
    %309 = vector.broadcast %184 : vector<1x32xf32> to vector<48x32xf32>
    %310 = arith.addf %308, %309 : vector<48x32xf32>
    %311 = vector.shape_cast %310 : vector<48x32xf32> to vector<2x24x32xf32>
    %312 = arith.addf %269, %311 : vector<2x24x32xf32>
    %313 = vector.extract_strided_slice %312 {offsets = [0, 0, 0], sizes = [2, 1, 32], strides = [1, 1, 1]} : vector<2x24x32xf32> to vector<2x1x32xf32>
    %314 = vector.shape_cast %313 : vector<2x1x32xf32> to vector<2x32xf32>
    %c0_99 = arith.constant 0 : index
    %c0_100 = arith.constant 0 : index
    %315 = vector.load %arg11[%c0_99, %c0_100] : memref<2x32xf32, #tpu.memory_space<vmem>>, vector<1x32xf32>
    %c1_101 = arith.constant 1 : index
    %c0_102 = arith.constant 0 : index
    %316 = vector.load %arg11[%c1_101, %c0_102] : memref<2x32xf32, #tpu.memory_space<vmem>>, vector<1x32xf32>
    %cst_103 = arith.constant dense<0.000000e+00> : vector<2xf32>
    %317 = vector.multi_reduction <add>, %314, %cst_103 [1] : vector<2x32xf32> to vector<2xf32>
    %318 = vector.shape_cast %317 : vector<2xf32> to vector<2x1xf32>
    %cst_104 = arith.constant 3.200000e+01 : f32
    %319 = vector.broadcast %cst_104 : f32 to vector<2x1xf32>
    %320 = arith.divf %318, %319 : vector<2x1xf32>
    %321 = vector.broadcast %320 : vector<2x1xf32> to vector<2x32xf32>
    %322 = arith.subf %314, %321 : vector<2x32xf32>
    %323 = arith.mulf %322, %322 : vector<2x32xf32>
    %cst_105 = arith.constant dense<0.000000e+00> : vector<2xf32>
    %324 = vector.multi_reduction <add>, %323, %cst_105 [1] : vector<2x32xf32> to vector<2xf32>
    %325 = vector.shape_cast %324 : vector<2xf32> to vector<2x1xf32>
    %cst_106 = arith.constant 3.200000e+01 : f32
    %326 = vector.broadcast %cst_106 : f32 to vector<2x1xf32>
    %327 = arith.divf %325, %326 : vector<2x1xf32>
    %328 = vector.broadcast %320 : vector<2x1xf32> to vector<2x32xf32>
    %329 = arith.subf %314, %328 : vector<2x32xf32>
    %cst_107 = arith.constant 9.99999974E-6 : f32
    %330 = vector.broadcast %cst_107 : f32 to vector<2x1xf32>
    %331 = arith.addf %327, %330 : vector<2x1xf32>
    %332 = math.rsqrt %331 : vector<2x1xf32>
    %333 = vector.broadcast %332 : vector<2x1xf32> to vector<2x32xf32>
    %334 = arith.mulf %329, %333 : vector<2x32xf32>
    %335 = vector.broadcast %315 : vector<1x32xf32> to vector<2x32xf32>
    %336 = arith.mulf %334, %335 : vector<2x32xf32>
    %337 = vector.broadcast %316 : vector<1x32xf32> to vector<2x32xf32>
    %338 = arith.addf %336, %337 : vector<2x32xf32>
    %339 = arith.truncf %338 : vector<2x32xf32> to vector<2x32xbf16>
    %c0_108 = arith.constant 0 : index
    %c0_109 = arith.constant 0 : index
    %340 = vector.load %arg12[%c0_108, %c0_109] : memref<32x16xbf16, #tpu.memory_space<vmem>>, vector<32x16xbf16>
    %cst_110 = arith.constant dense<0.000000e+00> : vector<2x16xf32>
    %341 = tpu.matmul %339, %340, %cst_110 {dimension_numbers = #tpu.dot_dimension_numbers<[1], [0], [0], [1], [0, 0, 1, 1], [], []>} : vector<2x32xbf16>, vector<32x16xbf16>, vector<2x16xf32> -> vector<2x16xf32>
    %c0_111 = arith.constant 0 : index
    %c0_112 = arith.constant 0 : index
    %c0_113 = arith.constant 0 : index
    %342 = vector.load %arg13[%c0_111, %c0_112, %c0_113] : memref<4x8x32xf32, #tpu.memory_space<vmem>>, vector<4x8x32xf32>
    %343 = tpu.iota {dimensions = array<i32: 0>} : vector<8x8xi32>
    %344 = tpu.iota {dimensions = array<i32: 1>} : vector<8x8xi32>
    %345 = arith.cmpi sle, %344, %343 : vector<8x8xi32>
    %cst_114 = arith.constant 0.000000e+00 : f32
    %cst_115 = arith.constant -1.000000e+09 : f32
    %346 = vector.broadcast %cst_114 : f32 to vector<8x8xf32>
    %347 = vector.broadcast %cst_115 : f32 to vector<8x8xf32>
    %348 = arith.select %345, %346, %347 : vector<8x8xi1>, vector<8x8xf32>
    %c0_116 = arith.constant 0 : index
    %c0_117 = arith.constant 0 : index
    %c0_118 = arith.constant 0 : index
    %349 = vector.load %arg15[%c0_116, %c0_117, %c0_118] : memref<2x6x32xf32, #tpu.memory_space<vmem>>, vector<1x6x32xf32>
    %350 = vector.shape_cast %349 : vector<1x6x32xf32> to vector<6x32xf32>
    %351 = vector.extract_strided_slice %350 {offsets = [0, 0], sizes = [1, 32], strides = [1, 1]} : vector<6x32xf32> to vector<1x32xf32>
    %352 = vector.extract_strided_slice %350 {offsets = [1, 0], sizes = [1, 32], strides = [1, 1]} : vector<6x32xf32> to vector<1x32xf32>
    %353 = vector.extract_strided_slice %350 {offsets = [2, 0], sizes = [1, 32], strides = [1, 1]} : vector<6x32xf32> to vector<1x32xf32>
    %354 = vector.extract_strided_slice %350 {offsets = [3, 0], sizes = [1, 32], strides = [1, 1]} : vector<6x32xf32> to vector<1x32xf32>
    %355 = vector.extract_strided_slice %350 {offsets = [4, 0], sizes = [1, 32], strides = [1, 1]} : vector<6x32xf32> to vector<1x32xf32>
    %356 = vector.extract_strided_slice %350 {offsets = [5, 0], sizes = [1, 32], strides = [1, 1]} : vector<6x32xf32> to vector<1x32xf32>
    %c0_119 = arith.constant 0 : index
    %c0_120 = arith.constant 0 : index
    %c0_121 = arith.constant 0 : index
    %357 = vector.load %arg16[%c0_119, %c0_120, %c0_121] : memref<2x1x96xf32, #tpu.memory_space<vmem>>, vector<1x1x96xf32>
    %358 = vector.shape_cast %357 : vector<1x1x96xf32> to vector<1x96xf32>
    %c0_122 = arith.constant 0 : index
    %c0_123 = arith.constant 0 : index
    %c0_124 = arith.constant 0 : index
    %359 = vector.load %arg17[%c0_122, %c0_123, %c0_124] : memref<2x1x128xf32, #tpu.memory_space<vmem>>, vector<1x1x128xf32>
    %360 = vector.shape_cast %359 : vector<1x1x128xf32> to vector<1x128xf32>
    %c0_125 = arith.constant 0 : index
    %c0_126 = arith.constant 0 : index
    %c0_127 = arith.constant 0 : index
    %361 = vector.load %arg18[%c0_125, %c0_126, %c0_127] : memref<2x32x96xbf16, #tpu.memory_space<vmem>>, vector<1x32x96xbf16>
    %362 = vector.shape_cast %361 : vector<1x32x96xbf16> to vector<32x96xbf16>
    %c0_128 = arith.constant 0 : index
    %c0_129 = arith.constant 0 : index
    %c0_130 = arith.constant 0 : index
    %363 = vector.load %arg19[%c0_128, %c0_129, %c0_130] : memref<2x32x32xbf16, #tpu.memory_space<vmem>>, vector<1x32x32xbf16>
    %364 = vector.shape_cast %363 : vector<1x32x32xbf16> to vector<32x32xbf16>
    %c0_131 = arith.constant 0 : index
    %c0_132 = arith.constant 0 : index
    %c0_133 = arith.constant 0 : index
    %365 = vector.load %arg20[%c0_131, %c0_132, %c0_133] : memref<2x32x128xbf16, #tpu.memory_space<vmem>>, vector<1x32x128xbf16>
    %366 = vector.shape_cast %365 : vector<1x32x128xbf16> to vector<32x128xbf16>
    %c0_134 = arith.constant 0 : index
    %c0_135 = arith.constant 0 : index
    %c0_136 = arith.constant 0 : index
    %367 = vector.load %arg21[%c0_134, %c0_135, %c0_136] : memref<2x128x32xbf16, #tpu.memory_space<vmem>>, vector<1x128x32xbf16>
    %368 = vector.shape_cast %367 : vector<1x128x32xbf16> to vector<128x32xbf16>
    %cst_137 = arith.constant dense<0.000000e+00> : vector<4x8xf32>
    %369 = vector.multi_reduction <add>, %342, %cst_137 [2] : vector<4x8x32xf32> to vector<4x8xf32>
    %370 = vector.shape_cast %369 : vector<4x8xf32> to vector<4x8x1xf32>
    %cst_138 = arith.constant 3.200000e+01 : f32
    %371 = vector.broadcast %cst_138 : f32 to vector<4x8x1xf32>
    %372 = arith.divf %370, %371 : vector<4x8x1xf32>
    %373 = vector.broadcast %372 : vector<4x8x1xf32> to vector<4x8x32xf32>
    %374 = arith.subf %342, %373 : vector<4x8x32xf32>
    %375 = arith.mulf %374, %374 : vector<4x8x32xf32>
    %cst_139 = arith.constant dense<0.000000e+00> : vector<4x8xf32>
    %376 = vector.multi_reduction <add>, %375, %cst_139 [2] : vector<4x8x32xf32> to vector<4x8xf32>
    %377 = vector.shape_cast %376 : vector<4x8xf32> to vector<4x8x1xf32>
    %cst_140 = arith.constant 3.200000e+01 : f32
    %378 = vector.broadcast %cst_140 : f32 to vector<4x8x1xf32>
    %379 = arith.divf %377, %378 : vector<4x8x1xf32>
    %380 = vector.broadcast %372 : vector<4x8x1xf32> to vector<4x8x32xf32>
    %381 = arith.subf %342, %380 : vector<4x8x32xf32>
    %cst_141 = arith.constant 9.99999974E-6 : f32
    %382 = vector.broadcast %cst_141 : f32 to vector<4x8x1xf32>
    %383 = arith.addf %379, %382 : vector<4x8x1xf32>
    %384 = math.rsqrt %383 : vector<4x8x1xf32>
    %385 = vector.broadcast %384 : vector<4x8x1xf32> to vector<4x8x32xf32>
    %386 = arith.mulf %381, %385 : vector<4x8x32xf32>
    %387 = vector.shape_cast %351 : vector<1x32xf32> to vector<1x1x32xf32>
    %388 = vector.broadcast %387 : vector<1x1x32xf32> to vector<4x8x32xf32>
    %389 = arith.mulf %386, %388 : vector<4x8x32xf32>
    %390 = vector.shape_cast %352 : vector<1x32xf32> to vector<1x1x32xf32>
    %391 = vector.broadcast %390 : vector<1x1x32xf32> to vector<4x8x32xf32>
    %392 = arith.addf %389, %391 : vector<4x8x32xf32>
    %393 = vector.shape_cast %392 : vector<4x8x32xf32> to vector<32x32xf32>
    %394 = arith.truncf %393 : vector<32x32xf32> to vector<32x32xbf16>
    %cst_142 = arith.constant dense<0.000000e+00> : vector<32x96xf32>
    %395 = tpu.matmul %394, %362, %cst_142 {dimension_numbers = #tpu.dot_dimension_numbers<[1], [0], [0], [1], [0, 0, 1, 1], [], []>} : vector<32x32xbf16>, vector<32x96xbf16>, vector<32x96xf32> -> vector<32x96xf32>
    %396 = vector.broadcast %358 : vector<1x96xf32> to vector<32x96xf32>
    %397 = arith.addf %395, %396 : vector<32x96xf32>
    %398 = vector.shape_cast %397 : vector<32x96xf32> to vector<4x8x96xf32>
    %399 = vector.extract_strided_slice %398 {offsets = [0, 0, 0], sizes = [4, 8, 32], strides = [1, 1, 1]} : vector<4x8x96xf32> to vector<4x8x32xf32>
    %cst_143 = arith.constant 2.500000e-01 : f32
    %400 = vector.broadcast %cst_143 : f32 to vector<4x8x32xf32>
    %401 = arith.mulf %399, %400 : vector<4x8x32xf32>
    %402 = vector.extract_strided_slice %398 {offsets = [0, 0, 32], sizes = [4, 8, 32], strides = [1, 1, 1]} : vector<4x8x96xf32> to vector<4x8x32xf32>
    %403 = vector.extract_strided_slice %398 {offsets = [0, 0, 64], sizes = [4, 8, 32], strides = [1, 1, 1]} : vector<4x8x96xf32> to vector<4x8x32xf32>
    %404 = vector.extract_strided_slice %401 {offsets = [0, 0, 0], sizes = [4, 8, 16], strides = [1, 1, 1]} : vector<4x8x32xf32> to vector<4x8x16xf32>
    %405 = vector.extract_strided_slice %401 {offsets = [0, 0, 16], sizes = [4, 8, 16], strides = [1, 1, 1]} : vector<4x8x32xf32> to vector<4x8x16xf32>
    %406 = tpu.concatenate %404, %405 in 0 : vector<4x8x16xf32>, vector<4x8x16xf32> -> vector<8x8x16xf32>
    %407 = arith.truncf %406 : vector<8x8x16xf32> to vector<8x8x16xbf16>
    %408 = vector.extract_strided_slice %402 {offsets = [0, 0, 0], sizes = [4, 8, 16], strides = [1, 1, 1]} : vector<4x8x32xf32> to vector<4x8x16xf32>
    %409 = vector.extract_strided_slice %402 {offsets = [0, 0, 16], sizes = [4, 8, 16], strides = [1, 1, 1]} : vector<4x8x32xf32> to vector<4x8x16xf32>
    %410 = tpu.concatenate %408, %409 in 0 : vector<4x8x16xf32>, vector<4x8x16xf32> -> vector<8x8x16xf32>
    %411 = arith.truncf %410 : vector<8x8x16xf32> to vector<8x8x16xbf16>
    %412 = vector.extract_strided_slice %403 {offsets = [0, 0, 0], sizes = [4, 8, 16], strides = [1, 1, 1]} : vector<4x8x32xf32> to vector<4x8x16xf32>
    %413 = vector.extract_strided_slice %403 {offsets = [0, 0, 16], sizes = [4, 8, 16], strides = [1, 1, 1]} : vector<4x8x32xf32> to vector<4x8x16xf32>
    %414 = tpu.concatenate %412, %413 in 0 : vector<4x8x16xf32>, vector<4x8x16xf32> -> vector<8x8x16xf32>
    %415 = arith.truncf %414 : vector<8x8x16xf32> to vector<8x8x16xbf16>
    "tpu.trace_start"() <{level = 10 : i32, message = "bqd,bkd->bqk"}> : () -> ()
    %cst_144 = arith.constant dense<0.000000e+00> : vector<8x8x8xf32>
    %416 = tpu.matmul %407, %411, %cst_144 {dimension_numbers = #tpu.dot_dimension_numbers<[2], [2], [1], [1], [0, 0, 0, 1, 1, 1], [0], [0]>} : vector<8x8x16xbf16>, vector<8x8x16xbf16>, vector<8x8x8xf32> -> vector<8x8x8xf32>
    "tpu.trace_stop"() : () -> ()
    %417 = vector.shape_cast %348 : vector<8x8xf32> to vector<1x8x8xf32>
    %418 = vector.broadcast %417 : vector<1x8x8xf32> to vector<8x8x8xf32>
    %419 = arith.addf %416, %418 : vector<8x8x8xf32>
    %cst_145 = arith.constant dense<0xFF800000> : vector<8x8xf32>
    %420 = vector.multi_reduction <maximumf>, %419, %cst_145 [2] : vector<8x8x8xf32> to vector<8x8xf32>
    %421 = vector.shape_cast %420 : vector<8x8xf32> to vector<8x8x1xf32>
    %422 = vector.broadcast %421 : vector<8x8x1xf32> to vector<8x8x8xf32>
    %423 = arith.subf %419, %422 : vector<8x8x8xf32>
    %424 = math.exp %423 : vector<8x8x8xf32>
    %cst_146 = arith.constant dense<0.000000e+00> : vector<8x8xf32>
    %425 = vector.multi_reduction <add>, %424, %cst_146 [2] : vector<8x8x8xf32> to vector<8x8xf32>
    %426 = vector.shape_cast %425 : vector<8x8xf32> to vector<8x8x1xf32>
    %427 = tpu.reciprocal %426 {approx = true} : vector<8x8x1xf32> -> vector<8x8x1xf32>
    %428 = vector.broadcast %427 : vector<8x8x1xf32> to vector<8x8x8xf32>
    %429 = arith.mulf %424, %428 : vector<8x8x8xf32>
    %430 = arith.truncf %429 : vector<8x8x8xf32> to vector<8x8x8xbf16>
    "tpu.trace_start"() <{level = 10 : i32, message = "bqk,bkd->bqd"}> : () -> ()
    %cst_147 = arith.constant dense<0.000000e+00> : vector<8x8x16xf32>
    %431 = tpu.matmul %430, %415, %cst_147 {dimension_numbers = #tpu.dot_dimension_numbers<[2], [1], [1], [2], [0, 0, 0, 1, 1, 2], [0], [0]>} : vector<8x8x8xbf16>, vector<8x8x16xbf16>, vector<8x8x16xf32> -> vector<8x8x16xf32>
    "tpu.trace_stop"() : () -> ()
    %432 = vector.extract_strided_slice %431 {offsets = [0, 0, 0], sizes = [4, 8, 16], strides = [1, 1, 1]} : vector<8x8x16xf32> to vector<4x8x16xf32>
    %433 = vector.extract_strided_slice %431 {offsets = [4, 0, 0], sizes = [4, 8, 16], strides = [1, 1, 1]} : vector<8x8x16xf32> to vector<4x8x16xf32>
    %434 = tpu.concatenate %432, %433 in 2 : vector<4x8x16xf32>, vector<4x8x16xf32> -> vector<4x8x32xf32>
    %435 = vector.shape_cast %434 : vector<4x8x32xf32> to vector<32x32xf32>
    %436 = arith.truncf %435 : vector<32x32xf32> to vector<32x32xbf16>
    %cst_148 = arith.constant dense<0.000000e+00> : vector<32x32xf32>
    %437 = tpu.matmul %436, %364, %cst_148 {dimension_numbers = #tpu.dot_dimension_numbers<[1], [0], [0], [1], [0, 0, 1, 1], [], []>} : vector<32x32xbf16>, vector<32x32xbf16>, vector<32x32xf32> -> vector<32x32xf32>
    %438 = vector.broadcast %355 : vector<1x32xf32> to vector<32x32xf32>
    %439 = arith.addf %437, %438 : vector<32x32xf32>
    %440 = vector.shape_cast %439 : vector<32x32xf32> to vector<4x8x32xf32>
    %441 = arith.addf %342, %440 : vector<4x8x32xf32>
    %cst_149 = arith.constant dense<0.000000e+00> : vector<4x8xf32>
    %442 = vector.multi_reduction <add>, %441, %cst_149 [2] : vector<4x8x32xf32> to vector<4x8xf32>
    %443 = vector.shape_cast %442 : vector<4x8xf32> to vector<4x8x1xf32>
    %cst_150 = arith.constant 3.200000e+01 : f32
    %444 = vector.broadcast %cst_150 : f32 to vector<4x8x1xf32>
    %445 = arith.divf %443, %444 : vector<4x8x1xf32>
    %446 = vector.broadcast %445 : vector<4x8x1xf32> to vector<4x8x32xf32>
    %447 = arith.subf %441, %446 : vector<4x8x32xf32>
    %448 = arith.mulf %447, %447 : vector<4x8x32xf32>
    %cst_151 = arith.constant dense<0.000000e+00> : vector<4x8xf32>
    %449 = vector.multi_reduction <add>, %448, %cst_151 [2] : vector<4x8x32xf32> to vector<4x8xf32>
    %450 = vector.shape_cast %449 : vector<4x8xf32> to vector<4x8x1xf32>
    %cst_152 = arith.constant 3.200000e+01 : f32
    %451 = vector.broadcast %cst_152 : f32 to vector<4x8x1xf32>
    %452 = arith.divf %450, %451 : vector<4x8x1xf32>
    %453 = vector.broadcast %445 : vector<4x8x1xf32> to vector<4x8x32xf32>
    %454 = arith.subf %441, %453 : vector<4x8x32xf32>
    %cst_153 = arith.constant 9.99999974E-6 : f32
    %455 = vector.broadcast %cst_153 : f32 to vector<4x8x1xf32>
    %456 = arith.addf %452, %455 : vector<4x8x1xf32>
    %457 = math.rsqrt %456 : vector<4x8x1xf32>
    %458 = vector.broadcast %457 : vector<4x8x1xf32> to vector<4x8x32xf32>
    %459 = arith.mulf %454, %458 : vector<4x8x32xf32>
    %460 = vector.shape_cast %353 : vector<1x32xf32> to vector<1x1x32xf32>
    %461 = vector.broadcast %460 : vector<1x1x32xf32> to vector<4x8x32xf32>
    %462 = arith.mulf %459, %461 : vector<4x8x32xf32>
    %463 = vector.shape_cast %354 : vector<1x32xf32> to vector<1x1x32xf32>
    %464 = vector.broadcast %463 : vector<1x1x32xf32> to vector<4x8x32xf32>
    %465 = arith.addf %462, %464 : vector<4x8x32xf32>
    %466 = vector.shape_cast %465 : vector<4x8x32xf32> to vector<32x32xf32>
    %467 = arith.truncf %466 : vector<32x32xf32> to vector<32x32xbf16>
    %cst_154 = arith.constant dense<0.000000e+00> : vector<32x128xf32>
    %468 = tpu.matmul %467, %366, %cst_154 {dimension_numbers = #tpu.dot_dimension_numbers<[1], [0], [0], [1], [0, 0, 1, 1], [], []>} : vector<32x32xbf16>, vector<32x128xbf16>, vector<32x128xf32> -> vector<32x128xf32>
    %469 = vector.broadcast %360 : vector<1x128xf32> to vector<32x128xf32>
    %470 = arith.addf %468, %469 : vector<32x128xf32>
    %cst_155 = arith.constant 1.702000e+00 : f32
    %471 = vector.broadcast %cst_155 : f32 to vector<32x128xf32>
    %472 = arith.mulf %471, %470 : vector<32x128xf32>
    %473 = arith.negf %472 : vector<32x128xf32>
    %474 = math.exp %473 : vector<32x128xf32>
    %cst_156 = arith.constant 1.000000e+00 : f32
    %475 = vector.broadcast %cst_156 : f32 to vector<32x128xf32>
    %476 = arith.addf %475, %474 : vector<32x128xf32>
    %477 = arith.divf %475, %476 : vector<32x128xf32>
    %478 = arith.mulf %470, %477 : vector<32x128xf32>
    %479 = arith.truncf %478 : vector<32x128xf32> to vector<32x128xbf16>
    %cst_157 = arith.constant dense<0.000000e+00> : vector<32x32xf32>
    %480 = tpu.matmul %479, %368, %cst_157 {dimension_numbers = #tpu.dot_dimension_numbers<[1], [0], [0], [1], [0, 0, 1, 1], [], []>} : vector<32x128xbf16>, vector<128x32xbf16>, vector<32x32xf32> -> vector<32x32xf32>
    %481 = vector.broadcast %356 : vector<1x32xf32> to vector<32x32xf32>
    %482 = arith.addf %480, %481 : vector<32x32xf32>
    %483 = vector.shape_cast %482 : vector<32x32xf32> to vector<4x8x32xf32>
    %484 = arith.addf %441, %483 : vector<4x8x32xf32>
    %c1_158 = arith.constant 1 : index
    %c0_159 = arith.constant 0 : index
    %c0_160 = arith.constant 0 : index
    %485 = vector.load %arg15[%c1_158, %c0_159, %c0_160] : memref<2x6x32xf32, #tpu.memory_space<vmem>>, vector<1x6x32xf32>
    %486 = vector.shape_cast %485 : vector<1x6x32xf32> to vector<6x32xf32>
    %487 = vector.extract_strided_slice %486 {offsets = [0, 0], sizes = [1, 32], strides = [1, 1]} : vector<6x32xf32> to vector<1x32xf32>
    %488 = vector.extract_strided_slice %486 {offsets = [1, 0], sizes = [1, 32], strides = [1, 1]} : vector<6x32xf32> to vector<1x32xf32>
    %489 = vector.extract_strided_slice %486 {offsets = [2, 0], sizes = [1, 32], strides = [1, 1]} : vector<6x32xf32> to vector<1x32xf32>
    %490 = vector.extract_strided_slice %486 {offsets = [3, 0], sizes = [1, 32], strides = [1, 1]} : vector<6x32xf32> to vector<1x32xf32>
    %491 = vector.extract_strided_slice %486 {offsets = [4, 0], sizes = [1, 32], strides = [1, 1]} : vector<6x32xf32> to vector<1x32xf32>
    %492 = vector.extract_strided_slice %486 {offsets = [5, 0], sizes = [1, 32], strides = [1, 1]} : vector<6x32xf32> to vector<1x32xf32>
    %c1_161 = arith.constant 1 : index
    %c0_162 = arith.constant 0 : index
    %c0_163 = arith.constant 0 : index
    %493 = vector.load %arg16[%c1_161, %c0_162, %c0_163] : memref<2x1x96xf32, #tpu.memory_space<vmem>>, vector<1x1x96xf32>
    %494 = vector.shape_cast %493 : vector<1x1x96xf32> to vector<1x96xf32>
    %c1_164 = arith.constant 1 : index
    %c0_165 = arith.constant 0 : index
    %c0_166 = arith.constant 0 : index
    %495 = vector.load %arg17[%c1_164, %c0_165, %c0_166] : memref<2x1x128xf32, #tpu.memory_space<vmem>>, vector<1x1x128xf32>
    %496 = vector.shape_cast %495 : vector<1x1x128xf32> to vector<1x128xf32>
    %c1_167 = arith.constant 1 : index
    %c0_168 = arith.constant 0 : index
    %c0_169 = arith.constant 0 : index
    %497 = vector.load %arg18[%c1_167, %c0_168, %c0_169] : memref<2x32x96xbf16, #tpu.memory_space<vmem>>, vector<1x32x96xbf16>
    %498 = vector.shape_cast %497 : vector<1x32x96xbf16> to vector<32x96xbf16>
    %c1_170 = arith.constant 1 : index
    %c0_171 = arith.constant 0 : index
    %c0_172 = arith.constant 0 : index
    %499 = vector.load %arg19[%c1_170, %c0_171, %c0_172] : memref<2x32x32xbf16, #tpu.memory_space<vmem>>, vector<1x32x32xbf16>
    %500 = vector.shape_cast %499 : vector<1x32x32xbf16> to vector<32x32xbf16>
    %c1_173 = arith.constant 1 : index
    %c0_174 = arith.constant 0 : index
    %c0_175 = arith.constant 0 : index
    %501 = vector.load %arg20[%c1_173, %c0_174, %c0_175] : memref<2x32x128xbf16, #tpu.memory_space<vmem>>, vector<1x32x128xbf16>
    %502 = vector.shape_cast %501 : vector<1x32x128xbf16> to vector<32x128xbf16>
    %c1_176 = arith.constant 1 : index
    %c0_177 = arith.constant 0 : index
    %c0_178 = arith.constant 0 : index
    %503 = vector.load %arg21[%c1_176, %c0_177, %c0_178] : memref<2x128x32xbf16, #tpu.memory_space<vmem>>, vector<1x128x32xbf16>
    %504 = vector.shape_cast %503 : vector<1x128x32xbf16> to vector<128x32xbf16>
    %cst_179 = arith.constant dense<0.000000e+00> : vector<4x8xf32>
    %505 = vector.multi_reduction <add>, %484, %cst_179 [2] : vector<4x8x32xf32> to vector<4x8xf32>
    %506 = vector.shape_cast %505 : vector<4x8xf32> to vector<4x8x1xf32>
    %cst_180 = arith.constant 3.200000e+01 : f32
    %507 = vector.broadcast %cst_180 : f32 to vector<4x8x1xf32>
    %508 = arith.divf %506, %507 : vector<4x8x1xf32>
    %509 = vector.broadcast %508 : vector<4x8x1xf32> to vector<4x8x32xf32>
    %510 = arith.subf %484, %509 : vector<4x8x32xf32>
    %511 = arith.mulf %510, %510 : vector<4x8x32xf32>
    %cst_181 = arith.constant dense<0.000000e+00> : vector<4x8xf32>
    %512 = vector.multi_reduction <add>, %511, %cst_181 [2] : vector<4x8x32xf32> to vector<4x8xf32>
    %513 = vector.shape_cast %512 : vector<4x8xf32> to vector<4x8x1xf32>
    %cst_182 = arith.constant 3.200000e+01 : f32
    %514 = vector.broadcast %cst_182 : f32 to vector<4x8x1xf32>
    %515 = arith.divf %513, %514 : vector<4x8x1xf32>
    %516 = vector.broadcast %508 : vector<4x8x1xf32> to vector<4x8x32xf32>
    %517 = arith.subf %484, %516 : vector<4x8x32xf32>
    %cst_183 = arith.constant 9.99999974E-6 : f32
    %518 = vector.broadcast %cst_183 : f32 to vector<4x8x1xf32>
    %519 = arith.addf %515, %518 : vector<4x8x1xf32>
    %520 = math.rsqrt %519 : vector<4x8x1xf32>
    %521 = vector.broadcast %520 : vector<4x8x1xf32> to vector<4x8x32xf32>
    %522 = arith.mulf %517, %521 : vector<4x8x32xf32>
    %523 = vector.shape_cast %487 : vector<1x32xf32> to vector<1x1x32xf32>
    %524 = vector.broadcast %523 : vector<1x1x32xf32> to vector<4x8x32xf32>
    %525 = arith.mulf %522, %524 : vector<4x8x32xf32>
    %526 = vector.shape_cast %488 : vector<1x32xf32> to vector<1x1x32xf32>
    %527 = vector.broadcast %526 : vector<1x1x32xf32> to vector<4x8x32xf32>
    %528 = arith.addf %525, %527 : vector<4x8x32xf32>
    %529 = vector.shape_cast %528 : vector<4x8x32xf32> to vector<32x32xf32>
    %530 = arith.truncf %529 : vector<32x32xf32> to vector<32x32xbf16>
    %cst_184 = arith.constant dense<0.000000e+00> : vector<32x96xf32>
    %531 = tpu.matmul %530, %498, %cst_184 {dimension_numbers = #tpu.dot_dimension_numbers<[1], [0], [0], [1], [0, 0, 1, 1], [], []>} : vector<32x32xbf16>, vector<32x96xbf16>, vector<32x96xf32> -> vector<32x96xf32>
    %532 = vector.broadcast %494 : vector<1x96xf32> to vector<32x96xf32>
    %533 = arith.addf %531, %532 : vector<32x96xf32>
    %534 = vector.shape_cast %533 : vector<32x96xf32> to vector<4x8x96xf32>
    %535 = vector.extract_strided_slice %534 {offsets = [0, 0, 0], sizes = [4, 8, 32], strides = [1, 1, 1]} : vector<4x8x96xf32> to vector<4x8x32xf32>
    %cst_185 = arith.constant 2.500000e-01 : f32
    %536 = vector.broadcast %cst_185 : f32 to vector<4x8x32xf32>
    %537 = arith.mulf %535, %536 : vector<4x8x32xf32>
    %538 = vector.extract_strided_slice %534 {offsets = [0, 0, 32], sizes = [4, 8, 32], strides = [1, 1, 1]} : vector<4x8x96xf32> to vector<4x8x32xf32>
    %539 = vector.extract_strided_slice %534 {offsets = [0, 0, 64], sizes = [4, 8, 32], strides = [1, 1, 1]} : vector<4x8x96xf32> to vector<4x8x32xf32>
    %540 = vector.extract_strided_slice %537 {offsets = [0, 0, 0], sizes = [4, 8, 16], strides = [1, 1, 1]} : vector<4x8x32xf32> to vector<4x8x16xf32>
    %541 = vector.extract_strided_slice %537 {offsets = [0, 0, 16], sizes = [4, 8, 16], strides = [1, 1, 1]} : vector<4x8x32xf32> to vector<4x8x16xf32>
    %542 = tpu.concatenate %540, %541 in 0 : vector<4x8x16xf32>, vector<4x8x16xf32> -> vector<8x8x16xf32>
    %543 = arith.truncf %542 : vector<8x8x16xf32> to vector<8x8x16xbf16>
    %544 = vector.extract_strided_slice %538 {offsets = [0, 0, 0], sizes = [4, 8, 16], strides = [1, 1, 1]} : vector<4x8x32xf32> to vector<4x8x16xf32>
    %545 = vector.extract_strided_slice %538 {offsets = [0, 0, 16], sizes = [4, 8, 16], strides = [1, 1, 1]} : vector<4x8x32xf32> to vector<4x8x16xf32>
    %546 = tpu.concatenate %544, %545 in 0 : vector<4x8x16xf32>, vector<4x8x16xf32> -> vector<8x8x16xf32>
    %547 = arith.truncf %546 : vector<8x8x16xf32> to vector<8x8x16xbf16>
    %548 = vector.extract_strided_slice %539 {offsets = [0, 0, 0], sizes = [4, 8, 16], strides = [1, 1, 1]} : vector<4x8x32xf32> to vector<4x8x16xf32>
    %549 = vector.extract_strided_slice %539 {offsets = [0, 0, 16], sizes = [4, 8, 16], strides = [1, 1, 1]} : vector<4x8x32xf32> to vector<4x8x16xf32>
    %550 = tpu.concatenate %548, %549 in 0 : vector<4x8x16xf32>, vector<4x8x16xf32> -> vector<8x8x16xf32>
    %551 = arith.truncf %550 : vector<8x8x16xf32> to vector<8x8x16xbf16>
    "tpu.trace_start"() <{level = 10 : i32, message = "bqd,bkd->bqk"}> : () -> ()
    %cst_186 = arith.constant dense<0.000000e+00> : vector<8x8x8xf32>
    %552 = tpu.matmul %543, %547, %cst_186 {dimension_numbers = #tpu.dot_dimension_numbers<[2], [2], [1], [1], [0, 0, 0, 1, 1, 1], [0], [0]>} : vector<8x8x16xbf16>, vector<8x8x16xbf16>, vector<8x8x8xf32> -> vector<8x8x8xf32>
    "tpu.trace_stop"() : () -> ()
    %553 = vector.shape_cast %348 : vector<8x8xf32> to vector<1x8x8xf32>
    %554 = vector.broadcast %553 : vector<1x8x8xf32> to vector<8x8x8xf32>
    %555 = arith.addf %552, %554 : vector<8x8x8xf32>
    %cst_187 = arith.constant dense<0xFF800000> : vector<8x8xf32>
    %556 = vector.multi_reduction <maximumf>, %555, %cst_187 [2] : vector<8x8x8xf32> to vector<8x8xf32>
    %557 = vector.shape_cast %556 : vector<8x8xf32> to vector<8x8x1xf32>
    %558 = vector.broadcast %557 : vector<8x8x1xf32> to vector<8x8x8xf32>
    %559 = arith.subf %555, %558 : vector<8x8x8xf32>
    %560 = math.exp %559 : vector<8x8x8xf32>
    %cst_188 = arith.constant dense<0.000000e+00> : vector<8x8xf32>
    %561 = vector.multi_reduction <add>, %560, %cst_188 [2] : vector<8x8x8xf32> to vector<8x8xf32>
    %562 = vector.shape_cast %561 : vector<8x8xf32> to vector<8x8x1xf32>
    %563 = tpu.reciprocal %562 {approx = true} : vector<8x8x1xf32> -> vector<8x8x1xf32>
    %564 = vector.broadcast %563 : vector<8x8x1xf32> to vector<8x8x8xf32>
    %565 = arith.mulf %560, %564 : vector<8x8x8xf32>
    %566 = arith.truncf %565 : vector<8x8x8xf32> to vector<8x8x8xbf16>
    "tpu.trace_start"() <{level = 10 : i32, message = "bqk,bkd->bqd"}> : () -> ()
    %cst_189 = arith.constant dense<0.000000e+00> : vector<8x8x16xf32>
    %567 = tpu.matmul %566, %551, %cst_189 {dimension_numbers = #tpu.dot_dimension_numbers<[2], [1], [1], [2], [0, 0, 0, 1, 1, 2], [0], [0]>} : vector<8x8x8xbf16>, vector<8x8x16xbf16>, vector<8x8x16xf32> -> vector<8x8x16xf32>
    "tpu.trace_stop"() : () -> ()
    %568 = vector.extract_strided_slice %567 {offsets = [0, 0, 0], sizes = [4, 8, 16], strides = [1, 1, 1]} : vector<8x8x16xf32> to vector<4x8x16xf32>
    %569 = vector.extract_strided_slice %567 {offsets = [4, 0, 0], sizes = [4, 8, 16], strides = [1, 1, 1]} : vector<8x8x16xf32> to vector<4x8x16xf32>
    %570 = tpu.concatenate %568, %569 in 2 : vector<4x8x16xf32>, vector<4x8x16xf32> -> vector<4x8x32xf32>
    %571 = vector.shape_cast %570 : vector<4x8x32xf32> to vector<32x32xf32>
    %572 = arith.truncf %571 : vector<32x32xf32> to vector<32x32xbf16>
    %cst_190 = arith.constant dense<0.000000e+00> : vector<32x32xf32>
    %573 = tpu.matmul %572, %500, %cst_190 {dimension_numbers = #tpu.dot_dimension_numbers<[1], [0], [0], [1], [0, 0, 1, 1], [], []>} : vector<32x32xbf16>, vector<32x32xbf16>, vector<32x32xf32> -> vector<32x32xf32>
    %574 = vector.broadcast %491 : vector<1x32xf32> to vector<32x32xf32>
    %575 = arith.addf %573, %574 : vector<32x32xf32>
    %576 = vector.shape_cast %575 : vector<32x32xf32> to vector<4x8x32xf32>
    %577 = arith.addf %484, %576 : vector<4x8x32xf32>
    %cst_191 = arith.constant dense<0.000000e+00> : vector<4x8xf32>
    %578 = vector.multi_reduction <add>, %577, %cst_191 [2] : vector<4x8x32xf32> to vector<4x8xf32>
    %579 = vector.shape_cast %578 : vector<4x8xf32> to vector<4x8x1xf32>
    %cst_192 = arith.constant 3.200000e+01 : f32
    %580 = vector.broadcast %cst_192 : f32 to vector<4x8x1xf32>
    %581 = arith.divf %579, %580 : vector<4x8x1xf32>
    %582 = vector.broadcast %581 : vector<4x8x1xf32> to vector<4x8x32xf32>
    %583 = arith.subf %577, %582 : vector<4x8x32xf32>
    %584 = arith.mulf %583, %583 : vector<4x8x32xf32>
    %cst_193 = arith.constant dense<0.000000e+00> : vector<4x8xf32>
    %585 = vector.multi_reduction <add>, %584, %cst_193 [2] : vector<4x8x32xf32> to vector<4x8xf32>
    %586 = vector.shape_cast %585 : vector<4x8xf32> to vector<4x8x1xf32>
    %cst_194 = arith.constant 3.200000e+01 : f32
    %587 = vector.broadcast %cst_194 : f32 to vector<4x8x1xf32>
    %588 = arith.divf %586, %587 : vector<4x8x1xf32>
    %589 = vector.broadcast %581 : vector<4x8x1xf32> to vector<4x8x32xf32>
    %590 = arith.subf %577, %589 : vector<4x8x32xf32>
    %cst_195 = arith.constant 9.99999974E-6 : f32
    %591 = vector.broadcast %cst_195 : f32 to vector<4x8x1xf32>
    %592 = arith.addf %588, %591 : vector<4x8x1xf32>
    %593 = math.rsqrt %592 : vector<4x8x1xf32>
    %594 = vector.broadcast %593 : vector<4x8x1xf32> to vector<4x8x32xf32>
    %595 = arith.mulf %590, %594 : vector<4x8x32xf32>
    %596 = vector.shape_cast %489 : vector<1x32xf32> to vector<1x1x32xf32>
    %597 = vector.broadcast %596 : vector<1x1x32xf32> to vector<4x8x32xf32>
    %598 = arith.mulf %595, %597 : vector<4x8x32xf32>
    %599 = vector.shape_cast %490 : vector<1x32xf32> to vector<1x1x32xf32>
    %600 = vector.broadcast %599 : vector<1x1x32xf32> to vector<4x8x32xf32>
    %601 = arith.addf %598, %600 : vector<4x8x32xf32>
    %602 = vector.shape_cast %601 : vector<4x8x32xf32> to vector<32x32xf32>
    %603 = arith.truncf %602 : vector<32x32xf32> to vector<32x32xbf16>
    %cst_196 = arith.constant dense<0.000000e+00> : vector<32x128xf32>
    %604 = tpu.matmul %603, %502, %cst_196 {dimension_numbers = #tpu.dot_dimension_numbers<[1], [0], [0], [1], [0, 0, 1, 1], [], []>} : vector<32x32xbf16>, vector<32x128xbf16>, vector<32x128xf32> -> vector<32x128xf32>
    %605 = vector.broadcast %496 : vector<1x128xf32> to vector<32x128xf32>
    %606 = arith.addf %604, %605 : vector<32x128xf32>
    %cst_197 = arith.constant 1.702000e+00 : f32
    %607 = vector.broadcast %cst_197 : f32 to vector<32x128xf32>
    %608 = arith.mulf %607, %606 : vector<32x128xf32>
    %609 = arith.negf %608 : vector<32x128xf32>
    %610 = math.exp %609 : vector<32x128xf32>
    %cst_198 = arith.constant 1.000000e+00 : f32
    %611 = vector.broadcast %cst_198 : f32 to vector<32x128xf32>
    %612 = arith.addf %611, %610 : vector<32x128xf32>
    %613 = arith.divf %611, %612 : vector<32x128xf32>
    %614 = arith.mulf %606, %613 : vector<32x128xf32>
    %615 = arith.truncf %614 : vector<32x128xf32> to vector<32x128xbf16>
    %cst_199 = arith.constant dense<0.000000e+00> : vector<32x32xf32>
    %616 = tpu.matmul %615, %504, %cst_199 {dimension_numbers = #tpu.dot_dimension_numbers<[1], [0], [0], [1], [0, 0, 1, 1], [], []>} : vector<32x128xbf16>, vector<128x32xbf16>, vector<32x32xf32> -> vector<32x32xf32>
    %617 = vector.broadcast %492 : vector<1x32xf32> to vector<32x32xf32>
    %618 = arith.addf %616, %617 : vector<32x32xf32>
    %619 = vector.shape_cast %618 : vector<32x32xf32> to vector<4x8x32xf32>
    %620 = arith.addf %577, %619 : vector<4x8x32xf32>
    %c0_200 = arith.constant 0 : index
    %c0_201 = arith.constant 0 : index
    %621 = vector.load %arg22[%c0_200, %c0_201] : memref<2x32xf32, #tpu.memory_space<vmem>>, vector<1x32xf32>
    %c1_202 = arith.constant 1 : index
    %c0_203 = arith.constant 0 : index
    %622 = vector.load %arg22[%c1_202, %c0_203] : memref<2x32xf32, #tpu.memory_space<vmem>>, vector<1x32xf32>
    %cst_204 = arith.constant dense<0.000000e+00> : vector<4x8xf32>
    %623 = vector.multi_reduction <add>, %620, %cst_204 [2] : vector<4x8x32xf32> to vector<4x8xf32>
    %624 = vector.shape_cast %623 : vector<4x8xf32> to vector<4x8x1xf32>
    %cst_205 = arith.constant 3.200000e+01 : f32
    %625 = vector.broadcast %cst_205 : f32 to vector<4x8x1xf32>
    %626 = arith.divf %624, %625 : vector<4x8x1xf32>
    %627 = vector.broadcast %626 : vector<4x8x1xf32> to vector<4x8x32xf32>
    %628 = arith.subf %620, %627 : vector<4x8x32xf32>
    %629 = arith.mulf %628, %628 : vector<4x8x32xf32>
    %cst_206 = arith.constant dense<0.000000e+00> : vector<4x8xf32>
    %630 = vector.multi_reduction <add>, %629, %cst_206 [2] : vector<4x8x32xf32> to vector<4x8xf32>
    %631 = vector.shape_cast %630 : vector<4x8xf32> to vector<4x8x1xf32>
    %cst_207 = arith.constant 3.200000e+01 : f32
    %632 = vector.broadcast %cst_207 : f32 to vector<4x8x1xf32>
    %633 = arith.divf %631, %632 : vector<4x8x1xf32>
    %634 = vector.broadcast %626 : vector<4x8x1xf32> to vector<4x8x32xf32>
    %635 = arith.subf %620, %634 : vector<4x8x32xf32>
    %cst_208 = arith.constant 9.99999974E-6 : f32
    %636 = vector.broadcast %cst_208 : f32 to vector<4x8x1xf32>
    %637 = arith.addf %633, %636 : vector<4x8x1xf32>
    %638 = math.rsqrt %637 : vector<4x8x1xf32>
    %639 = vector.broadcast %638 : vector<4x8x1xf32> to vector<4x8x32xf32>
    %640 = arith.mulf %635, %639 : vector<4x8x32xf32>
    %641 = vector.shape_cast %621 : vector<1x32xf32> to vector<1x1x32xf32>
    %642 = vector.broadcast %641 : vector<1x1x32xf32> to vector<4x8x32xf32>
    %643 = arith.mulf %640, %642 : vector<4x8x32xf32>
    %644 = vector.shape_cast %622 : vector<1x32xf32> to vector<1x1x32xf32>
    %645 = vector.broadcast %644 : vector<1x1x32xf32> to vector<4x8x32xf32>
    %646 = arith.addf %643, %645 : vector<4x8x32xf32>
    %c0_209 = arith.constant 0 : index
    %c0_210 = arith.constant 0 : index
    %647 = vector.load %arg14[%c0_209, %c0_210] : memref<4x8xf32, #tpu.memory_space<vmem>>, vector<4x8xf32>
    %648 = vector.shape_cast %647 : vector<4x8xf32> to vector<4x8x1xf32>
    %649 = vector.broadcast %648 : vector<4x8x1xf32> to vector<4x8x32xf32>
    %650 = arith.mulf %649, %646 : vector<4x8x32xf32>
    %cst_211 = arith.constant dense<0.000000e+00> : vector<4x32xf32>
    %651 = vector.multi_reduction <add>, %650, %cst_211 [1] : vector<4x8x32xf32> to vector<4x32xf32>
    %652 = arith.truncf %651 : vector<4x32xf32> to vector<4x32xbf16>
    %c0_212 = arith.constant 0 : index
    %c0_213 = arith.constant 0 : index
    %653 = vector.load %arg23[%c0_212, %c0_213] : memref<32x16xbf16, #tpu.memory_space<vmem>>, vector<32x16xbf16>
    %cst_214 = arith.constant dense<0.000000e+00> : vector<4x16xf32>
    %654 = tpu.matmul %652, %653, %cst_214 {dimension_numbers = #tpu.dot_dimension_numbers<[1], [0], [0], [1], [0, 0, 1, 1], [], []>} : vector<4x32xbf16>, vector<32x16xbf16>, vector<4x16xf32> -> vector<4x16xf32>
    %655 = arith.mulf %341, %341 : vector<2x16xf32>
    %cst_215 = arith.constant dense<0.000000e+00> : vector<2xf32>
    %656 = vector.multi_reduction <add>, %655, %cst_215 [1] : vector<2x16xf32> to vector<2xf32>
    %657 = vector.shape_cast %656 : vector<2xf32> to vector<2x1xf32>
    %cst_216 = arith.constant 9.99999996E-13 : f32
    %658 = vector.broadcast %cst_216 : f32 to vector<2x1xf32>
    %659 = arith.addf %657, %658 : vector<2x1xf32>
    %660 = math.rsqrt %659 : vector<2x1xf32>
    %661 = vector.broadcast %660 : vector<2x1xf32> to vector<2x16xf32>
    %662 = arith.mulf %341, %661 : vector<2x16xf32>
    %663 = arith.mulf %654, %654 : vector<4x16xf32>
    %cst_217 = arith.constant dense<0.000000e+00> : vector<4xf32>
    %664 = vector.multi_reduction <add>, %663, %cst_217 [1] : vector<4x16xf32> to vector<4xf32>
    %665 = vector.shape_cast %664 : vector<4xf32> to vector<4x1xf32>
    %cst_218 = arith.constant 9.99999996E-13 : f32
    %666 = vector.broadcast %cst_218 : f32 to vector<4x1xf32>
    %667 = arith.addf %665, %666 : vector<4x1xf32>
    %668 = math.rsqrt %667 : vector<4x1xf32>
    %669 = vector.broadcast %668 : vector<4x1xf32> to vector<4x16xf32>
    %670 = arith.mulf %654, %669 : vector<4x16xf32>
    "tpu.trace_start"() <{level = 10 : i32, message = "be,ce->bc"}> : () -> ()
    %cst_219 = arith.constant dense<0.000000e+00> : vector<2x4xf32>
    %671 = tpu.matmul %662, %670, %cst_219 {dimension_numbers = #tpu.dot_dimension_numbers<[1], [1], [0], [0], [0, 0, 1, 0], [], []>} : vector<2x16xf32>, vector<4x16xf32>, vector<2x4xf32> -> vector<2x4xf32>
    "tpu.trace_stop"() : () -> ()
    %cst_220 = arith.constant 14.2857141 : f32
    %672 = vector.broadcast %cst_220 : f32 to vector<2x4xf32>
    %673 = arith.mulf %671, %672 : vector<2x4xf32>
    %cst_221 = arith.constant 0.000000e+00 : f32
    %674 = vector.broadcast %cst_221 : f32 to vector<8x128xf32>
    %c0_222 = arith.constant 0 : index
    %c0_223 = arith.constant 0 : index
    %675 = vector.load %arg24[%c0_222, %c0_223] : memref<8x128xf32, #tpu.memory_space<vmem>>, vector<8x128xf32>
    tpu.vector_store %arg24[%c0_222, %c0_223], %674 {strides = array<i32>} : memref<8x128xf32, #tpu.memory_space<vmem>>, vector<8x128xf32>,
    %c0_224 = arith.constant 0 : index
    %c0_225 = arith.constant 0 : index
    %676 = vector.load %arg24[%c0_224, %c0_225] : memref<8x128xf32, #tpu.memory_space<vmem>>, vector<2x16xf32>
    tpu.vector_store %arg24[%c0_224, %c0_225], %341 {strides = array<i32>} : memref<8x128xf32, #tpu.memory_space<vmem>>, vector<2x16xf32>,
    %c2 = arith.constant 2 : index
    %c0_226 = arith.constant 0 : index
    %677 = vector.load %arg24[%c2, %c0_226] : memref<8x128xf32, #tpu.memory_space<vmem>>, vector<4x16xf32>
    tpu.vector_store %arg24[%c2, %c0_226], %654 {strides = array<i32>} : memref<8x128xf32, #tpu.memory_space<vmem>>, vector<4x16xf32>,
    %c6 = arith.constant 6 : index
    %c0_227 = arith.constant 0 : index
    %678 = vector.load %arg24[%c6, %c0_227] : memref<8x128xf32, #tpu.memory_space<vmem>>, vector<2x4xf32>
    tpu.vector_store %arg24[%c6, %c0_227], %673 {strides = array<i32>} : memref<8x128xf32, #tpu.memory_space<vmem>>, vector<2x4xf32>,
    return
  }
}

</mosaic_0001>

<bundles_post_ra>
// kernel: clip_forward.1
= control target key start
LH: loop header
LB: loop body
LE: loop exit
PB: predicated region body
PF: predicated region fallthrough
CT: control target
= control target key end

     0   :  { %v8264_v0 = vmov 0   ;;  %vm192_vm0 = vcmask 523264   ;;  %vm270_vm1 = vcmask 261120   ;;  %vm8266_vm2 = vmmov 0   ;;  %s8267_s26 = smov 112   ;;  %s10278_s1 = inlined_call_operand.vmem [shape: bf16[192,32], index: 1, kind: input, shape index: {}]   ;;  %s10279_s0 = inlined_call_operand.vmem [shape: f32[48,192], index: 0, kind: input, shape index: {}]   ;;  %s10280_s2 = inlined_call_operand.vmem [shape: f32[24,32], index: 2, kind: input, shape index: {}]   ;;  %s10281_s3 = inlined_call_operand.vmem [shape: f32[2,32], index: 3, kind: input, shape index: {}]   ;;  %s10282_s7 = inlined_call_operand.vmem [shape: bf16[2,32,96], index: 7, kind: input, shape index: {}]   ;;  %s10283_s4 = inlined_call_operand.vmem [shape: f32[2,6,32], index: 4, kind: input, shape index: {}]   ;;  %s10284_s5 = inlined_call_operand.vmem [shape: f32[2,1,96], index: 5, kind: input, shape index: {}]   ;;  %s10285_s8 = inlined_call_operand.vmem [shape: bf16[2,32,32], index: 8, kind: input, shape index: {}]   ;;  %s10286_s9 = inlined_call_operand.vmem [shape: bf16[2,32,128], index: 9, kind: input, shape index: {}]   ;;  %s10287_s10 = inlined_call_operand.vmem [shape: bf16[2,128,32], index: 10, kind: input, shape index: {}]   ;;  %s10288_s6 = inlined_call_operand.vmem [shape: f32[2,1,128], index: 6, kind: input, shape index: {}]   ;;  %s10289_s13 = inlined_call_operand.vmem [shape: f32[4,8,32], index: 13, kind: input, shape index: {}]   ;;  %s10290_s12 = inlined_call_operand.vmem [shape: bf16[32,16], index: 12, kind: input, shape index: {}]   ;;  %s10291_s18 = inlined_call_operand.vmem [shape: bf16[2,32,96], index: 18, kind: input, shape index: {}]   ;;  %s10292_s11 = inlined_call_operand.vmem [shape: f32[2,32], index: 11, kind: input, shape index: {}]   ;;  %s10293_s15 = inlined_call_operand.vmem [shape: f32[2,6,32], index: 15, kind: input, shape index: {}]   ;;  %s10294_s24 = inlined_call_operand.vmem [shape: f32[8,128], index: 24, kind: output, shape index: {}]   ;;  %s10295_s16 = inlined_call_operand.vmem [shape: f32[2,1,96], index: 16, kind: input, shape index: {}]   ;;  %s10296_s19 = inlined_call_operand.vmem [shape: bf16[2,32,32], index: 19, kind: input, shape index: {}]   ;;  %s10297_s20 = inlined_call_operand.vmem [shape: bf16[2,32,128], index: 20, kind: input, shape index: {}]   ;;  %s10298_s21 = inlined_call_operand.vmem [shape: bf16[2,128,32], index: 21, kind: input, shape index: {}]   ;;  %s10299_s17 = inlined_call_operand.vmem [shape: f32[2,1,128], index: 17, kind: input, shape index: {}]   ;;  %s10300_s14 = inlined_call_operand.vmem [shape: f32[4,8], index: 14, kind: input, shape index: {}]   ;;  %s10301_s23 = inlined_call_operand.vmem [shape: bf16[32,16], index: 23, kind: input, shape index: {}]   ;;  %s10302_s22 = inlined_call_operand.vmem [shape: f32[2,32], index: 22, kind: input, shape index: {}]  }
   0x1   :  { %10316 = sst [smem:[#allocation2_spill]] %s10278_s1  ;;  %202 = vmatprep.subr.bf16.mxu0 %v8264_v0  ;;  %vm666_vm3 = vcmask 130048   ;;  %vm925_vm5 = vcmask 195584   ;;  %vm1077_vm6 = vcmask 1043456   ;;  %vm3201_vm7 = vcmask 1041409  }
   0x2   :  { %10317 = sst [smem:[#allocation3_spill]] %s10279_s0  ;;  %s10325_s27 = sld [smem:[#allocation2_spill]]  ;;  %vm3204_vm8 = vcmask 254976   ;;  %vm6493_vm9 = vcmask 123904   ;;  %vm3940_vm11 = vcmask 64512   ;;  %vm6432_vm12 = vcmask 1042434  }
   0x3   :  { %10318 = sst [smem:[#allocation4_spill]] %s10280_s2  ;;  %s10326_s25 = sld [smem:[#allocation3_spill]]  ;;  %vm6434_vm13 = vcmask 1043459   ;;  %vm6501_vm14 = vcmask 125952   ;;  %vm6588_vm15 = vcmask 25600  }
   0x4   :  { %10319 = sst [smem:[#allocation5_spill]] %s10281_s3  ;;  %s10335_s3 = smov 16  }
   0x5   :  { %10320 = sst [smem:[#allocation6_spill]] %s10282_s7  ;;  %s10328_s28 = sld [smem:[#allocation5_spill]] }
   0x6   :  { %10321 = sst [smem:[#allocation7_spill]] %s10283_s4 }
   0x7   :  { %10322 = sst [smem:[#allocation8_spill]] %s10284_s5  ;;  %s10330_s7 = sld [smem:[#allocation7_spill]] }
   0x8   :  { %10323 = sst [smem:[#allocation9_spill]] %s10285_s8  ;;  %v7838_v1 = vld [vmem:[%s10325_s27] sm:$0xff]   ;;  %v7839_v2 = vld [vmem:[%s10325_s27 + $0x8] sm:$0xff]   ;;  %v7840_v3 = vld [vmem:[%s10325_s27 + $0x10] sm:$0xff]   ;;  %s10329_s8 = sld [smem:[#allocation6_spill]] }
   0x9   :  { %10324 = sst [smem:[#allocation10_spill]] %s10286_s9  ;;  %203 = vmatpush1.bf16.msra.mxu0 %v7838_v1  ;;  %v7841_v4 = vld [vmem:[%s10325_s27 + $0x18] sm:$0xff]   ;;  %v79_v5 = vld [vmem:[%s10326_s25 + $0x8] sm:$0xff]  ;;  %v7842_v8 = vld [vmem:[%s10325_s27 + $0x20] sm:$0xff]   ;;  %s10331_s4 = sld [smem:[#allocation8_spill]] }
   0xa   :  { %204 = vmatprep.subr.bf16.mxu0 %v8264_v0  ;;  %v81_v6 = vld [vmem:[%s10326_s25 + $0x18] sm:$0xff]  ;;  %v7843_v9 = vld [vmem:[%s10325_s27 + $0x28] sm:$0xff]   ;;  %v7844_v10 = vld [vmem:[%s10325_s27 + $0x30] sm:$0xff]   ;;  %s10314_s5 = smov 64   ;;  %s10332_s1 = sld [smem:[#allocation9_spill]] }
   0xb   :  { %v91_v7 = vpack.c.bf16 %v81_v6, %v79_v5  ;;  %v7845_v11 = vld [vmem:[%s10325_s27 + $0x38] sm:$0xff]   ;;  %v7846_v12 = vld [vmem:[%s10325_s27 + $0x40] sm:$0xff]   ;;  %v7847_v13 = vld [vmem:[%s10325_s27 + $0x48] sm:$0xff]   ;;  %s10333_s0 = sld [smem:[#allocation10_spill]] }
   0xc   :  { %v7848_v14 = vld [vmem:[%s10325_s27 + $0x50] sm:$0xff]   ;;  %v7849_v15 = vld [vmem:[%s10325_s27 + $0x58] sm:$0xff]   ;;  %v78_v16 = vld [vmem:[%s10326_s25] sm:$0xff]  ;;  %s10327_s27 = sld [smem:[#allocation4_spill]] }
   0xd   :  { %205 = vmatpush1.bf16.msra.mxu0 %v7839_v2  ;;  %6606 = vmatprep.mubr.msk.bf16.mxu0 %vm192_vm0, %v91_v7  ;;  %v80_v17 = vld [vmem:[%s10326_s25 + $0x10] sm:$0xff]  ;;  %v83_v18 = vld [vmem:[%s10326_s25 + $0x28] sm:$0xff]  ;;  %v85_v19 = vld [vmem:[%s10326_s25 + $0x38] sm:$0xff] }
   0xe   :  { %206 = vmatprep.subr.bf16.mxu0 %v8264_v0  ;;  %v90_v20 = vpack.c.bf16 %v80_v17, %v78_v16  ;;  %v93_v21 = vpack.c.bf16 %v85_v19, %v83_v18  ;;  %v82_v22 = vld [vmem:[%s10326_s25 + $0x20] sm:$0xff]  ;;  %v84_v23 = vld [vmem:[%s10326_s25 + $0x30] sm:$0xff]  ;;  %v87_v24 = vld [vmem:[%s10326_s25 + $0x48] sm:$0xff] }
   0xf   :  { %v89_v25 = vld [vmem:[%s10326_s25 + $0x58] sm:$0xff]  ;;  %v92_v26 = vpack.c.bf16 %v84_v23, %v82_v22  ;;  %v86_v28 = vld [vmem:[%s10326_s25 + $0x40] sm:$0xff]  ;;  %v88_v29 = vld [vmem:[%s10326_s25 + $0x50] sm:$0xff] }
  0x10   :  { %v95_v27 = vpack.c.bf16 %v89_v25, %v87_v24  ;;  %v94_v30 = vpack.c.bf16 %v88_v29, %v86_v28 }
  0x11   :  { %207 = vmatpush1.bf16.msra.mxu0 %v7840_v3 }
  0x12   :  { %208 = vmatprep.subr.bf16.mxu0 %v8264_v0  ;;  %v259_v31 = vld [vmem:[%s10327_s27] sm:$0xff]  ;;  %v260_v33 = vld [vmem:[%s10327_s27 + $0x8] sm:$0xff]  ;;  %v261_v40 = vld [vmem:[%s10327_s27 + $0x10] sm:$0xff]  ;;  %s10312_s27 = smov 16  }
  0x15   :  { %209 = vmatpush1.bf16.msra.mxu0 %v7841_v4 }
  0x16   :  { %210 = vmatprep.subr.bf16.mxu0 %v8264_v0 }
  0x19   :  { %211 = vmatpush1.bf16.msra.mxu0 %v7842_v8 }
  0x1a   :  { %212 = vmatprep.subr.bf16.mxu0 %v8264_v0 }
  0x1d   :  { %213 = vmatpush1.bf16.msra.mxu0 %v7843_v9 }
  0x1e   :  { %214 = vmatprep.subr.bf16.mxu0 %v8264_v0 }
  0x21   :  { %215 = vmatpush1.bf16.msra.mxu0 %v7844_v10 }
  0x22   :  { %216 = vmatprep.subr.bf16.mxu0 %v8264_v0 }
  0x25   :  { %217 = vmatpush1.bf16.msra.mxu0 %v7845_v11 }
  0x26   :  { %218 = vmatprep.subr.bf16.mxu0 %v8264_v0 }
  0x29   :  { %219 = vmatpush1.bf16.msra.mxu0 %v7846_v12 }
  0x2a   :  { %220 = vmatprep.subr.bf16.mxu0 %v8264_v0 }
  0x2d   :  { %221 = vmatpush1.bf16.msra.mxu0 %v7847_v13 }
  0x2e   :  { %222 = vmatprep.subr.bf16.mxu0 %v8264_v0 }
  0x31   :  { %223 = vmatpush1.bf16.msra.mxu0 %v7848_v14 }
  0x32   :  { %224 = vmatprep.subr.bf16.mxu0 %v8264_v0 }
  0x35   :  { %225 = vmatpush1.bf16.msra.mxu0 %v7849_v15 }
  0x38   :  { %235 = vmatmul.mubr.bf16.vlgmr.msra.gmra.mrb[0].mxu0 %v90_v20 }
  0x39   :  { %6607 = vmatprep.mubr.msk.bf16.mxu0 %vm192_vm0, %v93_v21 }
  0x40   :  { %243 = vmatmul.mubr.bf16.gmra.mrb[4].mxu0 %v92_v26 }
  0x41   :  { %6608 = vmatprep.mubr.msk.bf16.mxu0 %vm192_vm0, %v95_v27 }
  0x48   :  { %251 = vmatmul.mubr.bf16.gmra.mrb[8].mxu0 %v94_v30 }
 0x10b   :  { %v236_v32 = vpop.f32.mrb[0].mxu0 }
 0x10c   :  { %v262_v34 = vadd.f32 %v259_v31, %v236_v32  ;;  %v238_v35 = vpop.f32.mrb[1].mxu0 }
 0x10d   :  { %v239_v36 = vpop.f32.mrb[2].mxu0 }
 0x10e   :  { %v263_v37 = vadd.f32 %v260_v33, %v239_v36  ;;  %v241_v38 = vpop.f32.mrb[3].mxu0  ;;  %v271_v39 = vsel %vm270_vm1, %v262_v34, 0.0 }
 0x10f   :  { %272 = vadd.xlane.f32.xlu0 %v271_v39 }
 0x110   :  { %v274_v41 = vsel %vm270_vm1, %v263_v37, 0.0 }
 0x113   :  { %275 = vadd.xlane.f32.xlu0 %v274_v41  ;;  %v244_v42 = vpop.f32.mrb[4].mxu0  ;;  %v6610_v41 = vld [vmem:[%s10328_s28 + $0x1] ss:$0 sm:$0xff] }
 0x114   :  { %v264_v43 = vadd.f32 %v261_v40, %v244_v42  ;;  %v246_v44 = vpop.f32.mrb[5].mxu0 }
 0x115   :  { %v247_v45 = vpop.f32.mrb[6].mxu0 }
 0x116   :  { %v265_v46 = vadd.f32 %v259_v31, %v247_v45  ;;  %v249_v47 = vpop.f32.mrb[7].mxu0  ;;  %v277_v48 = vsel %vm270_vm1, %v264_v43, 0.0 }
 0x117   :  { %278 = vadd.xlane.f32.xlu1 %v277_v48 }
 0x118   :  { %v280_v49 = vsel %vm270_vm1, %v265_v46, 0.0 }
 0x11b   :  { %281 = vadd.xlane.f32.xlu1 %v280_v49  ;;  %v252_v50 = vpop.f32.mrb[8].mxu0 }
 0x11c   :  { %v266_v51 = vadd.f32 %v260_v33, %v252_v50  ;;  %v254_v52 = vpop.f32.mrb[9].mxu0 }
 0x11d   :  { %v255_v53 = vpop.f32.mrb[10].mxu0 }
 0x11e   :  { %v267_v54 = vadd.f32 %v261_v40, %v255_v53  ;;  %v257_v55 = vpop.f32.mrb[11].mxu0  ;;  %v283_v56 = vsel %vm270_vm1, %v266_v51, 0.0 }
 0x11f   :  { %284 = vadd.xlane.f32.xlu0 %v283_v56 }
 0x120   :  { %v286_v57 = vsel %vm270_vm1, %v267_v54, 0.0 }
 0x121   :  { %287 = vadd.xlane.f32.xlu1 %v286_v57 }
 0x19c   :  { %v273_v58 = vpop.xlane.xlu0 %272 }
 0x19d   :  { %v290_v59 = vmul.f32 0.03125, %v273_v58 }
 0x19f   :  { %v296_v60 = vsub.f32 %v262_v34, %v290_v59 }
 0x1a0   :  { %v276_v61 = vpop.xlane.xlu0 %275 }
 0x1a1   :  { %v291_v62 = vmul.f32 0.03125, %v276_v61  ;;  %v302_v63 = vmul.f32 %v296_v60, %v296_v60 }
 0x1a3   :  { %v297_v0 = vsub.f32 %v263_v37, %v291_v62  ;;  %v308_v1 = vsel %vm270_vm1, %v302_v63, 0.0  ;;  %v6609_v37 = vld [vmem:[%s10328_s28] ss:$0 sm:$0xff]  ;;  %s8268_s28 = smov 96  }
 0x1a4   :  { %v279_v2 = vpop.xlane.xlu1 %278  ;;  %309 = vadd.xlane.f32.xlu0 %v308_v1 }
 0x1a5   :  { %v292_v3 = vmul.f32 0.03125, %v279_v2  ;;  %v303_v4 = vmul.f32 %v297_v0, %v297_v0 }
 0x1a7   :  { %v298_v5 = vsub.f32 %v264_v43, %v292_v3  ;;  %v311_v6 = vsel %vm270_vm1, %v303_v4, 0.0 }
 0x1a8   :  { %v282_v7 = vpop.xlane.xlu1 %281  ;;  %312 = vadd.xlane.f32.xlu1 %v311_v6 }
 0x1a9   :  { %v293_v8 = vmul.f32 0.03125, %v282_v7  ;;  %v304_v9 = vmul.f32 %v298_v5, %v298_v5 }
 0x1ab   :  { %v299_v10 = vsub.f32 %v265_v46, %v293_v8  ;;  %v314_v11 = vsel %vm270_vm1, %v304_v9, 0.0 }
 0x1ac   :  { %315 = vadd.xlane.f32.xlu0 %v314_v11  ;;  %v285_v12 = vpop.xlane.xlu0 %284 }
 0x1ad   :  { %v294_v13 = vmul.f32 0.03125, %v285_v12  ;;  %v305_v14 = vmul.f32 %v299_v10, %v299_v10 }
 0x1ae   :  { %v288_v15 = vpop.xlane.xlu1 %287 }
 0x1af   :  { %v300_v16 = vsub.f32 %v266_v51, %v294_v13  ;;  %v295_v17 = vmul.f32 0.03125, %v288_v15  ;;  %v317_v18 = vsel %vm270_vm1, %v305_v14, 0.0 }
 0x1b0   :  { %318 = vadd.xlane.f32.xlu1 %v317_v18 }
 0x1b1   :  { %v301_v19 = vsub.f32 %v267_v54, %v295_v17  ;;  %v306_v20 = vmul.f32 %v300_v16, %v300_v16 }
 0x1b3   :  { %v320_v21 = vsel %vm270_vm1, %v306_v20, 0.0  ;;  %v307_v22 = vmul.f32 %v301_v19, %v301_v19 }
 0x1b4   :  { %321 = vadd.xlane.f32.xlu0 %v320_v21 }
 0x1b5   :  { %v323_v23 = vsel %vm270_vm1, %v307_v22, 0.0 }
 0x1b6   :  { %324 = vadd.xlane.f32.xlu1 %v323_v23 }
 0x231   :  { %v310_v24 = vpop.xlane.xlu0 %309 }
 0x232   :  { %v326_v25 = vmul.f32 0.03125, %v310_v24 }
 0x234   :  { %v332_v26 = vadd.f32 1e-05, %v326_v25 }
 0x235   :  { %v313_v27 = vpop.xlane.xlu1 %312 }
 0x236   :  { %7910 = vrsqrt.f32 %v332_v26  ;;  %v327_v28 = vmul.f32 0.03125, %v313_v27 }
 0x238   :  { %v333_v29 = vadd.f32 1e-05, %v327_v28 }
 0x239   :  { %v316_v30 = vpop.xlane.xlu0 %315 }
 0x23a   :  { %7912 = vrsqrt.f32 %v333_v29  ;;  %v328_v31 = vmul.f32 0.03125, %v316_v30 }
 0x23c   :  { %v334_v32 = vadd.f32 1e-05, %v328_v31 }
 0x23d   :  { %v319_v33 = vpop.xlane.xlu1 %318 }
 0x23e   :  { %7914 = vrsqrt.f32 %v334_v32  ;;  %v329_v34 = vmul.f32 0.03125, %v319_v33 }
 0x240   :  { %v7911_v35 = vpop.eup %7910  ;;  %v335_v36 = vadd.f32 1e-05, %v329_v34 }
 0x241   :  { %v322_v38 = vpop.xlane.xlu0 %321  ;;  %v344_v39 = vmul.f32 %v7911_v35, %v296_v60 }
 0x242   :  { %7916 = vrsqrt.f32 %v335_v36  ;;  %v330_v40 = vmul.f32 0.03125, %v322_v38 }
 0x243   :  { %v325_v42 = vpop.xlane.xlu1 %324  ;;  %v354_v43 = vmul.f32 %v6609_v37, %v344_v39 }
 0x244   :  { %v7913_v44 = vpop.eup %7912  ;;  %v336_v45 = vadd.f32 1e-05, %v330_v40  ;;  %v331_v46 = vmul.f32 0.03125, %v325_v42  ;;  %v7850_v40 = vld [vmem:[%s10329_s8] sm:$0xff]   ;;  %v7851_v42 = vld [vmem:[%s10329_s8 + $0x8] sm:$0xff]  }
 0x245   :  { %v8499_v47 = vadd.f32 %v6610_v41, %v354_v43  ;;  %v345_v48 = vmul.f32 %v7913_v44, %v297_v0 }
 0x246   :  { %7918 = vrsqrt.f32 %v336_v45  ;;  %v337_v49 = vadd.f32 1e-05, %v331_v46 }
 0x247   :  { %v405_v50 = vsel %vm270_vm1, %v8499_v47, 0.0  ;;  %v355_v51 = vmul.f32 %v6609_v37, %v345_v48  ;;  %v370_v48 = vlaneseq }
 0x248   :  { %v7915_v52 = vpop.eup %7914  ;;  %7920 = vrsqrt.f32 %v337_v49  ;;  %406 = vadd.xlane.f32.xlu0 %v405_v50 }
 0x249   :  { %v8503_v53 = vadd.f32 %v6610_v41, %v355_v51  ;;  %v346_v54 = vmul.f32 %v7915_v52, %v298_v5  ;;  %v8570_v52 = vshrl.u32 %v370_v48, 7 }
 0x24b   :  { %v408_v55 = vsel %vm270_vm1, %v8503_v53, 0.0  ;;  %v356_v56 = vmul.f32 %v6609_v37, %v346_v54 }
 0x24c   :  { %v7917_v57 = vpop.eup %7916  ;;  %409 = vadd.xlane.f32.xlu1 %v408_v55 }
 0x24d   :  { %v8507_v58 = vadd.f32 %v6610_v41, %v356_v56  ;;  %v347_v59 = vmul.f32 %v7917_v57, %v299_v10  ;;  %v8573_v57 = vsub.s32 0, %v8570_v52 }
 0x24f   :  { %v411_v60 = vsel %vm270_vm1, %v8507_v58, 0.0  ;;  %v357_v61 = vmul.f32 %v6609_v37, %v347_v59 }
 0x250   :  { %v7919_v62 = vpop.eup %7918  ;;  %412 = vadd.xlane.f32.xlu0 %v411_v60  ;;  %v8578_v60 = vld [vmem:[%s10330_s7] sm:$0x3f] }
 0x251   :  { %v8511_v63 = vadd.f32 %v6610_v41, %v357_v61  ;;  %v348_v0 = vmul.f32 %v7919_v62, %v300_v16 }
 0x252   :  { %v7921_v1 = vpop.eup %7920 }
 0x253   :  { %v414_v2 = vsel %vm270_vm1, %v8511_v63, 0.0  ;;  %v358_v3 = vmul.f32 %v6609_v37, %v348_v0  ;;  %v349_v4 = vmul.f32 %v7921_v1, %v301_v19 }
 0x254   :  { %415 = vadd.xlane.f32.xlu1 %v414_v2  ;;  %v486_v2 = vrot.slane %v8578_v60, %v8573_v57 }
 0x255   :  { %v8515_v5 = vadd.f32 %v6610_v41, %v358_v3  ;;  %v359_v6 = vmul.f32 %v6609_v37, %v349_v4  ;;  %v8584_v3 = vsub.s32 1, %v8570_v52 }
 0x257   :  { %v417_v7 = vsel %vm270_vm1, %v8515_v5, 0.0  ;;  %v8519_v8 = vadd.f32 %v6610_v41, %v359_v6  ;;  %v8265_v41 = vmov 0.0  }
 0x258   :  { %418 = vadd.xlane.f32.xlu0 %v417_v7  ;;  %7095 = vmatprep.subr.bf16.mxu1 %v8265_v41  ;;  %6585 = vst [vmem:[%s10294_s24] sm:$0xff] %v8265_v41 }
 0x259   :  { %v420_v9 = vsel %vm270_vm1, %v8519_v8, 0.0  ;;  %7096 = vmatpush3.bf16.msra.mxu1 %v7850_v40  ;;  %7099 = vmatprep.mubr.msk.bf16.mxu1 %vm8266_vm2, %v8265_v41 }
 0x25a   :  { %421 = vadd.xlane.f32.xlu1 %v420_v9  ;;  %7097 = vmatprep.subr.bf16.mxu1 %v8265_v41 }
 0x25d   :  { %7098 = vmatpush3.bf16.msra.mxu1 %v7851_v42 }
 0x2d5   :  { %v407_v10 = vpop.xlane.xlu0 %406 }
 0x2d6   :  { %v423_v11 = vmul.f32 0.03125, %v407_v10 }
 0x2d8   :  { %v8524_v12 = vsub.f32 %v8499_v47, %v423_v11 }
 0x2d9   :  { %v410_v13 = vpop.xlane.xlu1 %409 }
 0x2da   :  { %v424_v14 = vmul.f32 0.03125, %v410_v13  ;;  %v435_v15 = vmul.f32 %v8524_v12, %v8524_v12 }
 0x2dc   :  { %v8529_v16 = vsub.f32 %v8503_v53, %v424_v14  ;;  %v441_v17 = vsel %vm270_vm1, %v435_v15, 0.0  ;;  %v496_v14 = vrot.slane %v8578_v60, %v8584_v3 }
 0x2dd   :  { %442 = vadd.xlane.f32.xlu0 %v441_v17  ;;  %v413_v18 = vpop.xlane.xlu0 %412 }
 0x2de   :  { %v425_v19 = vmul.f32 0.03125, %v413_v18  ;;  %v436_v20 = vmul.f32 %v8529_v16, %v8529_v16 }
 0x2e0   :  { %v8535_v21 = vsub.f32 %v8507_v58, %v425_v19  ;;  %v444_v22 = vsel %vm270_vm1, %v436_v20, 0.0 }
 0x2e1   :  { %445 = vadd.xlane.f32.xlu1 %v444_v22  ;;  %v416_v23 = vpop.xlane.xlu1 %415 }
 0x2e2   :  { %v426_v24 = vmul.f32 0.03125, %v416_v23  ;;  %v437_v25 = vmul.f32 %v8535_v21, %v8535_v21 }
 0x2e4   :  { %v8541_v26 = vsub.f32 %v8511_v63, %v426_v24  ;;  %v447_v27 = vsel %vm270_vm1, %v437_v25, 0.0 }
 0x2e5   :  { %448 = vadd.xlane.f32.xlu0 %v447_v27  ;;  %v419_v28 = vpop.xlane.xlu0 %418 }
 0x2e6   :  { %v427_v29 = vmul.f32 0.03125, %v419_v28  ;;  %v438_v30 = vmul.f32 %v8541_v26, %v8541_v26 }
 0x2e7   :  { %v422_v31 = vpop.xlane.xlu1 %421 }
 0x2e8   :  { %v8547_v32 = vsub.f32 %v8515_v5, %v427_v29  ;;  %v428_v33 = vmul.f32 0.03125, %v422_v31  ;;  %v450_v34 = vsel %vm270_vm1, %v438_v30, 0.0 }
 0x2e9   :  { %451 = vadd.xlane.f32.xlu1 %v450_v34 }
 0x2ea   :  { %v8551_v35 = vsub.f32 %v8519_v8, %v428_v33  ;;  %v439_v36 = vmul.f32 %v8547_v32, %v8547_v32 }
 0x2ec   :  { %v453_v37 = vsel %vm270_vm1, %v439_v36, 0.0  ;;  %v440_v38 = vmul.f32 %v8551_v35, %v8551_v35 }
 0x2ed   :  { %454 = vadd.xlane.f32.xlu0 %v453_v37 }
 0x2ee   :  { %v456_v39 = vsel %vm270_vm1, %v440_v38, 0.0 }
 0x2ef   :  { %457 = vadd.xlane.f32.xlu1 %v456_v39 }
 0x36a   :  { %v443_v43 = vpop.xlane.xlu0 %442 }
 0x36b   :  { %v459_v44 = vmul.f32 0.03125, %v443_v43 }
 0x36d   :  { %v465_v45 = vadd.f32 1e-05, %v459_v44 }
 0x36e   :  { %v446_v46 = vpop.xlane.xlu1 %445 }
 0x36f   :  { %7922 = vrsqrt.f32 %v465_v45  ;;  %v460_v49 = vmul.f32 0.03125, %v446_v46 }
 0x371   :  { %v466_v50 = vadd.f32 1e-05, %v460_v49 }
 0x372   :  { %v449_v51 = vpop.xlane.xlu0 %448 }
 0x373   :  { %7924 = vrsqrt.f32 %v466_v50  ;;  %v461_v54 = vmul.f32 0.03125, %v449_v51 }
 0x375   :  { %v467_v55 = vadd.f32 1e-05, %v461_v54 }
 0x376   :  { %v452_v56 = vpop.xlane.xlu1 %451 }
 0x377   :  { %7926 = vrsqrt.f32 %v467_v55  ;;  %v462_v59 = vmul.f32 0.03125, %v452_v56 }
 0x379   :  { %v7923_v61 = vpop.eup %7922  ;;  %v468_v62 = vadd.f32 1e-05, %v462_v59 }
 0x37a   :  { %v455_v0 = vpop.xlane.xlu0 %454  ;;  %v477_v1 = vmul.f32 %v7923_v61, %v8524_v12 }
 0x37b   :  { %7928 = vrsqrt.f32 %v468_v62  ;;  %v463_v4 = vmul.f32 0.03125, %v455_v0 }
 0x37c   :  { %v458_v6 = vpop.xlane.xlu1 %457  ;;  %v487_v13 = vmul.f32 %v486_v2, %v477_v1 }
 0x37d   :  { %v7925_v7 = vpop.eup %7924  ;;  %v469_v9 = vadd.f32 1e-05, %v463_v4  ;;  %v464_v10 = vmul.f32 0.03125, %v458_v6 }
 0x37e   :  { %v478_v11 = vmul.f32 %v7925_v7, %v8529_v16  ;;  %v497_v18 = vadd.f32 %v496_v14, %v487_v13 }
 0x37f   :  { %7930 = vrsqrt.f32 %v469_v9  ;;  %v470_v12 = vadd.f32 1e-05, %v464_v10 }
 0x380   :  { %v488_v15 = vmul.f32 %v486_v2, %v478_v11 }
 0x381   :  { %v7927_v17 = vpop.eup %7926  ;;  %7932 = vrsqrt.f32 %v470_v12 }
 0x382   :  { %v498_v19 = vadd.f32 %v496_v14, %v488_v15  ;;  %v479_v20 = vmul.f32 %v7927_v17, %v8535_v21 }
 0x384   :  { %v503_v22 = vpack.c.bf16 %v498_v19, %v497_v18  ;;  %v489_v16 = vmul.f32 %v486_v2, %v479_v20 }
 0x385   :  { %v7929_v23 = vpop.eup %7928 }
 0x386   :  { %7100 = vmatmul.mubr.msk.bf16.vlgmr.msra.gmra.mrb[0].mxu1 %vm270_vm1, %v503_v22  ;;  %v480_v24 = vmul.f32 %v7929_v23, %v8541_v26  ;;  %v499_v28 = vadd.f32 %v496_v14, %v489_v16 }
 0x387   :  { %7103 = vmatprep.mubr.msk.bf16.mxu1 %vm8266_vm2, %v8265_v41 }
 0x388   :  { %v490_v25 = vmul.f32 %v486_v2, %v480_v24 }
 0x389   :  { %v7931_v27 = vpop.eup %7930 }
 0x38a   :  { %v500_v29 = vadd.f32 %v496_v14, %v490_v25  ;;  %v481_v30 = vmul.f32 %v7931_v27, %v8547_v32  ;;  %v6611_v32 = vld [vmem:[%s10331_s4] ss:$0 sm:$0xff] }
 0x38b   :  { %v7933_v31 = vpop.eup %7932 }
 0x38c   :  { %v504_v33 = vpack.c.bf16 %v500_v29, %v499_v28  ;;  %v482_v21 = vmul.f32 %v7933_v31, %v8551_v35  ;;  %v491_v34 = vmul.f32 %v486_v2, %v481_v30 }
 0x38e   :  { %7104 = vmatmul.mubr.msk.bf16.gmra.mrb[4].mxu1 %vm270_vm1, %v504_v33  ;;  %v492_v36 = vmul.f32 %v486_v2, %v482_v21  ;;  %v501_v37 = vadd.f32 %v496_v14, %v491_v34 }
 0x38f   :  { %7107 = vmatprep.mubr.msk.bf16.mxu1 %vm8266_vm2, %v8265_v41 }
 0x390   :  { %v502_v26 = vadd.f32 %v496_v14, %v492_v36 }
 0x392   :  { %v505_v38 = vpack.c.bf16 %v502_v26, %v501_v37 }
 0x396   :  { %7108 = vmatmul.mubr.msk.bf16.gmra.mrb[8].mxu1 %vm270_vm1, %v505_v38 }
 0x459   :  { %v567_v39 = vpop.f32.mrb[0].mxu1 }
 0x45a   :  { %v568_v40 = vadd.f32 %v6611_v32, %v567_v39  ;;  %v7101_v42 = vpop.f32.mrb[1].mxu1 }
 0x45b   :  { %v570_v35 = vpop.f32.mrb[2].mxu1 }
 0x45c   :  { %v571_v43 = vadd.f32 %v6611_v32, %v570_v35  ;;  %v7102_v44 = vpop.f32.mrb[3].mxu1  ;;  %v590_v45 = vmul.f32 0.25, %v568_v40 }
 0x45e   :  { %v591_v46 = vmul.f32 0.25, %v571_v43  ;;  %v7708_v49 = vpack.i.bf16 %v571_v43, %v568_v40  ;;  %v8603_v50 = vpack.c.bf16 %v571_v43, %v568_v40 }
 0x460   :  { %v620_v51 = vpack.c.bf16 %v591_v46, %v590_v45  ;;  %7709 = vrot.lane.b32.xlu0 %v7708_v49, %s8267_s26  ;;  %v7718_v54 = vpack.i.bf16 %v591_v46, %v590_v45 }
 0x461   :  { %v575_v55 = vpop.f32.mrb[4].mxu1 }
 0x462   :  { %v7105_v56 = vpop.f32.mrb[5].mxu1  ;;  %7115 = vmatprep.mubr.msk.bf16.mxu1 %vm666_vm3, %v620_v51  ;;  %v576_v61 = vadd.f32 %v6611_v32, %v575_v55 }
 0x463   :  { %v578_v59 = vpop.f32.mrb[6].mxu1 }
 0x464   :  { %v579_v62 = vadd.f32 %v6611_v32, %v578_v59  ;;  %662 = vrot.lane.b32.xlu0 %v8603_v50, %s8268_s28  ;;  %v7106_v0 = vpop.f32.mrb[7].mxu1  ;;  %v8616_v17 = vpack.c.bf16 %v576_v61, %v576_v61  ;;  %v592_v21 = vmul.f32 0.25, %v576_v61 }
 0x466   :  { %v7713_v1 = vpack.i.bf16 %v579_v62, %v576_v61  ;;  %v593_v9 = vmul.f32 0.25, %v579_v62 }
 0x468   :  { %7714 = vrot.lane.b32.xlu1 %v7713_v1, %s8267_s26 }
 0x469   :  { %v583_v2 = vpop.f32.mrb[8].mxu1 }
 0x46a   :  { %v584_v4 = vadd.f32 %v6611_v32, %v583_v2  ;;  %v7109_v6 = vpop.f32.mrb[9].mxu1 }
 0x46b   :  { %v586_v7 = vpop.f32.mrb[10].mxu1 }
 0x46c   :  { %v594_v10 = vmul.f32 0.25, %v584_v4  ;;  %642 = vrot.lane.b32.xlu1 %v584_v4, %s8267_s26  ;;  %v7110_v11 = vpop.f32.mrb[11].mxu1  ;;  %v8611_v13 = vpack.c.bf16 %v584_v4, %v579_v62  ;;  %v587_v12 = vadd.f32 %v6611_v32, %v586_v7  ;;  %v621_v32 = vpack.c.bf16 %v592_v21, %v592_v21 }
 0x46d   :  { %v8668_v11 = vand.u32 127, %v370_v48 }
 0x46e   :  { %v622_v14 = vpack.c.bf16 %v594_v10, %v593_v9  ;;  %729 = vrot.lane.b32.xlu0 %v8611_v13, %s8268_s28  ;;  %v7723_v15 = vpack.i.bf16 %v594_v10, %v593_v9  ;;  %v8620_v18 = vpack.c.bf16 %v587_v12, %v587_v12  ;;  %v595_v38 = vmul.f32 0.25, %v587_v12 }
 0x46f   :  { %vm372_vm4 = vcmp.lt.s32.totalorder %v8668_v11, 17  ;;  %vm3320_vm10 = vcmp.le.s32.totalorder %v8668_v11, %v8570_v52 }
 0x470   :  { %644 = vrot.lane.b32.xlu1 %v587_v12, %s8267_s26  ;;  %v623_v35 = vpack.c.bf16 %v595_v38, %v595_v38 }
 0x474   :  { %664 = vrot.lane.b32.xlu1 %v8616_v17, %s8268_s28 }
 0x478   :  { %731 = vrot.lane.b32.xlu1 %v8620_v18, %s8268_s28 }
 0x4d2   :  { %v7710_v19 = vpop.permute.xlu0 %7709 }
 0x4d3   :  { %v7712_v20 = vunpack.i.h.bf16 %v7710_v19  ;;  %v7711_v22 = vunpack.i.l.bf16 %v7710_v19 }
 0x4d5   :  { %v8624_v23 = vpack.c.bf16 %v7712_v20, %v7711_v22 }
 0x4d6   :  { %v663_v24 = vpop.permute.xlu0 %662 }
 0x4d7   :  { %7676 = vmatprep.subr.msk.bf16.mxu1 %vm666_vm3, %v663_v24  ;;  %795 = vrot.lane.b32.xlu0 %v8624_v23, %s8268_s28  ;;  %v674_v16 = vsel %vm666_vm3, %v663_v24, 0 }
 0x4d8   :  { %7112 = vmatpush3.bf16.xpose.msra.mxu1 %v674_v16 }
 0x4da   :  { %v7715_v25 = vpop.permute.xlu1 %7714 }
 0x4db   :  { %v7716_v27 = vunpack.i.l.bf16 %v7715_v25  ;;  %v7717_v28 = vunpack.i.h.bf16 %v7715_v25 }
 0x4dd   :  { %v8630_v29 = vpack.c.bf16 %v7716_v27, %v7716_v27 }
 0x4de   :  { %v643_v30 = vpop.permute.xlu1 %642 }
 0x4df   :  { %v8632_v31 = vpack.c.bf16 %v643_v30, %v7717_v28  ;;  %797 = vrot.lane.b32.xlu1 %v8630_v29, %s8268_s28 }
 0x4e0   :  { %v730_v37 = vpop.permute.xlu0 %729 }
 0x4e1   :  { %861 = vrot.lane.b32.xlu0 %v8632_v31, %s8268_s28  ;;  %v740_v39 = vsel %vm666_vm3, %v730_v37, 0 }
 0x4e2   :  { %v645_v33 = vpop.permute.xlu1 %644 }
 0x4e3   :  { %7719 = vrot.lane.b32.xlu1 %v7718_v54, %s8267_s26  ;;  %v8639_v34 = vpack.c.bf16 %v645_v33, %v645_v33 }
 0x4e5   :  { %606 = vrot.lane.b32.xlu0 %v592_v21, %s8267_s26 }
 0x4e6   :  { %v665_v36 = vpop.permute.xlu1 %664 }
 0x4e7   :  { %7677 = vmatprep.subr.msk.bf16.mxu1 %vm666_vm3, %v665_v36  ;;  %863 = vrot.lane.b32.xlu1 %v8639_v34, %s8268_s28  ;;  %v677_v26 = vsel %vm666_vm3, %v665_v36, 0 }
 0x4e8   :  { %7114 = vmatpush3.bf16.xpose.msra.mxu1 %v677_v26 }
 0x4e9   :  { %7678 = vmatprep.subr.msk.bf16.mxu1 %vm666_vm3, %v730_v37  ;;  %7724 = vrot.lane.b32.xlu0 %v7723_v15, %s8267_s26 }
 0x4ea   :  { %v732_v40 = vpop.permute.xlu1 %731 }
 0x4eb   :  { %612 = vrot.lane.b32.xlu1 %v595_v38, %s8267_s26  ;;  %v743_v42 = vsel %vm666_vm3, %v732_v40, 0 }
 0x4ef   :  { %7116 = vmatmul.mubr.msk.bf16.vlgmr.msra.gmra.mrb[12].mxu1 %vm666_vm3, %v621_v32 }
 0x4f0   :  { %7120 = vmatpush3.bf16.xpose.msra.mxu1 %v740_v39  ;;  %7123 = vmatprep.mubr.msk.bf16.mxu1 %vm666_vm3, %v622_v14  ;;  %v8269_v14 = vmov -1e+09  }
 0x4f1   :  { %7679 = vmatprep.subr.msk.bf16.mxu1 %vm666_vm3, %v732_v40  ;;  %v8672_v12 = vsel %vm372_vm4, 0.0, %v8269_v14 }
 0x4f8   :  { %7122 = vmatpush3.bf16.xpose.msra.mxu1 %v743_v42 }
 0x4ff   :  { %7124 = vmatmul.mubr.msk.bf16.vlgmr.msra.gmra.mrb[16].mxu1 %vm666_vm3, %v623_v35 }
 0x549   :  { %v796_v43 = vpop.permute.xlu0 %795 }
 0x54a   :  { %7680 = vmatprep.subr.msk.bf16.mxu1 %vm666_vm3, %v796_v43  ;;  %v806_v44 = vsel %vm666_vm3, %v796_v43, 0 }
 0x54b   :  { %7128 = vmatpush3.bf16.xpose.msra.mxu1 %v806_v44 }
 0x551   :  { %v798_v45 = vpop.permute.xlu1 %797 }
 0x552   :  { %7681 = vmatprep.subr.msk.bf16.mxu1 %vm666_vm3, %v798_v45  ;;  %v809_v46 = vsel %vm666_vm3, %v798_v45, 0 }
 0x553   :  { %v862_v49 = vpop.permute.xlu0 %861  ;;  %7130 = vmatpush3.bf16.xpose.msra.mxu1 %v809_v46 }
 0x554   :  { %7682 = vmatprep.subr.msk.bf16.mxu0 %vm666_vm3, %v862_v49  ;;  %v872_v51 = vsel %vm666_vm3, %v862_v49, 0 }
 0x555   :  { %7136 = vmatpush3.bf16.xpose.msra.mxu0 %v872_v51  ;;  %v7720_v54 = vpop.permute.xlu1 %7719 }
 0x556   :  { %v7722_v55 = vunpack.i.h.bf16 %v7720_v54  ;;  %v7721_v56 = vunpack.i.l.bf16 %v7720_v54 }
 0x557   :  { %v607_v59 = vpop.permute.xlu0 %606 }
 0x558   :  { %v624_v61 = vpack.c.bf16 %v7722_v55, %v7721_v56  ;;  %v625_v62 = vpack.c.bf16 %v607_v59, %v607_v59 }
 0x559   :  { %v864_v0 = vpop.permute.xlu1 %863 }
 0x55a   :  { %7131 = vmatprep.mubr.msk.bf16.mxu1 %vm666_vm3, %v624_v61  ;;  %7683 = vmatprep.subr.msk.bf16.mxu0 %vm666_vm3, %v864_v0  ;;  %v875_v6 = vsel %vm666_vm3, %v864_v0, 0 }
 0x55b   :  { %v7725_v1 = vpop.permute.xlu0 %7724  ;;  %7132 = vmatmul.mubr.msk.bf16.vlgmr.msra.gmra.mrb[20].mxu1 %vm666_vm3, %v625_v62 }
 0x55c   :  { %v7727_v2 = vunpack.i.h.bf16 %v7725_v1  ;;  %v7726_v4 = vunpack.i.l.bf16 %v7725_v1 }
 0x55d   :  { %7138 = vmatpush3.bf16.xpose.msra.mxu0 %v875_v6  ;;  %v613_v9 = vpop.permute.xlu1 %612 }
 0x55e   :  { %v626_v7 = vpack.c.bf16 %v7727_v2, %v7726_v4  ;;  %v627_v10 = vpack.c.bf16 %v613_v9, %v613_v9 }
 0x560   :  { %7139 = vmatprep.mubr.msk.bf16.mxu0 %vm666_vm3, %v626_v7 }
 0x564   :  { %7140 = vmatmul.mubr.msk.bf16.vlgmr.msra.gmra.mrb[12].mxu0 %vm666_vm3, %v627_v10 }
 0x5c2   :  { %v7117_v15 = vpop.f32.mrb[12].mxu1 }
 0x5c3   :  { %v722_v19 = vadd.f32 %v7117_v15, %v8672_v12  ;;  %v713_v20 = vpop.f32.mrb[13].mxu1 }
 0x5c4   :  { %v7118_v22 = vpop.f32.mrb[14].mxu1  ;;  %v714_v24 = vadd.f32 %v713_v20, %v8672_v12 }
 0x5c5   :  { %v716_v16 = vpop.f32.mrb[15].mxu1  ;;  %v932_v25 = vsel %vm925_vm5, %v722_v19, -inf }
 0x5c6   :  { %v8678_v48 = vadd.f32 %v716_v16, %v8672_v12  ;;  %933 = vmax.xlane.f32.xlu0 %v932_v25  ;;  %v926_v28 = vsel %vm925_vm5, %v714_v24, -inf }
 0x5c8   :  { %v929_v27 = vsel %vm925_vm5, %v8678_v48, -inf }
 0x5c9   :  { %930 = vmax.xlane.f32.xlu1 %v929_v27 }
 0x5ca   :  { %927 = vmax.xlane.f32.xlu0 %v926_v28 }
 0x5d2   :  { %v7125_v30 = vpop.f32.mrb[16].mxu1 }
 0x5d3   :  { %v779_v33 = vpop.f32.mrb[17].mxu1  ;;  %v8704_v51 = vadd.f32 %v7125_v30, %v8672_v12 }
 0x5d4   :  { %v8684_v21 = vadd.f32 %v779_v33, %v8672_v12  ;;  %v7126_v36 = vpop.f32.mrb[18].mxu1 }
 0x5d5   :  { %v782_v26 = vpop.f32.mrb[19].mxu1  ;;  %v941_v0 = vsel %vm925_vm5, %v8704_v51, -inf }
 0x5d6   :  { %v783_v37 = vadd.f32 %v782_v26, %v8672_v12  ;;  %v935_v38 = vsel %vm925_vm5, %v8684_v21, -inf }
 0x5d7   :  { %936 = vmax.xlane.f32.xlu0 %v935_v38 }
 0x5d8   :  { %v938_v32 = vsel %vm925_vm5, %v783_v37, -inf }
 0x5d9   :  { %939 = vmax.xlane.f32.xlu1 %v938_v32 }
 0x62e   :  { %v7133_v39 = vpop.f32.mrb[20].mxu1 }
 0x62f   :  { %v8691_v40 = vadd.f32 %v7133_v39, %v8672_v12  ;;  %v845_v42 = vpop.f32.mrb[21].mxu1 }
 0x630   :  { %v8694_v35 = vadd.f32 %v845_v42, %v8672_v12  ;;  %v7134_v43 = vpop.f32.mrb[22].mxu1 }
 0x631   :  { %v848_v44 = vpop.f32.mrb[23].mxu1  ;;  %v950_v45 = vsel %vm925_vm5, %v8691_v40, -inf }
 0x632   :  { %v8699_v46 = vadd.f32 %v848_v44, %v8672_v12  ;;  %951 = vmax.xlane.f32.xlu1 %v950_v45  ;;  %v944_v49 = vsel %vm925_vm5, %v8694_v35, -inf }
 0x633   :  { %945 = vmax.xlane.f32.xlu0 %v944_v49 }
 0x634   :  { %v947_v54 = vsel %vm925_vm5, %v8699_v46, -inf }
 0x637   :  { %948 = vmax.xlane.f32.xlu0 %v947_v54  ;;  %v7141_v55 = vpop.f32.mrb[12].mxu0 }
 0x638   :  { %v911_v56 = vpop.f32.mrb[13].mxu0  ;;  %v8714_v1 = vadd.f32 %v7141_v55, %v8672_v12 }
 0x639   :  { %v8709_v59 = vadd.f32 %v911_v56, %v8672_v12  ;;  %v7142_v61 = vpop.f32.mrb[14].mxu0 }
 0x63a   :  { %v914_v62 = vpop.f32.mrb[15].mxu0  ;;  %v959_v7 = vsel %vm925_vm5, %v8714_v1, -inf }
 0x63b   :  { %v8717_v2 = vadd.f32 %v914_v62, %v8672_v12  ;;  %942 = vmax.xlane.f32.xlu0 %v941_v0  ;;  %v953_v4 = vsel %vm925_vm5, %v8709_v59, -inf }
 0x63c   :  { %954 = vmax.xlane.f32.xlu1 %v953_v4 }
 0x63d   :  { %v956_v6 = vsel %vm925_vm5, %v8717_v2, -inf }
 0x63f   :  { %957 = vmax.xlane.f32.xlu0 %v956_v6 }
 0x640   :  { %960 = vmax.xlane.f32.xlu1 %v959_v7 }
 0x651   :  { %1068 = vrot.lane.b32.xlu1 %v8616_v17, %s10314_s5 }
 0x653   :  { %v934_v9 = vpop.xlane.xlu0 %933 }
 0x654   :  { %v964_v10 = vsub.f32 %v722_v19, %v934_v9 }
 0x655   :  { %1066 = vrot.lane.b32.xlu0 %v8603_v50, %s10314_s5  ;;  %1191 = vrot.lane.b32.xlu1 %v8624_v23, %s10314_s5 }
 0x656   :  { %v978_v20 = vmul.f32 1.442695, %v964_v10  ;;  %v931_v22 = vpop.xlane.xlu1 %930 }
 0x657   :  { %v928_v15 = vpop.xlane.xlu0 %927  ;;  %v963_v16 = vsub.f32 %v8678_v48, %v931_v22 }
 0x658   :  { %v962_v17 = vsub.f32 %v714_v24, %v928_v15  ;;  %7934 = vpow2.f32 %v978_v20 }
 0x659   :  { %1193 = vrot.lane.b32.xlu0 %v8630_v29, %s10314_s5  ;;  %1129 = vrot.lane.b32.xlu1 %v8611_v13, %s10314_s5  ;;  %v976_v25 = vmul.f32 1.442695, %v963_v16 }
 0x65a   :  { %v974_v50 = vmul.f32 1.442695, %v962_v17 }
 0x65c   :  { %7936 = vpow2.f32 %v974_v50 }
 0x65d   :  { %1131 = vrot.lane.b32.xlu1 %v8620_v18, %s10314_s5  ;;  %7938 = vpow2.f32 %v976_v25 }
 0x662   :  { %v8738_v13 = vpop.eup %7934 }
 0x663   :  { %v1004_v18 = vsel %vm925_vm5, %v8738_v13, 0.0 }
 0x664   :  { %v937_v36 = vpop.xlane.xlu0 %936 }
 0x665   :  { %v965_v44 = vsub.f32 %v8684_v21, %v937_v36 }
 0x666   :  { %v940_v23 = vpop.xlane.xlu1 %939  ;;  %v8742_v19 = vpop.eup %7936 }
 0x667   :  { %v966_v29 = vsub.f32 %v783_v37, %v940_v23  ;;  %v998_v24 = vsel %vm925_vm5, %v8742_v19, 0.0  ;;  %v8746_v48 = vpop.eup %7938  ;;  %v980_v55 = vmul.f32 1.442695, %v965_v44 }
 0x668   :  { %v1001_v28 = vsel %vm925_vm5, %v8746_v48, 0.0 }
 0x669   :  { %v982_v27 = vmul.f32 1.442695, %v966_v29 }
 0x66b   :  { %7940 = vpow2.f32 %v982_v27 }
 0x675   :  { %v8750_v30 = vpop.eup %7940 }
 0x676   :  { %v1010_v33 = vsel %vm925_vm5, %v8750_v30, 0.0 }
 0x678   :  { %1005 = vadd.xlane.f32.xlu0 %v1004_v18 }
 0x67c   :  { %999 = vadd.xlane.f32.xlu0 %v998_v24 }
 0x681   :  { %1002 = vadd.xlane.f32.xlu1 %v1001_v28 }
 0x685   :  { %1011 = vadd.xlane.f32.xlu1 %v1010_v33 }
 0x6bf   :  { %v952_v26 = vpop.xlane.xlu1 %951 }
 0x6c0   :  { %v970_v37 = vsub.f32 %v8691_v40, %v952_v26  ;;  %v946_v38 = vpop.xlane.xlu0 %945 }
 0x6c1   :  { %v968_v32 = vsub.f32 %v8694_v35, %v946_v38 }
 0x6c2   :  { %v990_v39 = vmul.f32 1.442695, %v970_v37 }
 0x6c3   :  { %v986_v42 = vmul.f32 1.442695, %v968_v32 }
 0x6c4   :  { %7942 = vpow2.f32 %v990_v39  ;;  %v949_v43 = vpop.xlane.xlu0 %948 }
 0x6c5   :  { %7944 = vpow2.f32 %v986_v42  ;;  %v969_v56 = vsub.f32 %v8699_v46, %v949_v43 }
 0x6c7   :  { %v988_v6 = vmul.f32 1.442695, %v969_v56 }
 0x6c8   :  { %v943_v45 = vpop.xlane.xlu0 %942 }
 0x6c9   :  { %v967_v49 = vsub.f32 %v8704_v51, %v943_v45  ;;  %v955_v54 = vpop.xlane.xlu1 %954 }
 0x6ca   :  { %v971_v40 = vsub.f32 %v8709_v59, %v955_v54 }
 0x6cb   :  { %v984_v61 = vmul.f32 1.442695, %v967_v49 }
 0x6cc   :  { %v958_v62 = vpop.xlane.xlu0 %957  ;;  %v992_v46 = vmul.f32 1.442695, %v971_v40 }
 0x6cd   :  { %7946 = vpow2.f32 %v984_v61  ;;  %v961_v35 = vpop.xlane.xlu1 %960  ;;  %v972_v21 = vsub.f32 %v8717_v2, %v958_v62 }
 0x6ce   :  { %v8760_v0 = vpop.eup %7942  ;;  %v973_v4 = vsub.f32 %v8714_v1, %v961_v35  ;;  %7948 = vpow2.f32 %v980_v55 }
 0x6cf   :  { %v1022_v51 = vsel %vm925_vm5, %v8760_v0, 0.0  ;;  %v8766_v7 = vpop.eup %7944  ;;  %v994_v1 = vmul.f32 1.442695, %v972_v21 }
 0x6d0   :  { %v996_v9 = vmul.f32 1.442695, %v973_v4  ;;  %v1067_v10 = vpop.permute.xlu0 %1066  ;;  %1023 = vadd.xlane.f32.xlu1 %v1022_v51  ;;  %v1016_v2 = vsel %vm925_vm5, %v8766_v7, 0.0 }
 0x6d1   :  { %7143 = vmatprep.subr.bf16.mxu0 %v1067_v10  ;;  %v1069_v59 = vpop.permute.xlu1 %1068 }
 0x6d2   :  { %7950 = vpow2.f32 %v996_v9  ;;  %7144 = vmatpush3.bf16.msra.mxu0 %v1067_v10  ;;  %v1079_v20 = vsel %vm1077_vm6, %v1069_v59, 0 }
 0x6d3   :  { %7952 = vpow2.f32 %v988_v6  ;;  %7684 = vmatprep.subr.msk.bf16.mxu0 %vm1077_vm6, %v1069_v59 }
 0x6d4   :  { %7954 = vpow2.f32 %v992_v46  ;;  %1017 = vadd.xlane.f32.xlu1 %v1016_v2  ;;  %v1194_v22 = vpop.permute.xlu0 %1193 }
 0x6d5   :  { %v1192_v15 = vpop.permute.xlu1 %1191  ;;  %7956 = vpow2.f32 %v994_v1  ;;  %v1203_v25 = vsel %vm1077_vm6, %v1194_v22, 0 }
 0x6d6   :  { %7146 = vmatpush3.bf16.msra.mxu0 %v1079_v20  ;;  %7159 = vmatprep.subr.bf16.mxu1 %v1192_v15 }
 0x6d7   :  { %v8772_v17 = vpop.eup %7946  ;;  %7160 = vmatpush3.bf16.msra.mxu1 %v1192_v15 }
 0x6d8   :  { %7686 = vmatprep.subr.msk.bf16.mxu1 %vm1077_vm6, %v1194_v22  ;;  %v1013_v50 = vsel %vm925_vm5, %v8772_v17, 0.0  ;;  %v8777_v16 = vpop.eup %7948 }
 0x6d9   :  { %1014 = vadd.xlane.f32.xlu0 %v1013_v50  ;;  %v1130_v23 = vpop.permute.xlu1 %1129  ;;  %v1007_v27 = vsel %vm925_vm5, %v8777_v16, 0.0 }
 0x6da   :  { %7151 = vmatprep.subr.bf16.mxu0 %v1130_v23 }
 0x6db   :  { %7162 = vmatpush3.bf16.msra.mxu1 %v1203_v25 }
 0x6dc   :  { %v8780_v29 = vpop.eup %7950  ;;  %7175 = vmatprep.subr.bf16.mxu1 %v8265_v41 }
 0x6dd   :  { %v8785_v18 = vpop.eup %7952  ;;  %1008 = vadd.xlane.f32.xlu0 %v1007_v27  ;;  %v1031_v24 = vsel %vm925_vm5, %v8780_v29, 0.0  ;;  %v1132_v32 = vpop.permute.xlu1 %1131 }
 0x6de   :  { %v8789_v28 = vpop.eup %7954  ;;  %1032 = vadd.xlane.f32.xlu1 %v1031_v24  ;;  %v1019_v33 = vsel %vm925_vm5, %v8785_v18, 0.0 }
 0x6df   :  { %v8793_v36 = vpop.eup %7956  ;;  %v1025_v26 = vsel %vm925_vm5, %v8789_v28, 0.0 }
 0x6e0   :  { %v1028_v37 = vsel %vm925_vm5, %v8793_v36, 0.0 }
 0x6e1   :  { %1020 = vadd.xlane.f32.xlu0 %v1019_v33 }
 0x6e2   :  { %1026 = vadd.xlane.f32.xlu1 %v1025_v26 }
 0x6e5   :  { %1029 = vadd.xlane.f32.xlu0 %v1028_v37 }
 0x6f3   :  { %1255 = vrot.lane.b32.xlu1 %v8639_v34, %s10314_s5 }
 0x6fb   :  { %1253 = vrot.lane.b32.xlu0 %v8632_v31, %s10314_s5  ;;  %v1141_v31 = vsel %vm1077_vm6, %v1132_v32, 0 }
 0x705   :  { %v1006_v38 = vpop.xlane.xlu0 %1005 }
 0x706   :  { %7958 = vrcp.f32 %v1006_v38 }
 0x709   :  { %v1000_v39 = vpop.xlane.xlu0 %999 }
 0x70a   :  { %7960 = vrcp.f32 %v1000_v39 }
 0x70e   :  { %v1003_v42 = vpop.xlane.xlu1 %1002 }
 0x70f   :  { %7962 = vrcp.f32 %v1003_v42 }
 0x710   :  { %v7959_v43 = vpop.eup %7958 }
 0x711   :  { %v1048_v49 = vmul.f32 %v7959_v43, %v8738_v13  ;;  %v7853_v43 = vld [vmem:[%s10332_s1 + $0x8] sm:$0xff]  }
 0x712   :  { %v1012_v61 = vpop.xlane.xlu1 %1011 }
 0x713   :  { %v1059_v56 = vpack.c.bf16 %v1048_v49, %v1048_v49 }
 0x714   :  { %v7961_v44 = vpop.eup %7960 }
 0x715   :  { %v1046_v54 = vmul.f32 %v7961_v44, %v8742_v19 }
 0x719   :  { %v7963_v45 = vpop.eup %7962 }
 0x71a   :  { %v1047_v55 = vmul.f32 %v7963_v45, %v8746_v48 }
 0x71c   :  { %v1058_v34 = vpack.c.bf16 %v1047_v55, %v1046_v54 }
 0x71e   :  { %7147 = vmatprep.mubr.msk.bf16.mxu0 %vm925_vm5, %v1058_v34 }
 0x71f   :  { %7148 = vmatmul.mubr.msk.bf16.vlgmr.msra.gmra.mrb[16].mxu0 %vm925_vm5, %v1059_v56 }
 0x720   :  { %7152 = vmatpush3.bf16.msra.mxu0 %v1130_v23 }
 0x721   :  { %7685 = vmatprep.subr.msk.bf16.mxu0 %vm1077_vm6, %v1132_v32 }
 0x724   :  { %7154 = vmatpush3.bf16.msra.mxu0 %v1141_v31 }
 0x75d   :  { %v1024_v40 = vpop.xlane.xlu1 %1023 }
 0x761   :  { %v1018_v13 = vpop.xlane.xlu1 %1017 }
 0x766   :  { %v1015_v62 = vpop.xlane.xlu0 %1014 }
 0x767   :  { %7964 = vrcp.f32 %v1015_v62 }
 0x768   :  { %7966 = vrcp.f32 %v1012_v61 }
 0x76a   :  { %v1009_v19 = vpop.xlane.xlu0 %1008 }
 0x76b   :  { %7968 = vrcp.f32 %v1009_v19  ;;  %v1033_v48 = vpop.xlane.xlu1 %1032 }
 0x76c   :  { %7970 = vrcp.f32 %v1024_v40 }
 0x76d   :  { %7972 = vrcp.f32 %v1018_v13 }
 0x76e   :  { %v1021_v35 = vpop.xlane.xlu0 %1020 }
 0x76f   :  { %7974 = vrcp.f32 %v1021_v35  ;;  %v1027_v4 = vpop.xlane.xlu1 %1026 }
 0x770   :  { %7976 = vrcp.f32 %v1033_v48 }
 0x771   :  { %7978 = vrcp.f32 %v1027_v4  ;;  %v7965_v6 = vpop.eup %7964 }
 0x772   :  { %v1030_v21 = vpop.xlane.xlu0 %1029  ;;  %v7967_v51 = vpop.eup %7966  ;;  %v1051_v9 = vmul.f32 %v7965_v6, %v8772_v17 }
 0x773   :  { %7980 = vrcp.f32 %v1030_v21  ;;  %v1050_v2 = vmul.f32 %v7967_v51, %v8750_v30 }
 0x774   :  { %v1061_v50 = vpack.c.bf16 %v1051_v9, %v1051_v9 }
 0x775   :  { %v7969_v46 = vpop.eup %7968 }
 0x776   :  { %v7971_v10 = vpop.eup %7970  ;;  %v1254_v59 = vpop.permute.xlu0 %1253  ;;  %v1049_v1 = vmul.f32 %v7969_v46, %v8777_v16 }
 0x777   :  { %v7973_v15 = vpop.eup %7972  ;;  %7167 = vmatprep.subr.bf16.mxu0 %v1254_v59  ;;  %v1054_v23 = vmul.f32 %v7971_v10, %v8760_v0  ;;  %v1256_v16 = vpop.permute.xlu1 %1255 }
 0x778   :  { %v1060_v20 = vpack.c.bf16 %v1050_v2, %v1049_v1  ;;  %v1052_v27 = vmul.f32 %v7973_v15, %v8766_v7 }
 0x779   :  { %v7975_v22 = vpop.eup %7974  ;;  %v1063_v26 = vpack.c.bf16 %v1054_v23, %v1054_v23 }
 0x77a   :  { %v7977_v25 = vpop.eup %7976  ;;  %7155 = vmatprep.mubr.msk.bf16.mxu0 %vm925_vm5, %v1060_v20  ;;  %v1053_v17 = vmul.f32 %v7975_v22, %v8785_v18  ;;  %v1265_v18 = vsel %vm1077_vm6, %v1256_v16, 0 }
 0x77b   :  { %v7979_v24 = vpop.eup %7978  ;;  %7156 = vmatmul.mubr.msk.bf16.vlgmr.msra.gmra.mrb[20].mxu0 %vm925_vm5, %v1061_v50  ;;  %v1057_v37 = vmul.f32 %v7977_v25, %v8780_v29  ;;  %v7852_v29 = vld [vmem:[%s10332_s1] sm:$0xff]  }
 0x77c   :  { %7168 = vmatpush3.bf16.msra.mxu0 %v1254_v59  ;;  %v1062_v30 = vpack.c.bf16 %v1053_v17, %v1052_v27  ;;  %v1055_v0 = vmul.f32 %v7979_v24, %v8789_v28  ;;  %v8859_v24 = vsub.s32 4, %v8570_v52 }
 0x77d   :  { %v7981_v33 = vpop.eup %7980  ;;  %7687 = vmatprep.subr.msk.bf16.mxu0 %vm1077_vm6, %v1256_v16  ;;  %v1065_v32 = vpack.c.bf16 %v1057_v37, %v1057_v37 }
 0x77e   :  { %7163 = vmatprep.mubr.msk.bf16.mxu1 %vm925_vm5, %v1062_v30  ;;  %v1056_v7 = vmul.f32 %v7981_v33, %v8793_v36  ;;  %v1351_v16 = vrot.slane %v8578_v60, %v8859_v24 }
 0x77f   :  { %7164 = vmatmul.mubr.msk.bf16.vlgmr.msra.gmra.mrb[24].mxu1 %vm925_vm5, %v1063_v26 }
 0x780   :  { %7170 = vmatpush3.bf16.msra.mxu0 %v1265_v18  ;;  %v1064_v38 = vpack.c.bf16 %v1056_v7, %v1055_v0  ;;  %7179 = vmatprep.mubr.msk.bf16.mxu1 %vm8266_vm2, %v8265_v41 }
 0x781   :  { %7191 = vmatprep.subr.bf16.mxu0 %v8265_v41  ;;  %7176 = vmatpush3.bf16.msra.mxu1 %v7852_v29 }
 0x782   :  { %7171 = vmatprep.mubr.msk.bf16.mxu0 %vm925_vm5, %v1064_v38  ;;  %7177 = vmatprep.subr.bf16.mxu1 %v8265_v41 }
 0x783   :  { %7172 = vmatmul.mubr.msk.bf16.vlgmr.msra.gmra.mrb[24].mxu0 %vm925_vm5, %v1065_v32 }
 0x784   :  { %7195 = vmatprep.mubr.msk.bf16.mxu0 %vm8266_vm2, %v8265_v41 }
 0x785   :  { %7178 = vmatpush3.bf16.msra.mxu1 %v7853_v43 }
 0x786   :  { %7207 = vmatprep.subr.bf16.mxu1 %v8265_v41 }
 0x7f2   :  { %v7149_v28 = vpop.f32.mrb[16].mxu0 }
 0x7f3   :  { %v1115_v36 = vpop.f32.mrb[17].mxu0 }
 0x7f4   :  { %v7150_v39 = vpop.f32.mrb[18].mxu0 }
 0x7f5   :  { %v1118_v42 = vpop.f32.mrb[19].mxu0 }
 0x84e   :  { %v7157_v44 = vpop.f32.mrb[20].mxu0 }
 0x84f   :  { %v1177_v45 = vpop.f32.mrb[21].mxu0 }
 0x850   :  { %v7158_v49 = vpop.f32.mrb[22].mxu0 }
 0x851   :  { %v1180_v54 = vpop.f32.mrb[23].mxu0 }
 0x852   :  { %v7165_v55 = vpop.f32.mrb[24].mxu1 }
 0x853   :  { %v1239_v34 = vpop.f32.mrb[25].mxu1 }
 0x854   :  { %v7166_v56 = vpop.f32.mrb[26].mxu1 }
 0x855   :  { %v1242_v31 = vpop.f32.mrb[27].mxu1 }
 0x856   :  { %v7728_v61 = vpack.i.bf16 %v1242_v31, %v1239_v34  ;;  %v7173_v40 = vpop.f32.mrb[24].mxu0 }
 0x857   :  { %v1301_v62 = vpop.f32.mrb[25].mxu0 }
 0x858   :  { %v7733_v13 = vpack.i.bf16 %v1301_v62, %v7165_v55  ;;  %7729 = vrot.lane.b32.xlu0 %v7728_v61, %s10312_s27  ;;  %v7174_v19 = vpop.f32.mrb[26].mxu0 }
 0x859   :  { %v1304_v48 = vpop.f32.mrb[27].mxu0 }
 0x85a   :  { %v7738_v35 = vpack.i.bf16 %v7173_v40, %v1304_v48  ;;  %7734 = vrot.lane.b32.xlu1 %v7733_v13, %s10312_s27 }
 0x85c   :  { %7739 = vrot.lane.b32.xlu0 %v7738_v35, %s10312_s27 }
 0x8ca   :  { %v7730_v4 = vpop.permute.xlu0 %7729 }
 0x8cb   :  { %v7732_v6 = vunpack.i.h.bf16 %v7730_v4  ;;  %v7731_v21 = vunpack.i.l.bf16 %v7730_v4 }
 0x8cc   :  { %v7735_v51 = vpop.permute.xlu1 %7734 }
 0x8cd   :  { %v1340_v46 = vsel %vm666_vm3, %v1118_v42, %v7732_v6  ;;  %v1339_v9 = vsel %vm666_vm3, %v1115_v36, %v7731_v21  ;;  %v7737_v10 = vunpack.i.h.bf16 %v7735_v51  ;;  %v7736_v59 = vunpack.i.l.bf16 %v7735_v51 }
 0x8ce   :  { %v1345_v1 = vpack.c.bf16 %v1340_v46, %v1339_v9  ;;  %v7740_v2 = vpop.permute.xlu0 %7739 }
 0x8cf   :  { %v1342_v15 = vsel %vm666_vm3, %v1177_v45, %v7737_v10  ;;  %v1341_v20 = vsel %vm666_vm3, %v7149_v28, %v7736_v59  ;;  %v7742_v22 = vunpack.i.h.bf16 %v7740_v2  ;;  %v7741_v50 = vunpack.i.l.bf16 %v7740_v2 }
 0x8d0   :  { %7180 = vmatmul.mubr.msk.bf16.vlgmr.msra.gmra.mrb[28].mxu1 %vm270_vm1, %v1345_v1  ;;  %v1346_v23 = vpack.c.bf16 %v1342_v15, %v1341_v20 }
 0x8d1   :  { %v1344_v25 = vsel %vm666_vm3, %v7157_v44, %v7742_v22  ;;  %v1343_v27 = vsel %vm666_vm3, %v1180_v54, %v7741_v50  ;;  %7183 = vmatprep.mubr.msk.bf16.mxu1 %vm8266_vm2, %v8265_v41 }
 0x8d2   :  { %v1347_v17 = vpack.c.bf16 %v1344_v25, %v1343_v27 }
 0x8d8   :  { %7184 = vmatmul.mubr.msk.bf16.gmra.mrb[32].mxu1 %vm270_vm1, %v1346_v23 }
 0x8d9   :  { %7187 = vmatprep.mubr.msk.bf16.mxu1 %vm8266_vm2, %v8265_v41 }
 0x8e0   :  { %7188 = vmatmul.mubr.msk.bf16.gmra.mrb[36].mxu1 %vm270_vm1, %v1347_v17 }
 0x8e1   :  { %7223 = vmatprep.mubr.msk.bf16.mxu1 %vm8266_vm2, %v8265_v41 }
 0x9a3   :  { %v1407_v30 = vpop.f32.mrb[28].mxu1 }
 0x9a4   :  { %v1408_v33 = vadd.f32 %v1407_v30, %v1351_v16  ;;  %v7181_v26 = vpop.f32.mrb[29].mxu1 }
 0x9a5   :  { %v1410_v37 = vpop.f32.mrb[30].mxu1 }
 0x9a6   :  { %v8864_v0 = vadd.f32 %v1408_v33, %v8499_v47  ;;  %v1411_v7 = vadd.f32 %v1410_v37, %v1351_v16  ;;  %v7182_v18 = vpop.f32.mrb[31].mxu1 }
 0x9a7   :  { %v7855_v18 = vld [vmem:[%s10333_s0 + $0x8] sm:$0xff]  }
 0x9a8   :  { %v8867_v38 = vadd.f32 %v1411_v7, %v8503_v53  ;;  %v1436_v32 = vsel %vm270_vm1, %v8864_v0, 0.0  ;;  %v7854_v7 = vld [vmem:[%s10333_s0] sm:$0xff]  }
 0x9a9   :  { %1437 = vadd.xlane.f32.xlu1 %v1436_v32  ;;  %7192 = vmatpush3.bf16.msra.mxu0 %v7854_v7 }
 0x9aa   :  { %v1439_v29 = vsel %vm270_vm1, %v8867_v38, 0.0  ;;  %7193 = vmatprep.subr.bf16.mxu0 %v8265_v41 }
 0x9ab   :  { %v1415_v60 = vpop.f32.mrb[32].mxu1  ;;  %1440 = vadd.xlane.f32.xlu0 %v1439_v29 }
 0x9ac   :  { %v1416_v28 = vadd.f32 %v1415_v60, %v1351_v16  ;;  %v7185_v36 = vpop.f32.mrb[33].mxu1 }
 0x9ad   :  { %v1418_v39 = vpop.f32.mrb[34].mxu1  ;;  %7194 = vmatpush3.bf16.msra.mxu0 %v7855_v18 }
 0x9ae   :  { %v8874_v47 = vadd.f32 %v1416_v28, %v8507_v58  ;;  %v1419_v42 = vadd.f32 %v1418_v39, %v1351_v16  ;;  %v7186_v43 = vpop.f32.mrb[35].mxu1  ;;  %7235 = vmatprep.subr.bf16.mxu0 %v8265_v41 }
 0x9b0   :  { %v8877_v53 = vadd.f32 %v1419_v42, %v8511_v63  ;;  %v1442_v44 = vsel %vm270_vm1, %v8874_v47, 0.0 }
 0x9b1   :  { %1443 = vadd.xlane.f32.xlu0 %v1442_v44  ;;  %v8934_v44 = vsub.s32 2, %v8570_v52 }
 0x9b2   :  { %v1445_v55 = vsel %vm270_vm1, %v8877_v53, 0.0 }
 0x9b3   :  { %v1423_v45 = vpop.f32.mrb[36].mxu1 }
 0x9b4   :  { %v1424_v49 = vadd.f32 %v1423_v45, %v1351_v16  ;;  %v7189_v54 = vpop.f32.mrb[37].mxu1 }
 0x9b5   :  { %1446 = vadd.xlane.f32.xlu0 %v1445_v55  ;;  %v1426_v34 = vpop.f32.mrb[38].mxu1  ;;  %v8939_v55 = vld [vmem:[%s10330_s7] sm:$0x3f] }
 0x9b6   :  { %v8884_v58 = vadd.f32 %v1424_v49, %v8515_v5  ;;  %v1427_v56 = vadd.f32 %v1426_v34, %v1351_v16  ;;  %v7190_v31 = vpop.f32.mrb[39].mxu1  ;;  %v1517_v34 = vrot.slane %v8939_v55, %v8934_v44 }
 0x9b8   :  { %v8887_v63 = vadd.f32 %v1427_v56, %v8519_v8  ;;  %v1448_v61 = vsel %vm270_vm1, %v8884_v58, 0.0  ;;  %v8944_v56 = vsub.s32 3, %v8570_v52 }
 0x9b9   :  { %1449 = vadd.xlane.f32.xlu1 %v1448_v61 }
 0x9ba   :  { %v1451_v40 = vsel %vm270_vm1, %v8887_v63, 0.0 }
 0x9bb   :  { %1452 = vadd.xlane.f32.xlu0 %v1451_v40 }
 0xa36   :  { %v1438_v62 = vpop.xlane.xlu1 %1437 }
 0xa37   :  { %v1454_v13 = vmul.f32 0.03125, %v1438_v62 }
 0xa38   :  { %v1441_v19 = vpop.xlane.xlu0 %1440 }
 0xa39   :  { %v1460_v48 = vsub.f32 %v8864_v0, %v1454_v13  ;;  %v1455_v5 = vmul.f32 0.03125, %v1441_v19 }
 0xa3b   :  { %v8895_v35 = vsub.f32 %v8867_v38, %v1455_v5  ;;  %v1466_v4 = vmul.f32 %v1460_v48, %v1460_v48 }
 0xa3d   :  { %v1472_v8 = vsel %vm270_vm1, %v1466_v4, 0.0  ;;  %v1467_v6 = vmul.f32 %v8895_v35, %v8895_v35 }
 0xa3e   :  { %v1444_v21 = vpop.xlane.xlu0 %1443  ;;  %1473 = vadd.xlane.f32.xlu1 %v1472_v8 }
 0xa3f   :  { %v1456_v51 = vmul.f32 0.03125, %v1444_v21  ;;  %v1475_v46 = vsel %vm270_vm1, %v1467_v6, 0.0  ;;  %v1527_v6 = vrot.slane %v8939_v55, %v8944_v56 }
 0xa40   :  { %1476 = vadd.xlane.f32.xlu0 %v1475_v46 }
 0xa41   :  { %v8902_v9 = vsub.f32 %v8874_v47, %v1456_v51 }
 0xa42   :  { %v1447_v10 = vpop.xlane.xlu0 %1446 }
 0xa43   :  { %v1457_v59 = vmul.f32 0.03125, %v1447_v10  ;;  %v1468_v1 = vmul.f32 %v8902_v9, %v8902_v9 }
 0xa45   :  { %v8907_v2 = vsub.f32 %v8877_v53, %v1457_v59  ;;  %v1478_v15 = vsel %vm270_vm1, %v1468_v1, 0.0 }
 0xa46   :  { %1479 = vadd.xlane.f32.xlu1 %v1478_v15  ;;  %v1450_v20 = vpop.xlane.xlu1 %1449 }
 0xa47   :  { %v1458_v22 = vmul.f32 0.03125, %v1450_v20  ;;  %v1469_v50 = vmul.f32 %v8907_v2, %v8907_v2 }
 0xa48   :  { %v1453_v23 = vpop.xlane.xlu0 %1452 }
 0xa49   :  { %v8913_v25 = vsub.f32 %v8884_v58, %v1458_v22  ;;  %v1459_v27 = vmul.f32 0.03125, %v1453_v23  ;;  %v1481_v17 = vsel %vm270_vm1, %v1469_v50, 0.0 }
 0xa4a   :  { %1482 = vadd.xlane.f32.xlu0 %v1481_v17 }
 0xa4b   :  { %v8917_v16 = vsub.f32 %v8887_v63, %v1459_v27  ;;  %v1470_v30 = vmul.f32 %v8913_v25, %v8913_v25 }
 0xa4d   :  { %v1484_v33 = vsel %vm270_vm1, %v1470_v30, 0.0  ;;  %v1471_v26 = vmul.f32 %v8917_v16, %v8917_v16 }
 0xa4e   :  { %1485 = vadd.xlane.f32.xlu1 %v1484_v33 }
 0xa4f   :  { %v1487_v37 = vsel %vm270_vm1, %v1471_v26, 0.0 }
 0xa50   :  { %1488 = vadd.xlane.f32.xlu0 %v1487_v37 }
 0xacb   :  { %v1474_v32 = vpop.xlane.xlu1 %1473 }
 0xacc   :  { %v1490_v29 = vmul.f32 0.03125, %v1474_v32 }
 0xacd   :  { %v1477_v60 = vpop.xlane.xlu0 %1476 }
 0xace   :  { %v1496_v28 = vadd.f32 1e-05, %v1490_v29  ;;  %v1491_v36 = vmul.f32 0.03125, %v1477_v60  ;;  %v7858_v60 = vld [vmem:[%s10287_s10 + $0x10] sm:$0xff]  }
 0xad0   :  { %7982 = vrsqrt.f32 %v1496_v28  ;;  %v1497_v39 = vadd.f32 1e-05, %v1491_v36  ;;  %v7859_v28 = vld [vmem:[%s10287_s10 + $0x18] sm:$0xff]   ;;  %v7860_v36 = vld [vmem:[%s10287_s10 + $0x20] sm:$0xff]  }
 0xad2   :  { %7984 = vrsqrt.f32 %v1497_v39  ;;  %v7861_v39 = vld [vmem:[%s10287_s10 + $0x28] sm:$0xff]  }
 0xad3   :  { %v1480_v42 = vpop.xlane.xlu1 %1479 }
 0xad4   :  { %v1492_v43 = vmul.f32 0.03125, %v1480_v42  ;;  %v7862_v42 = vld [vmem:[%s10287_s10 + $0x30] sm:$0xff]  }
 0xad6   :  { %v1498_v45 = vadd.f32 1e-05, %v1492_v43  ;;  %v7863_v43 = vld [vmem:[%s10287_s10 + $0x38] sm:$0xff]  }
 0xad7   :  { %v1483_v49 = vpop.xlane.xlu0 %1482 }
 0xad8   :  { %7986 = vrsqrt.f32 %v1498_v45  ;;  %v1493_v54 = vmul.f32 0.03125, %v1483_v49  ;;  %v6638_v45 = vld [vmem:[%s10288_s6] ss:$0 sm:$0xff] }
 0xada   :  { %v7983_v31 = vpop.eup %7982  ;;  %v1499_v61 = vadd.f32 1e-05, %v1493_v54 }
 0xadb   :  { %v1508_v40 = vmul.f32 %v7983_v31, %v1460_v48  ;;  %v1486_v62 = vpop.xlane.xlu1 %1485 }
 0xadc   :  { %v7985_v13 = vpop.eup %7984  ;;  %7988 = vrsqrt.f32 %v1499_v61  ;;  %v1494_v19 = vmul.f32 0.03125, %v1486_v62 }
 0xadd   :  { %v1518_v5 = vmul.f32 %v1517_v34, %v1508_v40  ;;  %v1509_v4 = vmul.f32 %v7985_v13, %v8895_v35  ;;  %v1489_v8 = vpop.xlane.xlu0 %1488 }
 0xade   :  { %v1500_v21 = vadd.f32 1e-05, %v1494_v19  ;;  %v1495_v51 = vmul.f32 0.03125, %v1489_v8 }
 0xadf   :  { %v1519_v46 = vmul.f32 %v1517_v34, %v1509_v4  ;;  %v1528_v59 = vadd.f32 %v1527_v6, %v1518_v5 }
 0xae0   :  { %7990 = vrsqrt.f32 %v1500_v21  ;;  %v1501_v10 = vadd.f32 1e-05, %v1495_v51 }
 0xae1   :  { %v1529_v1 = vadd.f32 %v1527_v6, %v1519_v46 }
 0xae2   :  { %v7987_v15 = vpop.eup %7986  ;;  %7992 = vrsqrt.f32 %v1501_v10 }
 0xae3   :  { %v1534_v48 = vpack.c.bf16 %v1529_v1, %v1528_v59  ;;  %v1510_v20 = vmul.f32 %v7987_v15, %v8902_v9 }
 0xae5   :  { %7196 = vmatmul.mubr.msk.bf16.vlgmr.msra.gmra.mrb[28].mxu0 %vm270_vm1, %v1534_v48  ;;  %v1520_v50 = vmul.f32 %v1517_v34, %v1510_v20 }
 0xae6   :  { %v7989_v22 = vpop.eup %7988  ;;  %7199 = vmatprep.mubr.msk.bf16.mxu0 %vm8266_vm2, %v8265_v41 }
 0xae7   :  { %v1511_v35 = vmul.f32 %v7989_v22, %v8907_v2  ;;  %v1530_v17 = vadd.f32 %v1527_v6, %v1520_v50 }
 0xae9   :  { %v1521_v23 = vmul.f32 %v1517_v34, %v1511_v35 }
 0xaea   :  { %v7991_v27 = vpop.eup %7990 }
 0xaeb   :  { %v1531_v30 = vadd.f32 %v1527_v6, %v1521_v23  ;;  %v1512_v33 = vmul.f32 %v7991_v27, %v8913_v25  ;;  %v7856_v25 = vld [vmem:[%s10287_s10] sm:$0xff]  }
 0xaec   :  { %v7993_v26 = vpop.eup %7992  ;;  %7208 = vmatpush3.bf16.msra.mxu1 %v7856_v25 }
 0xaed   :  { %v1535_v37 = vpack.c.bf16 %v1531_v30, %v1530_v17  ;;  %v1513_v7 = vmul.f32 %v7993_v26, %v8917_v16  ;;  %v1522_v9 = vmul.f32 %v1517_v34, %v1512_v33  ;;  %7209 = vmatprep.subr.bf16.mxu1 %v8265_v41  ;;  %v7857_v16 = vld [vmem:[%s10287_s10 + $0x8] sm:$0xff]  }
 0xaef   :  { %7200 = vmatmul.mubr.msk.bf16.gmra.mrb[32].mxu0 %vm270_vm1, %v1535_v37  ;;  %v1523_v18 = vmul.f32 %v1517_v34, %v1513_v7  ;;  %v1532_v2 = vadd.f32 %v1527_v6, %v1522_v9 }
 0xaf0   :  { %7203 = vmatprep.mubr.msk.bf16.mxu0 %vm8266_vm2, %v8265_v41  ;;  %7210 = vmatpush3.bf16.msra.mxu1 %v7857_v16 }
 0xaf1   :  { %v1533_v32 = vadd.f32 %v1527_v6, %v1523_v18  ;;  %7211 = vmatprep.subr.bf16.mxu1 %v8265_v41 }
 0xaf3   :  { %v1536_v29 = vpack.c.bf16 %v1533_v32, %v1532_v2 }
 0xaf4   :  { %7212 = vmatpush3.bf16.msra.mxu1 %v7858_v60 }
 0xaf5   :  { %7213 = vmatprep.subr.bf16.mxu1 %v8265_v41 }
 0xaf7   :  { %7204 = vmatmul.mubr.msk.bf16.gmra.mrb[36].mxu0 %vm270_vm1, %v1536_v29 }
 0xaf8   :  { %7239 = vmatprep.mubr.msk.bf16.mxu0 %vm8266_vm2, %v8265_v41  ;;  %7214 = vmatpush3.bf16.msra.mxu1 %v7859_v28 }
 0xaf9   :  { %7215 = vmatprep.subr.bf16.mxu1 %v8265_v41 }
 0xafc   :  { %7216 = vmatpush3.bf16.msra.mxu1 %v7860_v36 }
 0xafd   :  { %7217 = vmatprep.subr.bf16.mxu1 %v8265_v41 }
 0xb00   :  { %7218 = vmatpush3.bf16.msra.mxu1 %v7861_v39 }
 0xb01   :  { %7219 = vmatprep.subr.bf16.mxu1 %v8265_v41 }
 0xb04   :  { %7220 = vmatpush3.bf16.msra.mxu1 %v7862_v42 }
 0xb05   :  { %7221 = vmatprep.subr.bf16.mxu1 %v8265_v41 }
 0xb08   :  { %7222 = vmatpush3.bf16.msra.mxu1 %v7863_v43 }
 0xbb8   :  { %v1598_v49 = vpop.f32.mrb[28].mxu0 }
 0xbb9   :  { %v1599_v54 = vadd.f32 %v6638_v45, %v1598_v49  ;;  %v7197_v34 = vpop.f32.mrb[29].mxu0 }
 0xbba   :  { %v1601_v31 = vpop.f32.mrb[30].mxu0 }
 0xbbb   :  { %v6644_v61 = vmul.f32 -1.702, %v1599_v54  ;;  %v1602_v40 = vadd.f32 %v6638_v45, %v1601_v31  ;;  %v7198_v62 = vpop.f32.mrb[31].mxu0 }
 0xbbd   :  { %v1633_v13 = vmul.f32 1.442695, %v6644_v61  ;;  %v6645_v19 = vmul.f32 -1.702, %v1602_v40 }
 0xbbf   :  { %7994 = vpow2.f32 %v1633_v13  ;;  %v1635_v5 = vmul.f32 1.442695, %v6645_v19 }
 0xbc1   :  { %7996 = vpow2.f32 %v1635_v5 }
 0xbc2   :  { %v1606_v4 = vpop.f32.mrb[32].mxu0 }
 0xbc3   :  { %v1607_v8 = vadd.f32 %v6638_v45, %v1606_v4  ;;  %v7201_v6 = vpop.f32.mrb[33].mxu0  ;;  %v9001_v4 = vsub.s32 5, %v8570_v52 }
 0xbc4   :  { %v1609_v21 = vpop.f32.mrb[34].mxu0 }
 0xbc5   :  { %v6646_v51 = vmul.f32 -1.702, %v1607_v8  ;;  %v1610_v46 = vadd.f32 %v6638_v45, %v1609_v21  ;;  %v7202_v10 = vpop.f32.mrb[35].mxu0  ;;  %v1675_v6 = vrot.slane %v8939_v55, %v9001_v4 }
 0xbc7   :  { %v1637_v59 = vmul.f32 1.442695, %v6646_v51  ;;  %v6647_v1 = vmul.f32 -1.702, %v1610_v46 }
 0xbc9   :  { %v7995_v15 = vpop.eup %7994  ;;  %7998 = vpow2.f32 %v1637_v59  ;;  %v1639_v48 = vmul.f32 1.442695, %v6647_v1 }
 0xbca   :  { %v1645_v20 = vadd.f32 1.0, %v7995_v15  ;;  %v1614_v22 = vpop.f32.mrb[36].mxu0 }
 0xbcb   :  { %v7997_v35 = vpop.eup %7996  ;;  %8000 = vpow2.f32 %v1639_v48  ;;  %v1615_v50 = vadd.f32 %v6638_v45, %v1614_v22  ;;  %v7205_v23 = vpop.f32.mrb[37].mxu0 }
 0xbcc   :  { %8002 = vrcp.f32 %v1645_v20  ;;  %v1646_v27 = vadd.f32 1.0, %v7997_v35  ;;  %v1617_v17 = vpop.f32.mrb[38].mxu0 }
 0xbcd   :  { %v6648_v30 = vmul.f32 -1.702, %v1615_v50  ;;  %v1618_v33 = vadd.f32 %v6638_v45, %v1617_v17  ;;  %v7206_v26 = vpop.f32.mrb[39].mxu0 }
 0xbce   :  { %8004 = vrcp.f32 %v1646_v27 }
 0xbcf   :  { %v1641_v37 = vmul.f32 1.442695, %v6648_v30  ;;  %v6649_v7 = vmul.f32 -1.702, %v1618_v33 }
 0xbd1   :  { %8006 = vpow2.f32 %v1641_v37  ;;  %v1643_v9 = vmul.f32 1.442695, %v6649_v7 }
 0xbd3   :  { %v7999_v18 = vpop.eup %7998  ;;  %8008 = vpow2.f32 %v1643_v9 }
 0xbd4   :  { %v1647_v32 = vadd.f32 1.0, %v7999_v18 }
 0xbd5   :  { %v8001_v2 = vpop.eup %8000 }
 0xbd6   :  { %v8003_v29 = vpop.eup %8002  ;;  %8010 = vrcp.f32 %v1647_v32  ;;  %v1648_v25 = vadd.f32 1.0, %v8001_v2 }
 0xbd7   :  { %v1663_v60 = vmul.f32 %v8003_v29, %v1599_v54 }
 0xbd8   :  { %v8005_v16 = vpop.eup %8004  ;;  %8012 = vrcp.f32 %v1648_v25 }
 0xbd9   :  { %v1664_v28 = vmul.f32 %v8005_v16, %v1602_v40 }
 0xbdb   :  { %v8007_v36 = vpop.eup %8006  ;;  %v1669_v39 = vpack.c.bf16 %v1664_v28, %v1663_v60 }
 0xbdc   :  { %v1649_v42 = vadd.f32 1.0, %v8007_v36 }
 0xbdd   :  { %v8009_v43 = vpop.eup %8008  ;;  %7224 = vmatmul.mubr.bf16.vlgmr.msra.gmra.mrb[40].mxu1 %v1669_v39 }
 0xbde   :  { %8014 = vrcp.f32 %v1649_v42  ;;  %v1650_v45 = vadd.f32 1.0, %v8009_v43  ;;  %7227 = vmatprep.mubr.msk.bf16.mxu1 %vm8266_vm2, %v8265_v41 }
 0xbe0   :  { %v8011_v49 = vpop.eup %8010  ;;  %8016 = vrcp.f32 %v1650_v45 }
 0xbe1   :  { %v1665_v31 = vmul.f32 %v8011_v49, %v1607_v8 }
 0xbe2   :  { %v8013_v34 = vpop.eup %8012 }
 0xbe3   :  { %v1666_v61 = vmul.f32 %v8013_v34, %v1610_v46 }
 0xbe5   :  { %v1670_v62 = vpack.c.bf16 %v1666_v61, %v1665_v31 }
 0xbe7   :  { %7228 = vmatmul.mubr.bf16.gmra.mrb[44].mxu1 %v1670_v62 }
 0xbe8   :  { %v8015_v13 = vpop.eup %8014  ;;  %7231 = vmatprep.mubr.msk.bf16.mxu1 %vm8266_vm2, %v8265_v41 }
 0xbe9   :  { %v1667_v40 = vmul.f32 %v8015_v13, %v1615_v50 }
 0xbea   :  { %v8017_v54 = vpop.eup %8016 }
 0xbeb   :  { %v1668_v19 = vmul.f32 %v8017_v54, %v1618_v33 }
 0xbed   :  { %v1671_v5 = vpack.c.bf16 %v1668_v19, %v1667_v40 }
 0xbef   :  { %7232 = vmatmul.mubr.bf16.gmra.mrb[48].mxu1 %v1671_v5 }
 0xcb0   :  { %v1758_v21 = vpop.f32.mrb[40].mxu1 }
 0xcb1   :  { %v1759_v8 = vadd.f32 %v1758_v21, %v1675_v6  ;;  %v7225_v51 = vpop.f32.mrb[41].mxu1 }
 0xcb2   :  { %v1761_v46 = vpop.f32.mrb[42].mxu1 }
 0xcb3   :  { %v9006_v10 = vadd.f32 %v1759_v8, %v8864_v0  ;;  %v1762_v59 = vadd.f32 %v1761_v46, %v1675_v6  ;;  %v7226_v1 = vpop.f32.mrb[43].mxu1 }
 0xcb5   :  { %v9009_v15 = vadd.f32 %v1762_v59, %v8867_v38  ;;  %v1825_v48 = vsel %vm270_vm1, %v9006_v10, 0.0 }
 0xcb6   :  { %1826 = vadd.xlane.f32.xlu1 %v1825_v48 }
 0xcb7   :  { %v1828_v20 = vsel %vm270_vm1, %v9009_v15, 0.0 }
 0xcb8   :  { %1829 = vadd.xlane.f32.xlu0 %v1828_v20  ;;  %v7864_v20 = vld [vmem:[%s10329_s8 + $0x10] sm:$0xff]  }
 0xcb9   :  { %7236 = vmatpush3.bf16.msra.mxu0 %v7864_v20 }
 0xcba   :  { %v1766_v55 = vpop.f32.mrb[44].mxu1  ;;  %7237 = vmatprep.subr.bf16.mxu0 %v8265_v41 }
 0xcbb   :  { %v1767_v22 = vadd.f32 %v1766_v55, %v1675_v6  ;;  %v7229_v35 = vpop.f32.mrb[45].mxu1  ;;  %v7865_v55 = vld [vmem:[%s10329_s8 + $0x18] sm:$0xff]  }
 0xcbc   :  { %v1769_v50 = vpop.f32.mrb[46].mxu1 }
 0xcbd   :  { %v9016_v0 = vadd.f32 %v1767_v22, %v8874_v47  ;;  %v1770_v23 = vadd.f32 %v1769_v50, %v1675_v6  ;;  %v7230_v27 = vpop.f32.mrb[47].mxu1  ;;  %7238 = vmatpush3.bf16.msra.mxu0 %v7865_v55 }
 0xcbf   :  { %v9019_v38 = vadd.f32 %v1770_v23, %v8877_v53  ;;  %v1831_v17 = vsel %vm270_vm1, %v9016_v0, 0.0 }
 0xcc0   :  { %1832 = vadd.xlane.f32.xlu1 %v1831_v17 }
 0xcc1   :  { %v1834_v30 = vsel %vm270_vm1, %v9019_v38, 0.0 }
 0xcc2   :  { %1835 = vadd.xlane.f32.xlu0 %v1834_v30  ;;  %v1774_v33 = vpop.f32.mrb[48].mxu1 }
 0xcc3   :  { %v1775_v26 = vadd.f32 %v1774_v33, %v1675_v6  ;;  %v7233_v37 = vpop.f32.mrb[49].mxu1  ;;  %v9069_v33 = vld [vmem:[%s10330_s7 + $0x8] sm:$0x3f] }
 0xcc4   :  { %v1777_v7 = vpop.f32.mrb[50].mxu1 }
 0xcc5   :  { %v9026_v47 = vadd.f32 %v1775_v26, %v8884_v58  ;;  %v1778_v9 = vadd.f32 %v1777_v7, %v1675_v6  ;;  %v7234_v18 = vpop.f32.mrb[51].mxu1 }
 0xcc6   :  { %v1906_v18 = vrot.slane %v9069_v33, %v8573_v57 }
 0xcc7   :  { %v9029_v53 = vadd.f32 %v1778_v9, %v8887_v63  ;;  %v1837_v32 = vsel %vm270_vm1, %v9026_v47, 0.0 }
 0xcc8   :  { %1838 = vadd.xlane.f32.xlu1 %v1837_v32 }
 0xcc9   :  { %v1840_v2 = vsel %vm270_vm1, %v9029_v53, 0.0 }
 0xcca   :  { %1841 = vadd.xlane.f32.xlu0 %v1840_v2 }
 0xd43   :  { %v1827_v29 = vpop.xlane.xlu1 %1826 }
 0xd44   :  { %v1843_v25 = vmul.f32 0.03125, %v1827_v29 }
 0xd45   :  { %v1830_v16 = vpop.xlane.xlu0 %1829 }
 0xd46   :  { %v1849_v60 = vsub.f32 %v9006_v10, %v1843_v25  ;;  %v1844_v58 = vmul.f32 0.03125, %v1830_v16  ;;  %v1916_v16 = vrot.slane %v9069_v33, %v8584_v3 }
 0xd48   :  { %v1850_v28 = vsub.f32 %v9009_v15, %v1844_v58  ;;  %v1855_v36 = vmul.f32 %v1849_v60, %v1849_v60 }
 0xd4a   :  { %v1861_v63 = vsel %vm270_vm1, %v1855_v36, 0.0  ;;  %v1856_v39 = vmul.f32 %v1850_v28, %v1850_v28 }
 0xd4b   :  { %1862 = vadd.xlane.f32.xlu1 %v1861_v63 }
 0xd4c   :  { %v1864_v42 = vsel %vm270_vm1, %v1856_v39, 0.0 }
 0xd4d   :  { %v1833_v43 = vpop.xlane.xlu1 %1832  ;;  %1865 = vadd.xlane.f32.xlu0 %v1864_v42 }
 0xd4e   :  { %v1845_v45 = vmul.f32 0.03125, %v1833_v43 }
 0xd4f   :  { %v1836_v49 = vpop.xlane.xlu0 %1835 }
 0xd50   :  { %v9040_v34 = vsub.f32 %v9016_v0, %v1845_v45  ;;  %v1846_v31 = vmul.f32 0.03125, %v1836_v49 }
 0xd52   :  { %v9043_v61 = vsub.f32 %v9019_v38, %v1846_v31  ;;  %v1857_v62 = vmul.f32 %v9040_v34, %v9040_v34 }
 0xd54   :  { %v1867_v13 = vsel %vm270_vm1, %v1857_v62, 0.0  ;;  %v1858_v54 = vmul.f32 %v9043_v61, %v9043_v61 }
 0xd55   :  { %1868 = vadd.xlane.f32.xlu1 %v1867_v13  ;;  %v1839_v40 = vpop.xlane.xlu1 %1838 }
 0xd56   :  { %v1847_v19 = vmul.f32 0.03125, %v1839_v40  ;;  %v1870_v5 = vsel %vm270_vm1, %v1858_v54, 0.0 }
 0xd57   :  { %1871 = vadd.xlane.f32.xlu0 %v1870_v5  ;;  %v1842_v6 = vpop.xlane.xlu0 %1841 }
 0xd58   :  { %v1853_v21 = vsub.f32 %v9026_v47, %v1847_v19  ;;  %v1848_v8 = vmul.f32 0.03125, %v1842_v6 }
 0xd5a   :  { %v9053_v51 = vsub.f32 %v9029_v53, %v1848_v8  ;;  %v1859_v46 = vmul.f32 %v1853_v21, %v1853_v21 }
 0xd5c   :  { %v1873_v59 = vsel %vm270_vm1, %v1859_v46, 0.0  ;;  %v1860_v1 = vmul.f32 %v9053_v51, %v9053_v51 }
 0xd5d   :  { %1874 = vadd.xlane.f32.xlu1 %v1873_v59 }
 0xd5e   :  { %v1876_v48 = vsel %vm270_vm1, %v1860_v1, 0.0 }
 0xd5f   :  { %1877 = vadd.xlane.f32.xlu0 %v1876_v48 }
 0xdd8   :  { %v1863_v22 = vpop.xlane.xlu1 %1862 }
 0xdd9   :  { %v1879_v35 = vmul.f32 0.03125, %v1863_v22 }
 0xdda   :  { %v1866_v50 = vpop.xlane.xlu0 %1865 }
 0xddb   :  { %v1885_v23 = vadd.f32 1e-05, %v1879_v35  ;;  %v1880_v27 = vmul.f32 0.03125, %v1866_v50 }
 0xddd   :  { %8018 = vrsqrt.f32 %v1885_v23  ;;  %v1886_v17 = vadd.f32 1e-05, %v1880_v27  ;;  %v6689_v23 = vld [vmem:[%s10331_s4 + $0x1] ss:$0 sm:$0xff]  ;;  %s10334_s4 = smov 64  }
 0xddf   :  { %8020 = vrsqrt.f32 %v1886_v17 }
 0xde2   :  { %v1869_v30 = vpop.xlane.xlu1 %1868 }
 0xde3   :  { %v1881_v26 = vmul.f32 0.03125, %v1869_v30 }
 0xde4   :  { %v1872_v37 = vpop.xlane.xlu0 %1871 }
 0xde5   :  { %v1887_v7 = vadd.f32 1e-05, %v1881_v26  ;;  %v1882_v9 = vmul.f32 0.03125, %v1872_v37 }
 0xde7   :  { %v8019_v32 = vpop.eup %8018  ;;  %8022 = vrsqrt.f32 %v1887_v7  ;;  %v1888_v2 = vadd.f32 1e-05, %v1882_v9 }
 0xde8   :  { %v1897_v29 = vmul.f32 %v8019_v32, %v1849_v60 }
 0xde9   :  { %v8021_v25 = vpop.eup %8020  ;;  %8024 = vrsqrt.f32 %v1888_v2 }
 0xdea   :  { %v1907_v58 = vmul.f32 %v1906_v18, %v1897_v29  ;;  %v1898_v36 = vmul.f32 %v8021_v25, %v1850_v28  ;;  %v1875_v63 = vpop.xlane.xlu1 %1874 }
 0xdeb   :  { %v1883_v39 = vmul.f32 0.03125, %v1875_v63 }
 0xdec   :  { %v1908_v42 = vmul.f32 %v1906_v18, %v1898_v36  ;;  %v1878_v43 = vpop.xlane.xlu0 %1877  ;;  %v1917_v31 = vadd.f32 %v1916_v16, %v1907_v58 }
 0xded   :  { %v1889_v45 = vadd.f32 1e-05, %v1883_v39  ;;  %v1884_v49 = vmul.f32 0.03125, %v1878_v43 }
 0xdee   :  { %v1918_v62 = vadd.f32 %v1916_v16, %v1908_v42 }
 0xdef   :  { %8026 = vrsqrt.f32 %v1889_v45  ;;  %v1890_v13 = vadd.f32 1e-05, %v1884_v49 }
 0xdf0   :  { %v1923_v54 = vpack.c.bf16 %v1918_v62, %v1917_v31 }
 0xdf1   :  { %v8023_v40 = vpop.eup %8022  ;;  %8028 = vrsqrt.f32 %v1890_v13 }
 0xdf2   :  { %7240 = vmatmul.mubr.msk.bf16.vlgmr.msra.gmra.mrb[40].mxu0 %vm270_vm1, %v1923_v54  ;;  %v1899_v60 = vmul.f32 %v8023_v40, %v9040_v34 }
 0xdf3   :  { %v8025_v19 = vpop.eup %8024  ;;  %7243 = vmatprep.mubr.msk.bf16.mxu0 %vm8266_vm2, %v8265_v41 }
 0xdf4   :  { %v1900_v28 = vmul.f32 %v8025_v19, %v9043_v61  ;;  %v1909_v5 = vmul.f32 %v1906_v18, %v1899_v60 }
 0xdf6   :  { %v1910_v6 = vmul.f32 %v1906_v18, %v1900_v28  ;;  %v1919_v8 = vadd.f32 %v1916_v16, %v1909_v5 }
 0xdf8   :  { %v1920_v46 = vadd.f32 %v1916_v16, %v1910_v6 }
 0xdf9   :  { %v8027_v59 = vpop.eup %8026 }
 0xdfa   :  { %v1924_v1 = vpack.c.bf16 %v1920_v46, %v1919_v8  ;;  %v1901_v48 = vmul.f32 %v8027_v59, %v1853_v21 }
 0xdfb   :  { %v8029_v20 = vpop.eup %8028 }
 0xdfc   :  { %7244 = vmatmul.mubr.msk.bf16.gmra.mrb[44].mxu0 %vm270_vm1, %v1924_v1  ;;  %v1902_v55 = vmul.f32 %v8029_v20, %v9053_v51  ;;  %v1911_v22 = vmul.f32 %v1906_v18, %v1901_v48 }
 0xdfd   :  { %7247 = vmatprep.mubr.msk.bf16.mxu0 %vm8266_vm2, %v8265_v41 }
 0xdfe   :  { %v1912_v34 = vmul.f32 %v1906_v18, %v1902_v55  ;;  %v1921_v35 = vadd.f32 %v1916_v16, %v1911_v22 }
 0xe00   :  { %v1922_v50 = vadd.f32 %v1916_v16, %v1912_v34 }
 0xe02   :  { %v1925_v61 = vpack.c.bf16 %v1922_v50, %v1921_v35 }
 0xe04   :  { %7248 = vmatmul.mubr.msk.bf16.gmra.mrb[48].mxu0 %vm270_vm1, %v1925_v61 }
 0xec5   :  { %v1987_v21 = vpop.f32.mrb[40].mxu0 }
 0xec6   :  { %v1988_v27 = vadd.f32 %v6689_v23, %v1987_v21  ;;  %v7241_v17 = vpop.f32.mrb[41].mxu0 }
 0xec7   :  { %v1990_v30 = vpop.f32.mrb[42].mxu0 }
 0xec8   :  { %v1991_v26 = vadd.f32 %v6689_v23, %v1990_v30  ;;  %v7242_v51 = vpop.f32.mrb[43].mxu0  ;;  %v2010_v37 = vmul.f32 0.25, %v1988_v27 }
 0xeca   :  { %v7743_v7 = vpack.i.bf16 %v1991_v26, %v1988_v27  ;;  %v2011_v9 = vmul.f32 0.25, %v1991_v26  ;;  %v9088_v32 = vpack.c.bf16 %v1991_v26, %v1988_v27 }
 0xecc   :  { %v7753_v18 = vpack.i.bf16 %v2011_v9, %v2010_v37  ;;  %v2040_v2 = vpack.c.bf16 %v2011_v9, %v2010_v37  ;;  %7744 = vrot.lane.b32.xlu1 %v7743_v7, %s8267_s26 }
 0xece   :  { %7255 = vmatprep.mubr.msk.bf16.mxu0 %vm666_vm3, %v2040_v2 }
 0xecf   :  { %v1995_v29 = vpop.f32.mrb[44].mxu0 }
 0xed0   :  { %v7245_v25 = vpop.f32.mrb[45].mxu0  ;;  %v1996_v58 = vadd.f32 %v6689_v23, %v1995_v29 }
 0xed1   :  { %v1998_v16 = vpop.f32.mrb[46].mxu0 }
 0xed2   :  { %v1999_v36 = vadd.f32 %v6689_v23, %v1998_v16  ;;  %v7246_v63 = vpop.f32.mrb[47].mxu0  ;;  %v9093_v43 = vpack.c.bf16 %v1996_v58, %v1996_v58  ;;  %v2012_v50 = vmul.f32 0.25, %v1996_v58 }
 0xed4   :  { %v7748_v39 = vpack.i.bf16 %v1999_v36, %v1996_v58  ;;  %v2013_v62 = vmul.f32 0.25, %v1999_v36  ;;  %v2041_v9 = vpack.c.bf16 %v2012_v50, %v2012_v50 }
 0xed6   :  { %7749 = vrot.lane.b32.xlu0 %v7748_v39, %s8267_s26 }
 0xed7   :  { %v2003_v42 = vpop.f32.mrb[48].mxu0 }
 0xed8   :  { %v2004_v45 = vadd.f32 %v6689_v23, %v2003_v42  ;;  %v7249_v49 = vpop.f32.mrb[49].mxu0 }
 0xed9   :  { %v2006_v31 = vpop.f32.mrb[50].mxu0 }
 0xeda   :  { %v2014_v13 = vmul.f32 0.25, %v2004_v45  ;;  %v9095_v54 = vpack.c.bf16 %v2004_v45, %v1999_v36  ;;  %2084 = vrot.lane.b32.xlu0 %v9093_v43, %s8268_s28  ;;  %2062 = vrot.lane.b32.xlu1 %v2004_v45, %s8267_s26  ;;  %v7250_v40 = vpop.f32.mrb[51].mxu0  ;;  %v2007_v28 = vadd.f32 %v6689_v23, %v2006_v31 }
 0xedc   :  { %v7758_v60 = vpack.i.bf16 %v2014_v13, %v2013_v62  ;;  %v2042_v19 = vpack.c.bf16 %v2014_v13, %v2013_v62  ;;  %v9106_v5 = vpack.c.bf16 %v2007_v28, %v2007_v28  ;;  %v2015_v17 = vmul.f32 0.25, %v2007_v28 }
 0xede   :  { %7263 = vmatprep.mubr.msk.bf16.mxu1 %vm666_vm3, %v2042_v19  ;;  %2064 = vrot.lane.b32.xlu1 %v2007_v28, %s8267_s26 }
 0xee2   :  { %2082 = vrot.lane.b32.xlu1 %v9088_v32, %s8268_s28 }
 0xee6   :  { %2148 = vrot.lane.b32.xlu1 %v9095_v54, %s8268_s28 }
 0xeea   :  { %2150 = vrot.lane.b32.xlu1 %v9106_v5, %s8268_s28 }
 0xf3e   :  { %v7745_v6 = vpop.permute.xlu1 %7744 }
 0xf3f   :  { %v7747_v8 = vunpack.i.h.bf16 %v7745_v6  ;;  %v7746_v46 = vunpack.i.l.bf16 %v7745_v6 }
 0xf41   :  { %v9110_v59 = vpack.c.bf16 %v7747_v8, %v7746_v46 }
 0xf43   :  { %2214 = vrot.lane.b32.xlu0 %v9110_v59, %s8268_s28 }
 0xf48   :  { %v7750_v1 = vpop.permute.xlu0 %7749 }
 0xf49   :  { %v7751_v48 = vunpack.i.l.bf16 %v7750_v1  ;;  %v7752_v20 = vunpack.i.h.bf16 %v7750_v1 }
 0xf4b   :  { %v9114_v55 = vpack.c.bf16 %v7751_v48, %v7751_v48 }
 0xf4c   :  { %v2063_v22 = vpop.permute.xlu1 %2062  ;;  %v2085_v27 = vpop.permute.xlu0 %2084 }
 0xf4d   :  { %v9116_v34 = vpack.c.bf16 %v2063_v22, %v7752_v20  ;;  %2216 = vrot.lane.b32.xlu0 %v9114_v55, %s8268_s28  ;;  %v2096_v37 = vsel %vm666_vm3, %v2085_v27, 0 }
 0xf4f   :  { %2280 = vrot.lane.b32.xlu1 %v9116_v34, %s8268_s28 }
 0xf50   :  { %v2065_v35 = vpop.permute.xlu1 %2064 }
 0xf51   :  { %7754 = vrot.lane.b32.xlu0 %v7753_v18, %s8267_s26  ;;  %v9123_v61 = vpack.c.bf16 %v2065_v35, %v2065_v35  ;;  %v2043_v18 = vpack.c.bf16 %v2015_v17, %v2015_v17 }
 0xf53   :  { %2026 = vrot.lane.b32.xlu1 %v2012_v50, %s8267_s26 }
 0xf54   :  { %v2083_v23 = vpop.permute.xlu1 %2082 }
 0xf55   :  { %7688 = vmatprep.subr.msk.bf16.mxu0 %vm666_vm3, %v2083_v23  ;;  %2282 = vrot.lane.b32.xlu0 %v9123_v61, %s8268_s28  ;;  %v2093_v21 = vsel %vm666_vm3, %v2083_v23, 0 }
 0xf56   :  { %7252 = vmatpush3.bf16.xpose.msra.mxu0 %v2093_v21 }
 0xf57   :  { %7689 = vmatprep.subr.msk.bf16.mxu0 %vm666_vm3, %v2085_v27  ;;  %7759 = vrot.lane.b32.xlu1 %v7758_v60, %s8267_s26 }
 0xf58   :  { %v2149_v30 = vpop.permute.xlu1 %2148 }
 0xf59   :  { %7690 = vmatprep.subr.msk.bf16.mxu1 %vm666_vm3, %v2149_v30  ;;  %2032 = vrot.lane.b32.xlu0 %v2015_v17, %s8267_s26  ;;  %v2159_v26 = vsel %vm666_vm3, %v2149_v30, 0 }
 0xf5a   :  { %7260 = vmatpush3.bf16.xpose.msra.mxu1 %v2159_v26 }
 0xf5c   :  { %v2151_v51 = vpop.permute.xlu1 %2150 }
 0xf5d   :  { %7691 = vmatprep.subr.msk.bf16.mxu1 %vm666_vm3, %v2151_v51  ;;  %v2162_v7 = vsel %vm666_vm3, %v2151_v51, 0 }
 0xf5e   :  { %7254 = vmatpush3.bf16.xpose.msra.mxu0 %v2096_v37 }
 0xf62   :  { %7262 = vmatpush3.bf16.xpose.msra.mxu1 %v2162_v7 }
 0xf65   :  { %7256 = vmatmul.mubr.msk.bf16.vlgmr.msra.gmra.mrb[52].mxu0 %vm666_vm3, %v2041_v9 }
 0xf69   :  { %7264 = vmatmul.mubr.msk.bf16.vlgmr.msra.gmra.mrb[52].mxu1 %vm666_vm3, %v2043_v18 }
 0xfb5   :  { %v2215_v2 = vpop.permute.xlu0 %2214 }
 0xfb6   :  { %7692 = vmatprep.subr.msk.bf16.mxu0 %vm666_vm3, %v2215_v2  ;;  %v2225_v29 = vsel %vm666_vm3, %v2215_v2, 0 }
 0xfb7   :  { %7268 = vmatpush3.bf16.xpose.msra.mxu0 %v2225_v29 }
 0xfbf   :  { %v2217_v25 = vpop.permute.xlu0 %2216 }
 0xfc0   :  { %7693 = vmatprep.subr.msk.bf16.mxu0 %vm666_vm3, %v2217_v25  ;;  %v2228_v16 = vsel %vm666_vm3, %v2217_v25, 0 }
 0xfc1   :  { %v2281_v58 = vpop.permute.xlu1 %2280  ;;  %7270 = vmatpush3.bf16.xpose.msra.mxu0 %v2228_v16 }
 0xfc2   :  { %7694 = vmatprep.subr.msk.bf16.mxu1 %vm666_vm3, %v2281_v58  ;;  %v2291_v36 = vsel %vm666_vm3, %v2281_v58, 0 }
 0xfc3   :  { %7276 = vmatpush3.bf16.xpose.msra.mxu1 %v2291_v36  ;;  %v7755_v63 = vpop.permute.xlu0 %7754 }
 0xfc4   :  { %v7757_v39 = vunpack.i.h.bf16 %v7755_v63  ;;  %v7756_v42 = vunpack.i.l.bf16 %v7755_v63 }
 0xfc5   :  { %v2027_v45 = vpop.permute.xlu1 %2026 }
 0xfc6   :  { %v2044_v49 = vpack.c.bf16 %v7757_v39, %v7756_v42  ;;  %v2045_v31 = vpack.c.bf16 %v2027_v45, %v2027_v45 }
 0xfc7   :  { %v2283_v62 = vpop.permute.xlu0 %2282 }
 0xfc8   :  { %7271 = vmatprep.mubr.msk.bf16.mxu0 %vm666_vm3, %v2044_v49  ;;  %7695 = vmatprep.subr.msk.bf16.mxu1 %vm666_vm3, %v2283_v62  ;;  %v2294_v19 = vsel %vm666_vm3, %v2283_v62, 0 }
 0xfc9   :  { %v7760_v13 = vpop.permute.xlu1 %7759  ;;  %7272 = vmatmul.mubr.msk.bf16.vlgmr.msra.gmra.mrb[56].mxu0 %vm666_vm3, %v2045_v31 }
 0xfca   :  { %v7762_v40 = vunpack.i.h.bf16 %v7760_v13  ;;  %v7761_v60 = vunpack.i.l.bf16 %v7760_v13 }
 0xfcb   :  { %7278 = vmatpush3.bf16.xpose.msra.mxu1 %v2294_v19  ;;  %v2033_v6 = vpop.permute.xlu0 %2032 }
 0xfcc   :  { %v2046_v28 = vpack.c.bf16 %v7762_v40, %v7761_v60  ;;  %v2047_v8 = vpack.c.bf16 %v2033_v6, %v2033_v6 }
 0xfce   :  { %7279 = vmatprep.mubr.msk.bf16.mxu1 %vm666_vm3, %v2046_v28 }
 0xfd2   :  { %7280 = vmatmul.mubr.msk.bf16.vlgmr.msra.gmra.mrb[56].mxu1 %vm666_vm3, %v2047_v8 }
0x1038   :  { %v7257_v46 = vpop.f32.mrb[52].mxu0 }
0x1039   :  { %v9153_v1 = vadd.f32 %v7257_v46, %v8672_v12  ;;  %v2132_v48 = vpop.f32.mrb[53].mxu0 }
0x103a   :  { %v9156_v20 = vadd.f32 %v2132_v48, %v8672_v12  ;;  %v7258_v22 = vpop.f32.mrb[54].mxu0 }
0x103b   :  { %v2135_v35 = vpop.f32.mrb[55].mxu0  ;;  %v2350_v50 = vsel %vm925_vm5, %v9153_v1, -inf }
0x103c   :  { %v2136_v23 = vadd.f32 %v2135_v35, %v8672_v12  ;;  %2351 = vmax.xlane.f32.xlu0 %v2350_v50  ;;  %v7265_v21 = vpop.f32.mrb[52].mxu1  ;;  %v2344_v27 = vsel %vm925_vm5, %v9156_v20, -inf }
0x103d   :  { %2345 = vmax.xlane.f32.xlu1 %v2344_v27  ;;  %v2198_v17 = vpop.f32.mrb[53].mxu1  ;;  %v2207_v7 = vadd.f32 %v7265_v21, %v8672_v12 }
0x103e   :  { %v9164_v30 = vadd.f32 %v2198_v17, %v8672_v12  ;;  %v7266_v26 = vpop.f32.mrb[54].mxu1  ;;  %v2347_v51 = vsel %vm925_vm5, %v2136_v23, -inf }
0x103f   :  { %v2201_v37 = vpop.f32.mrb[55].mxu1  ;;  %v2359_v18 = vsel %vm925_vm5, %v2207_v7, -inf }
0x1040   :  { %2348 = vmax.xlane.f32.xlu0 %v2347_v51  ;;  %v2353_v9 = vsel %vm925_vm5, %v9164_v30, -inf  ;;  %v9185_v45 = vadd.f32 %v2201_v37, %v8672_v12 }
0x1041   :  { %2354 = vmax.xlane.f32.xlu1 %v2353_v9 }
0x1042   :  { %v2356_v60 = vsel %vm925_vm5, %v9185_v45, -inf }
0x1045   :  { %2360 = vmax.xlane.f32.xlu1 %v2359_v18 }
0x109c   :  { %v7273_v2 = vpop.f32.mrb[56].mxu0 }
0x109d   :  { %v9172_v29 = vadd.f32 %v7273_v2, %v8672_v12  ;;  %v2264_v25 = vpop.f32.mrb[57].mxu0 }
0x109e   :  { %v7274_v16 = vpop.f32.mrb[58].mxu0  ;;  %v9175_v58 = vadd.f32 %v2264_v25, %v8672_v12 }
0x109f   :  { %v2267_v36 = vpop.f32.mrb[59].mxu0  ;;  %v2368_v63 = vsel %vm925_vm5, %v9172_v29, -inf }
0x10a0   :  { %v9180_v39 = vadd.f32 %v2267_v36, %v8672_v12  ;;  %2369 = vmax.xlane.f32.xlu0 %v2368_v63  ;;  %v2362_v49 = vsel %vm925_vm5, %v9175_v58, -inf }
0x10a2   :  { %v2365_v42 = vsel %vm925_vm5, %v9180_v39, -inf }
0x10a3   :  { %2366 = vmax.xlane.f32.xlu1 %v2365_v42 }
0x10a4   :  { %2363 = vmax.xlane.f32.xlu0 %v2362_v49 }
0x10a5   :  { %v7281_v31 = vpop.f32.mrb[56].mxu1 }
0x10a6   :  { %v2330_v62 = vpop.f32.mrb[57].mxu1  ;;  %v9195_v28 = vadd.f32 %v7281_v31, %v8672_v12 }
0x10a7   :  { %v9190_v13 = vadd.f32 %v2330_v62, %v8672_v12  ;;  %v7282_v40 = vpop.f32.mrb[58].mxu1 }
0x10a8   :  { %v2333_v19 = vpop.f32.mrb[59].mxu1  ;;  %2357 = vmax.xlane.f32.xlu0 %v2356_v60  ;;  %v2377_v8 = vsel %vm925_vm5, %v9195_v28, -inf }
0x10a9   :  { %v2371_v6 = vsel %vm925_vm5, %v9190_v13, -inf  ;;  %v9210_v35 = vadd.f32 %v2333_v19, %v8672_v12 }
0x10ac   :  { %2372 = vmax.xlane.f32.xlu0 %v2371_v6 }
0x10b0   :  { %2378 = vmax.xlane.f32.xlu0 %v2377_v8 }
0x10b4   :  { %2484 = vrot.lane.b32.xlu1 %v9088_v32, %s10334_s4  ;;  %v2374_v32 = vsel %vm925_vm5, %v9210_v35, -inf }
0x10b8   :  { %2608 = vrot.lane.b32.xlu1 %v9110_v59, %s10334_s4 }
0x10c6   :  { %2486 = vrot.lane.b32.xlu0 %v9093_v43, %s10334_s4 }
0x10c9   :  { %v2352_v46 = vpop.xlane.xlu0 %2351 }
0x10ca   :  { %2548 = vrot.lane.b32.xlu0 %v9106_v5, %s10334_s4  ;;  %v2346_v12 = vpop.xlane.xlu1 %2345  ;;  %v2382_v59 = vsub.f32 %v9153_v1, %v2352_v46 }
0x10cb   :  { %v2380_v27 = vsub.f32 %v9156_v20, %v2346_v12 }
0x10cd   :  { %v2349_v48 = vpop.xlane.xlu0 %2348  ;;  %v2392_v26 = vmul.f32 1.442695, %v2380_v27 }
0x10ce   :  { %v2381_v22 = vsub.f32 %v2136_v23, %v2349_v48  ;;  %v2355_v5 = vpop.xlane.xlu1 %2354  ;;  %v2396_v23 = vmul.f32 1.442695, %v2382_v59 }
0x10cf   :  { %v2383_v37 = vsub.f32 %v9164_v30, %v2355_v5 }
0x10d0   :  { %v2394_v50 = vmul.f32 1.442695, %v2381_v22 }
0x10d1   :  { %v2398_v18 = vmul.f32 1.442695, %v2383_v37 }
0x10d2   :  { %8030 = vpow2.f32 %v2394_v50  ;;  %v2361_v17 = vpop.xlane.xlu1 %2360 }
0x10d3   :  { %8032 = vpow2.f32 %v2396_v23  ;;  %v2385_v51 = vsub.f32 %v2207_v7, %v2361_v17 }
0x10d4   :  { %8034 = vpow2.f32 %v2392_v26 }
0x10d5   :  { %v2402_v9 = vmul.f32 1.442695, %v2385_v51 }
0x10d7   :  { %8036 = vpow2.f32 %v2402_v9 }
0x10d8   :  { %8038 = vpow2.f32 %v2398_v18 }
0x10dc   :  { %2375 = vmax.xlane.f32.xlu1 %v2374_v32  ;;  %v9214_v21 = vpop.eup %8030 }
0x10dd   :  { %v2419_v43 = vsel %vm925_vm5, %v9214_v21, 0.0 }
0x10e9   :  { %2420 = vadd.xlane.f32.xlu0 %v2419_v43 }
0x10ed   :  { %2546 = vrot.lane.b32.xlu1 %v9095_v54, %s10334_s4  ;;  %v9225_v54 = vpop.eup %8032 }
0x10ee   :  { %v9229_v1 = vpop.eup %8034 }
0x10ef   :  { %v2416_v20 = vsel %vm925_vm5, %v9229_v1, 0.0  ;;  %v9233_v2 = vpop.eup %8036 }
0x10f0   :  { %v2431_v30 = vsel %vm925_vm5, %v9233_v2, 0.0  ;;  %v9237_v7 = vpop.eup %8038 }
0x10f1   :  { %2610 = vrot.lane.b32.xlu1 %v9114_v55, %s10334_s4  ;;  %v2422_v55 = vsel %vm925_vm5, %v9225_v54, 0.0  ;;  %v2425_v25 = vsel %vm925_vm5, %v9237_v7, 0.0 }
0x1115   :  { %2423 = vadd.xlane.f32.xlu1 %v2422_v55 }
0x1119   :  { %2417 = vadd.xlane.f32.xlu1 %v2416_v20 }
0x111d   :  { %2432 = vadd.xlane.f32.xlu1 %v2431_v30 }
0x1121   :  { %2426 = vadd.xlane.f32.xlu1 %v2425_v25 }
0x112d   :  { %v2370_v16 = vpop.xlane.xlu0 %2369 }
0x112e   :  { %v2388_v31 = vsub.f32 %v9172_v29, %v2370_v16 }
0x1130   :  { %v2367_v36 = vpop.xlane.xlu1 %2366  ;;  %v2408_v19 = vmul.f32 1.442695, %v2388_v31 }
0x1131   :  { %v2387_v63 = vsub.f32 %v9180_v39, %v2367_v36  ;;  %v2364_v42 = vpop.xlane.xlu0 %2363 }
0x1132   :  { %v2386_v6 = vsub.f32 %v9175_v58, %v2364_v42 }
0x1133   :  { %v2406_v49 = vmul.f32 1.442695, %v2387_v63 }
0x1134   :  { %v2485_v62 = vpop.permute.xlu1 %2484  ;;  %v2404_v48 = vmul.f32 1.442695, %v2386_v6 }
0x1135   :  { %8040 = vpow2.f32 %v2406_v49  ;;  %v2358_v40 = vpop.xlane.xlu0 %2357  ;;  %7283 = vmatprep.subr.bf16.mxu0 %v2485_v62 }
0x1136   :  { %v2384_v60 = vsub.f32 %v9185_v45, %v2358_v40  ;;  %7284 = vmatpush3.bf16.msra.mxu0 %v2485_v62 }
0x1138   :  { %v2400_v8 = vmul.f32 1.442695, %v2384_v60  ;;  %v2609_v12 = vpop.permute.xlu1 %2608 }
0x1139   :  { %v2373_v46 = vpop.xlane.xlu0 %2372 }
0x113a   :  { %8042 = vpow2.f32 %v2400_v8  ;;  %v2389_v29 = vsub.f32 %v9190_v13, %v2373_v46 }
0x113b   :  { %8044 = vpow2.f32 %v2408_v19 }
0x113c   :  { %8046 = vpow2.f32 %v2404_v48 }
0x113d   :  { %v2379_v39 = vpop.xlane.xlu0 %2378 }
0x113e   :  { %v2391_v22 = vsub.f32 %v9195_v28, %v2379_v39  ;;  %v2410_v28 = vmul.f32 1.442695, %v2389_v29 }
0x113f   :  { %v9246_v50 = vpop.eup %8040 }
0x1140   :  { %v2414_v32 = vmul.f32 1.442695, %v2391_v22  ;;  %v2437_v45 = vsel %vm925_vm5, %v9246_v50, 0.0 }
0x1141   :  { %v2487_v43 = vpop.permute.xlu0 %2486  ;;  %2438 = vadd.xlane.f32.xlu1 %v2437_v45 }
0x1142   :  { %7696 = vmatprep.subr.msk.bf16.mxu0 %vm1077_vm6, %v2487_v43  ;;  %v2496_v58 = vsel %vm1077_vm6, %v2487_v43, 0  ;;  %8048 = vpow2.f32 %v2414_v32 }
0x1143   :  { %7286 = vmatpush3.bf16.msra.mxu0 %v2496_v58  ;;  %8050 = vpow2.f32 %v2410_v28 }
0x1144   :  { %v9253_v5 = vpop.eup %8042  ;;  %7299 = vmatprep.subr.bf16.mxu0 %v2609_v12 }
0x1145   :  { %v2428_v13 = vsel %vm925_vm5, %v9253_v5, 0.0  ;;  %v9257_v59 = vpop.eup %8044  ;;  %v2549_v25 = vpop.permute.xlu0 %2548 }
0x1146   :  { %2429 = vadd.xlane.f32.xlu0 %v2428_v13  ;;  %v2440_v23 = vsel %vm925_vm5, %v9257_v59, 0.0  ;;  %v9261_v27 = vpop.eup %8046  ;;  %v2558_v16 = vsel %vm1077_vm6, %v2549_v25, 0 }
0x1147   :  { %v2434_v17 = vsel %vm925_vm5, %v9261_v27, 0.0 }
0x114a   :  { %2441 = vadd.xlane.f32.xlu0 %v2440_v23 }
0x114c   :  { %v9265_v26 = vpop.eup %8048 }
0x114d   :  { %v2449_v51 = vsel %vm925_vm5, %v9265_v26, 0.0  ;;  %v9269_v37 = vpop.eup %8050 }
0x114e   :  { %2435 = vadd.xlane.f32.xlu0 %v2434_v17  ;;  %v2443_v9 = vsel %vm925_vm5, %v9269_v37, 0.0 }
0x1152   :  { %2450 = vadd.xlane.f32.xlu0 %v2449_v51 }
0x1156   :  { %2444 = vadd.xlane.f32.xlu0 %v2443_v9 }
0x1169   :  { %v2376_v18 = vpop.xlane.xlu1 %2375 }
0x116a   :  { %v2390_v55 = vsub.f32 %v9210_v35, %v2376_v18 }
0x116c   :  { %v2412_v20 = vmul.f32 1.442695, %v2390_v55  ;;  %2672 = vrot.lane.b32.xlu0 %v9123_v61, %s10334_s4 }
0x116d   :  { %v2547_v30 = vpop.permute.xlu1 %2546 }
0x116e   :  { %8052 = vpow2.f32 %v2412_v20  ;;  %7291 = vmatprep.subr.bf16.mxu1 %v2547_v30 }
0x116f   :  { %7292 = vmatpush3.bf16.msra.mxu1 %v2547_v30 }
0x1170   :  { %7697 = vmatprep.subr.msk.bf16.mxu1 %vm1077_vm6, %v2549_v25 }
0x1171   :  { %v2611_v61 = vpop.permute.xlu1 %2610 }
0x1173   :  { %7294 = vmatpush3.bf16.msra.mxu1 %v2558_v16 }
0x1176   :  { %v2421_v35 = vpop.xlane.xlu0 %2420 }
0x1178   :  { %v9278_v36 = vpop.eup %8052 }
0x1179   :  { %v2446_v63 = vsel %vm925_vm5, %v9278_v36, 0.0 }
0x117a   :  { %2447 = vadd.xlane.f32.xlu1 %v2446_v63 }
0x118b   :  { %2670 = vrot.lane.b32.xlu1 %v9116_v34, %s10334_s4  ;;  %v2620_v34 = vsel %vm1077_vm6, %v2611_v61, 0 }
0x11a2   :  { %v2424_v42 = vpop.xlane.xlu1 %2423 }
0x11a3   :  { %8054 = vrcp.f32 %v2424_v42 }
0x11a4   :  { %8056 = vrcp.f32 %v2421_v35 }
0x11a6   :  { %v2418_v49 = vpop.xlane.xlu1 %2417 }
0x11a7   :  { %8058 = vrcp.f32 %v2418_v49 }
0x11aa   :  { %v2433_v48 = vpop.xlane.xlu1 %2432 }
0x11ab   :  { %8060 = vrcp.f32 %v2433_v48 }
0x11ad   :  { %v8055_v31 = vpop.eup %8054 }
0x11ae   :  { %v8057_v62 = vpop.eup %8056  ;;  %v2466_v60 = vmul.f32 %v8055_v31, %v9225_v54  ;;  %v2427_v54 = vpop.xlane.xlu1 %2426 }
0x11af   :  { %v2465_v6 = vmul.f32 %v8057_v62, %v9214_v21  ;;  %8062 = vrcp.f32 %v2427_v54  ;;  %v7866_v62 = vld [vmem:[%s10332_s1 + $0x10] sm:$0xff]  }
0x11b0   :  { %v2477_v46 = vpack.c.bf16 %v2466_v60, %v2466_v60 }
0x11b1   :  { %v8059_v40 = vpop.eup %8058 }
0x11b2   :  { %v2464_v19 = vmul.f32 %v8059_v40, %v9229_v1 }
0x11b4   :  { %v2476_v8 = vpack.c.bf16 %v2465_v6, %v2464_v19 }
0x11b5   :  { %v8061_v22 = vpop.eup %8060 }
0x11b6   :  { %7287 = vmatprep.mubr.msk.bf16.mxu0 %vm925_vm5, %v2476_v8  ;;  %v2469_v43 = vmul.f32 %v8061_v22, %v9233_v2  ;;  %v7867_v8 = vld [vmem:[%s10332_s1 + $0x18] sm:$0xff]  }
0x11b7   :  { %7288 = vmatmul.mubr.msk.bf16.vlgmr.msra.gmra.mrb[60].mxu0 %vm925_vm5, %v2477_v46 }
0x11b8   :  { %7300 = vmatpush3.bf16.msra.mxu0 %v2609_v12  ;;  %v2479_v13 = vpack.c.bf16 %v2469_v43, %v2469_v43 }
0x11b9   :  { %7698 = vmatprep.subr.msk.bf16.mxu0 %vm1077_vm6, %v2611_v61  ;;  %v8063_v32 = vpop.eup %8062 }
0x11ba   :  { %v2467_v58 = vmul.f32 %v8063_v32, %v9237_v7 }
0x11bc   :  { %7302 = vmatpush3.bf16.msra.mxu0 %v2620_v34 }
0x11bd   :  { %7315 = vmatprep.subr.bf16.mxu0 %v8265_v41 }
0x11ce   :  { %v2439_v21 = vpop.xlane.xlu1 %2438 }
0x11d3   :  { %v2430_v1 = vpop.xlane.xlu0 %2429 }
0x11d4   :  { %8064 = vrcp.f32 %v2430_v1 }
0x11d7   :  { %v2442_v39 = vpop.xlane.xlu0 %2441 }
0x11d8   :  { %8066 = vrcp.f32 %v2442_v39 }
0x11d9   :  { %8068 = vrcp.f32 %v2439_v21 }
0x11db   :  { %v2436_v29 = vpop.xlane.xlu0 %2435 }
0x11dc   :  { %8070 = vrcp.f32 %v2436_v29 }
0x11de   :  { %v8065_v45 = vpop.eup %8064 }
0x11df   :  { %v2468_v12 = vmul.f32 %v8065_v45, %v9253_v5  ;;  %v2451_v7 = vpop.xlane.xlu0 %2450 }
0x11e0   :  { %8072 = vrcp.f32 %v2451_v7  ;;  %v9346_v7 = vrot.slane %v9069_v33, %v8859_v24 }
0x11e1   :  { %v2478_v28 = vpack.c.bf16 %v2468_v12, %v2467_v58 }
0x11e2   :  { %v8067_v23 = vpop.eup %8066 }
0x11e3   :  { %7295 = vmatprep.mubr.msk.bf16.mxu1 %vm925_vm5, %v2478_v28  ;;  %v8069_v17 = vpop.eup %8068  ;;  %v2472_v9 = vmul.f32 %v8067_v23, %v9257_v59  ;;  %v2445_v5 = vpop.xlane.xlu0 %2444 }
0x11e4   :  { %7296 = vmatmul.mubr.msk.bf16.vlgmr.msra.gmra.mrb[60].mxu1 %vm925_vm5, %v2479_v13  ;;  %v2471_v55 = vmul.f32 %v8069_v17, %v9246_v50  ;;  %8074 = vrcp.f32 %v2445_v5 }
0x11e5   :  { %v2481_v20 = vpack.c.bf16 %v2472_v9, %v2472_v9 }
0x11e6   :  { %v8071_v51 = vpop.eup %8070 }
0x11e7   :  { %v2470_v18 = vmul.f32 %v8071_v51, %v9261_v27  ;;  %v2673_v27 = vpop.permute.xlu0 %2672 }
0x11e8   :  { %v2682_v16 = vsel %vm1077_vm6, %v2673_v27, 0 }
0x11e9   :  { %v2480_v2 = vpack.c.bf16 %v2471_v55, %v2470_v18 }
0x11ea   :  { %v8073_v50 = vpop.eup %8072 }
0x11eb   :  { %7303 = vmatprep.mubr.msk.bf16.mxu0 %vm925_vm5, %v2480_v2  ;;  %v2475_v61 = vmul.f32 %v8073_v50, %v9265_v26 }
0x11ec   :  { %7304 = vmatmul.mubr.msk.bf16.vlgmr.msra.gmra.mrb[64].mxu0 %vm925_vm5, %v2481_v20 }
0x11ed   :  { %7319 = vmatprep.mubr.msk.bf16.mxu0 %vm8266_vm2, %v8265_v41  ;;  %v2483_v31 = vpack.c.bf16 %v2475_v61, %v2475_v61  ;;  %7316 = vmatpush3.bf16.msra.mxu0 %v7866_v62 }
0x11ee   :  { %v8075_v25 = vpop.eup %8074  ;;  %7317 = vmatprep.subr.bf16.mxu0 %v8265_v41 }
0x11ef   :  { %v2473_v35 = vmul.f32 %v8075_v25, %v9269_v37 }
0x11f1   :  { %7318 = vmatpush3.bf16.msra.mxu0 %v7867_v8 }
0x11f2   :  { %7347 = vmatprep.subr.bf16.mxu0 %v8265_v41 }
0x1207   :  { %v2448_v30 = vpop.xlane.xlu1 %2447 }
0x1208   :  { %8076 = vrcp.f32 %v2448_v30 }
0x120b   :  { %v2671_v59 = vpop.permute.xlu1 %2670 }
0x120c   :  { %7307 = vmatprep.subr.bf16.mxu1 %v2671_v59 }
0x120d   :  { %7308 = vmatpush3.bf16.msra.mxu1 %v2671_v59 }
0x120e   :  { %7699 = vmatprep.subr.msk.bf16.mxu1 %vm1077_vm6, %v2673_v27 }
0x1211   :  { %7310 = vmatpush3.bf16.msra.mxu1 %v2682_v16 }
0x1212   :  { %v8077_v63 = vpop.eup %8076  ;;  %7331 = vmatprep.subr.bf16.mxu1 %v8265_v41 }
0x1213   :  { %v2474_v42 = vmul.f32 %v8077_v63, %v9278_v36 }
0x1215   :  { %v2482_v49 = vpack.c.bf16 %v2474_v42, %v2473_v35 }
0x1217   :  { %7311 = vmatprep.mubr.msk.bf16.mxu1 %vm925_vm5, %v2482_v49 }
0x1218   :  { %7312 = vmatmul.mubr.msk.bf16.vlgmr.msra.gmra.mrb[64].mxu1 %vm925_vm5, %v2483_v31 }
0x1219   :  { %7335 = vmatprep.mubr.msk.bf16.mxu1 %vm8266_vm2, %v8265_v41 }
0x128a   :  { %v7289_v26 = vpop.f32.mrb[60].mxu0 }
0x128b   :  { %v2532_v37 = vpop.f32.mrb[61].mxu0 }
0x128c   :  { %v7290_v40 = vpop.f32.mrb[62].mxu0 }
0x128d   :  { %v2535_v36 = vpop.f32.mrb[63].mxu0 }
0x12b7   :  { %v9318_v60 = vpop.f32.mrb[60].mxu1 }
0x12b8   :  { %v2594_v19 = vpop.f32.mrb[61].mxu1 }
0x12b9   :  { %v7298_v6 = vpop.f32.mrb[62].mxu1 }
0x12ba   :  { %v9323_v46 = vpop.f32.mrb[63].mxu1 }
0x12bf   :  { %v7305_v34 = vpop.f32.mrb[64].mxu0 }
0x12c0   :  { %v2656_v48 = vpop.f32.mrb[65].mxu0 }
0x12c1   :  { %v7306_v54 = vpop.f32.mrb[66].mxu0 }
0x12c2   :  { %v2659_v1 = vpop.f32.mrb[67].mxu0 }
0x12c3   :  { %v7763_v21 = vpack.i.bf16 %v2659_v1, %v2656_v48 }
0x12c5   :  { %7764 = vrot.lane.b32.xlu1 %v7763_v21, %s10335_s3  ;;  %v7868_v21 = vld [vmem:[%s10333_s0 + $0x10] sm:$0xff]  }
0x12c6   :  { %7332 = vmatpush3.bf16.msra.mxu1 %v7868_v21 }
0x12c7   :  { %7333 = vmatprep.subr.bf16.mxu1 %v8265_v41 }
0x12eb   :  { %v9327_v39 = vpop.f32.mrb[64].mxu1 }
0x12ec   :  { %v2718_v22 = vpop.f32.mrb[65].mxu1 }
0x12ed   :  { %v7768_v29 = vpack.i.bf16 %v2718_v22, %v7305_v34  ;;  %v7314_v32 = vpop.f32.mrb[66].mxu1  ;;  %v7869_v22 = vld [vmem:[%s10333_s0 + $0x18] sm:$0xff]  }
0x12ee   :  { %v9329_v45 = vpop.f32.mrb[67].mxu1  ;;  %7334 = vmatpush3.bf16.msra.mxu1 %v7869_v22 }
0x12ef   :  { %v7773_v43 = vpack.i.bf16 %v9327_v39, %v9329_v45  ;;  %7769 = vrot.lane.b32.xlu0 %v7768_v29, %s10335_s3  ;;  %7375 = vmatprep.subr.bf16.mxu1 %v8265_v41 }
0x1337   :  { %v7765_v58 = vpop.permute.xlu1 %7764 }
0x1338   :  { %v7767_v12 = vunpack.i.h.bf16 %v7765_v58  ;;  %v7766_v28 = vunpack.i.l.bf16 %v7765_v58 }
0x133a   :  { %v2757_v13 = vsel %vm666_vm3, %v2535_v36, %v7767_v12  ;;  %v2756_v23 = vsel %vm666_vm3, %v2532_v37, %v7766_v28 }
0x133b   :  { %v2762_v17 = vpack.c.bf16 %v2757_v13, %v2756_v23 }
0x133d   :  { %7320 = vmatmul.mubr.msk.bf16.vlgmr.msra.gmra.mrb[68].mxu0 %vm270_vm1, %v2762_v17 }
0x133e   :  { %7323 = vmatprep.mubr.msk.bf16.mxu0 %vm8266_vm2, %v8265_v41 }
0x1361   :  { %v7770_v51 = vpop.permute.xlu0 %7769 }
0x1362   :  { %v7772_v9 = vunpack.i.h.bf16 %v7770_v51  ;;  %v7771_v18 = vunpack.i.l.bf16 %v7770_v51 }
0x1364   :  { %v2759_v55 = vsel %vm666_vm3, %v2594_v19, %v7772_v9  ;;  %v2758_v2 = vsel %vm666_vm3, %v7289_v26, %v7771_v18 }
0x1365   :  { %v2763_v20 = vpack.c.bf16 %v2759_v55, %v2758_v2 }
0x1367   :  { %7324 = vmatmul.mubr.msk.bf16.gmra.mrb[72].mxu0 %vm270_vm1, %v2763_v20 }
0x1368   :  { %7327 = vmatprep.mubr.msk.bf16.mxu0 %vm8266_vm2, %v8265_v41 }
0x1410   :  { %v2824_v5 = vpop.f32.mrb[68].mxu0 }
0x1411   :  { %v2825_v30 = vadd.f32 %v2824_v5, %v9346_v7  ;;  %v7321_v59 = vpop.f32.mrb[69].mxu0 }
0x1412   :  { %v2827_v27 = vpop.f32.mrb[70].mxu0  ;;  %v9387_v59 = vld [vmem:[%s10330_s7 + $0x8] sm:$0x3f] }
0x1413   :  { %v9350_v50 = vadd.f32 %v2825_v30, %v9006_v10  ;;  %v2828_v25 = vadd.f32 %v2827_v27, %v9346_v7  ;;  %v7322_v16 = vpop.f32.mrb[71].mxu0  ;;  %v9391_v27 = vrot.slane %v9387_v59, %v8934_v44 }
0x1415   :  { %v2848_v63 = vadd.f32 %v2828_v25, %v9009_v15  ;;  %v2853_v61 = vsel %vm270_vm1, %v9350_v50, 0.0 }
0x1416   :  { %2854 = vadd.xlane.f32.xlu1 %v2853_v61 }
0x1417   :  { %v2856_v33 = vsel %vm270_vm1, %v2848_v63, 0.0 }
0x1418   :  { %2857 = vadd.xlane.f32.xlu0 %v2856_v33 }
0x143a   :  { %v2832_v35 = vpop.f32.mrb[72].mxu0 }
0x143b   :  { %v2833_v42 = vadd.f32 %v2832_v35, %v9346_v7  ;;  %v7325_v49 = vpop.f32.mrb[73].mxu0 }
0x143c   :  { %v2835_v31 = vpop.f32.mrb[74].mxu0 }
0x143d   :  { %v2849_v10 = vadd.f32 %v2833_v42, %v9016_v0  ;;  %v2836_v62 = vadd.f32 %v2835_v31, %v9346_v7  ;;  %v7326_v26 = vpop.f32.mrb[75].mxu0 }
0x143f   :  { %v9361_v37 = vadd.f32 %v2836_v62, %v9019_v38  ;;  %v2859_v15 = vsel %vm270_vm1, %v2849_v10, 0.0 }
0x1440   :  { %2860 = vadd.xlane.f32.xlu0 %v2859_v15 }
0x1441   :  { %v2862_v40 = vsel %vm270_vm1, %v9361_v37, 0.0 }
0x1444   :  { %2863 = vadd.xlane.f32.xlu0 %v2862_v40 }
0x14a3   :  { %v2855_v36 = vpop.xlane.xlu1 %2854 }
0x14a4   :  { %v2871_v19 = vmul.f32 0.03125, %v2855_v36 }
0x14a5   :  { %v2858_v6 = vpop.xlane.xlu0 %2857 }
0x14a6   :  { %v2877_v8 = vsub.f32 %v9350_v50, %v2871_v19  ;;  %v2872_v34 = vmul.f32 0.03125, %v2858_v6 }
0x14a8   :  { %v2878_v0 = vsub.f32 %v2848_v63, %v2872_v34  ;;  %v2883_v48 = vmul.f32 %v2877_v8, %v2877_v8  ;;  %v9396_v63 = vrot.slane %v9387_v59, %v8944_v56 }
0x14aa   :  { %v2889_v54 = vsel %vm270_vm1, %v2883_v48, 0.0  ;;  %v2884_v1 = vmul.f32 %v2878_v0, %v2878_v0 }
0x14ab   :  { %2890 = vadd.xlane.f32.xlu1 %v2889_v54 }
0x14ac   :  { %v2892_v38 = vsel %vm270_vm1, %v2884_v1, 0.0 }
0x14ad   :  { %2893 = vadd.xlane.f32.xlu0 %v2892_v38 }
0x14cd   :  { %v2861_v29 = vpop.xlane.xlu0 %2860 }
0x14ce   :  { %v2873_v32 = vmul.f32 0.03125, %v2861_v29  ;;  %v7870_v29 = vld [vmem:[%s10287_s10 + $0x40] sm:$0xff]  }
0x14cf   :  { %7348 = vmatpush3.bf16.msra.mxu0 %v7870_v29 }
0x14d0   :  { %v2879_v58 = vsub.f32 %v2849_v10, %v2873_v32  ;;  %7349 = vmatprep.subr.bf16.mxu0 %v8265_v41  ;;  %v7871_v32 = vld [vmem:[%s10287_s10 + $0x48] sm:$0xff]  }
0x14d1   :  { %v2864_v12 = vpop.xlane.xlu0 %2863 }
0x14d2   :  { %v2874_v28 = vmul.f32 0.03125, %v2864_v12  ;;  %v2885_v13 = vmul.f32 %v2879_v58, %v2879_v58  ;;  %v7873_v12 = vld [vmem:[%s10287_s10 + $0x58] sm:$0xff]  }
0x14d3   :  { %7350 = vmatpush3.bf16.msra.mxu0 %v7871_v32 }
0x14d4   :  { %v2880_v23 = vsub.f32 %v9361_v37, %v2874_v28  ;;  %v2895_v17 = vsel %vm270_vm1, %v2885_v13, 0.0  ;;  %7351 = vmatprep.subr.bf16.mxu0 %v8265_v41  ;;  %v7874_v28 = vld [vmem:[%s10287_s10 + $0x60] sm:$0xff]   ;;  %v7875_v13 = vld [vmem:[%s10287_s10 + $0x68] sm:$0xff]  }
0x14d5   :  { %2896 = vadd.xlane.f32.xlu1 %v2895_v17  ;;  %v7877_v17 = vld [vmem:[%s10287_s10 + $0x78] sm:$0xff]  }
0x14d6   :  { %v2886_v51 = vmul.f32 %v2880_v23, %v2880_v23 }
0x14d8   :  { %v2898_v9 = vsel %vm270_vm1, %v2886_v51, 0.0  ;;  %v9453_v51 = vld [vmem:[%s10288_s6 + $0x1] ss:$0 sm:$0xff] }
0x14d9   :  { %2899 = vadd.xlane.f32.xlu0 %v2898_v9 }
0x14e6   :  { %7774 = vrot.lane.b32.xlu1 %v7773_v43, %s10335_s3 }
0x1538   :  { %v2891_v18 = vpop.xlane.xlu1 %2890 }
0x1539   :  { %v2907_v55 = vmul.f32 0.03125, %v2891_v18 }
0x153a   :  { %v2894_v2 = vpop.xlane.xlu0 %2893 }
0x153b   :  { %v2913_v20 = vadd.f32 1e-05, %v2907_v55  ;;  %v2908_v5 = vmul.f32 0.03125, %v2894_v2 }
0x153d   :  { %8078 = vrsqrt.f32 %v2913_v20  ;;  %v2914_v30 = vadd.f32 1e-05, %v2908_v5 }
0x153f   :  { %8080 = vrsqrt.f32 %v2914_v30 }
0x1547   :  { %v8079_v25 = vpop.eup %8078 }
0x1548   :  { %v2925_v39 = vmul.f32 %v8079_v25, %v2877_v8 }
0x1549   :  { %v8081_v45 = vpop.eup %8080 }
0x154a   :  { %v2935_v43 = vmul.f32 %v9391_v27, %v2925_v39  ;;  %v2926_v16 = vmul.f32 %v8081_v45, %v2878_v0 }
0x154c   :  { %v2936_v61 = vmul.f32 %v9391_v27, %v2926_v16  ;;  %v2945_v33 = vadd.f32 %v9396_v63, %v2935_v43 }
0x154e   :  { %v2946_v35 = vadd.f32 %v9396_v63, %v2936_v61 }
0x1550   :  { %v2951_v42 = vpack.c.bf16 %v2946_v35, %v2945_v33 }
0x1552   :  { %7336 = vmatmul.mubr.msk.bf16.vlgmr.msra.gmra.mrb[68].mxu1 %vm270_vm1, %v2951_v42 }
0x1553   :  { %7339 = vmatprep.mubr.msk.bf16.mxu1 %vm8266_vm2, %v8265_v41 }
0x1562   :  { %v2897_v49 = vpop.xlane.xlu1 %2896 }
0x1563   :  { %v2909_v31 = vmul.f32 0.03125, %v2897_v49 }
0x1565   :  { %v2915_v10 = vadd.f32 1e-05, %v2909_v31 }
0x1566   :  { %v7775_v62 = vpop.permute.xlu1 %7774  ;;  %v2900_v26 = vpop.xlane.xlu0 %2899 }
0x1567   :  { %8082 = vrsqrt.f32 %v2915_v10  ;;  %v7777_v15 = vunpack.i.h.bf16 %v7775_v62  ;;  %v7776_v40 = vunpack.i.l.bf16 %v7775_v62  ;;  %v2910_v36 = vmul.f32 0.03125, %v2900_v26 }
0x1569   :  { %v2761_v19 = vsel %vm666_vm3, %v9318_v60, %v7777_v15  ;;  %v2760_v6 = vsel %vm666_vm3, %v9323_v46, %v7776_v40  ;;  %v2916_v8 = vadd.f32 1e-05, %v2910_v36 }
0x156a   :  { %v2764_v34 = vpack.c.bf16 %v2761_v19, %v2760_v6 }
0x156b   :  { %8084 = vrsqrt.f32 %v2916_v8 }
0x156c   :  { %7328 = vmatmul.mubr.msk.bf16.gmra.mrb[76].mxu0 %vm270_vm1, %v2764_v34 }
0x156d   :  { %7363 = vmatprep.mubr.msk.bf16.mxu0 %vm8266_vm2, %v8265_v41 }
0x1571   :  { %v8083_v0 = vpop.eup %8082 }
0x1572   :  { %v2927_v48 = vmul.f32 %v8083_v0, %v2879_v58  ;;  %v7872_v58 = vld [vmem:[%s10287_s10 + $0x50] sm:$0xff]  }
0x1573   :  { %7352 = vmatpush3.bf16.msra.mxu0 %v7872_v58 }
0x1574   :  { %v2937_v38 = vmul.f32 %v9391_v27, %v2927_v48  ;;  %7353 = vmatprep.subr.bf16.mxu0 %v8265_v41 }
0x1575   :  { %v8085_v54 = vpop.eup %8084 }
0x1576   :  { %v2928_v1 = vmul.f32 %v8085_v54, %v2880_v23  ;;  %v2947_v60 = vadd.f32 %v9396_v63, %v2937_v38  ;;  %v7876_v23 = vld [vmem:[%s10287_s10 + $0x70] sm:$0xff]  }
0x1577   :  { %7354 = vmatpush3.bf16.msra.mxu0 %v7873_v12 }
0x1578   :  { %v2938_v21 = vmul.f32 %v9391_v27, %v2928_v1  ;;  %7355 = vmatprep.subr.bf16.mxu0 %v8265_v41 }
0x157a   :  { %v2948_v46 = vadd.f32 %v9396_v63, %v2938_v21 }
0x157b   :  { %7356 = vmatpush3.bf16.msra.mxu0 %v7874_v28 }
0x157c   :  { %v2952_v22 = vpack.c.bf16 %v2948_v46, %v2947_v60  ;;  %7357 = vmatprep.subr.bf16.mxu0 %v8265_v41 }
0x157e   :  { %7340 = vmatmul.mubr.msk.bf16.gmra.mrb[72].mxu1 %vm270_vm1, %v2952_v22 }
0x157f   :  { %7343 = vmatprep.mubr.msk.bf16.mxu1 %vm8266_vm2, %v8265_v41  ;;  %7358 = vmatpush3.bf16.msra.mxu0 %v7875_v13  ;;  %v9466_v13 = vld [vmem:[%s10289_s13 + $0x8] sm:$0xff] }
0x1580   :  { %7359 = vmatprep.subr.bf16.mxu0 %v8265_v41 }
0x1583   :  { %7360 = vmatpush3.bf16.msra.mxu0 %v7876_v23  ;;  %v3356_v23 = vsel %vm270_vm1, %v9466_v13, 0.0 }
0x1584   :  { %7361 = vmatprep.subr.bf16.mxu0 %v8265_v41  ;;  %3357 = vadd.xlane.f32.xlu1 %v3356_v23 }
0x1587   :  { %7362 = vmatpush3.bf16.msra.mxu0 %v7877_v17 }
0x1588   :  { %7403 = vmatprep.subr.bf16.mxu0 %v8265_v41 }
0x1625   :  { %v3015_v9 = vpop.f32.mrb[68].mxu1 }
0x1626   :  { %v3016_v18 = vadd.f32 %v9453_v51, %v3015_v9  ;;  %v7337_v55 = vpop.f32.mrb[69].mxu1 }
0x1627   :  { %v3018_v2 = vpop.f32.mrb[70].mxu1 }
0x1628   :  { %v6722_v20 = vmul.f32 -1.702, %v3016_v18  ;;  %v3019_v5 = vadd.f32 %v9453_v51, %v3018_v2  ;;  %v7338_v30 = vpop.f32.mrb[71].mxu1  ;;  %v3092_v2 = vrot.slane %v9387_v59, %v9001_v4 }
0x162a   :  { %v3050_v25 = vmul.f32 1.442695, %v6722_v20  ;;  %v6723_v39 = vmul.f32 -1.702, %v3019_v5 }
0x162c   :  { %8086 = vpow2.f32 %v3050_v25  ;;  %v3052_v45 = vmul.f32 1.442695, %v6723_v39 }
0x162e   :  { %8088 = vpow2.f32 %v3052_v45 }
0x1636   :  { %v8087_v43 = vpop.eup %8086 }
0x1637   :  { %v3062_v16 = vadd.f32 1.0, %v8087_v43 }
0x1638   :  { %v8089_v61 = vpop.eup %8088 }
0x1639   :  { %8090 = vrcp.f32 %v3062_v16  ;;  %v3063_v33 = vadd.f32 1.0, %v8089_v61 }
0x163b   :  { %8092 = vrcp.f32 %v3063_v33 }
0x163f   :  { %v2840_v35 = vpop.f32.mrb[76].mxu0 }
0x1640   :  { %v7329_v42 = vpop.f32.mrb[77].mxu0  ;;  %v2841_v16 = vadd.f32 %v2840_v35, %v9346_v7 }
0x1641   :  { %v2843_v49 = vpop.f32.mrb[78].mxu0 }
0x1642   :  { %v7330_v31 = vpop.f32.mrb[79].mxu0  ;;  %v2844_v59 = vadd.f32 %v2843_v49, %v9346_v7 }
0x1643   :  { %v8091_v10 = vpop.eup %8090  ;;  %v2851_v31 = vadd.f32 %v2841_v16, %v9026_v47  ;;  %v3316_v47 = vld [vmem:[%s10289_s13 + $0x10] sm:$0xff] }
0x1644   :  { %v3080_v26 = vmul.f32 %v8091_v10, %v3016_v18  ;;  %v3359_v7 = vsel %vm270_vm1, %v3316_v47, 0.0 }
0x1645   :  { %v8093_v62 = vpop.eup %8092 }
0x1646   :  { %v3081_v15 = vmul.f32 %v8093_v62, %v3019_v5  ;;  %v2852_v62 = vadd.f32 %v2844_v59, %v9029_v53  ;;  %v3317_v53 = vld [vmem:[%s10289_s13 + $0x18] sm:$0xff]  ;;  %v7878_v59 = vld [vmem:[%s10290_s12] sm:$0xff]  }
0x1647   :  { %v3362_v49 = vsel %vm270_vm1, %v3317_v53, 0.0  ;;  %7376 = vmatpush3.bf16.msra.mxu1 %v7878_v59 }
0x1648   :  { %v3086_v40 = vpack.c.bf16 %v3081_v15, %v3080_v26  ;;  %v2868_v35 = vsel %vm270_vm1, %v2852_v62, 0.0  ;;  %7377 = vmatprep.subr.bf16.mxu1 %v8265_v41 }
0x164a   :  { %7364 = vmatmul.mubr.bf16.vlgmr.msra.gmra.mrb[80].mxu0 %v3086_v40 }
0x164b   :  { %7367 = vmatprep.mubr.msk.bf16.mxu0 %vm8266_vm2, %v8265_v41 }
0x1651   :  { %v3023_v36 = vpop.f32.mrb[72].mxu1 }
0x1652   :  { %v3024_v19 = vadd.f32 %v9453_v51, %v3023_v36  ;;  %v7341_v6 = vpop.f32.mrb[73].mxu1 }
0x1653   :  { %v3026_v8 = vpop.f32.mrb[74].mxu1 }
0x1654   :  { %v6724_v34 = vmul.f32 -1.702, %v3024_v19  ;;  %v3027_v0 = vadd.f32 %v9453_v51, %v3026_v8  ;;  %v7342_v48 = vpop.f32.mrb[75].mxu1 }
0x1656   :  { %v3054_v54 = vmul.f32 1.442695, %v6724_v34  ;;  %v6725_v1 = vmul.f32 -1.702, %v3027_v0 }
0x1658   :  { %8094 = vpow2.f32 %v3054_v54  ;;  %v3056_v38 = vmul.f32 1.442695, %v6725_v1 }
0x165a   :  { %8096 = vpow2.f32 %v3056_v38 }
0x1662   :  { %v8095_v21 = vpop.eup %8094 }
0x1663   :  { %v3064_v60 = vadd.f32 1.0, %v8095_v21 }
0x1664   :  { %v8097_v46 = vpop.eup %8096 }
0x1665   :  { %8098 = vrcp.f32 %v3064_v60  ;;  %v3065_v22 = vadd.f32 1.0, %v8097_v46  ;;  %v3358_v46 = vpop.xlane.xlu1 %3357 }
0x1667   :  { %8100 = vrcp.f32 %v3065_v22 }
0x166f   :  { %v8099_v29 = vpop.eup %8098 }
0x1670   :  { %v3082_v58 = vmul.f32 %v8099_v29, %v3024_v19 }
0x1671   :  { %v8101_v32 = vpop.eup %8100 }
0x1672   :  { %v3083_v12 = vmul.f32 %v8101_v32, %v3027_v0 }
0x1674   :  { %v3087_v28 = vpack.c.bf16 %v3083_v12, %v3082_v58 }
0x1676   :  { %7368 = vmatmul.mubr.bf16.gmra.mrb[84].mxu0 %v3087_v28  ;;  %v3366_v28 = vmul.f32 0.03125, %v3358_v46 }
0x1677   :  { %7371 = vmatprep.mubr.msk.bf16.mxu0 %vm8266_vm2, %v8265_v41 }
0x171d   :  { %v3175_v17 = vpop.f32.mrb[80].mxu0 }
0x171e   :  { %v7365_v9 = vpop.f32.mrb[81].mxu0  ;;  %v3176_v25 = vadd.f32 %v3175_v17, %v3092_v2 }
0x171f   :  { %v3178_v18 = vpop.f32.mrb[82].mxu0 }
0x1720   :  { %v7366_v55 = vpop.f32.mrb[83].mxu0  ;;  %v3194_v61 = vadd.f32 %v3176_v25, %v9350_v50  ;;  %v3314_v50 = vld [vmem:[%s10289_s13] sm:$0xff] }
0x1721   :  { %v3353_v26 = vsel %vm270_vm1, %v3314_v50, 0.0  ;;  %v9516_v55 = vsub.f32 %v9466_v13, %v3366_v28 }
0x1749   :  { %v3182_v20 = vpop.f32.mrb[84].mxu0 }
0x174a   :  { %v7369_v5 = vpop.f32.mrb[85].mxu0 }
0x174b   :  { %v3184_v30 = vpop.f32.mrb[86].mxu0 }
0x174c   :  { %v3185_v39 = vadd.f32 %v3184_v30, %v3092_v2  ;;  %v7370_v45 = vpop.f32.mrb[87].mxu0 }
0x174d   :  { %v3374_v45 = vmul.f32 %v9516_v55, %v9516_v55 }
0x174e   :  { %v3195_v43 = vadd.f32 %v3185_v39, %v9361_v37  ;;  %v2865_v37 = vsel %vm270_vm1, %v2851_v31, 0.0 }
0x174f   :  { %v3380_v13 = vsel %vm270_vm1, %v3374_v45, 0.0 }
0x1750   :  { %v3200_v33 = vrot.slane %v3195_v43, 7 }
0x1752   :  { %v3202_v42 = vsel %vm3201_vm7, %v3200_v33, %v3194_v61 }
0x1753   :  { %v3205_v10 = vsel %vm3204_vm8, %v3202_v42, 0.0 }
0x1754   :  { %3206 = vadd.xlane.f32.xlu0 %v3205_v10  ;;  %v7879_v10 = vld [vmem:[%s10290_s12 + $0x8] sm:$0xff]  }
0x1755   :  { %7378 = vmatpush3.bf16.msra.mxu1 %v7879_v10 }
0x1758   :  { %2866 = vadd.xlane.f32.xlu0 %v2865_v37 }
0x175c   :  { %2869 = vadd.xlane.f32.xlu0 %v2868_v35 }
0x1760   :  { %3354 = vadd.xlane.f32.xlu0 %v3353_v26 }
0x1764   :  { %3360 = vadd.xlane.f32.xlu0 %v3359_v7 }
0x1768   :  { %3363 = vadd.xlane.f32.xlu0 %v3362_v49 }
0x17e1   :  { %v3207_v15 = vpop.xlane.xlu0 %3206 }
0x17e2   :  { %v3208_v40 = vmul.f32 0.03125, %v3207_v15 }
0x17e4   :  { %v3210_v36 = vrot.slane %v3208_v40, 1  ;;  %v9496_v34 = vsub.f32 %v3194_v61, %v3208_v40 }
0x17e5   :  { %v2867_v19 = vpop.xlane.xlu0 %2866 }
0x17e6   :  { %v9494_v6 = vsub.f32 %v3195_v43, %v3210_v36  ;;  %v2875_v8 = vmul.f32 0.03125, %v2867_v19  ;;  %v3215_v60 = vmul.f32 %v9496_v34, %v9496_v34 }
0x17e8   :  { %v9498_v0 = vsub.f32 %v2851_v31, %v2875_v8  ;;  %v3216_v48 = vmul.f32 %v9494_v6, %v9494_v6 }
0x17e9   :  { %v2870_v54 = vpop.xlane.xlu0 %2869 }
0x17ea   :  { %v2876_v1 = vmul.f32 0.03125, %v2870_v54  ;;  %v2887_v38 = vmul.f32 %v9498_v0, %v9498_v0  ;;  %v3219_v21 = vrot.slane %v3216_v48, 7 }
0x17ec   :  { %v9506_v22 = vsub.f32 %v2852_v62, %v2876_v1  ;;  %v2901_v29 = vsel %vm270_vm1, %v2887_v38, 0.0  ;;  %v3220_v32 = vsel %vm3201_vm7, %v3219_v21, %v3215_v60  ;;  %v9545_v62 = vld [vmem:[%s10291_s18] sm:$0xff]  }
0x17ed   :  { %2902 = vadd.xlane.f32.xlu0 %v2901_v29  ;;  %v3355_v58 = vpop.xlane.xlu0 %3354  ;;  %v3222_v23 = vsel %vm3204_vm8, %v3220_v32, 0.0  ;;  %7383 = vmatprep.subr.bf16.mxu1 %v9545_v62  ;;  %v6736_v38 = vld [vmem:[%s10292_s11] ss:$0 sm:$0xff] }
0x17ee   :  { %v3365_v12 = vmul.f32 0.03125, %v3355_v58  ;;  %v2888_v9 = vmul.f32 %v9506_v22, %v9506_v22 }
0x17f0   :  { %v9511_v17 = vsub.f32 %v3314_v50, %v3365_v12  ;;  %v2904_v5 = vsel %vm270_vm1, %v2888_v9, 0.0  ;;  %v6737_v12 = vld [vmem:[%s10292_s11 + $0x1] ss:$0 sm:$0xff] }
0x17f1   :  { %3223 = vadd.xlane.f32.xlu0 %v3222_v23  ;;  %v3361_v18 = vpop.xlane.xlu0 %3360 }
0x17f2   :  { %v3373_v2 = vmul.f32 %v9511_v17, %v9511_v17  ;;  %v3367_v20 = vmul.f32 0.03125, %v3361_v18 }
0x17f4   :  { %v3377_v25 = vsel %vm270_vm1, %v3373_v2, 0.0  ;;  %v9522_v39 = vsub.f32 %v3316_v47, %v3367_v20  ;;  %v9560_v20 = vld [vmem:[%s10293_s15] sm:$0x3f] }
0x17f5   :  { %2905 = vadd.xlane.f32.xlu0 %v2904_v5  ;;  %v3364_v30 = vpop.xlane.xlu0 %3363 }
0x17f6   :  { %v3368_v43 = vmul.f32 0.03125, %v3364_v30  ;;  %v3375_v61 = vmul.f32 %v9522_v39, %v9522_v39 }
0x17f8   :  { %v9527_v16 = vsub.f32 %v3317_v53, %v3368_v43  ;;  %v3383_v33 = vsel %vm270_vm1, %v3375_v61, 0.0 }
0x17f9   :  { %3378 = vadd.xlane.f32.xlu0 %v3377_v25 }
0x17fa   :  { %v3376_v42 = vmul.f32 %v9527_v16, %v9527_v16 }
0x17fc   :  { %v3386_v31 = vsel %vm270_vm1, %v3376_v42, 0.0 }
0x17fd   :  { %3381 = vadd.xlane.f32.xlu0 %v3380_v13  ;;  %v3408_v13 = vrot.slane %v9560_v20, %v8573_v57 }
0x1801   :  { %3384 = vadd.xlane.f32.xlu0 %v3383_v33 }
0x1805   :  { %3387 = vadd.xlane.f32.xlu0 %v3386_v31 }
0x187a   :  { %v2903_v37 = vpop.xlane.xlu0 %2902 }
0x187b   :  { %v2911_v50 = vmul.f32 0.03125, %v2903_v37 }
0x187d   :  { %v2917_v35 = vadd.f32 1e-05, %v2911_v50 }
0x187e   :  { %v3224_v26 = vpop.xlane.xlu0 %3223 }
0x187f   :  { %v3225_v47 = vmul.f32 0.03125, %v3224_v26  ;;  %8102 = vrsqrt.f32 %v2917_v35 }
0x1881   :  { %v3226_v7 = vadd.f32 1e-05, %v3225_v47  ;;  %v3416_v47 = vrot.slane %v9560_v20, %v8584_v3 }
0x1882   :  { %v2906_v53 = vpop.xlane.xlu0 %2905 }
0x1883   :  { %8104 = vrsqrt.f32 %v3226_v7  ;;  %v2912_v49 = vmul.f32 0.03125, %v2906_v53 }
0x1885   :  { %v2918_v15 = vadd.f32 1e-05, %v2912_v49 }
0x1886   :  { %v3379_v40 = vpop.xlane.xlu0 %3378 }
0x1887   :  { %8106 = vrsqrt.f32 %v2918_v15  ;;  %v3389_v36 = vmul.f32 0.03125, %v3379_v40 }
0x1889   :  { %v3393_v19 = vadd.f32 1e-05, %v3389_v36  ;;  %v8103_v48 = vpop.eup %8102 }
0x188a   :  { %v3382_v8 = vpop.xlane.xlu0 %3381  ;;  %v2929_v32 = vmul.f32 %v8103_v48, %v9498_v0 }
0x188b   :  { %8108 = vrsqrt.f32 %v3393_v19  ;;  %v3390_v54 = vmul.f32 0.03125, %v3382_v8 }
0x188c   :  { %v2939_v5 = vmul.f32 %v9391_v27, %v2929_v32 }
0x188d   :  { %v8105_v1 = vpop.eup %8104  ;;  %v3394_v21 = vadd.f32 1e-05, %v3390_v54 }
0x188e   :  { %v3229_v60 = vrot.slane %v8105_v1, 1  ;;  %v3232_v46 = vmul.f32 %v8105_v1, %v9496_v34  ;;  %v3385_v29 = vpop.xlane.xlu0 %3384  ;;  %v2949_v42 = vadd.f32 %v9396_v63, %v2939_v5  ;;  %v6741_v5 = vld [vmem:[%s10295_s16] ss:$0 sm:$0xff] }
0x188f   :  { %8110 = vrsqrt.f32 %v3394_v21  ;;  %v3391_v58 = vmul.f32 0.03125, %v3385_v29 }
0x1890   :  { %v3233_v28 = vmul.f32 %v3229_v60, %v9494_v6  ;;  %v3238_v23 = vmul.f32 %v6736_v38, %v3232_v46 }
0x1891   :  { %v8107_v9 = vpop.eup %8106  ;;  %v3395_v18 = vadd.f32 1e-05, %v3391_v58 }
0x1892   :  { %v3239_v2 = vmul.f32 %v6736_v38, %v3233_v28  ;;  %v3388_v34 = vpop.xlane.xlu0 %3387  ;;  %v2930_v0 = vmul.f32 %v8107_v9, %v9506_v22  ;;  %v3244_v30 = vadd.f32 %v6737_v12, %v3238_v23 }
0x1893   :  { %8112 = vrsqrt.f32 %v3395_v18  ;;  %v3392_v25 = vmul.f32 0.03125, %v3388_v34 }
0x1894   :  { %v3245_v45 = vadd.f32 %v6737_v12, %v3239_v2  ;;  %v2940_v6 = vmul.f32 %v9391_v27, %v2930_v0  ;;  %v3246_v59 = vpack.c.bf16 %v3244_v30, %v3244_v30 }
0x1895   :  { %v8109_v43 = vpop.eup %8108  ;;  %v3396_v61 = vadd.f32 1e-05, %v3392_v25 }
0x1896   :  { %v3247_v33 = vpack.c.bf16 %v3245_v45, %v3245_v45  ;;  %v2950_v31 = vadd.f32 %v9396_v63, %v2940_v6  ;;  %v3401_v22 = vmul.f32 %v8109_v43, %v9511_v17  ;;  %v3254_v7 = vunpack.c.l.b16 %v3246_v59 }
0x1897   :  { %8114 = vrsqrt.f32 %v3396_v61 }
0x1898   :  { %v3255_v10 = vunpack.c.l.b16 %v3247_v33  ;;  %v2953_v37 = vpack.c.bf16 %v2950_v31, %v2949_v42  ;;  %v3409_v26 = vmul.f32 %v3408_v13, %v3401_v22 }
0x1899   :  { %v8111_v50 = vpop.eup %8110 }
0x189a   :  { %v3256_v35 = vrot.slane %v3255_v10, 7  ;;  %7344 = vmatmul.mubr.msk.bf16.gmra.mrb[76].mxu1 %vm270_vm1, %v2953_v37  ;;  %v3402_v27 = vmul.f32 %v8111_v50, %v9516_v55  ;;  %v3417_v15 = vadd.f32 %v3416_v47, %v3409_v26  ;;  %v7881_v55 = vld [vmem:[%s10291_s18 + $0x8] sm:$0xff]  }
0x189b   :  { %7379 = vmatprep.mubr.msk.bf16.mxu1 %vm8266_vm2, %v8265_v41 }
0x189c   :  { %v3410_v63 = vmul.f32 %v3408_v13, %v3402_v27  ;;  %v3257_v53 = vsel %vm3201_vm7, %v3256_v35, %v3254_v7 }
0x189d   :  { %v8113_v17 = vpop.eup %8112  ;;  %v3258_v36 = vpack.c.b16 %v3257_v53, %v3257_v53 }
0x189e   :  { %v3403_v49 = vmul.f32 %v8113_v17, %v9522_v39  ;;  %v3418_v40 = vadd.f32 %v3416_v47, %v3410_v63 }
0x18a0   :  { %v3421_v19 = vpack.c.bf16 %v3418_v40, %v3417_v15  ;;  %v3411_v48 = vmul.f32 %v3408_v13, %v3403_v49 }
0x18a1   :  { %v8115_v8 = vpop.eup %8114 }
0x18a2   :  { %v3404_v54 = vmul.f32 %v8115_v8, %v9527_v16  ;;  %7380 = vmatmul.mubr.msk.bf16.vlgmr.msra.gmra.mrb[80].mxu1 %vm270_vm1, %v3258_v36  ;;  %v3419_v39 = vadd.f32 %v3416_v47, %v3411_v48 }
0x18a3   :  { %7384 = vmatpush3.bf16.msra.mxu1 %v9545_v62  ;;  %7387 = vmatprep.mubr.msk.bf16.mxu1 %vm270_vm1, %v3421_v19 }
0x18a4   :  { %v3412_v1 = vmul.f32 %v3408_v13, %v3404_v54  ;;  %7385 = vmatprep.subr.bf16.mxu1 %v7881_v55 }
0x18a6   :  { %v3420_v38 = vadd.f32 %v3416_v47, %v3412_v1 }
0x18a7   :  { %7386 = vmatpush3.bf16.msra.mxu1 %v7881_v55 }
0x18a8   :  { %v3422_v21 = vpack.c.bf16 %v3420_v38, %v3419_v39  ;;  %7391 = vmatprep.subr.bf16.mxu1 %v8265_v41 }
0x18aa   :  { %7388 = vmatmul.mubr.msk.bf16.vlgmr.msra.gmra.mrb[84].mxu1 %vm270_vm1, %v3422_v21 }
0x18ab   :  { %7393 = vmatprep.mubr.msk.bf16.mxu1 %vm8266_vm2, %v8265_v41 }
0x196d   :  { %v3031_v16 = vpop.f32.mrb[76].mxu1 }
0x196e   :  { %v3032_v62 = vadd.f32 %v9453_v51, %v3031_v16  ;;  %v7345_v60 = vpop.f32.mrb[77].mxu1 }
0x196f   :  { %v3034_v46 = vpop.f32.mrb[78].mxu1 }
0x1970   :  { %v6726_v29 = vmul.f32 -1.702, %v3032_v62  ;;  %v3035_v32 = vadd.f32 %v9453_v51, %v3034_v46  ;;  %v7346_v58 = vpop.f32.mrb[79].mxu1 }
0x1972   :  { %v3058_v12 = vmul.f32 1.442695, %v6726_v29  ;;  %v6727_v28 = vmul.f32 -1.702, %v3035_v32 }
0x1974   :  { %8116 = vpow2.f32 %v3058_v12  ;;  %v3060_v23 = vmul.f32 1.442695, %v6727_v28 }
0x1975   :  { %v9595_v9 = vpop.f32.mrb[80].mxu1 }
0x1976   :  { %8118 = vpow2.f32 %v3060_v23  ;;  %v6492_v18 = vmul.f32 %v9595_v9, %v9595_v9  ;;  %v7381_v2 = vpop.f32.mrb[81].mxu1  ;;  %6586 = vst.msk [vmem:[%s10294_s24] sm:$0x3] %vm6493_vm9, %v9595_v9 }
0x1977   :  { %v3311_v34 = vpop.f32.mrb[82].mxu1 }
0x1978   :  { %v7382_v51 = vpop.f32.mrb[83].mxu1  ;;  %v9603_v0 = vsel %vm6493_vm9, %v6492_v18, 0.0 }
0x197d   :  { %v7389_v30 = vpop.f32.mrb[84].mxu1 }
0x197e   :  { %v8117_v25 = vpop.eup %8116  ;;  %v3490_v45 = vadd.f32 %v7389_v30, %v6741_v5  ;;  %v3481_v6 = vpop.f32.mrb[85].mxu1 }
0x197f   :  { %v3066_v43 = vadd.f32 1.0, %v8117_v25  ;;  %v7390_v13 = vpop.f32.mrb[86].mxu1  ;;  %v3482_v22 = vadd.f32 %v6741_v5, %v3481_v6 }
0x1980   :  { %v8119_v61 = vpop.eup %8118  ;;  %v3493_v33 = vadd.f32 %v7390_v13, %v6741_v5  ;;  %v3484_v42 = vpop.f32.mrb[87].mxu1  ;;  %v3498_v59 = vmul.f32 0.25, %v3490_v45  ;;  %v9612_v7 = vpack.c.bf16 %v3490_v45, %v3490_v45 }
0x1981   :  { %8120 = vrcp.f32 %v3066_v43  ;;  %v3067_v31 = vadd.f32 1.0, %v8119_v61  ;;  %v3485_v50 = vadd.f32 %v6741_v5, %v3484_v42  ;;  %v3496_v27 = vmul.f32 0.25, %v3482_v22 }
0x1982   :  { %v7783_v10 = vpack.i.bf16 %v3493_v33, %v3490_v45  ;;  %v9608_v37 = vmul.f32 0.25, %v3493_v33  ;;  %v3540_v17 = vpack.c.bf16 %v3482_v22, %v3482_v22  ;;  %v9622_v55 = vpack.c.bf16 %v3493_v33, %v3493_v33 }
0x1983   :  { %8122 = vrcp.f32 %v3067_v31  ;;  %v3497_v26 = vmul.f32 0.25, %v3485_v50  ;;  %v7778_v47 = vpack.i.bf16 %v3485_v50, %v3482_v22  ;;  %v9618_v15 = vpack.c.bf16 %v3485_v50, %v3485_v50 }
0x1984   :  { %v7793_v35 = vpack.i.bf16 %v9608_v37, %v3498_v59  ;;  %7784 = vrot.lane.b32.xlu0 %v7783_v10, %s8267_s26  ;;  %v3518_v58 = vpack.c.bf16 %v3498_v59, %v3498_v59  ;;  %v3516_v23 = vpack.c.bf16 %v3496_v27, %v3496_v27  ;;  %v3519_v5 = vpack.c.bf16 %v9608_v37, %v9608_v37 }
0x1985   :  { %v7788_v63 = vpack.i.bf16 %v3497_v26, %v3496_v27  ;;  %7779 = vrot.lane.b32.xlu1 %v7778_v47, %s8267_s26  ;;  %v3517_v34 = vpack.c.bf16 %v3497_v26, %v3497_v26 }
0x1988   :  { %3647 = vrot.lane.b32.xlu0 %v9612_v7, %s8268_s28 }
0x1989   :  { %3549 = vrot.lane.b32.xlu1 %v3540_v17, %s8268_s28 }
0x198b   :  { %v8121_v53 = vpop.eup %8120 }
0x198c   :  { %v3084_v40 = vmul.f32 %v8121_v53, %v3032_v62 }
0x198d   :  { %v8123_v49 = vpop.eup %8122  ;;  %3598 = vrot.lane.b32.xlu1 %v9618_v15, %s8268_s28 }
0x198e   :  { %v3085_v36 = vmul.f32 %v8123_v49, %v3035_v32 }
0x1990   :  { %v3088_v19 = vpack.c.bf16 %v3085_v36, %v3084_v40  ;;  %v9694_v36 = vsel %vm3320_vm10, 0.0, %v8269_v14 }
0x1991   :  { %3696 = vrot.lane.b32.xlu1 %v9622_v55, %s8268_s28 }
0x1992   :  { %7372 = vmatmul.mubr.bf16.gmra.mrb[88].mxu0 %v3088_v19 }
0x1993   :  { %7405 = vmatprep.mubr.msk.bf16.mxu0 %vm8266_vm2, %v8265_v41 }
0x19f6   :  { %v7785_v8 = vpop.permute.xlu0 %7784 }
0x19f7   :  { %v7780_v48 = vpop.permute.xlu1 %7779  ;;  %v7786_v21 = vunpack.i.l.bf16 %v7785_v8  ;;  %v7787_v29 = vunpack.i.h.bf16 %v7785_v8 }
0x19f8   :  { %v7782_v54 = vunpack.i.h.bf16 %v7780_v48  ;;  %v7781_v1 = vunpack.i.l.bf16 %v7780_v48 }
0x19f9   :  { %v9639_v32 = vpack.c.bf16 %v7786_v21, %v7786_v21  ;;  %v9646_v12 = vpack.c.bf16 %v7787_v29, %v7787_v29 }
0x19fa   :  { %v3648_v39 = vpop.permute.xlu0 %3647  ;;  %v9629_v16 = vpack.c.bf16 %v7782_v54, %v7782_v54  ;;  %v9631_v62 = vpack.c.bf16 %v7781_v1, %v7781_v1 }
0x19fb   :  { %v3653_v38 = vsel %vm666_vm3, %v3648_v39, 0  ;;  %v3550_v60 = vpop.permute.xlu1 %3549 }
0x19fc   :  { %7404 = vmatpush3.bf16.xpose.msra.mxu0 %v3653_v38  ;;  %v3555_v46 = vsel %vm666_vm3, %v3550_v60, 0  ;;  %3745 = vrot.lane.b32.xlu0 %v9631_v62, %s8268_s28 }
0x19fd   :  { %7415 = vmatprep.subr.bf16.mxu0 %v8265_v41  ;;  %3794 = vrot.lane.b32.xlu1 %v9629_v16, %s8268_s28 }
0x19fe   :  { %7392 = vmatpush3.bf16.xpose.msra.mxu1 %v3555_v46 }
0x19ff   :  { %7397 = vmatprep.subr.bf16.mxu1 %v8265_v41  ;;  %v3599_v28 = vpop.permute.xlu1 %3598 }
0x1a00   :  { %7789 = vrot.lane.b32.xlu0 %v7788_v63, %s8267_s26  ;;  %v3604_v18 = vsel %vm666_vm3, %v3599_v28, 0 }
0x1a01   :  { %3843 = vrot.lane.b32.xlu1 %v9639_v32, %s8268_s28 }
0x1a03   :  { %7406 = vmatmul.mubr.msk.bf16.vlgmr.msra.gmra.mrb[92].mxu0 %vm666_vm3, %v3518_v58  ;;  %v3697_v2 = vpop.permute.xlu1 %3696 }
0x1a04   :  { %7417 = vmatprep.mubr.msk.bf16.mxu0 %vm8266_vm2, %v8265_v41  ;;  %3892 = vrot.lane.b32.xlu0 %v9646_v12, %s8268_s28  ;;  %v3702_v51 = vsel %vm666_vm3, %v3697_v2, 0 }
0x1a05   :  { %7794 = vrot.lane.b32.xlu1 %v7793_v35, %s8267_s26  ;;  %7394 = vmatmul.mubr.msk.bf16.vlgmr.msra.gmra.mrb[88].mxu1 %vm666_vm3, %v3516_v23 }
0x1a06   :  { %7398 = vmatpush3.bf16.xpose.msra.mxu1 %v3604_v18  ;;  %7399 = vmatprep.mubr.msk.bf16.mxu1 %vm8266_vm2, %v8265_v41 }
0x1a07   :  { %7409 = vmatprep.subr.bf16.mxu1 %v8265_v41 }
0x1a09   :  { %4037 = vrot.lane.b32.xlu1 %v3540_v17, %s10334_s4 }
0x1a0d   :  { %7400 = vmatmul.mubr.msk.bf16.vlgmr.msra.gmra.mrb[92].mxu1 %vm666_vm3, %v3517_v34 }
0x1a0e   :  { %7410 = vmatpush3.bf16.xpose.msra.mxu1 %v3702_v51  ;;  %7411 = vmatprep.mubr.msk.bf16.mxu1 %vm8266_vm2, %v8265_v41 }
0x1a0f   :  { %7421 = vmatprep.subr.bf16.mxu1 %v8265_v41 }
0x1a15   :  { %7412 = vmatmul.mubr.msk.bf16.vlgmr.msra.gmra.mrb[96].mxu1 %vm666_vm3, %v3519_v5 }
0x1a16   :  { %7423 = vmatprep.mubr.msk.bf16.mxu1 %vm8266_vm2, %v8265_v41 }
0x1a65   :  { %v3189_v30 = vpop.f32.mrb[88].mxu0 }
0x1a66   :  { %v7373_v25 = vpop.f32.mrb[89].mxu0 }
0x1a67   :  { %v3191_v45 = vpop.f32.mrb[90].mxu0 }
0x1a68   :  { %v7374_v6 = vpop.f32.mrb[91].mxu0 }
0x1a6e   :  { %v3746_v43 = vpop.permute.xlu0 %3745 }
0x1a6f   :  { %v3795_v13 = vpop.permute.xlu1 %3794  ;;  %v3751_v61 = vsel %vm666_vm3, %v3746_v43, 0 }
0x1a70   :  { %v3800_v33 = vsel %vm666_vm3, %v3795_v13, 0  ;;  %7416 = vmatpush3.bf16.xpose.msra.mxu0 %v3751_v61 }
0x1a71   :  { %7422 = vmatpush3.bf16.xpose.msra.mxu1 %v3800_v33  ;;  %7427 = vmatprep.subr.bf16.mxu0 %v8265_v41 }
0x1a72   :  { %7433 = vmatprep.subr.bf16.mxu1 %v8265_v41  ;;  %v7790_v31 = vpop.permute.xlu0 %7789 }
0x1a73   :  { %v3844_v42 = vpop.permute.xlu1 %3843  ;;  %v7792_v22 = vunpack.i.h.bf16 %v7790_v31  ;;  %v7791_v59 = vunpack.i.l.bf16 %v7790_v31 }
0x1a74   :  { %v3849_v27 = vsel %vm666_vm3, %v3844_v42, 0 }
0x1a75   :  { %v3521_v10 = vpack.c.bf16 %v7792_v22, %v7792_v22  ;;  %v3520_v37 = vpack.c.bf16 %v7791_v59, %v7791_v59 }
0x1a76   :  { %v3893_v35 = vpop.permute.xlu0 %3892 }
0x1a77   :  { %v7795_v50 = vpop.permute.xlu1 %7794  ;;  %v3898_v26 = vsel %vm666_vm3, %v3893_v35, 0  ;;  %7418 = vmatmul.mubr.msk.bf16.vlgmr.msra.gmra.mrb[96].mxu0 %vm666_vm3, %v3520_v37 }
0x1a78   :  { %7424 = vmatmul.mubr.msk.bf16.vlgmr.msra.gmra.mrb[100].mxu1 %vm666_vm3, %v3521_v10  ;;  %7428 = vmatpush3.bf16.xpose.msra.mxu0 %v3849_v27  ;;  %v7797_v47 = vunpack.i.h.bf16 %v7795_v50  ;;  %v7796_v63 = vunpack.i.l.bf16 %v7795_v50 }
0x1a79   :  { %7434 = vmatpush3.bf16.xpose.msra.mxu1 %v3898_v26  ;;  %7429 = vmatprep.mubr.msk.bf16.mxu0 %vm8266_vm2, %v8265_v41 }
0x1a7a   :  { %7435 = vmatprep.mubr.msk.bf16.mxu1 %vm8266_vm2, %v8265_v41  ;;  %7439 = vmatprep.subr.bf16.mxu0 %v8265_v41  ;;  %v3523_v53 = vpack.c.bf16 %v7797_v47, %v7797_v47  ;;  %v3522_v49 = vpack.c.bf16 %v7796_v63, %v7796_v63 }
0x1a7b   :  { %7445 = vmatprep.subr.bf16.mxu1 %v8265_v41  ;;  %v4038_v17 = vpop.permute.xlu1 %4037 }
0x1a7c   :  { %v4043_v40 = vsel %vm1077_vm6, %v4038_v17, 0 }
0x1a7f   :  { %7430 = vmatmul.mubr.msk.bf16.vlgmr.msra.gmra.mrb[100].mxu0 %vm666_vm3, %v3522_v49 }
0x1a80   :  { %7436 = vmatmul.mubr.msk.bf16.vlgmr.msra.gmra.mrb[104].mxu1 %vm666_vm3, %v3523_v53  ;;  %7440 = vmatpush3.bf16.msra.mxu0 %v4043_v40 }
0x1a81   :  { %7447 = vmatprep.mubr.msk.bf16.mxu1 %vm8266_vm2, %v8265_v41  ;;  %7441 = vmatprep.mubr.msk.bf16.mxu0 %vm8266_vm2, %v8265_v41 }
0x1a82   :  { %7451 = vmatprep.subr.bf16.mxu0 %v8265_v41 }
0x1ad6   :  { %v3689_v19 = vpop.f32.mrb[92].mxu0 }
0x1ad7   :  { %v9697_v8 = vadd.f32 %v3689_v19, %v9694_v36  ;;  %v7407_v48 = vpop.f32.mrb[93].mxu0 }
0x1ad8   :  { %v3692_v54 = vpop.f32.mrb[94].mxu0  ;;  %v3591_v38 = vpop.f32.mrb[88].mxu1 }
0x1ad9   :  { %v7408_v1 = vpop.f32.mrb[95].mxu0  ;;  %v3947_v39 = vsel %vm3940_vm11, %v9697_v8, -inf  ;;  %v9702_v21 = vadd.f32 %v3591_v38, %v9694_v36  ;;  %v7395_v52 = vpop.f32.mrb[89].mxu1 }
0x1ada   :  { %3948 = vmax.xlane.f32.xlu0 %v3947_v39  ;;  %v3594_v11 = vpop.f32.mrb[90].mxu1 }
0x1adb   :  { %v7396_v14 = vpop.f32.mrb[91].mxu1  ;;  %v3941_v60 = vsel %vm3940_vm11, %v9702_v21, -inf }
0x1ade   :  { %3942 = vmax.xlane.f32.xlu0 %v3941_v60 }
0x1ae0   :  { %v3640_v46 = vpop.f32.mrb[92].mxu1 }
0x1ae1   :  { %v3641_v29 = vadd.f32 %v3640_v46, %v9694_v36  ;;  %v7401_v58 = vpop.f32.mrb[93].mxu1 }
0x1ae2   :  { %v3643_v28 = vpop.f32.mrb[94].mxu1 }
0x1ae3   :  { %v7402_v23 = vpop.f32.mrb[95].mxu1  ;;  %v3944_v18 = vsel %vm3940_vm11, %v3641_v29, -inf }
0x1ae4   :  { %3945 = vmax.xlane.f32.xlu1 %v3944_v18 }
0x1ae8   :  { %v3738_v2 = vpop.f32.mrb[96].mxu1 }
0x1ae9   :  { %v3739_v34 = vadd.f32 %v3738_v2, %v9694_v36  ;;  %v7413_v51 = vpop.f32.mrb[97].mxu1 }
0x1aea   :  { %v3741_v5 = vpop.f32.mrb[98].mxu1 }
0x1aeb   :  { %v7414_v30 = vpop.f32.mrb[99].mxu1  ;;  %v3950_v25 = vsel %vm3940_vm11, %v3739_v34, -inf }
0x1aec   :  { %3951 = vmax.xlane.f32.xlu0 %v3950_v25 }
0x1b4a   :  { %v3787_v45 = vpop.f32.mrb[96].mxu0 }
0x1b4b   :  { %v3836_v6 = vpop.f32.mrb[100].mxu1  ;;  %v9711_v43 = vadd.f32 %v3787_v45, %v9694_v36  ;;  %v7419_v61 = vpop.f32.mrb[97].mxu0 }
0x1b4c   :  { %v3837_v13 = vadd.f32 %v3836_v6, %v9694_v36  ;;  %v7425_v33 = vpop.f32.mrb[101].mxu1  ;;  %v3790_v42 = vpop.f32.mrb[98].mxu0 }
0x1b4d   :  { %v3839_v31 = vpop.f32.mrb[102].mxu1  ;;  %v7420_v22 = vpop.f32.mrb[99].mxu0  ;;  %v3953_v37 = vsel %vm3940_vm11, %v9711_v43, -inf }
0x1b4e   :  { %v7426_v59 = vpop.f32.mrb[103].mxu1  ;;  %v3956_v10 = vsel %vm3940_vm11, %v3837_v13, -inf  ;;  %3954 = vmax.xlane.f32.xlu1 %v3953_v37 }
0x1b4f   :  { %3957 = vmax.xlane.f32.xlu0 %v3956_v10 }
0x1b52   :  { %v3885_v50 = vpop.f32.mrb[100].mxu0 }
0x1b53   :  { %v3934_v35 = vpop.f32.mrb[104].mxu1  ;;  %v3886_v27 = vadd.f32 %v3885_v50, %v9694_v36  ;;  %v7431_v47 = vpop.f32.mrb[101].mxu0 }
0x1b54   :  { %v3935_v26 = vadd.f32 %v3934_v35, %v9694_v36  ;;  %v7437_v63 = vpop.f32.mrb[105].mxu1  ;;  %v3888_v17 = vpop.f32.mrb[102].mxu0 }
0x1b55   :  { %v3937_v53 = vpop.f32.mrb[106].mxu1  ;;  %v7432_v49 = vpop.f32.mrb[103].mxu0  ;;  %v3959_v48 = vsel %vm3940_vm11, %v3886_v27, -inf }
0x1b56   :  { %v7438_v40 = vpop.f32.mrb[107].mxu1  ;;  %v3962_v19 = vsel %vm3940_vm11, %v3935_v26, -inf  ;;  %3960 = vmax.xlane.f32.xlu1 %v3959_v48 }
0x1b57   :  { %3963 = vmax.xlane.f32.xlu0 %v3962_v19 }
0x1b67   :  { %4133 = vrot.lane.b32.xlu1 %v9612_v7, %s10334_s4  ;;  %v3949_v54 = vpop.xlane.xlu0 %3948 }
0x1b68   :  { %v3967_v52 = vsub.f32 %v9697_v8, %v3949_v54 }
0x1b6a   :  { %v3977_v46 = vmul.f32 1.442695, %v3967_v52 }
0x1b6b   :  { %4181 = vrot.lane.b32.xlu1 %v9622_v55, %s10334_s4  ;;  %v3943_v39 = vpop.xlane.xlu0 %3942 }
0x1b6c   :  { %v3965_v58 = vsub.f32 %v9702_v21, %v3943_v39 }
0x1b6d   :  { %4085 = vrot.lane.b32.xlu0 %v9618_v15, %s10334_s4 }
0x1b6e   :  { %v3973_v28 = vmul.f32 1.442695, %v3965_v58 }
0x1b71   :  { %v3946_v1 = vpop.xlane.xlu1 %3945 }
0x1b72   :  { %v3966_v38 = vsub.f32 %v3641_v29, %v3946_v1 }
0x1b74   :  { %v3975_v11 = vmul.f32 1.442695, %v3966_v38 }
0x1b76   :  { %8124 = vpow2.f32 %v3975_v11 }
0x1b77   :  { %8126 = vpow2.f32 %v3977_v46 }
0x1b79   :  { %v3952_v14 = vpop.xlane.xlu0 %3951 }
0x1b7a   :  { %v3968_v60 = vsub.f32 %v3739_v34, %v3952_v14 }
0x1b7c   :  { %v3979_v7 = vmul.f32 1.442695, %v3968_v60 }
0x1b7e   :  { %8128 = vpow2.f32 %v3979_v7 }
0x1b7f   :  { %8130 = vpow2.f32 %v3973_v28 }
0x1b80   :  { %v8125_v55 = vpop.eup %8124 }
0x1b81   :  { %v9729_v15 = vpop.eup %8126  ;;  %v3992_v23 = vsel %vm3940_vm11, %v8125_v55, 0.0 }
0x1b82   :  { %v3995_v21 = vsel %vm3940_vm11, %v9729_v15, 0.0 }
0x1b88   :  { %v9732_v29 = vpop.eup %8128 }
0x1b89   :  { %v3998_v8 = vsel %vm3940_vm11, %v9732_v29, 0.0  ;;  %v8131_v18 = vpop.eup %8130 }
0x1b8a   :  { %v3989_v2 = vsel %vm3940_vm11, %v8131_v18, 0.0 }
0x1b8c   :  { %3993 = vadd.xlane.f32.xlu0 %v3992_v23 }
0x1b8f   :  { %3996 = vadd.xlane.f32.xlu1 %v3995_v21 }
0x1b90   :  { %3999 = vadd.xlane.f32.xlu0 %v3998_v8 }
0x1b93   :  { %3990 = vadd.xlane.f32.xlu1 %v3989_v2 }
0x1ba4   :  { %4277 = vrot.lane.b32.xlu1 %v9629_v16, %s10334_s4 }
0x1ba6   :  { %4229 = vrot.lane.b32.xlu0 %v9631_v62, %s10334_s4 }
0x1bdb   :  { %v3955_v51 = vpop.xlane.xlu1 %3954 }
0x1bdc   :  { %v3958_v34 = vpop.xlane.xlu0 %3957  ;;  %v3969_v30 = vsub.f32 %v9711_v43, %v3955_v51 }
0x1bdd   :  { %v3970_v5 = vsub.f32 %v3837_v13, %v3958_v34 }
0x1bde   :  { %v3981_v45 = vmul.f32 1.442695, %v3969_v30 }
0x1bdf   :  { %v3983_v25 = vmul.f32 1.442695, %v3970_v5 }
0x1be1   :  { %8132 = vpow2.f32 %v3983_v25 }
0x1be2   :  { %8134 = vpow2.f32 %v3981_v45 }
0x1be3   :  { %v3961_v61 = vpop.xlane.xlu1 %3960 }
0x1be4   :  { %v3964_v6 = vpop.xlane.xlu0 %3963  ;;  %v3971_v42 = vsub.f32 %v3886_v27, %v3961_v61 }
0x1be5   :  { %v3972_v33 = vsub.f32 %v3935_v26, %v3964_v6 }
0x1be6   :  { %v3985_v22 = vmul.f32 1.442695, %v3971_v42 }
0x1be7   :  { %v3987_v31 = vmul.f32 1.442695, %v3972_v33  ;;  %v4134_v26 = vpop.permute.xlu1 %4133 }
0x1be8   :  { %v4086_v59 = vpop.permute.xlu0 %4085  ;;  %v4139_v60 = vsel %vm1077_vm6, %v4134_v26, 0 }
0x1be9   :  { %8136 = vpow2.f32 %v3987_v31  ;;  %v4091_v16 = vsel %vm1077_vm6, %v4086_v59, 0 }
0x1bea   :  { %8138 = vpow2.f32 %v3985_v22  ;;  %7446 = vmatpush3.bf16.msra.mxu1 %v4091_v16 }
0x1beb   :  { %v9745_v62 = vpop.eup %8132  ;;  %7457 = vmatprep.subr.bf16.mxu1 %v8265_v41  ;;  %v4182_v47 = vpop.permute.xlu1 %4181 }
0x1bec   :  { %v9748_v43 = vpop.eup %8134  ;;  %v4004_v13 = vsel %vm3940_vm11, %v9745_v62, 0.0  ;;  %v4187_v1 = vsel %vm1077_vm6, %v4182_v47, 0 }
0x1bed   :  { %4005 = vadd.xlane.f32.xlu0 %v4004_v13  ;;  %v4001_v10 = vsel %vm3940_vm11, %v9748_v43, 0.0 }
0x1bee   :  { %4002 = vadd.xlane.f32.xlu1 %v4001_v10 }
0x1bf3   :  { %v9754_v37 = vpop.eup %8136 }
0x1bf4   :  { %v9756_v50 = vpop.eup %8138  ;;  %v4010_v35 = vsel %vm3940_vm11, %v9754_v37, 0.0 }
0x1bf5   :  { %4011 = vadd.xlane.f32.xlu0 %v4010_v35  ;;  %v4007_v27 = vsel %vm3940_vm11, %v9756_v50, 0.0 }
0x1bf6   :  { %4008 = vadd.xlane.f32.xlu1 %v4007_v27 }
0x1c07   :  { %4373 = vrot.lane.b32.xlu1 %v9646_v12, %s10334_s4 }
0x1c0b   :  { %4325 = vrot.lane.b32.xlu0 %v9639_v32, %s10334_s4 }
0x1c19   :  { %v3994_v63 = vpop.xlane.xlu0 %3993 }
0x1c1a   :  { %8140 = vrcp.f32 %v3994_v63 }
0x1c1c   :  { %v3997_v53 = vpop.xlane.xlu1 %3996 }
0x1c1d   :  { %v4000_v17 = vpop.xlane.xlu0 %3999 }
0x1c1e   :  { %8142 = vrcp.f32 %v4000_v17 }
0x1c20   :  { %v3991_v49 = vpop.xlane.xlu1 %3990 }
0x1c21   :  { %8144 = vrcp.f32 %v3991_v49  ;;  %v4230_v7 = vpop.permute.xlu0 %4229 }
0x1c22   :  { %8146 = vrcp.f32 %v3997_v53 }
0x1c24   :  { %v8141_v40 = vpop.eup %8140  ;;  %v4278_v38 = vpop.permute.xlu1 %4277 }
0x1c25   :  { %v4022_v19 = vmul.f32 %v8141_v40, %v8125_v55  ;;  %v4283_v46 = vsel %vm1077_vm6, %v4278_v38, 0  ;;  %v4235_v55 = vsel %vm1077_vm6, %v4230_v7, 0 }
0x1c27   :  { %v4030_v48 = vpack.c.bf16 %v4022_v19, %v4022_v19  ;;  %v7882_v19 = vld [vmem:[%s10296_s19] sm:$0xff]  }
0x1c28   :  { %v8143_v54 = vpop.eup %8142 }
0x1c29   :  { %7448 = vmatmul.mubr.msk.bf16.vlgmr.msra.gmra.mrb[108].mxu1 %vm3940_vm11, %v4030_v48  ;;  %v4024_v32 = vmul.f32 %v8143_v54, %v9732_v29  ;;  %v7883_v48 = vld [vmem:[%s10296_s19 + $0x8] sm:$0xff]  }
0x1c2a   :  { %7458 = vmatpush3.bf16.msra.mxu1 %v4187_v1  ;;  %7459 = vmatprep.mubr.msk.bf16.mxu1 %vm8266_vm2, %v8265_v41 }
0x1c2b   :  { %7469 = vmatprep.subr.bf16.mxu1 %v8265_v41  ;;  %v8145_v12 = vpop.eup %8144  ;;  %v4032_v11 = vpack.c.bf16 %v4024_v32, %v4024_v32 }
0x1c2c   :  { %v4021_v39 = vmul.f32 %v8145_v12, %v8131_v18  ;;  %v8147_v14 = vpop.eup %8146 }
0x1c2d   :  { %v4023_v58 = vmul.f32 %v8147_v14, %v9729_v15 }
0x1c2e   :  { %v4029_v52 = vpack.c.bf16 %v4021_v39, %v4021_v39 }
0x1c2f   :  { %v4031_v28 = vpack.c.bf16 %v4023_v58, %v4023_v58 }
0x1c30   :  { %7442 = vmatmul.mubr.msk.bf16.vlgmr.msra.gmra.mrb[104].mxu0 %vm3940_vm11, %v4029_v52 }
0x1c31   :  { %7460 = vmatmul.mubr.msk.bf16.vlgmr.msra.gmra.mrb[112].mxu1 %vm3940_vm11, %v4032_v11  ;;  %7452 = vmatpush3.bf16.msra.mxu0 %v4139_v60 }
0x1c32   :  { %7470 = vmatpush3.bf16.msra.mxu1 %v4283_v46  ;;  %7453 = vmatprep.mubr.msk.bf16.mxu0 %vm8266_vm2, %v8265_v41 }
0x1c33   :  { %7463 = vmatprep.subr.bf16.mxu0 %v8265_v41  ;;  %7471 = vmatprep.mubr.msk.bf16.mxu1 %vm8266_vm2, %v8265_v41 }
0x1c34   :  { %7481 = vmatprep.subr.bf16.mxu1 %v8265_v41 }
0x1c38   :  { %7454 = vmatmul.mubr.msk.bf16.vlgmr.msra.gmra.mrb[108].mxu0 %vm3940_vm11, %v4031_v28 }
0x1c39   :  { %7464 = vmatpush3.bf16.msra.mxu0 %v4235_v55  ;;  %7465 = vmatprep.mubr.msk.bf16.mxu0 %vm8266_vm2, %v8265_v41 }
0x1c3a   :  { %7475 = vmatprep.subr.bf16.mxu0 %v8265_v41 }
0x1c7a   :  { %v4006_v15 = vpop.xlane.xlu0 %4005 }
0x1c7b   :  { %8148 = vrcp.f32 %v4006_v15  ;;  %v4003_v23 = vpop.xlane.xlu1 %4002 }
0x1c7c   :  { %8150 = vrcp.f32 %v4003_v23 }
0x1c82   :  { %v4012_v29 = vpop.xlane.xlu0 %4011 }
0x1c83   :  { %8152 = vrcp.f32 %v4012_v29  ;;  %v4009_v8 = vpop.xlane.xlu1 %4008 }
0x1c84   :  { %8154 = vrcp.f32 %v4009_v8 }
0x1c85   :  { %v8149_v21 = vpop.eup %8148 }
0x1c86   :  { %v8151_v18 = vpop.eup %8150  ;;  %v4026_v2 = vmul.f32 %v8149_v21, %v9745_v62  ;;  %v4326_v5 = vpop.permute.xlu0 %4325 }
0x1c87   :  { %v4025_v34 = vmul.f32 %v8151_v18, %v9748_v43  ;;  %v4374_v51 = vpop.permute.xlu1 %4373  ;;  %v4331_v6 = vsel %vm1077_vm6, %v4326_v5, 0 }
0x1c88   :  { %v4034_v30 = vpack.c.bf16 %v4026_v2, %v4026_v2  ;;  %v4379_v45 = vsel %vm1077_vm6, %v4374_v51, 0 }
0x1c89   :  { %v4033_v25 = vpack.c.bf16 %v4025_v34, %v4025_v34 }
0x1c8a   :  { %7472 = vmatmul.mubr.msk.bf16.vlgmr.msra.gmra.mrb[116].mxu1 %vm3940_vm11, %v4034_v30 }
0x1c8b   :  { %7466 = vmatmul.mubr.msk.bf16.vlgmr.msra.gmra.mrb[112].mxu0 %vm3940_vm11, %v4033_v25  ;;  %7482 = vmatpush3.bf16.msra.mxu1 %v4379_v45 }
0x1c8c   :  { %7476 = vmatpush3.bf16.msra.mxu0 %v4331_v6  ;;  %7477 = vmatprep.mubr.msk.bf16.mxu0 %vm8266_vm2, %v8265_v41 }
0x1c8d   :  { %v8153_v61 = vpop.eup %8152  ;;  %7483 = vmatprep.mubr.msk.bf16.mxu1 %vm8266_vm2, %v8265_v41  ;;  %7487 = vmatprep.subr.bf16.mxu0 %v7882_v19 }
0x1c8e   :  { %v8155_v33 = vpop.eup %8154  ;;  %v4028_v42 = vmul.f32 %v8153_v61, %v9754_v37 }
0x1c8f   :  { %v4027_v31 = vmul.f32 %v8155_v33, %v9756_v50  ;;  %v4446_v33 = vrot.slane %v9560_v20, %v8859_v24 }
0x1c90   :  { %v4036_v22 = vpack.c.bf16 %v4028_v42, %v4028_v42 }
0x1c91   :  { %v4035_v59 = vpack.c.bf16 %v4027_v31, %v4027_v31 }
0x1c92   :  { %7484 = vmatmul.mubr.msk.bf16.vlgmr.msra.gmra.mrb[120].mxu1 %vm3940_vm11, %v4036_v22 }
0x1c93   :  { %7478 = vmatmul.mubr.msk.bf16.vlgmr.msra.gmra.mrb[116].mxu0 %vm3940_vm11, %v4035_v59 }
0x1c94   :  { %7488 = vmatpush3.bf16.msra.mxu0 %v7882_v19 }
0x1c95   :  { %7489 = vmatprep.subr.bf16.mxu0 %v7883_v48 }
0x1c98   :  { %7490 = vmatpush3.bf16.msra.mxu0 %v7883_v48 }
0x1cfc   :  { %v4127_v16 = vpop.f32.mrb[108].mxu1 }
0x1cfd   :  { %v7449_v62 = vpop.f32.mrb[109].mxu1 }
0x1cfe   :  { %v4130_v43 = vpop.f32.mrb[110].mxu1 }
0x1cff   :  { %v7450_v13 = vpop.f32.mrb[111].mxu1  ;;  %v8258_v43 = vld [vmem:[%s10289_s13] sm:$0xff] }
0x1d03   :  { %v4079_v10 = vpop.f32.mrb[104].mxu0 }
0x1d04   :  { %v4223_v35 = vpop.f32.mrb[112].mxu1  ;;  %v7443_v27 = vpop.f32.mrb[105].mxu0 }
0x1d05   :  { %v7461_v26 = vpop.f32.mrb[113].mxu1  ;;  %v4082_v47 = vpop.f32.mrb[106].mxu0 }
0x1d06   :  { %v4226_v63 = vpop.f32.mrb[114].mxu1  ;;  %v7444_v17 = vpop.f32.mrb[107].mxu0  ;;  %v8260_v26 = vld [vmem:[%s10289_s13 + $0x8] sm:$0xff] }
0x1d07   :  { %v7462_v37 = vpop.f32.mrb[115].mxu1 }
0x1d08   :  { %v8261_v37 = vld [vmem:[%s10289_s13 + $0x18] sm:$0xff] }
0x1d0b   :  { %v4175_v53 = vpop.f32.mrb[108].mxu0 }
0x1d0c   :  { %v7455_v50 = vpop.f32.mrb[109].mxu0 }
0x1d0d   :  { %v4178_v49 = vpop.f32.mrb[110].mxu0 }
0x1d0e   :  { %v7456_v40 = vpop.f32.mrb[111].mxu0 }
0x1d5d   :  { %v4319_v54 = vpop.f32.mrb[116].mxu1 }
0x1d5e   :  { %v4271_v1 = vpop.f32.mrb[112].mxu0  ;;  %v7473_v32 = vpop.f32.mrb[117].mxu1 }
0x1d5f   :  { %v7798_v12 = vpack.i.bf16 %v4319_v54, %v4271_v1  ;;  %v7467_v39 = vpop.f32.mrb[113].mxu0  ;;  %v4322_v38 = vpop.f32.mrb[118].mxu1 }
0x1d60   :  { %v4274_v52 = vpop.f32.mrb[114].mxu0  ;;  %v7474_v11 = vpop.f32.mrb[119].mxu1 }
0x1d61   :  { %7799 = vrot.lane.b32.xlu0 %v7798_v12, %s10335_s3  ;;  %v7468_v14 = vpop.f32.mrb[115].mxu0 }
0x1d65   :  { %v4415_v60 = vpop.f32.mrb[120].mxu1 }
0x1d66   :  { %v4367_v46 = vpop.f32.mrb[116].mxu0  ;;  %v7485_v58 = vpop.f32.mrb[121].mxu1 }
0x1d67   :  { %v7803_v7 = vpack.i.bf16 %v4415_v60, %v4367_v46  ;;  %v7479_v28 = vpop.f32.mrb[117].mxu0  ;;  %v4418_v55 = vpop.f32.mrb[122].mxu1 }
0x1d68   :  { %v4370_v15 = vpop.f32.mrb[118].mxu0  ;;  %v7486_v23 = vpop.f32.mrb[123].mxu1 }
0x1d69   :  { %7804 = vrot.lane.b32.xlu1 %v7803_v7, %s10335_s3  ;;  %v7480_v29 = vpop.f32.mrb[119].mxu0 }
0x1d6a   :  { %v7884_v29 = vld [vmem:[%s10297_s20] sm:$0xff]  }
0x1d6b   :  { %7495 = vmatprep.subr.bf16.mxu1 %v7884_v29 }
0x1d6c   :  { %7496 = vmatpush3.bf16.msra.mxu1 %v7884_v29 }
0x1dd3   :  { %v7800_v8 = vpop.permute.xlu0 %7799 }
0x1dd4   :  { %v7802_v21 = vunpack.i.h.bf16 %v7800_v8  ;;  %v7801_v18 = vunpack.i.l.bf16 %v7800_v8  ;;  %v7885_v8 = vld [vmem:[%s10297_s20 + $0x8] sm:$0xff]  }
0x1dd5   :  { %7497 = vmatprep.subr.bf16.mxu1 %v7885_v8 }
0x1dd6   :  { %v4438_v2 = vsel %vm666_vm3, %v4127_v16, %v7802_v21  ;;  %v4437_v34 = vsel %vm666_vm3, %v4079_v10, %v7801_v18  ;;  %7498 = vmatpush3.bf16.msra.mxu1 %v7885_v8 }
0x1dd7   :  { %v4441_v51 = vpack.c.bf16 %v4438_v2, %v4437_v34 }
0x1dd9   :  { %7491 = vmatprep.mubr.msk.bf16.mxu0 %vm270_vm1, %v4441_v51 }
0x1ddb   :  { %v7805_v5 = vpop.permute.xlu1 %7804 }
0x1ddc   :  { %v7807_v30 = vunpack.i.h.bf16 %v7805_v5  ;;  %v7806_v25 = vunpack.i.l.bf16 %v7805_v5 }
0x1dde   :  { %v4440_v45 = vsel %vm666_vm3, %v4223_v35, %v7807_v30  ;;  %v4439_v6 = vsel %vm666_vm3, %v4175_v53, %v7806_v25  ;;  %v8259_v35 = vld [vmem:[%s10289_s13 + $0x10] sm:$0xff] }
0x1ddf   :  { %v4442_v61 = vpack.c.bf16 %v4440_v45, %v4439_v6 }
0x1de1   :  { %7492 = vmatmul.mubr.msk.bf16.vlgmr.msra.gmra.mrb[120].mxu0 %vm270_vm1, %v4442_v61 }
0x1eb4   :  { %v7493_v42 = vpop.f32.mrb[120].mxu0 }
0x1eb5   :  { %v4499_v31 = vpop.f32.mrb[121].mxu0  ;;  %v4508_v22 = vadd.f32 %v7493_v42, %v4446_v33  ;;  %v9863_v42 = vld [vmem:[%s10293_s15] sm:$0x3f] }
0x1eb6   :  { %v4500_v59 = vadd.f32 %v4499_v31, %v4446_v33  ;;  %v7494_v16 = vpop.f32.mrb[122].mxu0  ;;  %v4573_v31 = vrot.slane %v9863_v42, %v8934_v44 }
0x1eb7   :  { %v4502_v62 = vpop.f32.mrb[123].mxu0  ;;  %v9826_v27 = vadd.f32 %v8259_v35, %v4508_v22  ;;  %v4511_v20 = vadd.f32 %v7494_v16, %v4446_v33 }
0x1eb8   :  { %v9821_v13 = vadd.f32 %v8258_v43, %v4500_v59  ;;  %v4503_v10 = vadd.f32 %v4502_v62, %v4446_v33 }
0x1eb9   :  { %v9840_v53 = vadd.f32 %v8261_v37, %v4511_v20  ;;  %v4524_v50 = vsel %vm270_vm1, %v9826_v27, 0.0 }
0x1eba   :  { %v9831_v47 = vadd.f32 %v8260_v26, %v4503_v10  ;;  %v4518_v63 = vsel %vm270_vm1, %v9821_v13, 0.0  ;;  %v4581_v10 = vrot.slane %v9863_v42, %v8944_v56 }
0x1ebb   :  { %4519 = vadd.xlane.f32.xlu0 %v4518_v63  ;;  %v4527_v49 = vsel %vm270_vm1, %v9840_v53, 0.0 }
0x1ebc   :  { %v4521_v17 = vsel %vm270_vm1, %v9831_v47, 0.0 }
0x1ebd   :  { %4522 = vadd.xlane.f32.xlu1 %v4521_v17 }
0x1ebf   :  { %4525 = vadd.xlane.f32.xlu0 %v4524_v50 }
0x1ec3   :  { %4528 = vadd.xlane.f32.xlu0 %v4527_v49 }
0x1f48   :  { %v4520_v40 = vpop.xlane.xlu0 %4519 }
0x1f49   :  { %v4530_v19 = vmul.f32 0.03125, %v4520_v40 }
0x1f4a   :  { %v4523_v48 = vpop.xlane.xlu1 %4522 }
0x1f4b   :  { %v4534_v54 = vsub.f32 %v9821_v13, %v4530_v19  ;;  %v4531_v1 = vmul.f32 0.03125, %v4523_v48 }
0x1f4c   :  { %v4526_v32 = vpop.xlane.xlu0 %4525 }
0x1f4d   :  { %v4535_v12 = vsub.f32 %v9831_v47, %v4531_v1  ;;  %v4532_v39 = vmul.f32 0.03125, %v4526_v32  ;;  %v4538_v38 = vmul.f32 %v4534_v54, %v4534_v54  ;;  %v7886_v32 = vld [vmem:[%s10298_s21] sm:$0xff]  }
0x1f4e   :  { %7503 = vmatprep.subr.bf16.mxu0 %v7886_v32 }
0x1f4f   :  { %v4536_v52 = vsub.f32 %v9826_v27, %v4532_v39  ;;  %v4542_v11 = vsel %vm270_vm1, %v4538_v38, 0.0  ;;  %v4539_v14 = vmul.f32 %v4535_v12, %v4535_v12  ;;  %7504 = vmatpush3.bf16.msra.mxu0 %v7886_v32  ;;  %v7888_v39 = vld [vmem:[%s10298_s21 + $0x10] sm:$0xff]   ;;  %v7889_v38 = vld [vmem:[%s10298_s21 + $0x18] sm:$0xff]  }
0x1f50   :  { %4543 = vadd.xlane.f32.xlu1 %v4542_v11  ;;  %v4529_v60 = vpop.xlane.xlu0 %4528  ;;  %v7891_v11 = vld [vmem:[%s10298_s21 + $0x28] sm:$0xff]  }
0x1f51   :  { %v4533_v46 = vmul.f32 0.03125, %v4529_v60  ;;  %v4545_v58 = vsel %vm270_vm1, %v4539_v14, 0.0  ;;  %v4540_v7 = vmul.f32 %v4536_v52, %v4536_v52  ;;  %v7892_v14 = vld [vmem:[%s10298_s21 + $0x30] sm:$0xff]   ;;  %v7893_v60 = vld [vmem:[%s10298_s21 + $0x38] sm:$0xff]  }
0x1f52   :  { %4546 = vadd.xlane.f32.xlu0 %v4545_v58 }
0x1f53   :  { %v4537_v28 = vsub.f32 %v9840_v53, %v4533_v46  ;;  %v4548_v55 = vsel %vm270_vm1, %v4540_v7, 0.0  ;;  %v6766_v46 = vld [vmem:[%s10299_s17] ss:$0 sm:$0xff] }
0x1f54   :  { %4549 = vadd.xlane.f32.xlu1 %v4548_v55 }
0x1f55   :  { %v4541_v15 = vmul.f32 %v4537_v28, %v4537_v28 }
0x1f57   :  { %v4551_v23 = vsel %vm270_vm1, %v4541_v15, 0.0 }
0x1f58   :  { %4552 = vadd.xlane.f32.xlu0 %v4551_v23 }
0x1fdd   :  { %v4544_v21 = vpop.xlane.xlu1 %4543 }
0x1fde   :  { %v4554_v18 = vmul.f32 0.03125, %v4544_v21 }
0x1fdf   :  { %v4547_v2 = vpop.xlane.xlu0 %4546 }
0x1fe0   :  { %v4558_v34 = vadd.f32 1e-05, %v4554_v18  ;;  %v4555_v51 = vmul.f32 0.03125, %v4547_v2 }
0x1fe1   :  { %v4550_v5 = vpop.xlane.xlu1 %4549 }
0x1fe2   :  { %8156 = vrsqrt.f32 %v4558_v34  ;;  %v4559_v30 = vadd.f32 1e-05, %v4555_v51  ;;  %v4556_v25 = vmul.f32 0.03125, %v4550_v5 }
0x1fe4   :  { %8158 = vrsqrt.f32 %v4559_v30  ;;  %v4560_v45 = vadd.f32 1e-05, %v4556_v25 }
0x1fe5   :  { %v4553_v6 = vpop.xlane.xlu0 %4552 }
0x1fe6   :  { %8160 = vrsqrt.f32 %v4560_v45  ;;  %v4557_v61 = vmul.f32 0.03125, %v4553_v6 }
0x1fe8   :  { %v4561_v33 = vadd.f32 1e-05, %v4557_v61 }
0x1fea   :  { %8162 = vrsqrt.f32 %v4561_v33 }
0x1fec   :  { %v8157_v22 = vpop.eup %8156 }
0x1fed   :  { %v4566_v59 = vmul.f32 %v8157_v22, %v4534_v54 }
0x1fee   :  { %v8159_v16 = vpop.eup %8158 }
0x1fef   :  { %v4567_v62 = vmul.f32 %v8159_v16, %v4535_v12  ;;  %v4574_v43 = vmul.f32 %v4573_v31, %v4566_v59  ;;  %v7887_v12 = vld [vmem:[%s10298_s21 + $0x8] sm:$0xff]  }
0x1ff0   :  { %v8161_v35 = vpop.eup %8160  ;;  %7505 = vmatprep.subr.bf16.mxu0 %v7887_v12 }
0x1ff1   :  { %v4568_v20 = vmul.f32 %v8161_v35, %v4536_v52  ;;  %v4575_v26 = vmul.f32 %v4573_v31, %v4567_v62  ;;  %v4582_v63 = vadd.f32 %v4581_v10, %v4574_v43  ;;  %7506 = vmatpush3.bf16.msra.mxu0 %v7887_v12  ;;  %v7890_v52 = vld [vmem:[%s10298_s21 + $0x20] sm:$0xff]  }
0x1ff2   :  { %7507 = vmatprep.subr.bf16.mxu0 %v7888_v39 }
0x1ff3   :  { %v4583_v17 = vadd.f32 %v4581_v10, %v4575_v26  ;;  %v4576_v50 = vmul.f32 %v4573_v31, %v4568_v20 }
0x1ff4   :  { %v8163_v37 = vpop.eup %8162 }
0x1ff5   :  { %v4569_v49 = vmul.f32 %v8163_v37, %v4537_v28  ;;  %v4586_v40 = vpack.c.bf16 %v4583_v17, %v4582_v63  ;;  %v4584_v48 = vadd.f32 %v4581_v10, %v4576_v50  ;;  %7508 = vmatpush3.bf16.msra.mxu0 %v7888_v39 }
0x1ff6   :  { %7509 = vmatprep.subr.bf16.mxu0 %v7889_v38 }
0x1ff7   :  { %v4577_v19 = vmul.f32 %v4573_v31, %v4569_v49  ;;  %7499 = vmatprep.mubr.msk.bf16.mxu1 %vm270_vm1, %v4586_v40  ;;  %v4698_v49 = vrot.slane %v9863_v42, %v9001_v4 }
0x1ff9   :  { %v4585_v54 = vadd.f32 %v4581_v10, %v4577_v19  ;;  %7510 = vmatpush3.bf16.msra.mxu0 %v7889_v38 }
0x1ffa   :  { %7511 = vmatprep.subr.bf16.mxu0 %v7890_v52 }
0x1ffb   :  { %v4587_v1 = vpack.c.bf16 %v4585_v54, %v4584_v48 }
0x1ffd   :  { %7500 = vmatmul.mubr.msk.bf16.vlgmr.msra.gmra.mrb[124].mxu1 %vm270_vm1, %v4587_v1  ;;  %7512 = vmatpush3.bf16.msra.mxu0 %v7890_v52 }
0x1ffe   :  { %7513 = vmatprep.subr.bf16.mxu0 %v7891_v11 }
0x2001   :  { %7514 = vmatpush3.bf16.msra.mxu0 %v7891_v11 }
0x2002   :  { %7515 = vmatprep.subr.bf16.mxu0 %v7892_v14 }
0x2005   :  { %7516 = vmatpush3.bf16.msra.mxu0 %v7892_v14 }
0x2006   :  { %7517 = vmatprep.subr.bf16.mxu0 %v7893_v60 }
0x2009   :  { %7518 = vmatpush3.bf16.msra.mxu0 %v7893_v60 }
0x200a   :  { %7549 = vmatprep.subr.bf16.mxu0 %v8265_v41 }
0x20d0   :  { %v7501_v58 = vpop.f32.mrb[124].mxu1 }
0x20d1   :  { %v4655_v7 = vadd.f32 %v7501_v58, %v6766_v46  ;;  %v4646_v28 = vpop.f32.mrb[125].mxu1 }
0x20d2   :  { %v4647_v55 = vadd.f32 %v6766_v46, %v4646_v28  ;;  %v7502_v15 = vpop.f32.mrb[126].mxu1 }
0x20d3   :  { %v6773_v23 = vmul.f32 -1.702, %v4655_v7  ;;  %v4658_v29 = vadd.f32 %v7502_v15, %v6766_v46  ;;  %v4649_v8 = vpop.f32.mrb[127].mxu1 }
0x20d4   :  { %v6771_v21 = vmul.f32 -1.702, %v4647_v55  ;;  %v4650_v18 = vadd.f32 %v6766_v46, %v4649_v8 }
0x20d5   :  { %v4673_v2 = vmul.f32 1.442695, %v6773_v23  ;;  %v6774_v34 = vmul.f32 -1.702, %v4658_v29 }
0x20d6   :  { %v4669_v51 = vmul.f32 1.442695, %v6771_v21  ;;  %v6772_v5 = vmul.f32 -1.702, %v4650_v18 }
0x20d7   :  { %8164 = vpow2.f32 %v4673_v2  ;;  %v4675_v30 = vmul.f32 1.442695, %v6774_v34 }
0x20d8   :  { %8166 = vpow2.f32 %v4669_v51  ;;  %v4671_v25 = vmul.f32 1.442695, %v6772_v5 }
0x20d9   :  { %8168 = vpow2.f32 %v4675_v30 }
0x20da   :  { %8170 = vpow2.f32 %v4671_v25 }
0x20e1   :  { %v8165_v45 = vpop.eup %8164 }
0x20e2   :  { %v8167_v6 = vpop.eup %8166  ;;  %v4679_v61 = vadd.f32 1.0, %v8165_v45 }
0x20e3   :  { %v8169_v33 = vpop.eup %8168  ;;  %v4677_v31 = vadd.f32 1.0, %v8167_v6  ;;  %v7894_v6 = vld [vmem:[%s10291_s18 + $0x10] sm:$0xff]  }
0x20e4   :  { %v8171_v22 = vpop.eup %8170  ;;  %8172 = vrcp.f32 %v4679_v61  ;;  %v4680_v59 = vadd.f32 1.0, %v8169_v33  ;;  %7523 = vmatprep.subr.bf16.mxu1 %v7894_v6  ;;  %v7895_v61 = vld [vmem:[%s10291_s18 + $0x18] sm:$0xff]  }
0x20e5   :  { %8174 = vrcp.f32 %v4677_v31  ;;  %v4678_v16 = vadd.f32 1.0, %v8171_v22  ;;  %7524 = vmatpush3.bf16.msra.mxu1 %v7894_v6 }
0x20e6   :  { %8176 = vrcp.f32 %v4680_v59  ;;  %7525 = vmatprep.subr.bf16.mxu1 %v7895_v61 }
0x20e7   :  { %8178 = vrcp.f32 %v4678_v16 }
0x20e9   :  { %7526 = vmatpush3.bf16.msra.mxu1 %v7895_v61 }
0x20ea   :  { %7531 = vmatprep.subr.bf16.mxu1 %v8265_v41 }
0x20ee   :  { %v8173_v62 = vpop.eup %8172 }
0x20ef   :  { %v8175_v43 = vpop.eup %8174  ;;  %v4691_v20 = vmul.f32 %v8173_v62, %v4655_v7 }
0x20f0   :  { %v8177_v10 = vpop.eup %8176  ;;  %v4689_v63 = vmul.f32 %v8175_v43, %v4647_v55 }
0x20f1   :  { %v8179_v35 = vpop.eup %8178  ;;  %v4692_v26 = vmul.f32 %v8177_v10, %v4658_v29 }
0x20f2   :  { %v4690_v17 = vmul.f32 %v8179_v35, %v4650_v18 }
0x20f3   :  { %v4694_v37 = vpack.c.bf16 %v4692_v26, %v4691_v20 }
0x20f4   :  { %v4693_v50 = vpack.c.bf16 %v4690_v17, %v4689_v63  ;;  %v9941_v17 = vld [vmem:[%s10293_s15 + $0x8] sm:$0x3f] }
0x20f6   :  { %7519 = vmatprep.mubr.bf16.mxu0 %v4693_v50 }
0x20f7   :  { %7520 = vmatmul.mubr.bf16.vlgmr.msra.gmra.mrb[124].mxu0 %v4694_v37  ;;  %v4893_v37 = vrot.slane %v9941_v17, %v8573_v57 }
0x20f8   :  { %7551 = vmatprep.mubr.msk.bf16.mxu0 %vm8266_vm2, %v8265_v41 }
0x21ca   :  { %v7521_v40 = vpop.f32.mrb[124].mxu0 }
0x21cb   :  { %v4781_v19 = vpop.f32.mrb[125].mxu0  ;;  %v4790_v48 = vadd.f32 %v7521_v40, %v4698_v49 }
0x21cc   :  { %v4782_v54 = vadd.f32 %v4781_v19, %v4698_v49  ;;  %v7522_v1 = vpop.f32.mrb[126].mxu0 }
0x21cd   :  { %v4784_v32 = vpop.f32.mrb[127].mxu0  ;;  %v4793_v39 = vadd.f32 %v7522_v1, %v4698_v49  ;;  %v9907_v52 = vadd.f32 %v4790_v48, %v9826_v27 }
0x21ce   :  { %v9904_v12 = vadd.f32 %v4782_v54, %v9821_v13  ;;  %v4785_v38 = vadd.f32 %v4784_v32, %v4698_v49  ;;  %v4901_v54 = vrot.slane %v9941_v17, %v8584_v3 }
0x21cf   :  { %v9915_v14 = vadd.f32 %v4793_v39, %v9840_v53  ;;  %v4844_v13 = vsel %vm270_vm1, %v9907_v52, 0.0 }
0x21d0   :  { %v9910_v11 = vadd.f32 %v4785_v38, %v9831_v47  ;;  %v4838_v42 = vsel %vm270_vm1, %v9904_v12, 0.0 }
0x21d1   :  { %4839 = vadd.xlane.f32.xlu1 %v4838_v42  ;;  %v4847_v27 = vsel %vm270_vm1, %v9915_v14, 0.0 }
0x21d2   :  { %v4841_v60 = vsel %vm270_vm1, %v9910_v11, 0.0 }
0x21d3   :  { %4842 = vadd.xlane.f32.xlu0 %v4841_v60 }
0x21d5   :  { %4845 = vadd.xlane.f32.xlu1 %v4844_v13 }
0x21d7   :  { %4848 = vadd.xlane.f32.xlu0 %v4847_v27 }
0x225e   :  { %v4840_v47 = vpop.xlane.xlu1 %4839 }
0x225f   :  { %v4850_v46 = vmul.f32 0.03125, %v4840_v47 }
0x2260   :  { %v4843_v58 = vpop.xlane.xlu0 %4842 }
0x2261   :  { %v4854_v7 = vsub.f32 %v9904_v12, %v4850_v46  ;;  %v4851_v28 = vmul.f32 0.03125, %v4843_v58 }
0x2262   :  { %v4846_v53 = vpop.xlane.xlu1 %4845 }
0x2263   :  { %v4855_v55 = vsub.f32 %v9910_v11, %v4851_v28  ;;  %v4852_v15 = vmul.f32 0.03125, %v4846_v53  ;;  %v4858_v23 = vmul.f32 %v4854_v7, %v4854_v7  ;;  %v6814_v53 = vld [vmem:[%s10295_s16 + $0x1] ss:$0 sm:$0xff] }
0x2264   :  { %v4849_v29 = vpop.xlane.xlu0 %4848 }
0x2265   :  { %v4856_v8 = vsub.f32 %v9907_v52, %v4852_v15  ;;  %v4853_v21 = vmul.f32 0.03125, %v4849_v29  ;;  %v4862_v18 = vsel %vm270_vm1, %v4858_v23, 0.0  ;;  %v4859_v2 = vmul.f32 %v4855_v55, %v4855_v55 }
0x2266   :  { %4863 = vadd.xlane.f32.xlu1 %v4862_v18 }
0x2267   :  { %v4857_v34 = vsub.f32 %v9915_v14, %v4853_v21  ;;  %v4865_v51 = vsel %vm270_vm1, %v4859_v2, 0.0  ;;  %v4860_v5 = vmul.f32 %v4856_v8, %v4856_v8 }
0x2268   :  { %4866 = vadd.xlane.f32.xlu0 %v4865_v51 }
0x2269   :  { %v4868_v30 = vsel %vm270_vm1, %v4860_v5, 0.0  ;;  %v4861_v25 = vmul.f32 %v4857_v34, %v4857_v34 }
0x226a   :  { %4869 = vadd.xlane.f32.xlu1 %v4868_v30 }
0x226b   :  { %v4871_v45 = vsel %vm270_vm1, %v4861_v25, 0.0 }
0x226c   :  { %4872 = vadd.xlane.f32.xlu0 %v4871_v45 }
0x22f3   :  { %v4864_v33 = vpop.xlane.xlu1 %4863 }
0x22f4   :  { %v4874_v31 = vmul.f32 0.03125, %v4864_v33 }
0x22f5   :  { %v4867_v22 = vpop.xlane.xlu0 %4866 }
0x22f6   :  { %v4878_v59 = vadd.f32 1e-05, %v4874_v31  ;;  %v4875_v16 = vmul.f32 0.03125, %v4867_v22 }
0x22f7   :  { %v4870_v62 = vpop.xlane.xlu1 %4869 }
0x22f8   :  { %8180 = vrsqrt.f32 %v4878_v59  ;;  %v4879_v43 = vadd.f32 1e-05, %v4875_v16  ;;  %v4876_v10 = vmul.f32 0.03125, %v4870_v62 }
0x22f9   :  { %v4873_v35 = vpop.xlane.xlu0 %4872 }
0x22fa   :  { %8182 = vrsqrt.f32 %v4879_v43  ;;  %v4880_v20 = vadd.f32 1e-05, %v4876_v10  ;;  %v4877_v26 = vmul.f32 0.03125, %v4873_v35 }
0x22fc   :  { %8184 = vrsqrt.f32 %v4880_v20  ;;  %v4881_v63 = vadd.f32 1e-05, %v4877_v26 }
0x22fe   :  { %8186 = vrsqrt.f32 %v4881_v63 }
0x2302   :  { %v8181_v50 = vpop.eup %8180 }
0x2303   :  { %v4886_v49 = vmul.f32 %v8181_v50, %v4854_v7 }
0x2304   :  { %v8183_v40 = vpop.eup %8182 }
0x2305   :  { %v4887_v19 = vmul.f32 %v8183_v40, %v4855_v55  ;;  %v4894_v48 = vmul.f32 %v4893_v37, %v4886_v49 }
0x2306   :  { %v8185_v1 = vpop.eup %8184 }
0x2307   :  { %v4888_v32 = vmul.f32 %v8185_v1, %v4856_v8  ;;  %v4895_v39 = vmul.f32 %v4893_v37, %v4887_v19  ;;  %v4902_v13 = vadd.f32 %v4901_v54, %v4894_v48 }
0x2308   :  { %v8187_v38 = vpop.eup %8186 }
0x2309   :  { %v4896_v42 = vmul.f32 %v4893_v37, %v4888_v32  ;;  %v4889_v60 = vmul.f32 %v8187_v38, %v4857_v34  ;;  %v4903_v27 = vadd.f32 %v4901_v54, %v4895_v39 }
0x230b   :  { %v4897_v47 = vmul.f32 %v4893_v37, %v4889_v60  ;;  %v4906_v46 = vpack.c.bf16 %v4903_v27, %v4902_v13  ;;  %v4904_v58 = vadd.f32 %v4901_v54, %v4896_v42 }
0x230d   :  { %7527 = vmatprep.mubr.msk.bf16.mxu1 %vm270_vm1, %v4906_v46  ;;  %v4905_v7 = vadd.f32 %v4901_v54, %v4897_v47 }
0x230f   :  { %v4907_v28 = vpack.c.bf16 %v4905_v7, %v4904_v58 }
0x2311   :  { %7528 = vmatmul.mubr.msk.bf16.vlgmr.msra.gmra.mrb[128].mxu1 %vm270_vm1, %v4907_v28 }
0x2312   :  { %7533 = vmatprep.mubr.msk.bf16.mxu1 %vm8266_vm2, %v8265_v41 }
0x23e4   :  { %v7529_v55 = vpop.f32.mrb[128].mxu1 }
0x23e5   :  { %v4975_v15 = vadd.f32 %v7529_v55, %v6814_v53  ;;  %v4966_v23 = vpop.f32.mrb[129].mxu1 }
0x23e6   :  { %v4967_v29 = vadd.f32 %v6814_v53, %v4966_v23  ;;  %v7530_v8 = vpop.f32.mrb[130].mxu1 }
0x23e7   :  { %v4978_v21 = vadd.f32 %v7530_v8, %v6814_v53  ;;  %v4969_v18 = vpop.f32.mrb[131].mxu1  ;;  %v4983_v34 = vmul.f32 0.25, %v4975_v15  ;;  %v9956_v33 = vpack.c.bf16 %v4975_v15, %v4975_v15 }
0x23e8   :  { %v4970_v2 = vadd.f32 %v6814_v53, %v4969_v18  ;;  %v4981_v30 = vmul.f32 0.25, %v4967_v29  ;;  %v5025_v31 = vpack.c.bf16 %v4967_v29, %v4967_v29 }
0x23e9   :  { %v7813_v51 = vpack.i.bf16 %v4978_v21, %v4975_v15  ;;  %v4984_v5 = vmul.f32 0.25, %v4978_v21  ;;  %v9965_v59 = vpack.c.bf16 %v4978_v21, %v4978_v21  ;;  %v5003_v13 = vpack.c.bf16 %v4983_v34, %v4983_v34 }
0x23ea   :  { %v4982_v25 = vmul.f32 0.25, %v4970_v2  ;;  %v7808_v45 = vpack.i.bf16 %v4970_v2, %v4967_v29  ;;  %v9961_v22 = vpack.c.bf16 %v4970_v2, %v4970_v2  ;;  %v5001_v48 = vpack.c.bf16 %v4981_v30, %v4981_v30 }
0x23eb   :  { %v7823_v6 = vpack.i.bf16 %v4984_v5, %v4983_v34  ;;  %7814 = vrot.lane.b32.xlu0 %v7813_v51, %s8267_s26  ;;  %v5004_v39 = vpack.c.bf16 %v4984_v5, %v4984_v5 }
0x23ec   :  { %v7818_v61 = vpack.i.bf16 %v4982_v25, %v4981_v30  ;;  %7809 = vrot.lane.b32.xlu1 %v7808_v45, %s8267_s26  ;;  %v5002_v42 = vpack.c.bf16 %v4982_v25, %v4982_v25 }
0x23ef   :  { %5132 = vrot.lane.b32.xlu0 %v9956_v33, %s8268_s28 }
0x23f0   :  { %5034 = vrot.lane.b32.xlu1 %v5025_v31, %s8268_s28 }
0x23f4   :  { %5083 = vrot.lane.b32.xlu1 %v9961_v22, %s8268_s28 }
0x23f8   :  { %5181 = vrot.lane.b32.xlu1 %v9965_v59, %s8268_s28 }
0x245d   :  { %v7815_v16 = vpop.permute.xlu0 %7814 }
0x245e   :  { %v7810_v62 = vpop.permute.xlu1 %7809  ;;  %v7816_v35 = vunpack.i.l.bf16 %v7815_v16  ;;  %v7817_v50 = vunpack.i.h.bf16 %v7815_v16 }
0x245f   :  { %v7812_v43 = vunpack.i.h.bf16 %v7810_v62  ;;  %v7811_v10 = vunpack.i.l.bf16 %v7810_v62 }
0x2460   :  { %v9978_v49 = vpack.c.bf16 %v7816_v35, %v7816_v35  ;;  %v9984_v19 = vpack.c.bf16 %v7817_v50, %v7817_v50 }
0x2461   :  { %v9969_v20 = vpack.c.bf16 %v7812_v43, %v7812_v43  ;;  %v9971_v26 = vpack.c.bf16 %v7811_v10, %v7811_v10  ;;  %v5133_v38 = vpop.permute.xlu0 %5132 }
0x2462   :  { %v5035_v63 = vpop.permute.xlu1 %5034  ;;  %v5138_v60 = vsel %vm666_vm3, %v5133_v38, 0 }
0x2463   :  { %v5040_v37 = vsel %vm666_vm3, %v5035_v63, 0  ;;  %5230 = vrot.lane.b32.xlu0 %v9971_v26, %s8268_s28  ;;  %5279 = vrot.lane.b32.xlu1 %v9969_v20, %s8268_s28 }
0x2464   :  { %7532 = vmatpush3.bf16.xpose.msra.mxu1 %v5040_v37 }
0x2465   :  { %7537 = vmatprep.subr.bf16.mxu1 %v8265_v41 }
0x2466   :  { %v5084_v40 = vpop.permute.xlu1 %5083 }
0x2467   :  { %5328 = vrot.lane.b32.xlu1 %v9978_v49, %s8268_s28  ;;  %7819 = vrot.lane.b32.xlu0 %v7818_v61, %s8267_s26  ;;  %v5089_v32 = vsel %vm666_vm3, %v5084_v40, 0 }
0x246a   :  { %v5182_v54 = vpop.permute.xlu1 %5181 }
0x246b   :  { %v5187_v1 = vsel %vm666_vm3, %v5182_v54, 0  ;;  %7824 = vrot.lane.b32.xlu1 %v7823_v6, %s8267_s26  ;;  %5377 = vrot.lane.b32.xlu0 %v9984_v19, %s8268_s28 }
0x246c   :  { %7534 = vmatmul.mubr.msk.bf16.vlgmr.msra.gmra.mrb[132].mxu1 %vm666_vm3, %v5001_v48  ;;  %7550 = vmatpush3.bf16.xpose.msra.mxu0 %v5187_v1 }
0x246d   :  { %7538 = vmatpush3.bf16.xpose.msra.mxu1 %v5089_v32  ;;  %7539 = vmatprep.mubr.msk.bf16.mxu1 %vm8266_vm2, %v8265_v41 }
0x246e   :  { %7543 = vmatprep.subr.bf16.mxu1 %v8265_v41  ;;  %7561 = vmatprep.subr.bf16.mxu0 %v8265_v41 }
0x246f   :  { %5521 = vrot.lane.b32.xlu1 %v5025_v31, %s10334_s4 }
0x2473   :  { %7552 = vmatmul.mubr.msk.bf16.vlgmr.msra.gmra.mrb[128].mxu0 %vm666_vm3, %v5004_v39 }
0x2474   :  { %7540 = vmatmul.mubr.msk.bf16.vlgmr.msra.gmra.mrb[136].mxu1 %vm666_vm3, %v5002_v42  ;;  %7563 = vmatprep.mubr.msk.bf16.mxu0 %vm8266_vm2, %v8265_v41 }
0x2475   :  { %7544 = vmatpush3.bf16.xpose.msra.mxu1 %v5138_v60  ;;  %7545 = vmatprep.mubr.msk.bf16.mxu1 %vm8266_vm2, %v8265_v41 }
0x2476   :  { %7555 = vmatprep.subr.bf16.mxu1 %v8265_v41 }
0x247c   :  { %7546 = vmatmul.mubr.msk.bf16.vlgmr.msra.gmra.mrb[140].mxu1 %vm666_vm3, %v5003_v13 }
0x247d   :  { %7557 = vmatprep.mubr.msk.bf16.mxu1 %vm8266_vm2, %v8265_v41 }
0x24d5   :  { %v5231_v27 = vpop.permute.xlu0 %5230  ;;  %v5280_v47 = vpop.permute.xlu1 %5279 }
0x24d6   :  { %v5236_v46 = vsel %vm666_vm3, %v5231_v27, 0  ;;  %v5285_v58 = vsel %vm666_vm3, %v5280_v47, 0 }
0x24d7   :  { %7556 = vmatpush3.bf16.xpose.msra.mxu1 %v5236_v46  ;;  %7562 = vmatpush3.bf16.xpose.msra.mxu0 %v5285_v58 }
0x24d8   :  { %7567 = vmatprep.subr.bf16.mxu1 %v8265_v41  ;;  %7573 = vmatprep.subr.bf16.mxu0 %v8265_v41 }
0x24d9   :  { %v5329_v7 = vpop.permute.xlu1 %5328  ;;  %v7820_v28 = vpop.permute.xlu0 %7819 }
0x24da   :  { %v7822_v53 = vunpack.i.h.bf16 %v7820_v28  ;;  %v7821_v55 = vunpack.i.l.bf16 %v7820_v28  ;;  %v5334_v21 = vsel %vm666_vm3, %v5329_v7, 0 }
0x24dc   :  { %v5006_v15 = vpack.c.bf16 %v7822_v53, %v7822_v53  ;;  %v5005_v23 = vpack.c.bf16 %v7821_v55, %v7821_v55 }
0x24dd   :  { %v7825_v29 = vpop.permute.xlu1 %7824  ;;  %v5378_v8 = vpop.permute.xlu0 %5377 }
0x24de   :  { %v5383_v18 = vsel %vm666_vm3, %v5378_v8, 0  ;;  %7558 = vmatmul.mubr.msk.bf16.vlgmr.msra.gmra.mrb[144].mxu1 %vm666_vm3, %v5005_v23  ;;  %7564 = vmatmul.mubr.msk.bf16.vlgmr.msra.gmra.mrb[132].mxu0 %vm666_vm3, %v5006_v15  ;;  %v7827_v2 = vunpack.i.h.bf16 %v7825_v29  ;;  %v7826_v34 = vunpack.i.l.bf16 %v7825_v29 }
0x24df   :  { %7568 = vmatpush3.bf16.xpose.msra.mxu1 %v5334_v21  ;;  %7574 = vmatpush3.bf16.xpose.msra.mxu0 %v5383_v18 }
0x24e0   :  { %7569 = vmatprep.mubr.msk.bf16.mxu1 %vm8266_vm2, %v8265_v41  ;;  %7575 = vmatprep.mubr.msk.bf16.mxu0 %vm8266_vm2, %v8265_v41  ;;  %v5008_v5 = vpack.c.bf16 %v7827_v2, %v7827_v2  ;;  %v5007_v30 = vpack.c.bf16 %v7826_v34, %v7826_v34 }
0x24e1   :  { %7579 = vmatprep.subr.bf16.mxu1 %v8265_v41  ;;  %7585 = vmatprep.subr.bf16.mxu0 %v8265_v41  ;;  %v5522_v51 = vpop.permute.xlu1 %5521 }
0x24e2   :  { %v5527_v25 = vsel %vm1077_vm6, %v5522_v51, 0 }
0x24e6   :  { %7570 = vmatmul.mubr.msk.bf16.vlgmr.msra.gmra.mrb[148].mxu1 %vm666_vm3, %v5007_v30  ;;  %7576 = vmatmul.mubr.msk.bf16.vlgmr.msra.gmra.mrb[136].mxu0 %vm666_vm3, %v5008_v5 }
0x24e7   :  { %7580 = vmatpush3.bf16.msra.mxu1 %v5527_v25  ;;  %7581 = vmatprep.mubr.msk.bf16.mxu1 %vm8266_vm2, %v8265_v41 }
0x24e8   :  { %7587 = vmatprep.mubr.msk.bf16.mxu0 %vm8266_vm2, %v8265_v41  ;;  %7591 = vmatprep.subr.bf16.mxu1 %v8265_v41 }
0x253f   :  { %v5076_v45 = vpop.f32.mrb[132].mxu1 }
0x2540   :  { %v10031_v6 = vadd.f32 %v5076_v45, %v9694_v36  ;;  %v7535_v61 = vpop.f32.mrb[133].mxu1 }
0x2541   :  { %v5079_v31 = vpop.f32.mrb[134].mxu1 }
0x2542   :  { %v7536_v16 = vpop.f32.mrb[135].mxu1  ;;  %v5425_v62 = vsel %vm3940_vm11, %v10031_v6, -inf }
0x2543   :  { %5426 = vmax.xlane.f32.xlu0 %v5425_v62 }
0x2546   :  { %v5223_v43 = vpop.f32.mrb[128].mxu0 }
0x2547   :  { %v5125_v10 = vpop.f32.mrb[136].mxu1  ;;  %v5224_v35 = vadd.f32 %v5223_v43, %v9694_v36  ;;  %v7553_v63 = vpop.f32.mrb[129].mxu0 }
0x2548   :  { %v5126_v37 = vadd.f32 %v5125_v10, %v9694_v36  ;;  %v7541_v50 = vpop.f32.mrb[137].mxu1  ;;  %v5226_v40 = vpop.f32.mrb[130].mxu0 }
0x2549   :  { %v5128_v48 = vpop.f32.mrb[138].mxu1  ;;  %v7554_v54 = vpop.f32.mrb[131].mxu0  ;;  %v5434_v1 = vsel %vm3940_vm11, %v5224_v35, -inf }
0x254a   :  { %v7542_v32 = vpop.f32.mrb[139].mxu1  ;;  %5435 = vmax.xlane.f32.xlu0 %v5434_v1  ;;  %v5428_v39 = vsel %vm3940_vm11, %v5126_v37, -inf }
0x254b   :  { %5429 = vmax.xlane.f32.xlu1 %v5428_v39 }
0x254f   :  { %v5174_v38 = vpop.f32.mrb[140].mxu1 }
0x2550   :  { %v5175_v42 = vadd.f32 %v5174_v38, %v9694_v36  ;;  %v7547_v60 = vpop.f32.mrb[141].mxu1 }
0x2551   :  { %v5177_v13 = vpop.f32.mrb[142].mxu1 }
0x2552   :  { %v7548_v27 = vpop.f32.mrb[143].mxu1  ;;  %v5431_v47 = vsel %vm3940_vm11, %v5175_v42, -inf }
0x2553   :  { %5432 = vmax.xlane.f32.xlu0 %v5431_v47 }
0x25b1   :  { %v5272_v46 = vpop.f32.mrb[144].mxu1  ;;  %v5321_v58 = vpop.f32.mrb[132].mxu0 }
0x25b2   :  { %v10042_v7 = vadd.f32 %v5272_v46, %v9694_v36  ;;  %v5322_v28 = vadd.f32 %v5321_v58, %v9694_v36  ;;  %v7559_v53 = vpop.f32.mrb[145].mxu1  ;;  %v7565_v55 = vpop.f32.mrb[133].mxu0 }
0x25b3   :  { %v5275_v15 = vpop.f32.mrb[146].mxu1  ;;  %v5324_v23 = vpop.f32.mrb[134].mxu0 }
0x25b4   :  { %v7560_v29 = vpop.f32.mrb[147].mxu1  ;;  %v7566_v8 = vpop.f32.mrb[135].mxu0  ;;  %v5440_v21 = vsel %vm3940_vm11, %v5322_v28, -inf  ;;  %v5437_v18 = vsel %vm3940_vm11, %v10042_v7, -inf }
0x25b5   :  { %5441 = vmax.xlane.f32.xlu0 %v5440_v21  ;;  %5438 = vmax.xlane.f32.xlu1 %v5437_v18 }
0x25b9   :  { %v5370_v2 = vpop.f32.mrb[148].mxu1  ;;  %v5419_v34 = vpop.f32.mrb[136].mxu0 }
0x25ba   :  { %v5371_v51 = vadd.f32 %v5370_v2, %v9694_v36  ;;  %v5420_v5 = vadd.f32 %v5419_v34, %v9694_v36  ;;  %v7571_v30 = vpop.f32.mrb[149].mxu1  ;;  %v7577_v25 = vpop.f32.mrb[137].mxu0 }
0x25bb   :  { %v5373_v45 = vpop.f32.mrb[150].mxu1  ;;  %v5422_v61 = vpop.f32.mrb[138].mxu0 }
0x25bc   :  { %v7572_v31 = vpop.f32.mrb[151].mxu1  ;;  %v7578_v16 = vpop.f32.mrb[139].mxu0  ;;  %v5446_v62 = vsel %vm3940_vm11, %v5420_v5, -inf  ;;  %v5443_v43 = vsel %vm3940_vm11, %v5371_v51, -inf }
0x25bd   :  { %5447 = vmax.xlane.f32.xlu0 %v5446_v62  ;;  %5444 = vmax.xlane.f32.xlu1 %v5443_v43 }
0x25ce   :  { %5617 = vrot.lane.b32.xlu1 %v9956_v33, %s10334_s4 }
0x25d0   :  { %v5427_v36 = vpop.xlane.xlu0 %5426 }
0x25d1   :  { %v5449_v40 = vsub.f32 %v10031_v6, %v5427_v36 }
0x25d2   :  { %5665 = vrot.lane.b32.xlu1 %v9965_v59, %s10334_s4 }
0x25d3   :  { %5569 = vrot.lane.b32.xlu0 %v9961_v22, %s10334_s4  ;;  %v5457_v1 = vmul.f32 1.442695, %v5449_v40 }
0x25d7   :  { %v5436_v10 = vpop.xlane.xlu0 %5435 }
0x25d8   :  { %v5452_v63 = vsub.f32 %v5224_v35, %v5436_v10  ;;  %v5430_v50 = vpop.xlane.xlu1 %5429 }
0x25d9   :  { %v5450_v54 = vsub.f32 %v5126_v37, %v5430_v50 }
0x25da   :  { %v5463_v48 = vmul.f32 1.442695, %v5452_v63 }
0x25db   :  { %v5459_v32 = vmul.f32 1.442695, %v5450_v54 }
0x25dc   :  { %8188 = vpow2.f32 %v5463_v48 }
0x25dd   :  { %8190 = vpow2.f32 %v5457_v1 }
0x25de   :  { %8192 = vpow2.f32 %v5459_v32 }
0x25e0   :  { %v5433_v6 = vpop.xlane.xlu0 %5432 }
0x25e1   :  { %v5451_v37 = vsub.f32 %v5175_v42, %v5433_v6 }
0x25e3   :  { %v5461_v60 = vmul.f32 1.442695, %v5451_v37 }
0x25e5   :  { %8194 = vpow2.f32 %v5461_v60 }
0x25e6   :  { %v10059_v33 = vpop.eup %8188 }
0x25e7   :  { %v8191_v39 = vpop.eup %8190  ;;  %v5482_v59 = vsel %vm3940_vm11, %v10059_v33, 0.0 }
0x25e8   :  { %v8193_v22 = vpop.eup %8192  ;;  %v5473_v38 = vsel %vm3940_vm11, %v8191_v39, 0.0 }
0x25e9   :  { %v5476_v35 = vsel %vm3940_vm11, %v8193_v22, 0.0 }
0x25ef   :  { %v10069_v13 = vpop.eup %8194 }
0x25f0   :  { %v5479_v27 = vsel %vm3940_vm11, %v10069_v13, 0.0 }
0x25f2   :  { %5483 = vadd.xlane.f32.xlu0 %v5482_v59 }
0x25f6   :  { %5477 = vadd.xlane.f32.xlu0 %v5476_v35  ;;  %5474 = vadd.xlane.f32.xlu1 %v5473_v38 }
0x2607   :  { %5761 = vrot.lane.b32.xlu1 %v9969_v20, %s10334_s4 }
0x260c   :  { %5713 = vrot.lane.b32.xlu0 %v9971_v26, %s10334_s4 }
0x262b   :  { %5480 = vadd.xlane.f32.xlu1 %v5479_v27 }
0x2642   :  { %v5442_v47 = vpop.xlane.xlu0 %5441  ;;  %v5439_v46 = vpop.xlane.xlu1 %5438 }
0x2643   :  { %v5454_v58 = vsub.f32 %v5322_v28, %v5442_v47  ;;  %v5453_v53 = vsub.f32 %v10042_v7, %v5439_v46 }
0x2645   :  { %v5467_v55 = vmul.f32 1.442695, %v5454_v58  ;;  %v5465_v20 = vmul.f32 1.442695, %v5453_v53 }
0x2647   :  { %8196 = vpow2.f32 %v5467_v55 }
0x2648   :  { %8198 = vpow2.f32 %v5465_v20 }
0x264a   :  { %v5448_v26 = vpop.xlane.xlu0 %5447  ;;  %v5445_v15 = vpop.xlane.xlu1 %5444 }
0x264b   :  { %v5456_v42 = vsub.f32 %v5420_v5, %v5448_v26  ;;  %v5455_v23 = vsub.f32 %v5371_v51, %v5445_v15 }
0x264d   :  { %v5471_v29 = vmul.f32 1.442695, %v5456_v42  ;;  %v5469_v8 = vmul.f32 1.442695, %v5455_v23 }
0x264e   :  { %v5570_v21 = vpop.permute.xlu0 %5569  ;;  %v5618_v45 = vpop.permute.xlu1 %5617 }
0x264f   :  { %8200 = vpow2.f32 %v5471_v29  ;;  %v5575_v18 = vsel %vm1077_vm6, %v5570_v21, 0 }
0x2650   :  { %8202 = vpow2.f32 %v5469_v8  ;;  %7586 = vmatpush3.bf16.msra.mxu0 %v5575_v18 }
0x2651   :  { %v10075_v2 = vpop.eup %8196  ;;  %7597 = vmatprep.subr.bf16.mxu0 %v8265_v41 }
0x2652   :  { %v10078_v7 = vpop.eup %8198  ;;  %v5488_v28 = vsel %vm3940_vm11, %v10075_v2, 0.0  ;;  %v5666_v61 = vpop.permute.xlu1 %5665 }
0x2653   :  { %5489 = vadd.xlane.f32.xlu0 %v5488_v28  ;;  %v5485_v34 = vsel %vm3940_vm11, %v10078_v7, 0.0 }
0x2654   :  { %5486 = vadd.xlane.f32.xlu1 %v5485_v34 }
0x2659   :  { %v10084_v51 = vpop.eup %8200 }
0x265a   :  { %v10086_v5 = vpop.eup %8202  ;;  %v5494_v30 = vsel %vm3940_vm11, %v10084_v51, 0.0 }
0x265b   :  { %5495 = vadd.xlane.f32.xlu0 %v5494_v30  ;;  %v5491_v25 = vsel %vm3940_vm11, %v10086_v5, 0.0 }
0x265c   :  { %5492 = vadd.xlane.f32.xlu1 %v5491_v25 }
0x266d   :  { %5857 = vrot.lane.b32.xlu1 %v9984_v19, %s10334_s4  ;;  %v5671_v19 = vsel %vm1077_vm6, %v5666_v61, 0 }
0x2671   :  { %5809 = vrot.lane.b32.xlu0 %v9978_v49, %s10334_s4  ;;  %v5623_v49 = vsel %vm1077_vm6, %v5618_v45, 0 }
0x267f   :  { %v5484_v31 = vpop.xlane.xlu0 %5483 }
0x2683   :  { %v5478_v16 = vpop.xlane.xlu0 %5477  ;;  %v5475_v62 = vpop.xlane.xlu1 %5474 }
0x2684   :  { %8204 = vrcp.f32 %v5478_v16 }
0x2685   :  { %8206 = vrcp.f32 %v5475_v62 }
0x2686   :  { %8208 = vrcp.f32 %v5484_v31 }
0x2687   :  { %v5762_v1 = vpop.permute.xlu1 %5761  ;;  %v5714_v35 = vpop.permute.xlu0 %5713 }
0x2688   :  { %v5719_v6 = vsel %vm1077_vm6, %v5714_v35, 0 }
0x268e   :  { %v8205_v43 = vpop.eup %8204 }
0x268f   :  { %v8207_v36 = vpop.eup %8206  ;;  %v5506_v10 = vmul.f32 %v8205_v43, %v8193_v22 }
0x2690   :  { %v5505_v63 = vmul.f32 %v8207_v36, %v8191_v39  ;;  %v8209_v40 = vpop.eup %8208  ;;  %v5767_v39 = vsel %vm1077_vm6, %v5762_v1, 0 }
0x2691   :  { %v5514_v50 = vpack.c.bf16 %v5506_v10, %v5506_v10  ;;  %v5508_v54 = vmul.f32 %v8209_v40, %v10059_v33  ;;  %v7896_v40 = vld [vmem:[%s10296_s19 + $0x10] sm:$0xff]  }
0x2692   :  { %v5513_v48 = vpack.c.bf16 %v5505_v63, %v5505_v63 }
0x2693   :  { %7588 = vmatmul.mubr.msk.bf16.vlgmr.msra.gmra.mrb[140].mxu0 %vm3940_vm11, %v5514_v50  ;;  %v5516_v32 = vpack.c.bf16 %v5508_v54, %v5508_v54 }
0x2694   :  { %7582 = vmatmul.mubr.msk.bf16.vlgmr.msra.gmra.mrb[152].mxu1 %vm3940_vm11, %v5513_v48  ;;  %7598 = vmatpush3.bf16.msra.mxu0 %v5671_v19  ;;  %v7897_v48 = vld [vmem:[%s10296_s19 + $0x18] sm:$0xff]  }
0x2695   :  { %7592 = vmatpush3.bf16.msra.mxu1 %v5623_v49  ;;  %7599 = vmatprep.mubr.msk.bf16.mxu0 %vm8266_vm2, %v8265_v41 }
0x2696   :  { %7609 = vmatprep.subr.bf16.mxu0 %v8265_v41  ;;  %7593 = vmatprep.mubr.msk.bf16.mxu1 %vm8266_vm2, %v8265_v41 }
0x2697   :  { %7603 = vmatprep.subr.bf16.mxu1 %v8265_v41 }
0x269b   :  { %7600 = vmatmul.mubr.msk.bf16.vlgmr.msra.gmra.mrb[144].mxu0 %vm3940_vm11, %v5516_v32 }
0x269c   :  { %7610 = vmatpush3.bf16.msra.mxu0 %v5767_v39  ;;  %7611 = vmatprep.mubr.msk.bf16.mxu0 %vm8266_vm2, %v8265_v41 }
0x269d   :  { %7621 = vmatprep.subr.bf16.mxu0 %v8265_v41 }
0x26b8   :  { %v5481_v33 = vpop.xlane.xlu1 %5480 }
0x26b9   :  { %8210 = vrcp.f32 %v5481_v33 }
0x26c3   :  { %v8211_v59 = vpop.eup %8210 }
0x26c4   :  { %v5507_v22 = vmul.f32 %v8211_v59, %v10069_v13 }
0x26c6   :  { %v5515_v38 = vpack.c.bf16 %v5507_v22, %v5507_v22 }
0x26c8   :  { %7594 = vmatmul.mubr.msk.bf16.vlgmr.msra.gmra.mrb[156].mxu1 %vm3940_vm11, %v5515_v38 }
0x26c9   :  { %7604 = vmatpush3.bf16.msra.mxu1 %v5719_v6  ;;  %7605 = vmatprep.mubr.msk.bf16.mxu1 %vm8266_vm2, %v8265_v41 }
0x26ca   :  { %7615 = vmatprep.subr.bf16.mxu1 %v8265_v41 }
0x26e0   :  { %v5490_v37 = vpop.xlane.xlu0 %5489 }
0x26e1   :  { %8212 = vrcp.f32 %v5490_v37  ;;  %v5487_v60 = vpop.xlane.xlu1 %5486 }
0x26e2   :  { %8214 = vrcp.f32 %v5487_v60 }
0x26e8   :  { %v5496_v27 = vpop.xlane.xlu0 %5495 }
0x26e9   :  { %8216 = vrcp.f32 %v5496_v27  ;;  %v5493_v47 = vpop.xlane.xlu1 %5492 }
0x26ea   :  { %8218 = vrcp.f32 %v5493_v47 }
0x26eb   :  { %v8213_v13 = vpop.eup %8212 }
0x26ec   :  { %v8215_v46 = vpop.eup %8214  ;;  %v5510_v58 = vmul.f32 %v8213_v13, %v10075_v2  ;;  %v5810_v20 = vpop.permute.xlu0 %5809 }
0x26ed   :  { %v5509_v53 = vmul.f32 %v8215_v46, %v10078_v7  ;;  %v5858_v55 = vpop.permute.xlu1 %5857  ;;  %v5815_v23 = vsel %vm1077_vm6, %v5810_v20, 0 }
0x26ee   :  { %v5518_v26 = vpack.c.bf16 %v5510_v58, %v5510_v58  ;;  %v5863_v42 = vsel %vm1077_vm6, %v5858_v55, 0 }
0x26ef   :  { %v5517_v15 = vpack.c.bf16 %v5509_v53, %v5509_v53 }
0x26f0   :  { %7612 = vmatmul.mubr.msk.bf16.vlgmr.msra.gmra.mrb[148].mxu0 %vm3940_vm11, %v5518_v26 }
0x26f1   :  { %7606 = vmatmul.mubr.msk.bf16.vlgmr.msra.gmra.mrb[160].mxu1 %vm3940_vm11, %v5517_v15  ;;  %7622 = vmatpush3.bf16.msra.mxu0 %v5863_v42 }
0x26f2   :  { %7616 = vmatpush3.bf16.msra.mxu1 %v5815_v23  ;;  %7617 = vmatprep.mubr.msk.bf16.mxu1 %vm8266_vm2, %v8265_v41 }
0x26f3   :  { %v8217_v29 = vpop.eup %8216  ;;  %7623 = vmatprep.mubr.msk.bf16.mxu0 %vm8266_vm2, %v8265_v41  ;;  %7627 = vmatprep.subr.bf16.mxu1 %v7896_v40 }
0x26f4   :  { %v8219_v8 = vpop.eup %8218  ;;  %v5512_v21 = vmul.f32 %v8217_v29, %v10084_v51 }
0x26f5   :  { %v5511_v18 = vmul.f32 %v8219_v8, %v10086_v5 }
0x26f6   :  { %v5520_v2 = vpack.c.bf16 %v5512_v21, %v5512_v21 }
0x26f7   :  { %v5519_v7 = vpack.c.bf16 %v5511_v18, %v5511_v18 }
0x26f8   :  { %7624 = vmatmul.mubr.msk.bf16.vlgmr.msra.gmra.mrb[152].mxu0 %vm3940_vm11, %v5520_v2  ;;  %v5930_v2 = vrot.slane %v9941_v17, %v8859_v24 }
0x26f9   :  { %7618 = vmatmul.mubr.msk.bf16.vlgmr.msra.gmra.mrb[164].mxu1 %vm3940_vm11, %v5519_v7 }
0x26fa   :  { %7628 = vmatpush3.bf16.msra.mxu1 %v7896_v40 }
0x26fb   :  { %7629 = vmatprep.subr.bf16.mxu1 %v7897_v48 }
0x26fe   :  { %7630 = vmatpush3.bf16.msra.mxu1 %v7897_v48 }
0x2766   :  { %v5611_v28 = vpop.f32.mrb[140].mxu0 }
0x2767   :  { %v5563_v34 = vpop.f32.mrb[152].mxu1  ;;  %v7589_v30 = vpop.f32.mrb[141].mxu0 }
0x2768   :  { %v7583_v25 = vpop.f32.mrb[153].mxu1  ;;  %v5614_v45 = vpop.f32.mrb[142].mxu0 }
0x2769   :  { %v5566_v61 = vpop.f32.mrb[154].mxu1  ;;  %v7590_v31 = vpop.f32.mrb[143].mxu0 }
0x276a   :  { %v7584_v16 = vpop.f32.mrb[155].mxu1 }
0x276e   :  { %v5707_v62 = vpop.f32.mrb[144].mxu0 }
0x276f   :  { %v7601_v43 = vpop.f32.mrb[145].mxu0 }
0x2770   :  { %v5710_v36 = vpop.f32.mrb[146].mxu0 }
0x2771   :  { %v7602_v51 = vpop.f32.mrb[147].mxu0 }
0x279b   :  { %v5659_v10 = vpop.f32.mrb[156].mxu1 }
0x279c   :  { %v7595_v5 = vpop.f32.mrb[157].mxu1 }
0x279d   :  { %v5662_v63 = vpop.f32.mrb[158].mxu1 }
0x279e   :  { %v7596_v50 = vpop.f32.mrb[159].mxu1 }
0x27c3   :  { %v5803_v19 = vpop.f32.mrb[148].mxu0 }
0x27c4   :  { %v5755_v49 = vpop.f32.mrb[160].mxu1  ;;  %v7613_v54 = vpop.f32.mrb[149].mxu0 }
0x27c5   :  { %v7828_v1 = vpack.i.bf16 %v5803_v19, %v5755_v49  ;;  %v7607_v32 = vpop.f32.mrb[161].mxu1  ;;  %v5806_v39 = vpop.f32.mrb[150].mxu0 }
0x27c6   :  { %v5758_v33 = vpop.f32.mrb[162].mxu1  ;;  %v7614_v59 = vpop.f32.mrb[151].mxu0 }
0x27c7   :  { %7829 = vrot.lane.b32.xlu0 %v7828_v1, %s10335_s3  ;;  %v7608_v22 = vpop.f32.mrb[163].mxu1 }
0x27cb   :  { %v5899_v35 = vpop.f32.mrb[152].mxu0 }
0x27cc   :  { %v5851_v38 = vpop.f32.mrb[164].mxu1  ;;  %v7625_v6 = vpop.f32.mrb[153].mxu0 }
0x27cd   :  { %v7833_v37 = vpack.i.bf16 %v5899_v35, %v5851_v38  ;;  %v7619_v60 = vpop.f32.mrb[165].mxu1  ;;  %v5902_v27 = vpop.f32.mrb[154].mxu0 }
0x27ce   :  { %v5854_v47 = vpop.f32.mrb[166].mxu1  ;;  %v7626_v13 = vpop.f32.mrb[155].mxu0  ;;  %v7899_v60 = vld [vmem:[%s10297_s20 + $0x18] sm:$0xff]  }
0x27cf   :  { %7834 = vrot.lane.b32.xlu1 %v7833_v37, %s10335_s3  ;;  %v7620_v46 = vpop.f32.mrb[167].mxu1  ;;  %v7898_v37 = vld [vmem:[%s10297_s20 + $0x10] sm:$0xff]  }
0x27d0   :  { %7635 = vmatprep.subr.bf16.mxu0 %v7898_v37 }
0x27d1   :  { %7636 = vmatpush3.bf16.msra.mxu0 %v7898_v37 }
0x27d2   :  { %7637 = vmatprep.subr.bf16.mxu0 %v7899_v60 }
0x27d5   :  { %7638 = vmatpush3.bf16.msra.mxu0 %v7899_v60 }
0x27d6   :  { %7663 = vmatprep.subr.bf16.mxu0 %v8265_v41 }
0x2839   :  { %v7830_v58 = vpop.permute.xlu0 %7829 }
0x283a   :  { %v7832_v53 = vunpack.i.h.bf16 %v7830_v58  ;;  %v7831_v55 = vunpack.i.l.bf16 %v7830_v58 }
0x283c   :  { %v5922_v20 = vsel %vm666_vm3, %v5611_v28, %v7832_v53  ;;  %v5921_v26 = vsel %vm666_vm3, %v5563_v34, %v7831_v55 }
0x283d   :  { %v5925_v15 = vpack.c.bf16 %v5922_v20, %v5921_v26 }
0x283f   :  { %7631 = vmatprep.mubr.msk.bf16.mxu1 %vm270_vm1, %v5925_v15 }
0x2841   :  { %v7835_v42 = vpop.permute.xlu1 %7834 }
0x2842   :  { %v7837_v23 = vunpack.i.h.bf16 %v7835_v42  ;;  %v7836_v29 = vunpack.i.l.bf16 %v7835_v42 }
0x2844   :  { %v5924_v8 = vsel %vm666_vm3, %v5707_v62, %v7837_v23  ;;  %v5923_v21 = vsel %vm666_vm3, %v5659_v10, %v7836_v29  ;;  %v6057_v29 = vrot.slane %v9941_v17, %v8934_v44 }
0x2845   :  { %v5926_v18 = vpack.c.bf16 %v5924_v8, %v5923_v21 }
0x2847   :  { %7632 = vmatmul.mubr.msk.bf16.vlgmr.msra.gmra.mrb[168].mxu1 %vm270_vm1, %v5926_v18 }
0x291a   :  { %v7633_v7 = vpop.f32.mrb[168].mxu1 }
0x291b   :  { %v5983_v28 = vpop.f32.mrb[169].mxu1  ;;  %v5992_v30 = vadd.f32 %v7633_v7, %v5930_v2 }
0x291c   :  { %v5984_v34 = vadd.f32 %v5983_v28, %v5930_v2  ;;  %v7634_v25 = vpop.f32.mrb[170].mxu1  ;;  %v6065_v28 = vrot.slane %v9941_v17, %v8944_v56  ;;  %v7900_v17 = vld [vmem:[%s10298_s21 + $0x40] sm:$0xff]  }
0x291d   :  { %v5986_v45 = vpop.f32.mrb[171].mxu1  ;;  %v10152_v16 = vadd.f32 %v5992_v30, %v9907_v52  ;;  %v5995_v62 = vadd.f32 %v7634_v25, %v5930_v2  ;;  %7643 = vmatprep.subr.bf16.mxu1 %v7900_v17 }
0x291e   :  { %v10149_v61 = vadd.f32 %v5984_v34, %v9904_v12  ;;  %v5987_v31 = vadd.f32 %v5986_v45, %v5930_v2  ;;  %7644 = vmatpush3.bf16.msra.mxu1 %v7900_v17 }
0x291f   :  { %v10162_v51 = vadd.f32 %v5995_v62, %v9915_v14  ;;  %v6008_v12 = vsel %vm270_vm1, %v10152_v16, 0.0 }
0x2920   :  { %v10155_v43 = vadd.f32 %v5987_v31, %v9910_v11  ;;  %v6002_v24 = vsel %vm270_vm1, %v10149_v61, 0.0 }
0x2921   :  { %6003 = vadd.xlane.f32.xlu0 %v6002_v24  ;;  %v6011_v52 = vsel %vm270_vm1, %v10162_v51, 0.0 }
0x2922   :  { %v6005_v36 = vsel %vm270_vm1, %v10155_v43, 0.0 }
0x2923   :  { %6006 = vadd.xlane.f32.xlu1 %v6005_v36 }
0x2925   :  { %6009 = vadd.xlane.f32.xlu0 %v6008_v12 }
0x2929   :  { %6012 = vadd.xlane.f32.xlu0 %v6011_v52 }
0x29ae   :  { %v6004_v11 = vpop.xlane.xlu0 %6003 }
0x29af   :  { %v6014_v10 = vmul.f32 0.03125, %v6004_v11 }
0x29b0   :  { %v6007_v5 = vpop.xlane.xlu1 %6006 }
0x29b1   :  { %v6018_v63 = vsub.f32 %v10149_v61, %v6014_v10  ;;  %v6015_v50 = vmul.f32 0.03125, %v6007_v5 }
0x29b2   :  { %v6010_v40 = vpop.xlane.xlu0 %6009 }
0x29b3   :  { %v6019_v48 = vsub.f32 %v10155_v43, %v6015_v50  ;;  %v6016_v19 = vmul.f32 0.03125, %v6010_v40  ;;  %v6022_v14 = vmul.f32 %v6018_v63, %v6018_v63  ;;  %v7902_v50 = vld [vmem:[%s10298_s21 + $0x50] sm:$0xff]   ;;  %v7903_v40 = vld [vmem:[%s10298_s21 + $0x58] sm:$0xff]  }
0x29b5   :  { %v6020_v49 = vsub.f32 %v10152_v16, %v6016_v19  ;;  %v6026_v54 = vsel %vm270_vm1, %v6022_v14, 0.0  ;;  %v6023_v1 = vmul.f32 %v6019_v48, %v6019_v48  ;;  %v7905_v19 = vld [vmem:[%s10298_s21 + $0x68] sm:$0xff]   ;;  %v7906_v14 = vld [vmem:[%s10298_s21 + $0x70] sm:$0xff]  }
0x29b6   :  { %6027 = vadd.xlane.f32.xlu1 %v6026_v54  ;;  %v6013_v32 = vpop.xlane.xlu0 %6012  ;;  %v6839_v54 = vld [vmem:[%s10299_s17 + $0x1] ss:$0 sm:$0xff] }
0x29b7   :  { %v6017_v39 = vmul.f32 0.03125, %v6013_v32  ;;  %v6029_v33 = vsel %vm270_vm1, %v6023_v1, 0.0  ;;  %v6024_v59 = vmul.f32 %v6020_v49, %v6020_v49 }
0x29b8   :  { %6030 = vadd.xlane.f32.xlu0 %v6029_v33 }
0x29b9   :  { %v6021_v22 = vsub.f32 %v10162_v51, %v6017_v39  ;;  %v6032_v35 = vsel %vm270_vm1, %v6024_v59, 0.0 }
0x29ba   :  { %6033 = vadd.xlane.f32.xlu1 %v6032_v35 }
0x29bb   :  { %v6025_v38 = vmul.f32 %v6021_v22, %v6021_v22 }
0x29bd   :  { %v6035_v6 = vsel %vm270_vm1, %v6025_v38, 0.0 }
0x29be   :  { %6036 = vadd.xlane.f32.xlu0 %v6035_v6 }
0x2a43   :  { %v6028_v27 = vpop.xlane.xlu1 %6027 }
0x2a44   :  { %v6038_v47 = vmul.f32 0.03125, %v6028_v27 }
0x2a45   :  { %v6031_v13 = vpop.xlane.xlu0 %6030 }
0x2a46   :  { %v6042_v46 = vadd.f32 1e-05, %v6038_v47  ;;  %v6039_v58 = vmul.f32 0.03125, %v6031_v13 }
0x2a47   :  { %v6034_v53 = vpop.xlane.xlu1 %6033 }
0x2a48   :  { %8220 = vrsqrt.f32 %v6042_v46  ;;  %v6043_v55 = vadd.f32 1e-05, %v6039_v58  ;;  %v6040_v20 = vmul.f32 0.03125, %v6034_v53 }
0x2a4a   :  { %8222 = vrsqrt.f32 %v6043_v55  ;;  %v6044_v26 = vadd.f32 1e-05, %v6040_v20 }
0x2a4b   :  { %v6037_v15 = vpop.xlane.xlu0 %6036 }
0x2a4c   :  { %8224 = vrsqrt.f32 %v6044_v26  ;;  %v6041_v42 = vmul.f32 0.03125, %v6037_v15 }
0x2a4e   :  { %v6045_v23 = vadd.f32 1e-05, %v6041_v42 }
0x2a50   :  { %8226 = vrsqrt.f32 %v6045_v23 }
0x2a52   :  { %v8221_v8 = vpop.eup %8220 }
0x2a53   :  { %v6050_v21 = vmul.f32 %v8221_v8, %v6018_v63  ;;  %v7901_v63 = vld [vmem:[%s10298_s21 + $0x48] sm:$0xff]  }
0x2a54   :  { %v8223_v18 = vpop.eup %8222  ;;  %7645 = vmatprep.subr.bf16.mxu1 %v7901_v63 }
0x2a55   :  { %v6051_v2 = vmul.f32 %v8223_v18, %v6019_v48  ;;  %v6058_v7 = vmul.f32 %v6057_v29, %v6050_v21  ;;  %7646 = vmatpush3.bf16.msra.mxu1 %v7901_v63  ;;  %v7904_v48 = vld [vmem:[%s10298_s21 + $0x60] sm:$0xff]  }
0x2a56   :  { %v8225_v30 = vpop.eup %8224  ;;  %7647 = vmatprep.subr.bf16.mxu1 %v7902_v50 }
0x2a57   :  { %v6052_v34 = vmul.f32 %v8225_v30, %v6020_v49  ;;  %v6059_v25 = vmul.f32 %v6057_v29, %v6051_v2  ;;  %v6066_v45 = vadd.f32 %v6065_v28, %v6058_v7  ;;  %v7907_v49 = vld [vmem:[%s10298_s21 + $0x78] sm:$0xff]  }
0x2a59   :  { %v6067_v31 = vadd.f32 %v6065_v28, %v6059_v25  ;;  %v6060_v24 = vmul.f32 %v6057_v29, %v6052_v34  ;;  %7648 = vmatpush3.bf16.msra.mxu1 %v7902_v50 }
0x2a5a   :  { %v8227_v62 = vpop.eup %8226  ;;  %7649 = vmatprep.subr.bf16.mxu1 %v7903_v40 }
0x2a5b   :  { %v6053_v36 = vmul.f32 %v8227_v62, %v6021_v22  ;;  %v6070_v12 = vpack.c.bf16 %v6067_v31, %v6066_v45  ;;  %v6068_v11 = vadd.f32 %v6065_v28, %v6060_v24  ;;  %v8263_v31 = vld [vmem:[%s10293_s15 + $0x8] sm:$0x3f] }
0x2a5c   :  { %v6182_v62 = vrot.slane %v8263_v31, %v9001_v4  ;;  %v6857_v31 = vld [vmem:[%s10302_s22 + $0x1] ss:$0 sm:$0xff] }
0x2a5d   :  { %v6061_v52 = vmul.f32 %v6057_v29, %v6053_v36  ;;  %7639 = vmatprep.mubr.msk.bf16.mxu0 %vm270_vm1, %v6070_v12  ;;  %7650 = vmatpush3.bf16.msra.mxu1 %v7903_v40 }
0x2a5e   :  { %7651 = vmatprep.subr.bf16.mxu1 %v7904_v48 }
0x2a5f   :  { %v6069_v10 = vadd.f32 %v6065_v28, %v6061_v52 }
0x2a61   :  { %v6071_v5 = vpack.c.bf16 %v6069_v10, %v6068_v11  ;;  %7652 = vmatpush3.bf16.msra.mxu1 %v7904_v48 }
0x2a62   :  { %7653 = vmatprep.subr.bf16.mxu1 %v7905_v19 }
0x2a63   :  { %7640 = vmatmul.mubr.msk.bf16.vlgmr.msra.gmra.mrb[156].mxu0 %vm270_vm1, %v6071_v5 }
0x2a64   :  { %7667 = vmatprep.mubr.msk.bf16.mxu0 %vm8266_vm2, %v8265_v41 }
0x2a65   :  { %7654 = vmatpush3.bf16.msra.mxu1 %v7905_v19 }
0x2a66   :  { %7655 = vmatprep.subr.bf16.mxu1 %v7906_v14 }
0x2a69   :  { %7656 = vmatpush3.bf16.msra.mxu1 %v7906_v14 }
0x2a6a   :  { %7657 = vmatprep.subr.bf16.mxu1 %v7907_v49 }
0x2a6d   :  { %7658 = vmatpush3.bf16.msra.mxu1 %v7907_v49 }
0x2b36   :  { %v7641_v1 = vpop.f32.mrb[156].mxu0 }
0x2b37   :  { %v6139_v32 = vadd.f32 %v7641_v1, %v6839_v54  ;;  %v6130_v39 = vpop.f32.mrb[157].mxu0 }
0x2b38   :  { %v6131_v33 = vadd.f32 %v6839_v54, %v6130_v39  ;;  %v7642_v59 = vpop.f32.mrb[158].mxu0 }
0x2b39   :  { %v6846_v22 = vmul.f32 -1.702, %v6139_v32  ;;  %v6142_v35 = vadd.f32 %v7642_v59, %v6839_v54  ;;  %v6133_v38 = vpop.f32.mrb[159].mxu0 }
0x2b3a   :  { %v6844_v6 = vmul.f32 -1.702, %v6131_v33  ;;  %v6134_v37 = vadd.f32 %v6839_v54, %v6133_v38 }
0x2b3b   :  { %v6157_v60 = vmul.f32 1.442695, %v6846_v22  ;;  %v6847_v27 = vmul.f32 -1.702, %v6142_v35 }
0x2b3c   :  { %v6153_v47 = vmul.f32 1.442695, %v6844_v6  ;;  %v6845_v13 = vmul.f32 -1.702, %v6134_v37 }
0x2b3d   :  { %8228 = vpow2.f32 %v6157_v60  ;;  %v6159_v46 = vmul.f32 1.442695, %v6847_v27 }
0x2b3e   :  { %8230 = vpow2.f32 %v6153_v47  ;;  %v6155_v58 = vmul.f32 1.442695, %v6845_v13 }
0x2b3f   :  { %8232 = vpow2.f32 %v6159_v46 }
0x2b40   :  { %8234 = vpow2.f32 %v6155_v58  ;;  %v6354_v58 = vld [vmem:[%s10300_s14] sm:$0xf] }
0x2b47   :  { %v8229_v53 = vpop.eup %8228 }
0x2b48   :  { %v8231_v55 = vpop.eup %8230  ;;  %v6163_v20 = vadd.f32 1.0, %v8229_v53  ;;  %v6358_v53 = vrot.slane %v6354_v58, %v8573_v57  ;;  %v7909_v57 = vld [vmem:[%s10301_s23 + $0x8] sm:$0xff]  }
0x2b49   :  { %v8233_v26 = vpop.eup %8232  ;;  %v6161_v15 = vadd.f32 1.0, %v8231_v55  ;;  %v6365_v55 = vrot.slane %v6354_v58, %v8584_v3 }
0x2b4a   :  { %v8235_v42 = vpop.eup %8234  ;;  %8236 = vrcp.f32 %v6163_v20  ;;  %v6164_v23 = vadd.f32 1.0, %v8233_v26  ;;  %v6372_v20 = vrot.slane %v6354_v58, %v8934_v44  ;;  %v6379_v26 = vrot.slane %v6354_v58, %v8944_v56 }
0x2b4b   :  { %8238 = vrcp.f32 %v6161_v15  ;;  %v6162_v29 = vadd.f32 1.0, %v8235_v42  ;;  %v7908_v15 = vld [vmem:[%s10301_s23] sm:$0xff]  }
0x2b4c   :  { %8240 = vrcp.f32 %v6164_v23  ;;  %7664 = vmatpush3.bf16.msra.mxu0 %v7908_v15 }
0x2b4d   :  { %8242 = vrcp.f32 %v6162_v29  ;;  %7665 = vmatprep.subr.bf16.mxu0 %v8265_v41 }
0x2b50   :  { %7666 = vmatpush3.bf16.msra.mxu0 %v7909_v57 }
0x2b51   :  { %7671 = vmatprep.subr.mxu0 %v8265_v41 }
0x2b54   :  { %v8237_v8 = vpop.eup %8236 }
0x2b55   :  { %v8239_v21 = vpop.eup %8238  ;;  %v6175_v7 = vmul.f32 %v8237_v8, %v6139_v32 }
0x2b56   :  { %v8241_v18 = vpop.eup %8240  ;;  %v6173_v30 = vmul.f32 %v8239_v21, %v6131_v33 }
0x2b57   :  { %v8243_v2 = vpop.eup %8242  ;;  %v6176_v28 = vmul.f32 %v8241_v18, %v6142_v35 }
0x2b58   :  { %v6174_v34 = vmul.f32 %v8243_v2, %v6134_v37 }
0x2b59   :  { %v6178_v25 = vpack.c.bf16 %v6176_v28, %v6175_v7 }
0x2b5a   :  { %v6177_v45 = vpack.c.bf16 %v6174_v34, %v6173_v30 }
0x2b5c   :  { %7659 = vmatprep.mubr.bf16.mxu1 %v6177_v45 }
0x2b5d   :  { %7660 = vmatmul.mubr.bf16.vlgmr.msra.gmra.mrb[172].mxu1 %v6178_v25 }
0x2c30   :  { %v7661_v24 = vpop.f32.mrb[172].mxu1 }
0x2c31   :  { %v6265_v36 = vpop.f32.mrb[173].mxu1  ;;  %v6274_v12 = vadd.f32 %v7661_v24, %v6182_v62 }
0x2c32   :  { %v6266_v52 = vadd.f32 %v6265_v36, %v6182_v62  ;;  %v7662_v11 = vpop.f32.mrb[174].mxu1 }
0x2c33   :  { %v6268_v10 = vpop.f32.mrb[175].mxu1  ;;  %v6277_v17 = vadd.f32 %v7662_v11, %v6182_v62  ;;  %v6282_v50 = vadd.f32 %v6274_v12, %v10152_v16 }
0x2c34   :  { %v6280_v5 = vadd.f32 %v6266_v52, %v10149_v61  ;;  %v6269_v63 = vadd.f32 %v6268_v10, %v6182_v62 }
0x2c35   :  { %v6283_v19 = vadd.f32 %v6277_v17, %v10162_v51  ;;  %v6292_v14 = vsel %vm270_vm1, %v6282_v50, 0.0 }
0x2c36   :  { %v6281_v40 = vadd.f32 %v6269_v63, %v10155_v43  ;;  %v6286_v48 = vsel %vm270_vm1, %v6280_v5, 0.0 }
0x2c37   :  { %6287 = vadd.xlane.f32.xlu1 %v6286_v48  ;;  %v6295_v49 = vsel %vm270_vm1, %v6283_v19, 0.0 }
0x2c38   :  { %v6289_v4 = vsel %vm270_vm1, %v6281_v40, 0.0 }
0x2c39   :  { %6290 = vadd.xlane.f32.xlu0 %v6289_v4 }
0x2c3b   :  { %6293 = vadd.xlane.f32.xlu1 %v6292_v14 }
0x2c3d   :  { %6296 = vadd.xlane.f32.xlu0 %v6295_v49 }
0x2cc4   :  { %v6288_v61 = vpop.xlane.xlu1 %6287 }
0x2cc5   :  { %v6298_v1 = vmul.f32 0.03125, %v6288_v61 }
0x2cc6   :  { %v6291_v54 = vpop.xlane.xlu0 %6290 }
0x2cc7   :  { %v6299_v16 = vmul.f32 0.03125, %v6291_v54  ;;  %v10230_v59 = vsub.f32 %v6280_v5, %v6298_v1 }
0x2cc8   :  { %v6294_v32 = vpop.xlane.xlu1 %6293 }
0x2cc9   :  { %v6303_v43 = vsub.f32 %v6281_v40, %v6299_v16  ;;  %v6300_v39 = vmul.f32 0.03125, %v6294_v32  ;;  %v6306_v47 = vmul.f32 %v10230_v59, %v10230_v59 }
0x2cca   :  { %v6297_v33 = vpop.xlane.xlu0 %6296 }
0x2ccb   :  { %v6304_v51 = vsub.f32 %v6282_v50, %v6300_v39  ;;  %v6301_v22 = vmul.f32 0.03125, %v6297_v33  ;;  %v6307_v35 = vmul.f32 %v6303_v43, %v6303_v43  ;;  %v6310_v46 = vsel %vm270_vm1, %v6306_v47, 0.0 }
0x2ccd   :  { %v6305_v38 = vsub.f32 %v6283_v19, %v6301_v22  ;;  %v6313_v6 = vsel %vm270_vm1, %v6307_v35, 0.0  ;;  %v6308_v37 = vmul.f32 %v6304_v51, %v6304_v51 }
0x2cce   :  { %6314 = vadd.xlane.f32.xlu0 %v6313_v6 }
0x2ccf   :  { %v6316_v60 = vsel %vm270_vm1, %v6308_v37, 0.0  ;;  %v6309_v27 = vmul.f32 %v6305_v38, %v6305_v38 }
0x2cd0   :  { %6317 = vadd.xlane.f32.xlu1 %v6316_v60 }
0x2cd1   :  { %v6319_v13 = vsel %vm270_vm1, %v6309_v27, 0.0 }
0x2cd2   :  { %6320 = vadd.xlane.f32.xlu0 %v6319_v13 }
0x2cd4   :  { %6311 = vadd.xlane.f32.xlu1 %v6310_v46 }
0x2ce5   :  { %6360 = vbcast.lane.b32.xlu1 %v6358_v53, 256 }
0x2ce8   :  { %6367 = vbcast.lane.b32.xlu0 %v6365_v55, 256 }
0x2ce9   :  { %6374 = vbcast.lane.b32.xlu1 %v6372_v20, 256 }
0x2ced   :  { %6381 = vbcast.lane.b32.xlu1 %v6379_v26, 256 }
0x2d11   :  { %6495 = vadd.xlane.f32.xlu1 %v9603_v0  ;;  %v6856_v0 = vld [vmem:[%s10302_s22] ss:$0 sm:$0xff] }
0x2d5b   :  { %v6315_v3 = vpop.xlane.xlu0 %6314 }
0x2d5c   :  { %v6323_v44 = vmul.f32 0.03125, %v6315_v3 }
0x2d5d   :  { %v6318_v56 = vpop.xlane.xlu1 %6317 }
0x2d5e   :  { %v6327_v42 = vadd.f32 1e-05, %v6323_v44  ;;  %v6324_v23 = vmul.f32 0.03125, %v6318_v56 }
0x2d5f   :  { %v6321_v29 = vpop.xlane.xlu0 %6320 }
0x2d60   :  { %8244 = vrsqrt.f32 %v6327_v42  ;;  %v6328_v8 = vadd.f32 1e-05, %v6324_v23  ;;  %v6325_v21 = vmul.f32 0.03125, %v6321_v29 }
0x2d61   :  { %v6312_v18 = vpop.xlane.xlu1 %6311 }
0x2d62   :  { %8246 = vrsqrt.f32 %v6328_v8  ;;  %v6329_v2 = vadd.f32 1e-05, %v6325_v21  ;;  %v6322_v7 = vmul.f32 0.03125, %v6312_v18 }
0x2d63   :  { %v6368_v52 = vpop.permute.xlu0 %6367 }
0x2d64   :  { %8248 = vrsqrt.f32 %v6329_v2  ;;  %v6326_v28 = vadd.f32 1e-05, %v6322_v7 }
0x2d65   :  { %v6361_v30 = vpop.permute.xlu1 %6360 }
0x2d66   :  { %8250 = vrsqrt.f32 %v6326_v28 }
0x2d69   :  { %v6375_v62 = vpop.permute.xlu1 %6374 }
0x2d6a   :  { %v8245_v34 = vpop.eup %8244 }
0x2d6b   :  { %v6335_v25 = vmul.f32 %v8245_v34, %v6303_v43 }
0x2d6c   :  { %v8247_v45 = vpop.eup %8246 }
0x2d6d   :  { %v6343_v24 = vmul.f32 %v6856_v0, %v6335_v25  ;;  %v6336_v36 = vmul.f32 %v8247_v45, %v6304_v51  ;;  %v6382_v19 = vpop.permute.xlu1 %6381 }
0x2d6e   :  { %v8249_v12 = vpop.eup %8248 }
0x2d6f   :  { %v6351_v11 = vadd.f32 %v6857_v31, %v6343_v24  ;;  %v6344_v10 = vmul.f32 %v6856_v0, %v6336_v36  ;;  %v6337_v5 = vmul.f32 %v8249_v12, %v6305_v38 }
0x2d70   :  { %v8251_v17 = vpop.eup %8250 }
0x2d71   :  { %v6334_v63 = vmul.f32 %v8251_v17, %v10230_v59  ;;  %v6384_v50 = vmul.f32 %v6368_v52, %v6351_v11  ;;  %v6352_v40 = vadd.f32 %v6857_v31, %v6344_v10  ;;  %v6345_v48 = vmul.f32 %v6856_v0, %v6337_v5 }
0x2d73   :  { %v6342_v4 = vmul.f32 %v6856_v0, %v6334_v63  ;;  %v6394_v14 = vsel %vm270_vm1, %v6384_v50, 0.0  ;;  %v6385_v49 = vmul.f32 %v6375_v62, %v6352_v40  ;;  %v6353_v61 = vadd.f32 %v6857_v31, %v6345_v48 }
0x2d74   :  { %v6395_v54 = vrot.slane %v6394_v14, 4 }
0x2d75   :  { %v6350_v1 = vadd.f32 %v6857_v31, %v6342_v4  ;;  %v6401_v16 = vsel %vm270_vm1, %v6385_v49, 0.0  ;;  %v6386_v32 = vmul.f32 %v6382_v19, %v6353_v61 }
0x2d76   :  { %v6396_v43 = vadd.f32 %v6395_v54, %v6394_v14  ;;  %v6402_v39 = vrot.slane %v6401_v16, 4 }
0x2d77   :  { %v6383_v33 = vmul.f32 %v6361_v30, %v6350_v1  ;;  %v6408_v51 = vsel %vm270_vm1, %v6386_v32, 0.0 }
0x2d78   :  { %v6397_v59 = vrot.slane %v6396_v43, 2  ;;  %v6403_v22 = vadd.f32 %v6402_v39, %v6401_v16  ;;  %v6409_v35 = vrot.slane %v6408_v51, 4 }
0x2d79   :  { %v6387_v38 = vsel %vm270_vm1, %v6383_v33, 0.0 }
0x2d7a   :  { %v6388_v6 = vrot.slane %v6387_v38, 4  ;;  %v6398_v37 = vadd.f32 %v6397_v59, %v6396_v43  ;;  %v6404_v60 = vrot.slane %v6403_v22, 2  ;;  %v6410_v27 = vadd.f32 %v6409_v35, %v6408_v51 }
0x2d7c   :  { %v6389_v47 = vadd.f32 %v6388_v6, %v6387_v38  ;;  %v6399_v13 = vrot.slane %v6398_v37, 1  ;;  %v6405_v46 = vadd.f32 %v6404_v60, %v6403_v22  ;;  %v6411_v58 = vrot.slane %v6410_v27, 2 }
0x2d7e   :  { %v6390_v53 = vrot.slane %v6389_v47, 2  ;;  %v6406_v55 = vrot.slane %v6405_v46, 1  ;;  %v6412_v20 = vadd.f32 %v6411_v58, %v6410_v27  ;;  %v6400_v15 = vadd.f32 %v6399_v13, %v6398_v37 }
0x2d80   :  { %v6391_v26 = vadd.f32 %v6390_v53, %v6389_v47  ;;  %v6413_v57 = vrot.slane %v6412_v20, 1  ;;  %v6407_v3 = vadd.f32 %v6406_v55, %v6405_v46  ;;  %v6416_v23 = vpack.c.bf16 %v6400_v15, %v6400_v15 }
0x2d82   :  { %v6392_v44 = vrot.slane %v6391_v26, 1  ;;  %v6414_v56 = vadd.f32 %v6413_v57, %v6412_v20  ;;  %v6417_v29 = vpack.c.bf16 %v6407_v3, %v6407_v3  ;;  %v6428_v2 = vunpack.c.l.b16 %v6416_v23 }
0x2d84   :  { %v6393_v42 = vadd.f32 %v6392_v44, %v6391_v26  ;;  %v6418_v21 = vpack.c.bf16 %v6414_v56, %v6414_v56  ;;  %v6429_v7 = vunpack.c.l.b16 %v6417_v29 }
0x2d86   :  { %v6415_v8 = vpack.c.bf16 %v6393_v42, %v6393_v42  ;;  %v6430_v30 = vunpack.c.l.b16 %v6418_v21 }
0x2d88   :  { %v6427_v18 = vunpack.c.l.b16 %v6415_v8 }
0x2d8a   :  { %v6431_v28 = vsel %vm3201_vm7, %v6428_v2, %v6427_v18 }
0x2d8b   :  { %v6433_v34 = vsel %vm6432_vm12, %v6429_v7, %v6431_v28 }
0x2d8c   :  { %v6435_v0 = vsel %vm6434_vm13, %v6430_v30, %v6433_v34 }
0x2d8d   :  { %v6436_v25 = vpack.c.b16 %v6435_v0, %v6435_v0 }
0x2d8f   :  { %7668 = vmatmul.mubr.msk.bf16.vlgmr.msra.gmra.mrb[160].mxu0 %vm270_vm1, %v6436_v25 }
0x2d90   :  { %7673 = vmatprep.mubr.msk.f32.mxu0 %vm8266_vm2, %v8265_v41 }
0x2d9e   :  { %v6496_v52 = vpop.xlane.xlu1 %6495 }
0x2d9f   :  { %v6497_v11 = vadd.f32 1e-12, %v6496_v52 }
0x2e62   :  { %v6486_v45 = vpop.f32.mrb[160].mxu0 }
0x2e63   :  { %v6500_v31 = vmul.f32 %v6486_v45, %v6486_v45  ;;  %v7669_v62 = vpop.f32.mrb[161].mxu0  ;;  %6587 = vst.msk [vmem:[%s10294_s24 + $0x2] sm:$0xf] %vm6501_vm14, %v6486_v45 }
0x2e64   :  { %v6489_v24 = vpop.f32.mrb[162].mxu0 }
0x2e65   :  { %v7670_v36 = vpop.f32.mrb[163].mxu0  ;;  %v6502_v12 = vsel %vm6501_vm14, %v6500_v31, 0.0 }
0x2e66   :  { %6503 = vadd.xlane.f32.xlu0 %v6502_v12 }
0x2ef3   :  { %v6504_v10 = vpop.xlane.xlu0 %6503 }
0x2ef4   :  { %v6505_v5 = vadd.f32 1e-12, %v6504_v10 }
0x2ef6   :  { %8252 = vrsqrt.f32 %v6505_v5 }
0x2ef7   :  { %8254 = vrsqrt.f32 %v6497_v11 }
0x2f00   :  { %v8253_v17 = vpop.eup %8252 }
0x2f01   :  { %v8255_v41 = vpop.eup %8254  ;;  %v6507_v63 = vmul.f32 %v8253_v17, %v6486_v45 }
0x2f02   :  { %v6499_v50 = vmul.f32 %v8255_v41, %v9595_v9 }
0x2f03   :  { %7672 = vmatpush3.xpose.msk.msra.mxu0 %vm666_vm3, %v6507_v63 }
0x2f06   :  { %7674 = vmatmul.mubr.msk.f32.vlgmr.msra.gmra.mrb[164].mxu0 %vm666_vm3, %v6499_v50 }
0x2fd9   :  { %v6580_v40 = vpop.f32.mrb[164].mxu0 }
0x2fda   :  { %v6584_v48 = vmul.f32 14.285714, %v6580_v40  ;;  %v7675_v19 = vpop.f32.mrb[165].mxu0 }
0x2fdc   :  { %6589 = vst.msk [vmem:[%s10294_s24 + $0x6] sm:$0x3] %vm6588_vm15, %v6584_v48 }

</bundles_post_ra>
